<compile_context>
chip_gen: v7x
topology: tpu7x:2x2x1
jax: 0.10.0
libtpu: 0.0.40
codegen_flags: <defaults>
</compile_context>

<pallas_src>
import numpy as np
import jax
import jax.numpy as jnp
from jax.experimental import pallas as pl
from jax.experimental.pallas import tpu as pltpu


# ----------------------------------------------------------------------------
# Constant-matrix builders (all shapes are static -> plain numpy)
# ----------------------------------------------------------------------------
def _fspecial_gauss_1d(size, sigma):
    """Same as the reference _fspecial_gauss_1d, as a 1-D numpy array."""
    coords = np.arange(size, dtype=np.float64) - size // 2
    g = np.exp(-(coords ** 2) / (2.0 * sigma ** 2))
    g /= g.sum()
    return g.astype(np.float32)


def _conv_band_matrix(s, win):
    """(s_out, s) banded matrix: valid 1-D correlation with `win` along a dim
    of length s.  If s < len(win) the smoothing of that dim is skipped
    (identity), matching gaussian_filter's warn-and-skip behaviour."""
    k = win.shape[0]
    if s < k:
        return np.eye(s, dtype=np.float32)
    so = s - k + 1
    m = np.zeros((so, s), dtype=np.float32)
    idx = np.arange(so)
    for t in range(k):
        m[idx, idx + t] = win[t]
    return m


def _avg_pool_matrix(s):
    """(s_out, s) matrix implementing F.avg_pool(kernel=2, stride=2,
    padding=s % 2, count_include_pad=True) along one spatial dim."""
    pad = s % 2
    so = (s + 2 * pad - 2) // 2 + 1
    m = np.zeros((so, s), dtype=np.float32)
    for i in range(so):
        for r in (2 * i - pad, 2 * i + 1 - pad):
            if 0 <= r < s:
                m[i, r] = 0.5
    return m


# ----------------------------------------------------------------------------
# Per-level fused kernel: Gaussian filters -> SSIM/CS means -> 2x2 avg pool
# ----------------------------------------------------------------------------
def _make_level_kernel(has_pool, c1, c2, inv_area):
    def _ssim_stats(x, y, gh, gw, ssim_ref, cs_ref):
        def gfilt(img):                       # separable Gaussian on the MXU
            t = jnp.dot(gh, img, preferred_element_type=jnp.float32)
            return jnp.dot(t, gw, preferred_element_type=jnp.float32)

        # TODO(synk): the Gaussian/pool matmuls use the default TPU matmul
        # precision; raise the precision if bit-level parity with the f32
        # torch reference is required.
        mu1, mu2 = gfilt(x), gfilt(y)
        exx, eyy, exy = gfilt(x * x), gfilt(y * y), gfilt(x * y)

        mu1_sq, mu2_sq, mu1_mu2 = mu1 * mu1, mu2 * mu2, mu1 * mu2
        sigma1_sq = exx - mu1_sq
        sigma2_sq = eyy - mu2_sq
        sigma12 = exy - mu1_mu2

        cs_map = (2.0 * sigma12 + c2) / (sigma1_sq + sigma2_sq + c2)
        ssim_map = (2.0 * mu1_mu2 + c1) / (mu1_sq + mu2_sq + c1) * cs_map

        def _mean(m):                          # spatial mean -> (1, 1)
            s = jnp.sum(m, axis=1, keepdims=True)
            s = jnp.sum(s, axis=0, keepdims=True)
            return s * inv_area

        ssim_ref[0] = _mean(ssim_map)
        cs_ref[0] = _mean(cs_map)

    if has_pool:
        def kernel(x_ref, y_ref, gh_ref, gw_ref, ph_ref, pw_ref,
                   ssim_ref, cs_ref, xp_ref, yp_ref):
            x, y = x_ref[0], y_ref[0]
            _ssim_stats(x, y, gh_ref[...], gw_ref[...], ssim_ref, cs_ref)
            ph, pw = ph_ref[...], pw_ref[...]  # 2x2 avg pool, also on the MXU
            xp_ref[0] = jnp.dot(
                jnp.dot(ph, x, preferred_element_type=jnp.float32),
                pw, preferred_element_type=jnp.float32)
            yp_ref[0] = jnp.dot(
                jnp.dot(ph, y, preferred_element_type=jnp.float32),
                pw, preferred_element_type=jnp.float32)
    else:
        def kernel(x_ref, y_ref, gh_ref, gw_ref, ssim_ref, cs_ref):
            _ssim_stats(x_ref[0], y_ref[0], gh_ref[...], gw_ref[...],
                        ssim_ref, cs_ref)

    return kernel


def _ssim_level(x, y, gh, gw, ph, pw, c1, c2):
    """x, y: (N, H, W) f32.  Returns (ssim_per_channel, cs) of shape (N,) and,
    when ph/pw are given, the 2x2-average-pooled (N, Hp, Wp) images."""
    N, H, W = x.shape
    Ho, Wo = gh.shape[0], gw.shape[1]
    has_pool = ph is not None
    kernel = _make_level_kernel(has_pool, float(c1), float(c2),
                                1.0 / float(Ho * Wo))

    img_spec = pl.BlockSpec((1, H, W), lambda n: (n, 0, 0))

    def full_spec(arr):                        # whole constant matrix per step
        return pl.BlockSpec(arr.shape, lambda n: (0, 0))

    stat_shape = jax.ShapeDtypeStruct((N, 1, 1), jnp.float32)
    stat_spec = pl.BlockSpec((1, 1, 1), lambda n: (n, 0, 0))

    in_specs = [img_spec, img_spec, full_spec(gh), full_spec(gw)]
    out_shape = [stat_shape, stat_shape]
    out_specs = [stat_spec, stat_spec]
    args = [x, y, gh, gw]
    if has_pool:
        Hp, Wp = ph.shape[0], pw.shape[1]
        in_specs += [full_spec(ph), full_spec(pw)]
        out_shape += [jax.ShapeDtypeStruct((N, Hp, Wp), jnp.float32)] * 2
        out_specs += [pl.BlockSpec((1, Hp, Wp), lambda n: (n, 0, 0))] * 2
        args += [ph, pw]

    outs = pl.pallas_call(
        kernel,
        out_shape=tuple(out_shape),
        grid=(N,),
        in_specs=in_specs,
        out_specs=tuple(out_specs),
        compiler_params=pltpu.CompilerParams(
            dimension_semantics=("parallel",)),
    )(*args)

    ssim_pc = outs[0].reshape(N)
    cs_pc = outs[1].reshape(N)
    if has_pool:
        return ssim_pc, cs_pc, outs[2], outs[3]
    return ssim_pc, cs_pc, None, None


# ----------------------------------------------------------------------------
# MS_SSIM_Loss.forward
# ----------------------------------------------------------------------------
def ms_ssim_loss(X, Y, data_range=255.0, size_average=True, win_size=11,
                 win_sigma=1.5, weights=None, K=(0.01, 0.03)):
    if X.shape != Y.shape:
        raise ValueError(
            f"Input images should have the same dimensions, but got "
            f"{X.shape} and {Y.shape}.")
    # Mirror the reference "squeeze trailing singleton dims (dim >= 2)" loop.
    keep = [d for d in range(X.ndim) if d < 2 or X.shape[d] != 1]
    new_shape = tuple(X.shape[d] for d in keep)
    X = X.reshape(new_shape)
    Y = Y.reshape(new_shape)
    if X.ndim != 4:
        # TODO(synk): the 5-D (conv3d / avg_pool3d) branch of the reference
        # module is not implemented.
        raise ValueError(f"Only 4-D inputs are supported, got {X.shape}")
    if win_size % 2 != 1:
        raise ValueError("Window size should be odd.")
    if weights is None:
        weights = [0.0448, 0.2856, 0.3001, 0.2363, 0.1333]
    levels = len(weights)

    B, C, H, W = X.shape
    smaller_side = min(H, W)
    assert smaller_side > (win_size - 1) * 2 ** 4, (
        "Image size should be larger than %d due to the 4 downsamplings in "
        "ms-ssim" % ((win_size - 1) * 2 ** 4))

    K1, K2 = K
    c1 = (K1 * data_range) ** 2
    c2 = (K2 * data_range) ** 2
    win = _fspecial_gauss_1d(win_size, win_sigma)

    N = B * C
    xf = X.reshape(N, H, W).astype(jnp.float32)
    yf = Y.reshape(N, H, W).astype(jnp.float32)

    mcs = []
    ssim_pc = None
    for lvl in range(levels):
        h, w = xf.shape[1], xf.shape[2]
        gh = jnp.asarray(_conv_band_matrix(h, win))          # (Ho, h)
        gw = jnp.asarray(_conv_band_matrix(w, win).T)        # (w, Wo)
        if lvl < levels - 1:
            ph = jnp.asarray(_avg_pool_matrix(h))            # (Hp, h)
            pw = jnp.asarray(_avg_pool_matrix(w).T)          # (w, Wp)
        else:
            ph = pw = None
        ssim_pc, cs_pc, xp, yp = _ssim_level(xf, yf, gh, gw, ph, pw, c1, c2)
        if lvl < levels - 1:
            mcs.append(jnp.maximum(cs_pc, 0.0))              # torch.relu(cs)
            xf, yf = xp, yp

    # Final relu / weighting / product / mean on a (levels, B*C) array: a
    # dedicated kernel here is pure launch overhead -> plain JAX.
    ssim_pc = jnp.maximum(ssim_pc, 0.0)
    mcs_and_ssim = jnp.stack(mcs + [ssim_pc], axis=0)        # (levels, N)
    w_t = jnp.asarray(weights, dtype=jnp.float32).reshape(-1, 1)
    ms_ssim_val = jnp.prod(mcs_and_ssim ** w_t, axis=0)      # (N,)
    ms_ssim_val = ms_ssim_val.reshape(B, C)
    if size_average:
        return ms_ssim_val.mean()
    return ms_ssim_val.mean(axis=1)


if __name__ == "__main__":
    key = jax.random.PRNGKey(0)
    k1, k2 = jax.random.split(key)
    # Smallest "small" shape the module permits: the reference asserts
    # min(H, W) > (win_size - 1) * 2**4 = 160 due to the 4 downsamplings.
    B, C, H, W = 2, 1, 176, 176
    X = jax.random.uniform(k1, (B, C, H, W), dtype=jnp.float32) * 255.0
    Y = jax.random.uniform(k2, (B, C, H, W), dtype=jnp.float32) * 255.0

    loss = jax.jit(ms_ssim_loss)(X, Y)
    jax.block_until_ready(loss)
    print("KERNEL_OK")
</pallas_src>

<mosaic_0001>
module attributes {stable_mosaic.version = 11 : i64} {
  func.func @kernel(%arg0: i32, %arg1: memref<1x44x44xf32, #tpu.memory_space<vmem>>, %arg2: memref<1x44x44xf32, #tpu.memory_space<vmem>>, %arg3: memref<34x44xf32, #tpu.memory_space<vmem>>, %arg4: memref<44x34xf32, #tpu.memory_space<vmem>>, %arg5: memref<22x44xf32, #tpu.memory_space<vmem>>, %arg6: memref<44x22xf32, #tpu.memory_space<vmem>>, %arg7: memref<1x1x1xf32, #tpu.memory_space<vmem>>, %arg8: memref<1x1x1xf32, #tpu.memory_space<vmem>>, %arg9: memref<1x22x22xf32, #tpu.memory_space<vmem>>, %arg10: memref<1x22x22xf32, #tpu.memory_space<vmem>>) attributes {dimension_semantics = [#tpu.dimension_semantics<parallel>], iteration_bounds = array<i64: 2>, scalar_prefetch = 0 : i64, scratch_operands = 0 : i64, tpu.core_type = #tpu.core_type<tc>, window_params = [{transform_indices = @transform_0, window_bounds = array<i64: 1, 44, 44>}, {transform_indices = @transform_1, window_bounds = array<i64: 1, 44, 44>}, {pipeline_mode = #tpu.pipeline_mode<synchronous>, transform_indices = @transform_2, window_bounds = array<i64: 34, 44>}, {pipeline_mode = #tpu.pipeline_mode<synchronous>, transform_indices = @transform_3, window_bounds = array<i64: 44, 34>}, {pipeline_mode = #tpu.pipeline_mode<synchronous>, transform_indices = @transform_4, window_bounds = array<i64: 22, 44>}, {pipeline_mode = #tpu.pipeline_mode<synchronous>, transform_indices = @transform_5, window_bounds = array<i64: 44, 22>}, {transform_indices = @transform_6, window_bounds = array<i64: 1, 1, 1>}, {transform_indices = @transform_7, window_bounds = array<i64: 1, 1, 1>}, {transform_indices = @transform_8, window_bounds = array<i64: 1, 22, 22>}, {transform_indices = @transform_9, window_bounds = array<i64: 1, 22, 22>}]} {
    %c0 = arith.constant 0 : index
    %c0_0 = arith.constant 0 : index
    %c0_1 = arith.constant 0 : index
    %0 = vector.load %arg1[%c0, %c0_0, %c0_1] : memref<1x44x44xf32, #tpu.memory_space<vmem>>, vector<1x44x44xf32>
    %1 = vector.shape_cast %0 : vector<1x44x44xf32> to vector<44x44xf32>
    %c0_2 = arith.constant 0 : index
    %c0_3 = arith.constant 0 : index
    %c0_4 = arith.constant 0 : index
    %2 = vector.load %arg2[%c0_2, %c0_3, %c0_4] : memref<1x44x44xf32, #tpu.memory_space<vmem>>, vector<1x44x44xf32>
    %3 = vector.shape_cast %2 : vector<1x44x44xf32> to vector<44x44xf32>
    %c0_5 = arith.constant 0 : index
    %c0_6 = arith.constant 0 : index
    %4 = vector.load %arg3[%c0_5, %c0_6] : memref<34x44xf32, #tpu.memory_space<vmem>>, vector<34x44xf32>
    %c0_7 = arith.constant 0 : index
    %c0_8 = arith.constant 0 : index
    %5 = vector.load %arg4[%c0_7, %c0_8] : memref<44x34xf32, #tpu.memory_space<vmem>>, vector<44x34xf32>
    %cst = arith.constant dense<0.000000e+00> : vector<34x44xf32>
    %6 = tpu.matmul %4, %1, %cst {dimension_numbers = #tpu.dot_dimension_numbers<[1], [0], [0], [1], [0, 0, 1, 1], [], []>} : vector<34x44xf32>, vector<44x44xf32>, vector<34x44xf32> -> vector<34x44xf32>
    %cst_9 = arith.constant dense<0.000000e+00> : vector<34x34xf32>
    %7 = tpu.matmul %6, %5, %cst_9 {dimension_numbers = #tpu.dot_dimension_numbers<[1], [0], [0], [1], [0, 0, 1, 1], [], []>} : vector<34x44xf32>, vector<44x34xf32>, vector<34x34xf32> -> vector<34x34xf32>
    %cst_10 = arith.constant dense<0.000000e+00> : vector<34x44xf32>
    %8 = tpu.matmul %4, %3, %cst_10 {dimension_numbers = #tpu.dot_dimension_numbers<[1], [0], [0], [1], [0, 0, 1, 1], [], []>} : vector<34x44xf32>, vector<44x44xf32>, vector<34x44xf32> -> vector<34x44xf32>
    %cst_11 = arith.constant dense<0.000000e+00> : vector<34x34xf32>
    %9 = tpu.matmul %8, %5, %cst_11 {dimension_numbers = #tpu.dot_dimension_numbers<[1], [0], [0], [1], [0, 0, 1, 1], [], []>} : vector<34x44xf32>, vector<44x34xf32>, vector<34x34xf32> -> vector<34x34xf32>
    %10 = arith.mulf %1, %1 : vector<44x44xf32>
    %cst_12 = arith.constant dense<0.000000e+00> : vector<34x44xf32>
    %11 = tpu.matmul %4, %10, %cst_12 {dimension_numbers = #tpu.dot_dimension_numbers<[1], [0], [0], [1], [0, 0, 1, 1], [], []>} : vector<34x44xf32>, vector<44x44xf32>, vector<34x44xf32> -> vector<34x44xf32>
    %cst_13 = arith.constant dense<0.000000e+00> : vector<34x34xf32>
    %12 = tpu.matmul %11, %5, %cst_13 {dimension_numbers = #tpu.dot_dimension_numbers<[1], [0], [0], [1], [0, 0, 1, 1], [], []>} : vector<34x44xf32>, vector<44x34xf32>, vector<34x34xf32> -> vector<34x34xf32>
    %13 = arith.mulf %3, %3 : vector<44x44xf32>
    %cst_14 = arith.constant dense<0.000000e+00> : vector<34x44xf32>
    %14 = tpu.matmul %4, %13, %cst_14 {dimension_numbers = #tpu.dot_dimension_numbers<[1], [0], [0], [1], [0, 0, 1, 1], [], []>} : vector<34x44xf32>, vector<44x44xf32>, vector<34x44xf32> -> vector<34x44xf32>
    %cst_15 = arith.constant dense<0.000000e+00> : vector<34x34xf32>
    %15 = tpu.matmul %14, %5, %cst_15 {dimension_numbers = #tpu.dot_dimension_numbers<[1], [0], [0], [1], [0, 0, 1, 1], [], []>} : vector<34x44xf32>, vector<44x34xf32>, vector<34x34xf32> -> vector<34x34xf32>
    %16 = arith.mulf %1, %3 : vector<44x44xf32>
    %cst_16 = arith.constant dense<0.000000e+00> : vector<34x44xf32>
    %17 = tpu.matmul %4, %16, %cst_16 {dimension_numbers = #tpu.dot_dimension_numbers<[1], [0], [0], [1], [0, 0, 1, 1], [], []>} : vector<34x44xf32>, vector<44x44xf32>, vector<34x44xf32> -> vector<34x44xf32>
    %cst_17 = arith.constant dense<0.000000e+00> : vector<34x34xf32>
    %18 = tpu.matmul %17, %5, %cst_17 {dimension_numbers = #tpu.dot_dimension_numbers<[1], [0], [0], [1], [0, 0, 1, 1], [], []>} : vector<34x44xf32>, vector<44x34xf32>, vector<34x34xf32> -> vector<34x34xf32>
    %19 = arith.mulf %7, %7 : vector<34x34xf32>
    %20 = arith.mulf %9, %9 : vector<34x34xf32>
    %21 = arith.mulf %7, %9 : vector<34x34xf32>
    %22 = arith.subf %12, %19 : vector<34x34xf32>
    %23 = arith.subf %15, %20 : vector<34x34xf32>
    %24 = arith.subf %18, %21 : vector<34x34xf32>
    %cst_18 = arith.constant 2.000000e+00 : f32
    %25 = vector.broadcast %cst_18 : f32 to vector<34x34xf32>
    %26 = arith.mulf %25, %24 : vector<34x34xf32>
    %cst_19 = arith.constant 5.852250e+01 : f32
    %27 = vector.broadcast %cst_19 : f32 to vector<34x34xf32>
    %28 = arith.addf %26, %27 : vector<34x34xf32>
    %29 = arith.addf %22, %23 : vector<34x34xf32>
    %cst_20 = arith.constant 5.852250e+01 : f32
    %30 = vector.broadcast %cst_20 : f32 to vector<34x34xf32>
    %31 = arith.addf %29, %30 : vector<34x34xf32>
    %32 = arith.divf %28, %31 : vector<34x34xf32>
    %cst_21 = arith.constant 2.000000e+00 : f32
    %33 = vector.broadcast %cst_21 : f32 to vector<34x34xf32>
    %34 = arith.mulf %33, %21 : vector<34x34xf32>
    %cst_22 = arith.constant 6.502500e+00 : f32
    %35 = vector.broadcast %cst_22 : f32 to vector<34x34xf32>
    %36 = arith.addf %34, %35 : vector<34x34xf32>
    %37 = arith.addf %19, %20 : vector<34x34xf32>
    %cst_23 = arith.constant 6.502500e+00 : f32
    %38 = vector.broadcast %cst_23 : f32 to vector<34x34xf32>
    %39 = arith.addf %37, %38 : vector<34x34xf32>
    %40 = arith.divf %36, %39 : vector<34x34xf32>
    %41 = arith.mulf %40, %32 : vector<34x34xf32>
    %cst_24 = arith.constant dense<0.000000e+00> : vector<34xf32>
    %42 = vector.multi_reduction <add>, %41, %cst_24 [1] : vector<34x34xf32> to vector<34xf32>
    %43 = vector.shape_cast %42 : vector<34xf32> to vector<34x1xf32>
    %cst_25 = arith.constant dense<0.000000e+00> : vector<1xf32>
    %44 = vector.multi_reduction <add>, %43, %cst_25 [0] : vector<34x1xf32> to vector<1xf32>
    %45 = vector.shape_cast %44 : vector<1xf32> to vector<1x1xf32>
    %cst_26 = arith.constant 8.6505193E-4 : f32
    %46 = vector.broadcast %cst_26 : f32 to vector<1x1xf32>
    %47 = arith.mulf %45, %46 : vector<1x1xf32>
    %c0_27 = arith.constant 0 : index
    %c0_28 = arith.constant 0 : index
    %c0_29 = arith.constant 0 : index
    %48 = vector.load %arg7[%c0_27, %c0_28, %c0_29] : memref<1x1x1xf32, #tpu.memory_space<vmem>>, vector<1x1x1xf32>
    %49 = vector.shape_cast %48 : vector<1x1x1xf32> to vector<1x1xf32>
    %50 = vector.shape_cast %47 : vector<1x1xf32> to vector<1x1x1xf32>
    tpu.vector_store %arg7[%c0_27, %c0_28, %c0_29], %50 {strides = array<i32>} : memref<1x1x1xf32, #tpu.memory_space<vmem>>, vector<1x1x1xf32>,
    %cst_30 = arith.constant dense<0.000000e+00> : vector<34xf32>
    %51 = vector.multi_reduction <add>, %32, %cst_30 [1] : vector<34x34xf32> to vector<34xf32>
    %52 = vector.shape_cast %51 : vector<34xf32> to vector<34x1xf32>
    %cst_31 = arith.constant dense<0.000000e+00> : vector<1xf32>
    %53 = vector.multi_reduction <add>, %52, %cst_31 [0] : vector<34x1xf32> to vector<1xf32>
    %54 = vector.shape_cast %53 : vector<1xf32> to vector<1x1xf32>
    %cst_32 = arith.constant 8.6505193E-4 : f32
    %55 = vector.broadcast %cst_32 : f32 to vector<1x1xf32>
    %56 = arith.mulf %54, %55 : vector<1x1xf32>
    %c0_33 = arith.constant 0 : index
    %c0_34 = arith.constant 0 : index
    %c0_35 = arith.constant 0 : index
    %57 = vector.load %arg8[%c0_33, %c0_34, %c0_35] : memref<1x1x1xf32, #tpu.memory_space<vmem>>, vector<1x1x1xf32>
    %58 = vector.shape_cast %57 : vector<1x1x1xf32> to vector<1x1xf32>
    %59 = vector.shape_cast %56 : vector<1x1xf32> to vector<1x1x1xf32>
    tpu.vector_store %arg8[%c0_33, %c0_34, %c0_35], %59 {strides = array<i32>} : memref<1x1x1xf32, #tpu.memory_space<vmem>>, vector<1x1x1xf32>,
    %c0_36 = arith.constant 0 : index
    %c0_37 = arith.constant 0 : index
    %60 = vector.load %arg5[%c0_36, %c0_37] : memref<22x44xf32, #tpu.memory_space<vmem>>, vector<22x44xf32>
    %c0_38 = arith.constant 0 : index
    %c0_39 = arith.constant 0 : index
    %61 = vector.load %arg6[%c0_38, %c0_39] : memref<44x22xf32, #tpu.memory_space<vmem>>, vector<44x22xf32>
    %cst_40 = arith.constant dense<0.000000e+00> : vector<22x44xf32>
    %62 = tpu.matmul %60, %1, %cst_40 {dimension_numbers = #tpu.dot_dimension_numbers<[1], [0], [0], [1], [0, 0, 1, 1], [], []>} : vector<22x44xf32>, vector<44x44xf32>, vector<22x44xf32> -> vector<22x44xf32>
    %cst_41 = arith.constant dense<0.000000e+00> : vector<22x22xf32>
    %63 = tpu.matmul %62, %61, %cst_41 {dimension_numbers = #tpu.dot_dimension_numbers<[1], [0], [0], [1], [0, 0, 1, 1], [], []>} : vector<22x44xf32>, vector<44x22xf32>, vector<22x22xf32> -> vector<22x22xf32>
    %c0_42 = arith.constant 0 : index
    %c0_43 = arith.constant 0 : index
    %c0_44 = arith.constant 0 : index
    %64 = vector.load %arg9[%c0_42, %c0_43, %c0_44] : memref<1x22x22xf32, #tpu.memory_space<vmem>>, vector<1x22x22xf32>
    %65 = vector.shape_cast %64 : vector<1x22x22xf32> to vector<22x22xf32>
    %66 = vector.shape_cast %63 : vector<22x22xf32> to vector<1x22x22xf32>
    tpu.vector_store %arg9[%c0_42, %c0_43, %c0_44], %66 {strides = array<i32>} : memref<1x22x22xf32, #tpu.memory_space<vmem>>, vector<1x22x22xf32>,
    %cst_45 = arith.constant dense<0.000000e+00> : vector<22x44xf32>
    %67 = tpu.matmul %60, %3, %cst_45 {dimension_numbers = #tpu.dot_dimension_numbers<[1], [0], [0], [1], [0, 0, 1, 1], [], []>} : vector<22x44xf32>, vector<44x44xf32>, vector<22x44xf32> -> vector<22x44xf32>
    %cst_46 = arith.constant dense<0.000000e+00> : vector<22x22xf32>
    %68 = tpu.matmul %67, %61, %cst_46 {dimension_numbers = #tpu.dot_dimension_numbers<[1], [0], [0], [1], [0, 0, 1, 1], [], []>} : vector<22x44xf32>, vector<44x22xf32>, vector<22x22xf32> -> vector<22x22xf32>
    %c0_47 = arith.constant 0 : index
    %c0_48 = arith.constant 0 : index
    %c0_49 = arith.constant 0 : index
    %69 = vector.load %arg10[%c0_47, %c0_48, %c0_49] : memref<1x22x22xf32, #tpu.memory_space<vmem>>, vector<1x22x22xf32>
    %70 = vector.shape_cast %69 : vector<1x22x22xf32> to vector<22x22xf32>
    %71 = vector.shape_cast %68 : vector<22x22xf32> to vector<1x22x22xf32>
    tpu.vector_store %arg10[%c0_47, %c0_48, %c0_49], %71 {strides = array<i32>} : memref<1x22x22xf32, #tpu.memory_space<vmem>>, vector<1x22x22xf32>,
    return
  }
  func.func @transform_0(%arg0: i32) -> (i32, i32, i32) {
    %c0_i32 = arith.constant 0 : i32
    %c0_i32_0 = arith.constant 0 : i32
    %c0_i32_1 = arith.constant 0 : i32
    return %arg0, %c0_i32, %c0_i32_0 : i32, i32, i32
  }
  func.func @transform_1(%arg0: i32) -> (i32, i32, i32) {
    %c0_i32 = arith.constant 0 : i32
    %c0_i32_0 = arith.constant 0 : i32
    %c0_i32_1 = arith.constant 0 : i32
    return %arg0, %c0_i32, %c0_i32_0 : i32, i32, i32
  }
  func.func @transform_2(%arg0: i32) -> (i32, i32) {
    %c0_i32 = arith.constant 0 : i32
    %c0_i32_0 = arith.constant 0 : i32
    %c0_i32_1 = arith.constant 0 : i32
    return %c0_i32, %c0_i32_0 : i32, i32
  }
  func.func @transform_3(%arg0: i32) -> (i32, i32) {
    %c0_i32 = arith.constant 0 : i32
    %c0_i32_0 = arith.constant 0 : i32
    %c0_i32_1 = arith.constant 0 : i32
    return %c0_i32, %c0_i32_0 : i32, i32
  }
  func.func @transform_4(%arg0: i32) -> (i32, i32) {
    %c0_i32 = arith.constant 0 : i32
    %c0_i32_0 = arith.constant 0 : i32
    %c0_i32_1 = arith.constant 0 : i32
    return %c0_i32, %c0_i32_0 : i32, i32
  }
  func.func @transform_5(%arg0: i32) -> (i32, i32) {
    %c0_i32 = arith.constant 0 : i32
    %c0_i32_0 = arith.constant 0 : i32
    %c0_i32_1 = arith.constant 0 : i32
    return %c0_i32, %c0_i32_0 : i32, i32
  }
  func.func @transform_6(%arg0: i32) -> (i32, i32, i32) {
    %c0_i32 = arith.constant 0 : i32
    %c0_i32_0 = arith.constant 0 : i32
    %c0_i32_1 = arith.constant 0 : i32
    return %arg0, %c0_i32, %c0_i32_0 : i32, i32, i32
  }
  func.func @transform_7(%arg0: i32) -> (i32, i32, i32) {
    %c0_i32 = arith.constant 0 : i32
    %c0_i32_0 = arith.constant 0 : i32
    %c0_i32_1 = arith.constant 0 : i32
    return %arg0, %c0_i32, %c0_i32_0 : i32, i32, i32
  }
  func.func @transform_8(%arg0: i32) -> (i32, i32, i32) {
    %c0_i32 = arith.constant 0 : i32
    %c0_i32_0 = arith.constant 0 : i32
    %c0_i32_1 = arith.constant 0 : i32
    return %arg0, %c0_i32, %c0_i32_0 : i32, i32, i32
  }
  func.func @transform_9(%arg0: i32) -> (i32, i32, i32) {
    %c0_i32 = arith.constant 0 : i32
    %c0_i32_0 = arith.constant 0 : i32
    %c0_i32_1 = arith.constant 0 : i32
    return %arg0, %c0_i32, %c0_i32_0 : i32, i32, i32
  }
}

module attributes {stable_mosaic.version = 11 : i64} {
  func.func @kernel(%arg0: i32, %arg1: memref<1x88x88xf32, #tpu.memory_space<vmem>>, %arg2: memref<1x88x88xf32, #tpu.memory_space<vmem>>, %arg3: memref<78x88xf32, #tpu.memory_space<vmem>>, %arg4: memref<88x78xf32, #tpu.memory_space<vmem>>, %arg5: memref<44x88xf32, #tpu.memory_space<vmem>>, %arg6: memref<88x44xf32, #tpu.memory_space<vmem>>, %arg7: memref<1x1x1xf32, #tpu.memory_space<vmem>>, %arg8: memref<1x1x1xf32, #tpu.memory_space<vmem>>, %arg9: memref<1x44x44xf32, #tpu.memory_space<vmem>>, %arg10: memref<1x44x44xf32, #tpu.memory_space<vmem>>) attributes {dimension_semantics = [#tpu.dimension_semantics<parallel>], iteration_bounds = array<i64: 2>, scalar_prefetch = 0 : i64, scratch_operands = 0 : i64, tpu.core_type = #tpu.core_type<tc>, window_params = [{transform_indices = @transform_0, window_bounds = array<i64: 1, 88, 88>}, {transform_indices = @transform_1, window_bounds = array<i64: 1, 88, 88>}, {pipeline_mode = #tpu.pipeline_mode<synchronous>, transform_indices = @transform_2, window_bounds = array<i64: 78, 88>}, {pipeline_mode = #tpu.pipeline_mode<synchronous>, transform_indices = @transform_3, window_bounds = array<i64: 88, 78>}, {pipeline_mode = #tpu.pipeline_mode<synchronous>, transform_indices = @transform_4, window_bounds = array<i64: 44, 88>}, {pipeline_mode = #tpu.pipeline_mode<synchronous>, transform_indices = @transform_5, window_bounds = array<i64: 88, 44>}, {transform_indices = @transform_6, window_bounds = array<i64: 1, 1, 1>}, {transform_indices = @transform_7, window_bounds = array<i64: 1, 1, 1>}, {transform_indices = @transform_8, window_bounds = array<i64: 1, 44, 44>}, {transform_indices = @transform_9, window_bounds = array<i64: 1, 44, 44>}]} {
    %c0 = arith.constant 0 : index
    %c0_0 = arith.constant 0 : index
    %c0_1 = arith.constant 0 : index
    %0 = vector.load %arg1[%c0, %c0_0, %c0_1] : memref<1x88x88xf32, #tpu.memory_space<vmem>>, vector<1x88x88xf32>
    %1 = vector.shape_cast %0 : vector<1x88x88xf32> to vector<88x88xf32>
    %c0_2 = arith.constant 0 : index
    %c0_3 = arith.constant 0 : index
    %c0_4 = arith.constant 0 : index
    %2 = vector.load %arg2[%c0_2, %c0_3, %c0_4] : memref<1x88x88xf32, #tpu.memory_space<vmem>>, vector<1x88x88xf32>
    %3 = vector.shape_cast %2 : vector<1x88x88xf32> to vector<88x88xf32>
    %c0_5 = arith.constant 0 : index
    %c0_6 = arith.constant 0 : index
    %4 = vector.load %arg3[%c0_5, %c0_6] : memref<78x88xf32, #tpu.memory_space<vmem>>, vector<78x88xf32>
    %c0_7 = arith.constant 0 : index
    %c0_8 = arith.constant 0 : index
    %5 = vector.load %arg4[%c0_7, %c0_8] : memref<88x78xf32, #tpu.memory_space<vmem>>, vector<88x78xf32>
    %cst = arith.constant dense<0.000000e+00> : vector<78x88xf32>
    %6 = tpu.matmul %4, %1, %cst {dimension_numbers = #tpu.dot_dimension_numbers<[1], [0], [0], [1], [0, 0, 1, 1], [], []>} : vector<78x88xf32>, vector<88x88xf32>, vector<78x88xf32> -> vector<78x88xf32>
    %cst_9 = arith.constant dense<0.000000e+00> : vector<78x78xf32>
    %7 = tpu.matmul %6, %5, %cst_9 {dimension_numbers = #tpu.dot_dimension_numbers<[1], [0], [0], [1], [0, 0, 1, 1], [], []>} : vector<78x88xf32>, vector<88x78xf32>, vector<78x78xf32> -> vector<78x78xf32>
    %cst_10 = arith.constant dense<0.000000e+00> : vector<78x88xf32>
    %8 = tpu.matmul %4, %3, %cst_10 {dimension_numbers = #tpu.dot_dimension_numbers<[1], [0], [0], [1], [0, 0, 1, 1], [], []>} : vector<78x88xf32>, vector<88x88xf32>, vector<78x88xf32> -> vector<78x88xf32>
    %cst_11 = arith.constant dense<0.000000e+00> : vector<78x78xf32>
    %9 = tpu.matmul %8, %5, %cst_11 {dimension_numbers = #tpu.dot_dimension_numbers<[1], [0], [0], [1], [0, 0, 1, 1], [], []>} : vector<78x88xf32>, vector<88x78xf32>, vector<78x78xf32> -> vector<78x78xf32>
    %10 = arith.mulf %1, %1 : vector<88x88xf32>
    %cst_12 = arith.constant dense<0.000000e+00> : vector<78x88xf32>
    %11 = tpu.matmul %4, %10, %cst_12 {dimension_numbers = #tpu.dot_dimension_numbers<[1], [0], [0], [1], [0, 0, 1, 1], [], []>} : vector<78x88xf32>, vector<88x88xf32>, vector<78x88xf32> -> vector<78x88xf32>
    %cst_13 = arith.constant dense<0.000000e+00> : vector<78x78xf32>
    %12 = tpu.matmul %11, %5, %cst_13 {dimension_numbers = #tpu.dot_dimension_numbers<[1], [0], [0], [1], [0, 0, 1, 1], [], []>} : vector<78x88xf32>, vector<88x78xf32>, vector<78x78xf32> -> vector<78x78xf32>
    %13 = arith.mulf %3, %3 : vector<88x88xf32>
    %cst_14 = arith.constant dense<0.000000e+00> : vector<78x88xf32>
    %14 = tpu.matmul %4, %13, %cst_14 {dimension_numbers = #tpu.dot_dimension_numbers<[1], [0], [0], [1], [0, 0, 1, 1], [], []>} : vector<78x88xf32>, vector<88x88xf32>, vector<78x88xf32> -> vector<78x88xf32>
    %cst_15 = arith.constant dense<0.000000e+00> : vector<78x78xf32>
    %15 = tpu.matmul %14, %5, %cst_15 {dimension_numbers = #tpu.dot_dimension_numbers<[1], [0], [0], [1], [0, 0, 1, 1], [], []>} : vector<78x88xf32>, vector<88x78xf32>, vector<78x78xf32> -> vector<78x78xf32>
    %16 = arith.mulf %1, %3 : vector<88x88xf32>
    %cst_16 = arith.constant dense<0.000000e+00> : vector<78x88xf32>
    %17 = tpu.matmul %4, %16, %cst_16 {dimension_numbers = #tpu.dot_dimension_numbers<[1], [0], [0], [1], [0, 0, 1, 1], [], []>} : vector<78x88xf32>, vector<88x88xf32>, vector<78x88xf32> -> vector<78x88xf32>
    %cst_17 = arith.constant dense<0.000000e+00> : vector<78x78xf32>
    %18 = tpu.matmul %17, %5, %cst_17 {dimension_numbers = #tpu.dot_dimension_numbers<[1], [0], [0], [1], [0, 0, 1, 1], [], []>} : vector<78x88xf32>, vector<88x78xf32>, vector<78x78xf32> -> vector<78x78xf32>
    %19 = arith.mulf %7, %7 : vector<78x78xf32>
    %20 = arith.mulf %9, %9 : vector<78x78xf32>
    %21 = arith.mulf %7, %9 : vector<78x78xf32>
    %22 = arith.subf %12, %19 : vector<78x78xf32>
    %23 = arith.subf %15, %20 : vector<78x78xf32>
    %24 = arith.subf %18, %21 : vector<78x78xf32>
    %cst_18 = arith.constant 2.000000e+00 : f32
    %25 = vector.broadcast %cst_18 : f32 to vector<78x78xf32>
    %26 = arith.mulf %25, %24 : vector<78x78xf32>
    %cst_19 = arith.constant 5.852250e+01 : f32
    %27 = vector.broadcast %cst_19 : f32 to vector<78x78xf32>
    %28 = arith.addf %26, %27 : vector<78x78xf32>
    %29 = arith.addf %22, %23 : vector<78x78xf32>
    %cst_20 = arith.constant 5.852250e+01 : f32
    %30 = vector.broadcast %cst_20 : f32 to vector<78x78xf32>
    %31 = arith.addf %29, %30 : vector<78x78xf32>
    %32 = arith.divf %28, %31 : vector<78x78xf32>
    %cst_21 = arith.constant 2.000000e+00 : f32
    %33 = vector.broadcast %cst_21 : f32 to vector<78x78xf32>
    %34 = arith.mulf %33, %21 : vector<78x78xf32>
    %cst_22 = arith.constant 6.502500e+00 : f32
    %35 = vector.broadcast %cst_22 : f32 to vector<78x78xf32>
    %36 = arith.addf %34, %35 : vector<78x78xf32>
    %37 = arith.addf %19, %20 : vector<78x78xf32>
    %cst_23 = arith.constant 6.502500e+00 : f32
    %38 = vector.broadcast %cst_23 : f32 to vector<78x78xf32>
    %39 = arith.addf %37, %38 : vector<78x78xf32>
    %40 = arith.divf %36, %39 : vector<78x78xf32>
    %41 = arith.mulf %40, %32 : vector<78x78xf32>
    %cst_24 = arith.constant dense<0.000000e+00> : vector<78xf32>
    %42 = vector.multi_reduction <add>, %41, %cst_24 [1] : vector<78x78xf32> to vector<78xf32>
    %43 = vector.shape_cast %42 : vector<78xf32> to vector<78x1xf32>
    %cst_25 = arith.constant dense<0.000000e+00> : vector<1xf32>
    %44 = vector.multi_reduction <add>, %43, %cst_25 [0] : vector<78x1xf32> to vector<1xf32>
    %45 = vector.shape_cast %44 : vector<1xf32> to vector<1x1xf32>
    %cst_26 = arith.constant 1.64365556E-4 : f32
    %46 = vector.broadcast %cst_26 : f32 to vector<1x1xf32>
    %47 = arith.mulf %45, %46 : vector<1x1xf32>
    %c0_27 = arith.constant 0 : index
    %c0_28 = arith.constant 0 : index
    %c0_29 = arith.constant 0 : index
    %48 = vector.load %arg7[%c0_27, %c0_28, %c0_29] : memref<1x1x1xf32, #tpu.memory_space<vmem>>, vector<1x1x1xf32>
    %49 = vector.shape_cast %48 : vector<1x1x1xf32> to vector<1x1xf32>
    %50 = vector.shape_cast %47 : vector<1x1xf32> to vector<1x1x1xf32>
    tpu.vector_store %arg7[%c0_27, %c0_28, %c0_29], %50 {strides = array<i32>} : memref<1x1x1xf32, #tpu.memory_space<vmem>>, vector<1x1x1xf32>,
    %cst_30 = arith.constant dense<0.000000e+00> : vector<78xf32>
    %51 = vector.multi_reduction <add>, %32, %cst_30 [1] : vector<78x78xf32> to vector<78xf32>
    %52 = vector.shape_cast %51 : vector<78xf32> to vector<78x1xf32>
    %cst_31 = arith.constant dense<0.000000e+00> : vector<1xf32>
    %53 = vector.multi_reduction <add>, %52, %cst_31 [0] : vector<78x1xf32> to vector<1xf32>
    %54 = vector.shape_cast %53 : vector<1xf32> to vector<1x1xf32>
    %cst_32 = arith.constant 1.64365556E-4 : f32
    %55 = vector.broadcast %cst_32 : f32 to vector<1x1xf32>
    %56 = arith.mulf %54, %55 : vector<1x1xf32>
    %c0_33 = arith.constant 0 : index
    %c0_34 = arith.constant 0 : index
    %c0_35 = arith.constant 0 : index
    %57 = vector.load %arg8[%c0_33, %c0_34, %c0_35] : memref<1x1x1xf32, #tpu.memory_space<vmem>>, vector<1x1x1xf32>
    %58 = vector.shape_cast %57 : vector<1x1x1xf32> to vector<1x1xf32>
    %59 = vector.shape_cast %56 : vector<1x1xf32> to vector<1x1x1xf32>
    tpu.vector_store %arg8[%c0_33, %c0_34, %c0_35], %59 {strides = array<i32>} : memref<1x1x1xf32, #tpu.memory_space<vmem>>, vector<1x1x1xf32>,
    %c0_36 = arith.constant 0 : index
    %c0_37 = arith.constant 0 : index
    %60 = vector.load %arg5[%c0_36, %c0_37] : memref<44x88xf32, #tpu.memory_space<vmem>>, vector<44x88xf32>
    %c0_38 = arith.constant 0 : index
    %c0_39 = arith.constant 0 : index
    %61 = vector.load %arg6[%c0_38, %c0_39] : memref<88x44xf32, #tpu.memory_space<vmem>>, vector<88x44xf32>
    %cst_40 = arith.constant dense<0.000000e+00> : vector<44x88xf32>
    %62 = tpu.matmul %60, %1, %cst_40 {dimension_numbers = #tpu.dot_dimension_numbers<[1], [0], [0], [1], [0, 0, 1, 1], [], []>} : vector<44x88xf32>, vector<88x88xf32>, vector<44x88xf32> -> vector<44x88xf32>
    %cst_41 = arith.constant dense<0.000000e+00> : vector<44x44xf32>
    %63 = tpu.matmul %62, %61, %cst_41 {dimension_numbers = #tpu.dot_dimension_numbers<[1], [0], [0], [1], [0, 0, 1, 1], [], []>} : vector<44x88xf32>, vector<88x44xf32>, vector<44x44xf32> -> vector<44x44xf32>
    %c0_42 = arith.constant 0 : index
    %c0_43 = arith.constant 0 : index
    %c0_44 = arith.constant 0 : index
    %64 = vector.load %arg9[%c0_42, %c0_43, %c0_44] : memref<1x44x44xf32, #tpu.memory_space<vmem>>, vector<1x44x44xf32>
    %65 = vector.shape_cast %64 : vector<1x44x44xf32> to vector<44x44xf32>
    %66 = vector.shape_cast %63 : vector<44x44xf32> to vector<1x44x44xf32>
    tpu.vector_store %arg9[%c0_42, %c0_43, %c0_44], %66 {strides = array<i32>} : memref<1x44x44xf32, #tpu.memory_space<vmem>>, vector<1x44x44xf32>,
    %cst_45 = arith.constant dense<0.000000e+00> : vector<44x88xf32>
    %67 = tpu.matmul %60, %3, %cst_45 {dimension_numbers = #tpu.dot_dimension_numbers<[1], [0], [0], [1], [0, 0, 1, 1], [], []>} : vector<44x88xf32>, vector<88x88xf32>, vector<44x88xf32> -> vector<44x88xf32>
    %cst_46 = arith.constant dense<0.000000e+00> : vector<44x44xf32>
    %68 = tpu.matmul %67, %61, %cst_46 {dimension_numbers = #tpu.dot_dimension_numbers<[1], [0], [0], [1], [0, 0, 1, 1], [], []>} : vector<44x88xf32>, vector<88x44xf32>, vector<44x44xf32> -> vector<44x44xf32>
    %c0_47 = arith.constant 0 : index
    %c0_48 = arith.constant 0 : index
    %c0_49 = arith.constant 0 : index
    %69 = vector.load %arg10[%c0_47, %c0_48, %c0_49] : memref<1x44x44xf32, #tpu.memory_space<vmem>>, vector<1x44x44xf32>
    %70 = vector.shape_cast %69 : vector<1x44x44xf32> to vector<44x44xf32>
    %71 = vector.shape_cast %68 : vector<44x44xf32> to vector<1x44x44xf32>
    tpu.vector_store %arg10[%c0_47, %c0_48, %c0_49], %71 {strides = array<i32>} : memref<1x44x44xf32, #tpu.memory_space<vmem>>, vector<1x44x44xf32>,
    return
  }
  func.func @transform_0(%arg0: i32) -> (i32, i32, i32) {
    %c0_i32 = arith.constant 0 : i32
    %c0_i32_0 = arith.constant 0 : i32
    %c0_i32_1 = arith.constant 0 : i32
    return %arg0, %c0_i32, %c0_i32_0 : i32, i32, i32
  }
  func.func @transform_1(%arg0: i32) -> (i32, i32, i32) {
    %c0_i32 = arith.constant 0 : i32
    %c0_i32_0 = arith.constant 0 : i32
    %c0_i32_1 = arith.constant 0 : i32
    return %arg0, %c0_i32, %c0_i32_0 : i32, i32, i32
  }
  func.func @transform_2(%arg0: i32) -> (i32, i32) {
    %c0_i32 = arith.constant 0 : i32
    %c0_i32_0 = arith.constant 0 : i32
    %c0_i32_1 = arith.constant 0 : i32
    return %c0_i32, %c0_i32_0 : i32, i32
  }
  func.func @transform_3(%arg0: i32) -> (i32, i32) {
    %c0_i32 = arith.constant 0 : i32
    %c0_i32_0 = arith.constant 0 : i32
    %c0_i32_1 = arith.constant 0 : i32
    return %c0_i32, %c0_i32_0 : i32, i32
  }
  func.func @transform_4(%arg0: i32) -> (i32, i32) {
    %c0_i32 = arith.constant 0 : i32
    %c0_i32_0 = arith.constant 0 : i32
    %c0_i32_1 = arith.constant 0 : i32
    return %c0_i32, %c0_i32_0 : i32, i32
  }
  func.func @transform_5(%arg0: i32) -> (i32, i32) {
    %c0_i32 = arith.constant 0 : i32
    %c0_i32_0 = arith.constant 0 : i32
    %c0_i32_1 = arith.constant 0 : i32
    return %c0_i32, %c0_i32_0 : i32, i32
  }
  func.func @transform_6(%arg0: i32) -> (i32, i32, i32) {
    %c0_i32 = arith.constant 0 : i32
    %c0_i32_0 = arith.constant 0 : i32
    %c0_i32_1 = arith.constant 0 : i32
    return %arg0, %c0_i32, %c0_i32_0 : i32, i32, i32
  }
  func.func @transform_7(%arg0: i32) -> (i32, i32, i32) {
    %c0_i32 = arith.constant 0 : i32
    %c0_i32_0 = arith.constant 0 : i32
    %c0_i32_1 = arith.constant 0 : i32
    return %arg0, %c0_i32, %c0_i32_0 : i32, i32, i32
  }
  func.func @transform_8(%arg0: i32) -> (i32, i32, i32) {
    %c0_i32 = arith.constant 0 : i32
    %c0_i32_0 = arith.constant 0 : i32
    %c0_i32_1 = arith.constant 0 : i32
    return %arg0, %c0_i32, %c0_i32_0 : i32, i32, i32
  }
  func.func @transform_9(%arg0: i32) -> (i32, i32, i32) {
    %c0_i32 = arith.constant 0 : i32
    %c0_i32_0 = arith.constant 0 : i32
    %c0_i32_1 = arith.constant 0 : i32
    return %arg0, %c0_i32, %c0_i32_0 : i32, i32, i32
  }
}

module attributes {stable_mosaic.version = 11 : i64} {
  func.func @kernel(%arg0: i32, %arg1: memref<1x176x176xf32, #tpu.memory_space<vmem>>, %arg2: memref<1x176x176xf32, #tpu.memory_space<vmem>>, %arg3: memref<166x176xf32, #tpu.memory_space<vmem>>, %arg4: memref<176x166xf32, #tpu.memory_space<vmem>>, %arg5: memref<88x176xf32, #tpu.memory_space<vmem>>, %arg6: memref<176x88xf32, #tpu.memory_space<vmem>>, %arg7: memref<1x1x1xf32, #tpu.memory_space<vmem>>, %arg8: memref<1x1x1xf32, #tpu.memory_space<vmem>>, %arg9: memref<1x88x88xf32, #tpu.memory_space<vmem>>, %arg10: memref<1x88x88xf32, #tpu.memory_space<vmem>>) attributes {dimension_semantics = [#tpu.dimension_semantics<parallel>], iteration_bounds = array<i64: 2>, scalar_prefetch = 0 : i64, scratch_operands = 0 : i64, tpu.core_type = #tpu.core_type<tc>, window_params = [{transform_indices = @transform_0, window_bounds = array<i64: 1, 176, 176>}, {transform_indices = @transform_1, window_bounds = array<i64: 1, 176, 176>}, {pipeline_mode = #tpu.pipeline_mode<synchronous>, transform_indices = @transform_2, window_bounds = array<i64: 166, 176>}, {pipeline_mode = #tpu.pipeline_mode<synchronous>, transform_indices = @transform_3, window_bounds = array<i64: 176, 166>}, {pipeline_mode = #tpu.pipeline_mode<synchronous>, transform_indices = @transform_4, window_bounds = array<i64: 88, 176>}, {pipeline_mode = #tpu.pipeline_mode<synchronous>, transform_indices = @transform_5, window_bounds = array<i64: 176, 88>}, {transform_indices = @transform_6, window_bounds = array<i64: 1, 1, 1>}, {transform_indices = @transform_7, window_bounds = array<i64: 1, 1, 1>}, {transform_indices = @transform_8, window_bounds = array<i64: 1, 88, 88>}, {transform_indices = @transform_9, window_bounds = array<i64: 1, 88, 88>}]} {
    %c0 = arith.constant 0 : index
    %c0_0 = arith.constant 0 : index
    %c0_1 = arith.constant 0 : index
    %0 = vector.load %arg1[%c0, %c0_0, %c0_1] : memref<1x176x176xf32, #tpu.memory_space<vmem>>, vector<1x176x176xf32>
    %1 = vector.shape_cast %0 : vector<1x176x176xf32> to vector<176x176xf32>
    %c0_2 = arith.constant 0 : index
    %c0_3 = arith.constant 0 : index
    %c0_4 = arith.constant 0 : index
    %2 = vector.load %arg2[%c0_2, %c0_3, %c0_4] : memref<1x176x176xf32, #tpu.memory_space<vmem>>, vector<1x176x176xf32>
    %3 = vector.shape_cast %2 : vector<1x176x176xf32> to vector<176x176xf32>
    %c0_5 = arith.constant 0 : index
    %c0_6 = arith.constant 0 : index
    %4 = vector.load %arg3[%c0_5, %c0_6] : memref<166x176xf32, #tpu.memory_space<vmem>>, vector<166x176xf32>
    %c0_7 = arith.constant 0 : index
    %c0_8 = arith.constant 0 : index
    %5 = vector.load %arg4[%c0_7, %c0_8] : memref<176x166xf32, #tpu.memory_space<vmem>>, vector<176x166xf32>
    %cst = arith.constant dense<0.000000e+00> : vector<166x176xf32>
    %6 = tpu.matmul %4, %1, %cst {dimension_numbers = #tpu.dot_dimension_numbers<[1], [0], [0], [1], [0, 0, 1, 1], [], []>} : vector<166x176xf32>, vector<176x176xf32>, vector<166x176xf32> -> vector<166x176xf32>
    %cst_9 = arith.constant dense<0.000000e+00> : vector<166x166xf32>
    %7 = tpu.matmul %6, %5, %cst_9 {dimension_numbers = #tpu.dot_dimension_numbers<[1], [0], [0], [1], [0, 0, 1, 1], [], []>} : vector<166x176xf32>, vector<176x166xf32>, vector<166x166xf32> -> vector<166x166xf32>
    %cst_10 = arith.constant dense<0.000000e+00> : vector<166x176xf32>
    %8 = tpu.matmul %4, %3, %cst_10 {dimension_numbers = #tpu.dot_dimension_numbers<[1], [0], [0], [1], [0, 0, 1, 1], [], []>} : vector<166x176xf32>, vector<176x176xf32>, vector<166x176xf32> -> vector<166x176xf32>
    %cst_11 = arith.constant dense<0.000000e+00> : vector<166x166xf32>
    %9 = tpu.matmul %8, %5, %cst_11 {dimension_numbers = #tpu.dot_dimension_numbers<[1], [0], [0], [1], [0, 0, 1, 1], [], []>} : vector<166x176xf32>, vector<176x166xf32>, vector<166x166xf32> -> vector<166x166xf32>
    %10 = arith.mulf %1, %1 : vector<176x176xf32>
    %cst_12 = arith.constant dense<0.000000e+00> : vector<166x176xf32>
    %11 = tpu.matmul %4, %10, %cst_12 {dimension_numbers = #tpu.dot_dimension_numbers<[1], [0], [0], [1], [0, 0, 1, 1], [], []>} : vector<166x176xf32>, vector<176x176xf32>, vector<166x176xf32> -> vector<166x176xf32>
    %cst_13 = arith.constant dense<0.000000e+00> : vector<166x166xf32>
    %12 = tpu.matmul %11, %5, %cst_13 {dimension_numbers = #tpu.dot_dimension_numbers<[1], [0], [0], [1], [0, 0, 1, 1], [], []>} : vector<166x176xf32>, vector<176x166xf32>, vector<166x166xf32> -> vector<166x166xf32>
    %13 = arith.mulf %3, %3 : vector<176x176xf32>
    %cst_14 = arith.constant dense<0.000000e+00> : vector<166x176xf32>
    %14 = tpu.matmul %4, %13, %cst_14 {dimension_numbers = #tpu.dot_dimension_numbers<[1], [0], [0], [1], [0, 0, 1, 1], [], []>} : vector<166x176xf32>, vector<176x176xf32>, vector<166x176xf32> -> vector<166x176xf32>
    %cst_15 = arith.constant dense<0.000000e+00> : vector<166x166xf32>
    %15 = tpu.matmul %14, %5, %cst_15 {dimension_numbers = #tpu.dot_dimension_numbers<[1], [0], [0], [1], [0, 0, 1, 1], [], []>} : vector<166x176xf32>, vector<176x166xf32>, vector<166x166xf32> -> vector<166x166xf32>
    %16 = arith.mulf %1, %3 : vector<176x176xf32>
    %cst_16 = arith.constant dense<0.000000e+00> : vector<166x176xf32>
    %17 = tpu.matmul %4, %16, %cst_16 {dimension_numbers = #tpu.dot_dimension_numbers<[1], [0], [0], [1], [0, 0, 1, 1], [], []>} : vector<166x176xf32>, vector<176x176xf32>, vector<166x176xf32> -> vector<166x176xf32>
    %cst_17 = arith.constant dense<0.000000e+00> : vector<166x166xf32>
    %18 = tpu.matmul %17, %5, %cst_17 {dimension_numbers = #tpu.dot_dimension_numbers<[1], [0], [0], [1], [0, 0, 1, 1], [], []>} : vector<166x176xf32>, vector<176x166xf32>, vector<166x166xf32> -> vector<166x166xf32>
    %19 = arith.mulf %7, %7 : vector<166x166xf32>
    %20 = arith.mulf %9, %9 : vector<166x166xf32>
    %21 = arith.mulf %7, %9 : vector<166x166xf32>
    %22 = arith.subf %12, %19 : vector<166x166xf32>
    %23 = arith.subf %15, %20 : vector<166x166xf32>
    %24 = arith.subf %18, %21 : vector<166x166xf32>
    %cst_18 = arith.constant 2.000000e+00 : f32
    %25 = vector.broadcast %cst_18 : f32 to vector<166x166xf32>
    %26 = arith.mulf %25, %24 : vector<166x166xf32>
    %cst_19 = arith.constant 5.852250e+01 : f32
    %27 = vector.broadcast %cst_19 : f32 to vector<166x166xf32>
    %28 = arith.addf %26, %27 : vector<166x166xf32>
    %29 = arith.addf %22, %23 : vector<166x166xf32>
    %cst_20 = arith.constant 5.852250e+01 : f32
    %30 = vector.broadcast %cst_20 : f32 to vector<166x166xf32>
    %31 = arith.addf %29, %30 : vector<166x166xf32>
    %32 = arith.divf %28, %31 : vector<166x166xf32>
    %cst_21 = arith.constant 2.000000e+00 : f32
    %33 = vector.broadcast %cst_21 : f32 to vector<166x166xf32>
    %34 = arith.mulf %33, %21 : vector<166x166xf32>
    %cst_22 = arith.constant 6.502500e+00 : f32
    %35 = vector.broadcast %cst_22 : f32 to vector<166x166xf32>
    %36 = arith.addf %34, %35 : vector<166x166xf32>
    %37 = arith.addf %19, %20 : vector<166x166xf32>
    %cst_23 = arith.constant 6.502500e+00 : f32
    %38 = vector.broadcast %cst_23 : f32 to vector<166x166xf32>
    %39 = arith.addf %37, %38 : vector<166x166xf32>
    %40 = arith.divf %36, %39 : vector<166x166xf32>
    %41 = arith.mulf %40, %32 : vector<166x166xf32>
    %cst_24 = arith.constant dense<0.000000e+00> : vector<166xf32>
    %42 = vector.multi_reduction <add>, %41, %cst_24 [1] : vector<166x166xf32> to vector<166xf32>
    %43 = vector.shape_cast %42 : vector<166xf32> to vector<166x1xf32>
    %cst_25 = arith.constant dense<0.000000e+00> : vector<1xf32>
    %44 = vector.multi_reduction <add>, %43, %cst_25 [0] : vector<166x1xf32> to vector<1xf32>
    %45 = vector.shape_cast %44 : vector<1xf32> to vector<1x1xf32>
    %cst_26 = arith.constant 3.62897372E-5 : f32
    %46 = vector.broadcast %cst_26 : f32 to vector<1x1xf32>
    %47 = arith.mulf %45, %46 : vector<1x1xf32>
    %c0_27 = arith.constant 0 : index
    %c0_28 = arith.constant 0 : index
    %c0_29 = arith.constant 0 : index
    %48 = vector.load %arg7[%c0_27, %c0_28, %c0_29] : memref<1x1x1xf32, #tpu.memory_space<vmem>>, vector<1x1x1xf32>
    %49 = vector.shape_cast %48 : vector<1x1x1xf32> to vector<1x1xf32>
    %50 = vector.shape_cast %47 : vector<1x1xf32> to vector<1x1x1xf32>
    tpu.vector_store %arg7[%c0_27, %c0_28, %c0_29], %50 {strides = array<i32>} : memref<1x1x1xf32, #tpu.memory_space<vmem>>, vector<1x1x1xf32>,
    %cst_30 = arith.constant dense<0.000000e+00> : vector<166xf32>
    %51 = vector.multi_reduction <add>, %32, %cst_30 [1] : vector<166x166xf32> to vector<166xf32>
    %52 = vector.shape_cast %51 : vector<166xf32> to vector<166x1xf32>
    %cst_31 = arith.constant dense<0.000000e+00> : vector<1xf32>
    %53 = vector.multi_reduction <add>, %52, %cst_31 [0] : vector<166x1xf32> to vector<1xf32>
    %54 = vector.shape_cast %53 : vector<1xf32> to vector<1x1xf32>
    %cst_32 = arith.constant 3.62897372E-5 : f32
    %55 = vector.broadcast %cst_32 : f32 to vector<1x1xf32>
    %56 = arith.mulf %54, %55 : vector<1x1xf32>
    %c0_33 = arith.constant 0 : index
    %c0_34 = arith.constant 0 : index
    %c0_35 = arith.constant 0 : index
    %57 = vector.load %arg8[%c0_33, %c0_34, %c0_35] : memref<1x1x1xf32, #tpu.memory_space<vmem>>, vector<1x1x1xf32>
    %58 = vector.shape_cast %57 : vector<1x1x1xf32> to vector<1x1xf32>
    %59 = vector.shape_cast %56 : vector<1x1xf32> to vector<1x1x1xf32>
    tpu.vector_store %arg8[%c0_33, %c0_34, %c0_35], %59 {strides = array<i32>} : memref<1x1x1xf32, #tpu.memory_space<vmem>>, vector<1x1x1xf32>,
    %c0_36 = arith.constant 0 : index
    %c0_37 = arith.constant 0 : index
    %60 = vector.load %arg5[%c0_36, %c0_37] : memref<88x176xf32, #tpu.memory_space<vmem>>, vector<88x176xf32>
    %c0_38 = arith.constant 0 : index
    %c0_39 = arith.constant 0 : index
    %61 = vector.load %arg6[%c0_38, %c0_39] : memref<176x88xf32, #tpu.memory_space<vmem>>, vector<176x88xf32>
    %cst_40 = arith.constant dense<0.000000e+00> : vector<88x176xf32>
    %62 = tpu.matmul %60, %1, %cst_40 {dimension_numbers = #tpu.dot_dimension_numbers<[1], [0], [0], [1], [0, 0, 1, 1], [], []>} : vector<88x176xf32>, vector<176x176xf32>, vector<88x176xf32> -> vector<88x176xf32>
    %cst_41 = arith.constant dense<0.000000e+00> : vector<88x88xf32>
    %63 = tpu.matmul %62, %61, %cst_41 {dimension_numbers = #tpu.dot_dimension_numbers<[1], [0], [0], [1], [0, 0, 1, 1], [], []>} : vector<88x176xf32>, vector<176x88xf32>, vector<88x88xf32> -> vector<88x88xf32>
    %c0_42 = arith.constant 0 : index
    %c0_43 = arith.constant 0 : index
    %c0_44 = arith.constant 0 : index
    %64 = vector.load %arg9[%c0_42, %c0_43, %c0_44] : memref<1x88x88xf32, #tpu.memory_space<vmem>>, vector<1x88x88xf32>
    %65 = vector.shape_cast %64 : vector<1x88x88xf32> to vector<88x88xf32>
    %66 = vector.shape_cast %63 : vector<88x88xf32> to vector<1x88x88xf32>
    tpu.vector_store %arg9[%c0_42, %c0_43, %c0_44], %66 {strides = array<i32>} : memref<1x88x88xf32, #tpu.memory_space<vmem>>, vector<1x88x88xf32>,
    %cst_45 = arith.constant dense<0.000000e+00> : vector<88x176xf32>
    %67 = tpu.matmul %60, %3, %cst_45 {dimension_numbers = #tpu.dot_dimension_numbers<[1], [0], [0], [1], [0, 0, 1, 1], [], []>} : vector<88x176xf32>, vector<176x176xf32>, vector<88x176xf32> -> vector<88x176xf32>
    %cst_46 = arith.constant dense<0.000000e+00> : vector<88x88xf32>
    %68 = tpu.matmul %67, %61, %cst_46 {dimension_numbers = #tpu.dot_dimension_numbers<[1], [0], [0], [1], [0, 0, 1, 1], [], []>} : vector<88x176xf32>, vector<176x88xf32>, vector<88x88xf32> -> vector<88x88xf32>
    %c0_47 = arith.constant 0 : index
    %c0_48 = arith.constant 0 : index
    %c0_49 = arith.constant 0 : index
    %69 = vector.load %arg10[%c0_47, %c0_48, %c0_49] : memref<1x88x88xf32, #tpu.memory_space<vmem>>, vector<1x88x88xf32>
    %70 = vector.shape_cast %69 : vector<1x88x88xf32> to vector<88x88xf32>
    %71 = vector.shape_cast %68 : vector<88x88xf32> to vector<1x88x88xf32>
    tpu.vector_store %arg10[%c0_47, %c0_48, %c0_49], %71 {strides = array<i32>} : memref<1x88x88xf32, #tpu.memory_space<vmem>>, vector<1x88x88xf32>,
    return
  }
  func.func @transform_0(%arg0: i32) -> (i32, i32, i32) {
    %c0_i32 = arith.constant 0 : i32
    %c0_i32_0 = arith.constant 0 : i32
    %c0_i32_1 = arith.constant 0 : i32
    return %arg0, %c0_i32, %c0_i32_0 : i32, i32, i32
  }
  func.func @transform_1(%arg0: i32) -> (i32, i32, i32) {
    %c0_i32 = arith.constant 0 : i32
    %c0_i32_0 = arith.constant 0 : i32
    %c0_i32_1 = arith.constant 0 : i32
    return %arg0, %c0_i32, %c0_i32_0 : i32, i32, i32
  }
  func.func @transform_2(%arg0: i32) -> (i32, i32) {
    %c0_i32 = arith.constant 0 : i32
    %c0_i32_0 = arith.constant 0 : i32
    %c0_i32_1 = arith.constant 0 : i32
    return %c0_i32, %c0_i32_0 : i32, i32
  }
  func.func @transform_3(%arg0: i32) -> (i32, i32) {
    %c0_i32 = arith.constant 0 : i32
    %c0_i32_0 = arith.constant 0 : i32
    %c0_i32_1 = arith.constant 0 : i32
    return %c0_i32, %c0_i32_0 : i32, i32
  }
  func.func @transform_4(%arg0: i32) -> (i32, i32) {
    %c0_i32 = arith.constant 0 : i32
    %c0_i32_0 = arith.constant 0 : i32
    %c0_i32_1 = arith.constant 0 : i32
    return %c0_i32, %c0_i32_0 : i32, i32
  }
  func.func @transform_5(%arg0: i32) -> (i32, i32) {
    %c0_i32 = arith.constant 0 : i32
    %c0_i32_0 = arith.constant 0 : i32
    %c0_i32_1 = arith.constant 0 : i32
    return %c0_i32, %c0_i32_0 : i32, i32
  }
  func.func @transform_6(%arg0: i32) -> (i32, i32, i32) {
    %c0_i32 = arith.constant 0 : i32
    %c0_i32_0 = arith.constant 0 : i32
    %c0_i32_1 = arith.constant 0 : i32
    return %arg0, %c0_i32, %c0_i32_0 : i32, i32, i32
  }
  func.func @transform_7(%arg0: i32) -> (i32, i32, i32) {
    %c0_i32 = arith.constant 0 : i32
    %c0_i32_0 = arith.constant 0 : i32
    %c0_i32_1 = arith.constant 0 : i32
    return %arg0, %c0_i32, %c0_i32_0 : i32, i32, i32
  }
  func.func @transform_8(%arg0: i32) -> (i32, i32, i32) {
    %c0_i32 = arith.constant 0 : i32
    %c0_i32_0 = arith.constant 0 : i32
    %c0_i32_1 = arith.constant 0 : i32
    return %arg0, %c0_i32, %c0_i32_0 : i32, i32, i32
  }
  func.func @transform_9(%arg0: i32) -> (i32, i32, i32) {
    %c0_i32 = arith.constant 0 : i32
    %c0_i32_0 = arith.constant 0 : i32
    %c0_i32_1 = arith.constant 0 : i32
    return %arg0, %c0_i32, %c0_i32_0 : i32, i32, i32
  }
}

module attributes {stable_mosaic.version = 11 : i64} {
  func.func @kernel(%arg0: i32, %arg1: memref<1x22x22xf32, #tpu.memory_space<vmem>>, %arg2: memref<1x22x22xf32, #tpu.memory_space<vmem>>, %arg3: memref<12x22xf32, #tpu.memory_space<vmem>>, %arg4: memref<22x12xf32, #tpu.memory_space<vmem>>, %arg5: memref<11x22xf32, #tpu.memory_space<vmem>>, %arg6: memref<22x11xf32, #tpu.memory_space<vmem>>, %arg7: memref<1x1x1xf32, #tpu.memory_space<vmem>>, %arg8: memref<1x1x1xf32, #tpu.memory_space<vmem>>, %arg9: memref<1x11x11xf32, #tpu.memory_space<vmem>>, %arg10: memref<1x11x11xf32, #tpu.memory_space<vmem>>) attributes {dimension_semantics = [#tpu.dimension_semantics<parallel>], iteration_bounds = array<i64: 2>, scalar_prefetch = 0 : i64, scratch_operands = 0 : i64, tpu.core_type = #tpu.core_type<tc>, window_params = [{transform_indices = @transform_0, window_bounds = array<i64: 1, 22, 22>}, {transform_indices = @transform_1, window_bounds = array<i64: 1, 22, 22>}, {pipeline_mode = #tpu.pipeline_mode<synchronous>, transform_indices = @transform_2, window_bounds = array<i64: 12, 22>}, {pipeline_mode = #tpu.pipeline_mode<synchronous>, transform_indices = @transform_3, window_bounds = array<i64: 22, 12>}, {pipeline_mode = #tpu.pipeline_mode<synchronous>, transform_indices = @transform_4, window_bounds = array<i64: 11, 22>}, {pipeline_mode = #tpu.pipeline_mode<synchronous>, transform_indices = @transform_5, window_bounds = array<i64: 22, 11>}, {transform_indices = @transform_6, window_bounds = array<i64: 1, 1, 1>}, {transform_indices = @transform_7, window_bounds = array<i64: 1, 1, 1>}, {transform_indices = @transform_8, window_bounds = array<i64: 1, 11, 11>}, {transform_indices = @transform_9, window_bounds = array<i64: 1, 11, 11>}]} {
    %c0 = arith.constant 0 : index
    %c0_0 = arith.constant 0 : index
    %c0_1 = arith.constant 0 : index
    %0 = vector.load %arg1[%c0, %c0_0, %c0_1] : memref<1x22x22xf32, #tpu.memory_space<vmem>>, vector<1x22x22xf32>
    %1 = vector.shape_cast %0 : vector<1x22x22xf32> to vector<22x22xf32>
    %c0_2 = arith.constant 0 : index
    %c0_3 = arith.constant 0 : index
    %c0_4 = arith.constant 0 : index
    %2 = vector.load %arg2[%c0_2, %c0_3, %c0_4] : memref<1x22x22xf32, #tpu.memory_space<vmem>>, vector<1x22x22xf32>
    %3 = vector.shape_cast %2 : vector<1x22x22xf32> to vector<22x22xf32>
    %c0_5 = arith.constant 0 : index
    %c0_6 = arith.constant 0 : index
    %4 = vector.load %arg3[%c0_5, %c0_6] : memref<12x22xf32, #tpu.memory_space<vmem>>, vector<12x22xf32>
    %c0_7 = arith.constant 0 : index
    %c0_8 = arith.constant 0 : index
    %5 = vector.load %arg4[%c0_7, %c0_8] : memref<22x12xf32, #tpu.memory_space<vmem>>, vector<22x12xf32>
    %cst = arith.constant dense<0.000000e+00> : vector<12x22xf32>
    %6 = tpu.matmul %4, %1, %cst {dimension_numbers = #tpu.dot_dimension_numbers<[1], [0], [0], [1], [0, 0, 1, 1], [], []>} : vector<12x22xf32>, vector<22x22xf32>, vector<12x22xf32> -> vector<12x22xf32>
    %cst_9 = arith.constant dense<0.000000e+00> : vector<12x12xf32>
    %7 = tpu.matmul %6, %5, %cst_9 {dimension_numbers = #tpu.dot_dimension_numbers<[1], [0], [0], [1], [0, 0, 1, 1], [], []>} : vector<12x22xf32>, vector<22x12xf32>, vector<12x12xf32> -> vector<12x12xf32>
    %cst_10 = arith.constant dense<0.000000e+00> : vector<12x22xf32>
    %8 = tpu.matmul %4, %3, %cst_10 {dimension_numbers = #tpu.dot_dimension_numbers<[1], [0], [0], [1], [0, 0, 1, 1], [], []>} : vector<12x22xf32>, vector<22x22xf32>, vector<12x22xf32> -> vector<12x22xf32>
    %cst_11 = arith.constant dense<0.000000e+00> : vector<12x12xf32>
    %9 = tpu.matmul %8, %5, %cst_11 {dimension_numbers = #tpu.dot_dimension_numbers<[1], [0], [0], [1], [0, 0, 1, 1], [], []>} : vector<12x22xf32>, vector<22x12xf32>, vector<12x12xf32> -> vector<12x12xf32>
    %10 = arith.mulf %1, %1 : vector<22x22xf32>
    %cst_12 = arith.constant dense<0.000000e+00> : vector<12x22xf32>
    %11 = tpu.matmul %4, %10, %cst_12 {dimension_numbers = #tpu.dot_dimension_numbers<[1], [0], [0], [1], [0, 0, 1, 1], [], []>} : vector<12x22xf32>, vector<22x22xf32>, vector<12x22xf32> -> vector<12x22xf32>
    %cst_13 = arith.constant dense<0.000000e+00> : vector<12x12xf32>
    %12 = tpu.matmul %11, %5, %cst_13 {dimension_numbers = #tpu.dot_dimension_numbers<[1], [0], [0], [1], [0, 0, 1, 1], [], []>} : vector<12x22xf32>, vector<22x12xf32>, vector<12x12xf32> -> vector<12x12xf32>
    %13 = arith.mulf %3, %3 : vector<22x22xf32>
    %cst_14 = arith.constant dense<0.000000e+00> : vector<12x22xf32>
    %14 = tpu.matmul %4, %13, %cst_14 {dimension_numbers = #tpu.dot_dimension_numbers<[1], [0], [0], [1], [0, 0, 1, 1], [], []>} : vector<12x22xf32>, vector<22x22xf32>, vector<12x22xf32> -> vector<12x22xf32>
    %cst_15 = arith.constant dense<0.000000e+00> : vector<12x12xf32>
    %15 = tpu.matmul %14, %5, %cst_15 {dimension_numbers = #tpu.dot_dimension_numbers<[1], [0], [0], [1], [0, 0, 1, 1], [], []>} : vector<12x22xf32>, vector<22x12xf32>, vector<12x12xf32> -> vector<12x12xf32>
    %16 = arith.mulf %1, %3 : vector<22x22xf32>
    %cst_16 = arith.constant dense<0.000000e+00> : vector<12x22xf32>
    %17 = tpu.matmul %4, %16, %cst_16 {dimension_numbers = #tpu.dot_dimension_numbers<[1], [0], [0], [1], [0, 0, 1, 1], [], []>} : vector<12x22xf32>, vector<22x22xf32>, vector<12x22xf32> -> vector<12x22xf32>
    %cst_17 = arith.constant dense<0.000000e+00> : vector<12x12xf32>
    %18 = tpu.matmul %17, %5, %cst_17 {dimension_numbers = #tpu.dot_dimension_numbers<[1], [0], [0], [1], [0, 0, 1, 1], [], []>} : vector<12x22xf32>, vector<22x12xf32>, vector<12x12xf32> -> vector<12x12xf32>
    %19 = arith.mulf %7, %7 : vector<12x12xf32>
    %20 = arith.mulf %9, %9 : vector<12x12xf32>
    %21 = arith.mulf %7, %9 : vector<12x12xf32>
    %22 = arith.subf %12, %19 : vector<12x12xf32>
    %23 = arith.subf %15, %20 : vector<12x12xf32>
    %24 = arith.subf %18, %21 : vector<12x12xf32>
    %cst_18 = arith.constant 2.000000e+00 : f32
    %25 = vector.broadcast %cst_18 : f32 to vector<12x12xf32>
    %26 = arith.mulf %25, %24 : vector<12x12xf32>
    %cst_19 = arith.constant 5.852250e+01 : f32
    %27 = vector.broadcast %cst_19 : f32 to vector<12x12xf32>
    %28 = arith.addf %26, %27 : vector<12x12xf32>
    %29 = arith.addf %22, %23 : vector<12x12xf32>
    %cst_20 = arith.constant 5.852250e+01 : f32
    %30 = vector.broadcast %cst_20 : f32 to vector<12x12xf32>
    %31 = arith.addf %29, %30 : vector<12x12xf32>
    %32 = arith.divf %28, %31 : vector<12x12xf32>
    %cst_21 = arith.constant 2.000000e+00 : f32
    %33 = vector.broadcast %cst_21 : f32 to vector<12x12xf32>
    %34 = arith.mulf %33, %21 : vector<12x12xf32>
    %cst_22 = arith.constant 6.502500e+00 : f32
    %35 = vector.broadcast %cst_22 : f32 to vector<12x12xf32>
    %36 = arith.addf %34, %35 : vector<12x12xf32>
    %37 = arith.addf %19, %20 : vector<12x12xf32>
    %cst_23 = arith.constant 6.502500e+00 : f32
    %38 = vector.broadcast %cst_23 : f32 to vector<12x12xf32>
    %39 = arith.addf %37, %38 : vector<12x12xf32>
    %40 = arith.divf %36, %39 : vector<12x12xf32>
    %41 = arith.mulf %40, %32 : vector<12x12xf32>
    %cst_24 = arith.constant dense<0.000000e+00> : vector<12xf32>
    %42 = vector.multi_reduction <add>, %41, %cst_24 [1] : vector<12x12xf32> to vector<12xf32>
    %43 = vector.shape_cast %42 : vector<12xf32> to vector<12x1xf32>
    %cst_25 = arith.constant dense<0.000000e+00> : vector<1xf32>
    %44 = vector.multi_reduction <add>, %43, %cst_25 [0] : vector<12x1xf32> to vector<1xf32>
    %45 = vector.shape_cast %44 : vector<1xf32> to vector<1x1xf32>
    %cst_26 = arith.constant 0.0069444445 : f32
    %46 = vector.broadcast %cst_26 : f32 to vector<1x1xf32>
    %47 = arith.mulf %45, %46 : vector<1x1xf32>
    %c0_27 = arith.constant 0 : index
    %c0_28 = arith.constant 0 : index
    %c0_29 = arith.constant 0 : index
    %48 = vector.load %arg7[%c0_27, %c0_28, %c0_29] : memref<1x1x1xf32, #tpu.memory_space<vmem>>, vector<1x1x1xf32>
    %49 = vector.shape_cast %48 : vector<1x1x1xf32> to vector<1x1xf32>
    %50 = vector.shape_cast %47 : vector<1x1xf32> to vector<1x1x1xf32>
    tpu.vector_store %arg7[%c0_27, %c0_28, %c0_29], %50 {strides = array<i32>} : memref<1x1x1xf32, #tpu.memory_space<vmem>>, vector<1x1x1xf32>,
    %cst_30 = arith.constant dense<0.000000e+00> : vector<12xf32>
    %51 = vector.multi_reduction <add>, %32, %cst_30 [1] : vector<12x12xf32> to vector<12xf32>
    %52 = vector.shape_cast %51 : vector<12xf32> to vector<12x1xf32>
    %cst_31 = arith.constant dense<0.000000e+00> : vector<1xf32>
    %53 = vector.multi_reduction <add>, %52, %cst_31 [0] : vector<12x1xf32> to vector<1xf32>
    %54 = vector.shape_cast %53 : vector<1xf32> to vector<1x1xf32>
    %cst_32 = arith.constant 0.0069444445 : f32
    %55 = vector.broadcast %cst_32 : f32 to vector<1x1xf32>
    %56 = arith.mulf %54, %55 : vector<1x1xf32>
    %c0_33 = arith.constant 0 : index
    %c0_34 = arith.constant 0 : index
    %c0_35 = arith.constant 0 : index
    %57 = vector.load %arg8[%c0_33, %c0_34, %c0_35] : memref<1x1x1xf32, #tpu.memory_space<vmem>>, vector<1x1x1xf32>
    %58 = vector.shape_cast %57 : vector<1x1x1xf32> to vector<1x1xf32>
    %59 = vector.shape_cast %56 : vector<1x1xf32> to vector<1x1x1xf32>
    tpu.vector_store %arg8[%c0_33, %c0_34, %c0_35], %59 {strides = array<i32>} : memref<1x1x1xf32, #tpu.memory_space<vmem>>, vector<1x1x1xf32>,
    %c0_36 = arith.constant 0 : index
    %c0_37 = arith.constant 0 : index
    %60 = vector.load %arg5[%c0_36, %c0_37] : memref<11x22xf32, #tpu.memory_space<vmem>>, vector<11x22xf32>
    %c0_38 = arith.constant 0 : index
    %c0_39 = arith.constant 0 : index
    %61 = vector.load %arg6[%c0_38, %c0_39] : memref<22x11xf32, #tpu.memory_space<vmem>>, vector<22x11xf32>
    %cst_40 = arith.constant dense<0.000000e+00> : vector<11x22xf32>
    %62 = tpu.matmul %60, %1, %cst_40 {dimension_numbers = #tpu.dot_dimension_numbers<[1], [0], [0], [1], [0, 0, 1, 1], [], []>} : vector<11x22xf32>, vector<22x22xf32>, vector<11x22xf32> -> vector<11x22xf32>
    %cst_41 = arith.constant dense<0.000000e+00> : vector<11x11xf32>
    %63 = tpu.matmul %62, %61, %cst_41 {dimension_numbers = #tpu.dot_dimension_numbers<[1], [0], [0], [1], [0, 0, 1, 1], [], []>} : vector<11x22xf32>, vector<22x11xf32>, vector<11x11xf32> -> vector<11x11xf32>
    %c0_42 = arith.constant 0 : index
    %c0_43 = arith.constant 0 : index
    %c0_44 = arith.constant 0 : index
    %64 = vector.load %arg9[%c0_42, %c0_43, %c0_44] : memref<1x11x11xf32, #tpu.memory_space<vmem>>, vector<1x11x11xf32>
    %65 = vector.shape_cast %64 : vector<1x11x11xf32> to vector<11x11xf32>
    %66 = vector.shape_cast %63 : vector<11x11xf32> to vector<1x11x11xf32>
    tpu.vector_store %arg9[%c0_42, %c0_43, %c0_44], %66 {strides = array<i32>} : memref<1x11x11xf32, #tpu.memory_space<vmem>>, vector<1x11x11xf32>,
    %cst_45 = arith.constant dense<0.000000e+00> : vector<11x22xf32>
    %67 = tpu.matmul %60, %3, %cst_45 {dimension_numbers = #tpu.dot_dimension_numbers<[1], [0], [0], [1], [0, 0, 1, 1], [], []>} : vector<11x22xf32>, vector<22x22xf32>, vector<11x22xf32> -> vector<11x22xf32>
    %cst_46 = arith.constant dense<0.000000e+00> : vector<11x11xf32>
    %68 = tpu.matmul %67, %61, %cst_46 {dimension_numbers = #tpu.dot_dimension_numbers<[1], [0], [0], [1], [0, 0, 1, 1], [], []>} : vector<11x22xf32>, vector<22x11xf32>, vector<11x11xf32> -> vector<11x11xf32>
    %c0_47 = arith.constant 0 : index
    %c0_48 = arith.constant 0 : index
    %c0_49 = arith.constant 0 : index
    %69 = vector.load %arg10[%c0_47, %c0_48, %c0_49] : memref<1x11x11xf32, #tpu.memory_space<vmem>>, vector<1x11x11xf32>
    %70 = vector.shape_cast %69 : vector<1x11x11xf32> to vector<11x11xf32>
    %71 = vector.shape_cast %68 : vector<11x11xf32> to vector<1x11x11xf32>
    tpu.vector_store %arg10[%c0_47, %c0_48, %c0_49], %71 {strides = array<i32>} : memref<1x11x11xf32, #tpu.memory_space<vmem>>, vector<1x11x11xf32>,
    return
  }
  func.func @transform_0(%arg0: i32) -> (i32, i32, i32) {
    %c0_i32 = arith.constant 0 : i32
    %c0_i32_0 = arith.constant 0 : i32
    %c0_i32_1 = arith.constant 0 : i32
    return %arg0, %c0_i32, %c0_i32_0 : i32, i32, i32
  }
  func.func @transform_1(%arg0: i32) -> (i32, i32, i32) {
    %c0_i32 = arith.constant 0 : i32
    %c0_i32_0 = arith.constant 0 : i32
    %c0_i32_1 = arith.constant 0 : i32
    return %arg0, %c0_i32, %c0_i32_0 : i32, i32, i32
  }
  func.func @transform_2(%arg0: i32) -> (i32, i32) {
    %c0_i32 = arith.constant 0 : i32
    %c0_i32_0 = arith.constant 0 : i32
    %c0_i32_1 = arith.constant 0 : i32
    return %c0_i32, %c0_i32_0 : i32, i32
  }
  func.func @transform_3(%arg0: i32) -> (i32, i32) {
    %c0_i32 = arith.constant 0 : i32
    %c0_i32_0 = arith.constant 0 : i32
    %c0_i32_1 = arith.constant 0 : i32
    return %c0_i32, %c0_i32_0 : i32, i32
  }
  func.func @transform_4(%arg0: i32) -> (i32, i32) {
    %c0_i32 = arith.constant 0 : i32
    %c0_i32_0 = arith.constant 0 : i32
    %c0_i32_1 = arith.constant 0 : i32
    return %c0_i32, %c0_i32_0 : i32, i32
  }
  func.func @transform_5(%arg0: i32) -> (i32, i32) {
    %c0_i32 = arith.constant 0 : i32
    %c0_i32_0 = arith.constant 0 : i32
    %c0_i32_1 = arith.constant 0 : i32
    return %c0_i32, %c0_i32_0 : i32, i32
  }
  func.func @transform_6(%arg0: i32) -> (i32, i32, i32) {
    %c0_i32 = arith.constant 0 : i32
    %c0_i32_0 = arith.constant 0 : i32
    %c0_i32_1 = arith.constant 0 : i32
    return %arg0, %c0_i32, %c0_i32_0 : i32, i32, i32
  }
  func.func @transform_7(%arg0: i32) -> (i32, i32, i32) {
    %c0_i32 = arith.constant 0 : i32
    %c0_i32_0 = arith.constant 0 : i32
    %c0_i32_1 = arith.constant 0 : i32
    return %arg0, %c0_i32, %c0_i32_0 : i32, i32, i32
  }
  func.func @transform_8(%arg0: i32) -> (i32, i32, i32) {
    %c0_i32 = arith.constant 0 : i32
    %c0_i32_0 = arith.constant 0 : i32
    %c0_i32_1 = arith.constant 0 : i32
    return %arg0, %c0_i32, %c0_i32_0 : i32, i32, i32
  }
  func.func @transform_9(%arg0: i32) -> (i32, i32, i32) {
    %c0_i32 = arith.constant 0 : i32
    %c0_i32_0 = arith.constant 0 : i32
    %c0_i32_1 = arith.constant 0 : i32
    return %arg0, %c0_i32, %c0_i32_0 : i32, i32, i32
  }
}

module attributes {stable_mosaic.version = 11 : i64} {
  func.func @kernel(%arg0: i32, %arg1: memref<1x11x11xf32, #tpu.memory_space<vmem>>, %arg2: memref<1x11x11xf32, #tpu.memory_space<vmem>>, %arg3: memref<1x11xf32, #tpu.memory_space<vmem>>, %arg4: memref<11x1xf32, #tpu.memory_space<vmem>>, %arg5: memref<1x1x1xf32, #tpu.memory_space<vmem>>, %arg6: memref<1x1x1xf32, #tpu.memory_space<vmem>>) attributes {dimension_semantics = [#tpu.dimension_semantics<parallel>], iteration_bounds = array<i64: 2>, scalar_prefetch = 0 : i64, scratch_operands = 0 : i64, tpu.core_type = #tpu.core_type<tc>, window_params = [{transform_indices = @transform_0, window_bounds = array<i64: 1, 11, 11>}, {transform_indices = @transform_1, window_bounds = array<i64: 1, 11, 11>}, {pipeline_mode = #tpu.pipeline_mode<synchronous>, transform_indices = @transform_2, window_bounds = array<i64: 1, 11>}, {pipeline_mode = #tpu.pipeline_mode<synchronous>, transform_indices = @transform_3, window_bounds = array<i64: 11, 1>}, {transform_indices = @transform_4, window_bounds = array<i64: 1, 1, 1>}, {transform_indices = @transform_5, window_bounds = array<i64: 1, 1, 1>}]} {
    %c0 = arith.constant 0 : index
    %c0_0 = arith.constant 0 : index
    %c0_1 = arith.constant 0 : index
    %0 = vector.load %arg1[%c0, %c0_0, %c0_1] : memref<1x11x11xf32, #tpu.memory_space<vmem>>, vector<1x11x11xf32>
    %1 = vector.shape_cast %0 : vector<1x11x11xf32> to vector<11x11xf32>
    %c0_2 = arith.constant 0 : index
    %c0_3 = arith.constant 0 : index
    %c0_4 = arith.constant 0 : index
    %2 = vector.load %arg2[%c0_2, %c0_3, %c0_4] : memref<1x11x11xf32, #tpu.memory_space<vmem>>, vector<1x11x11xf32>
    %3 = vector.shape_cast %2 : vector<1x11x11xf32> to vector<11x11xf32>
    %c0_5 = arith.constant 0 : index
    %c0_6 = arith.constant 0 : index
    %4 = vector.load %arg3[%c0_5, %c0_6] : memref<1x11xf32, #tpu.memory_space<vmem>>, vector<1x11xf32>
    %c0_7 = arith.constant 0 : index
    %c0_8 = arith.constant 0 : index
    %5 = vector.load %arg4[%c0_7, %c0_8] : memref<11x1xf32, #tpu.memory_space<vmem>>, vector<11x1xf32>
    %cst = arith.constant dense<0.000000e+00> : vector<1x11xf32>
    %6 = tpu.matmul %4, %1, %cst {dimension_numbers = #tpu.dot_dimension_numbers<[1], [0], [0], [1], [0, 0, 1, 1], [], []>} : vector<1x11xf32>, vector<11x11xf32>, vector<1x11xf32> -> vector<1x11xf32>
    %cst_9 = arith.constant dense<0.000000e+00> : vector<1x1xf32>
    %7 = tpu.matmul %6, %5, %cst_9 {dimension_numbers = #tpu.dot_dimension_numbers<[1], [0], [0], [1], [0, 0, 1, 1], [], []>} : vector<1x11xf32>, vector<11x1xf32>, vector<1x1xf32> -> vector<1x1xf32>
    %cst_10 = arith.constant dense<0.000000e+00> : vector<1x11xf32>
    %8 = tpu.matmul %4, %3, %cst_10 {dimension_numbers = #tpu.dot_dimension_numbers<[1], [0], [0], [1], [0, 0, 1, 1], [], []>} : vector<1x11xf32>, vector<11x11xf32>, vector<1x11xf32> -> vector<1x11xf32>
    %cst_11 = arith.constant dense<0.000000e+00> : vector<1x1xf32>
    %9 = tpu.matmul %8, %5, %cst_11 {dimension_numbers = #tpu.dot_dimension_numbers<[1], [0], [0], [1], [0, 0, 1, 1], [], []>} : vector<1x11xf32>, vector<11x1xf32>, vector<1x1xf32> -> vector<1x1xf32>
    %10 = arith.mulf %1, %1 : vector<11x11xf32>
    %cst_12 = arith.constant dense<0.000000e+00> : vector<1x11xf32>
    %11 = tpu.matmul %4, %10, %cst_12 {dimension_numbers = #tpu.dot_dimension_numbers<[1], [0], [0], [1], [0, 0, 1, 1], [], []>} : vector<1x11xf32>, vector<11x11xf32>, vector<1x11xf32> -> vector<1x11xf32>
    %cst_13 = arith.constant dense<0.000000e+00> : vector<1x1xf32>
    %12 = tpu.matmul %11, %5, %cst_13 {dimension_numbers = #tpu.dot_dimension_numbers<[1], [0], [0], [1], [0, 0, 1, 1], [], []>} : vector<1x11xf32>, vector<11x1xf32>, vector<1x1xf32> -> vector<1x1xf32>
    %13 = arith.mulf %3, %3 : vector<11x11xf32>
    %cst_14 = arith.constant dense<0.000000e+00> : vector<1x11xf32>
    %14 = tpu.matmul %4, %13, %cst_14 {dimension_numbers = #tpu.dot_dimension_numbers<[1], [0], [0], [1], [0, 0, 1, 1], [], []>} : vector<1x11xf32>, vector<11x11xf32>, vector<1x11xf32> -> vector<1x11xf32>
    %cst_15 = arith.constant dense<0.000000e+00> : vector<1x1xf32>
    %15 = tpu.matmul %14, %5, %cst_15 {dimension_numbers = #tpu.dot_dimension_numbers<[1], [0], [0], [1], [0, 0, 1, 1], [], []>} : vector<1x11xf32>, vector<11x1xf32>, vector<1x1xf32> -> vector<1x1xf32>
    %16 = arith.mulf %1, %3 : vector<11x11xf32>
    %cst_16 = arith.constant dense<0.000000e+00> : vector<1x11xf32>
    %17 = tpu.matmul %4, %16, %cst_16 {dimension_numbers = #tpu.dot_dimension_numbers<[1], [0], [0], [1], [0, 0, 1, 1], [], []>} : vector<1x11xf32>, vector<11x11xf32>, vector<1x11xf32> -> vector<1x11xf32>
    %cst_17 = arith.constant dense<0.000000e+00> : vector<1x1xf32>
    %18 = tpu.matmul %17, %5, %cst_17 {dimension_numbers = #tpu.dot_dimension_numbers<[1], [0], [0], [1], [0, 0, 1, 1], [], []>} : vector<1x11xf32>, vector<11x1xf32>, vector<1x1xf32> -> vector<1x1xf32>
    %19 = arith.mulf %7, %7 : vector<1x1xf32>
    %20 = arith.mulf %9, %9 : vector<1x1xf32>
    %21 = arith.mulf %7, %9 : vector<1x1xf32>
    %22 = arith.subf %12, %19 : vector<1x1xf32>
    %23 = arith.subf %15, %20 : vector<1x1xf32>
    %24 = arith.subf %18, %21 : vector<1x1xf32>
    %cst_18 = arith.constant 2.000000e+00 : f32
    %25 = vector.broadcast %cst_18 : f32 to vector<1x1xf32>
    %26 = arith.mulf %25, %24 : vector<1x1xf32>
    %cst_19 = arith.constant 5.852250e+01 : f32
    %27 = vector.broadcast %cst_19 : f32 to vector<1x1xf32>
    %28 = arith.addf %26, %27 : vector<1x1xf32>
    %29 = arith.addf %22, %23 : vector<1x1xf32>
    %cst_20 = arith.constant 5.852250e+01 : f32
    %30 = vector.broadcast %cst_20 : f32 to vector<1x1xf32>
    %31 = arith.addf %29, %30 : vector<1x1xf32>
    %32 = arith.divf %28, %31 : vector<1x1xf32>
    %cst_21 = arith.constant 2.000000e+00 : f32
    %33 = vector.broadcast %cst_21 : f32 to vector<1x1xf32>
    %34 = arith.mulf %33, %21 : vector<1x1xf32>
    %cst_22 = arith.constant 6.502500e+00 : f32
    %35 = vector.broadcast %cst_22 : f32 to vector<1x1xf32>
    %36 = arith.addf %34, %35 : vector<1x1xf32>
    %37 = arith.addf %19, %20 : vector<1x1xf32>
    %cst_23 = arith.constant 6.502500e+00 : f32
    %38 = vector.broadcast %cst_23 : f32 to vector<1x1xf32>
    %39 = arith.addf %37, %38 : vector<1x1xf32>
    %40 = arith.divf %36, %39 : vector<1x1xf32>
    %41 = arith.mulf %40, %32 : vector<1x1xf32>
    %cst_24 = arith.constant dense<0.000000e+00> : vector<1xf32>
    %42 = vector.multi_reduction <add>, %41, %cst_24 [1] : vector<1x1xf32> to vector<1xf32>
    %43 = vector.shape_cast %42 : vector<1xf32> to vector<1x1xf32>
    %cst_25 = arith.constant dense<0.000000e+00> : vector<1xf32>
    %44 = vector.multi_reduction <add>, %43, %cst_25 [0] : vector<1x1xf32> to vector<1xf32>
    %45 = vector.shape_cast %44 : vector<1xf32> to vector<1x1xf32>
    %cst_26 = arith.constant 1.000000e+00 : f32
    %46 = vector.broadcast %cst_26 : f32 to vector<1x1xf32>
    %47 = arith.mulf %45, %46 : vector<1x1xf32>
    %c0_27 = arith.constant 0 : index
    %c0_28 = arith.constant 0 : index
    %c0_29 = arith.constant 0 : index
    %48 = vector.load %arg5[%c0_27, %c0_28, %c0_29] : memref<1x1x1xf32, #tpu.memory_space<vmem>>, vector<1x1x1xf32>
    %49 = vector.shape_cast %48 : vector<1x1x1xf32> to vector<1x1xf32>
    %50 = vector.shape_cast %47 : vector<1x1xf32> to vector<1x1x1xf32>
    tpu.vector_store %arg5[%c0_27, %c0_28, %c0_29], %50 {strides = array<i32>} : memref<1x1x1xf32, #tpu.memory_space<vmem>>, vector<1x1x1xf32>,
    %cst_30 = arith.constant dense<0.000000e+00> : vector<1xf32>
    %51 = vector.multi_reduction <add>, %32, %cst_30 [1] : vector<1x1xf32> to vector<1xf32>
    %52 = vector.shape_cast %51 : vector<1xf32> to vector<1x1xf32>
    %cst_31 = arith.constant dense<0.000000e+00> : vector<1xf32>
    %53 = vector.multi_reduction <add>, %52, %cst_31 [0] : vector<1x1xf32> to vector<1xf32>
    %54 = vector.shape_cast %53 : vector<1xf32> to vector<1x1xf32>
    %cst_32 = arith.constant 1.000000e+00 : f32
    %55 = vector.broadcast %cst_32 : f32 to vector<1x1xf32>
    %56 = arith.mulf %54, %55 : vector<1x1xf32>
    %c0_33 = arith.constant 0 : index
    %c0_34 = arith.constant 0 : index
    %c0_35 = arith.constant 0 : index
    %57 = vector.load %arg6[%c0_33, %c0_34, %c0_35] : memref<1x1x1xf32, #tpu.memory_space<vmem>>, vector<1x1x1xf32>
    %58 = vector.shape_cast %57 : vector<1x1x1xf32> to vector<1x1xf32>
    %59 = vector.shape_cast %56 : vector<1x1xf32> to vector<1x1x1xf32>
    tpu.vector_store %arg6[%c0_33, %c0_34, %c0_35], %59 {strides = array<i32>} : memref<1x1x1xf32, #tpu.memory_space<vmem>>, vector<1x1x1xf32>,
    return
  }
  func.func @transform_0(%arg0: i32) -> (i32, i32, i32) {
    %c0_i32 = arith.constant 0 : i32
    %c0_i32_0 = arith.constant 0 : i32
    %c0_i32_1 = arith.constant 0 : i32
    return %arg0, %c0_i32, %c0_i32_0 : i32, i32, i32
  }
  func.func @transform_1(%arg0: i32) -> (i32, i32, i32) {
    %c0_i32 = arith.constant 0 : i32
    %c0_i32_0 = arith.constant 0 : i32
    %c0_i32_1 = arith.constant 0 : i32
    return %arg0, %c0_i32, %c0_i32_0 : i32, i32, i32
  }
  func.func @transform_2(%arg0: i32) -> (i32, i32) {
    %c0_i32 = arith.constant 0 : i32
    %c0_i32_0 = arith.constant 0 : i32
    %c0_i32_1 = arith.constant 0 : i32
    return %c0_i32, %c0_i32_0 : i32, i32
  }
  func.func @transform_3(%arg0: i32) -> (i32, i32) {
    %c0_i32 = arith.constant 0 : i32
    %c0_i32_0 = arith.constant 0 : i32
    %c0_i32_1 = arith.constant 0 : i32
    return %c0_i32, %c0_i32_0 : i32, i32
  }
  func.func @transform_4(%arg0: i32) -> (i32, i32, i32) {
    %c0_i32 = arith.constant 0 : i32
    %c0_i32_0 = arith.constant 0 : i32
    %c0_i32_1 = arith.constant 0 : i32
    return %arg0, %c0_i32, %c0_i32_0 : i32, i32, i32
  }
  func.func @transform_5(%arg0: i32) -> (i32, i32, i32) {
    %c0_i32 = arith.constant 0 : i32
    %c0_i32_0 = arith.constant 0 : i32
    %c0_i32_1 = arith.constant 0 : i32
    return %arg0, %c0_i32, %c0_i32_0 : i32, i32, i32
  }
}

</mosaic_0001>

<bundles_post_ra>
// kernel: ms_ssim_loss.8
= control target key start
LH: loop header
LB: loop body
LE: loop exit
PB: predicated region body
PF: predicated region fallthrough
CT: control target
= control target key end

     0   :  { %15 = vsyncpa [#allocation3], 0  ;;  %s2473_s0 = inlined_call_operand.vmem [shape: f32[2,22,22], index: 0, kind: input, shape index: {}]   ;;  %s2474_s1 = inlined_call_operand.vmem [shape: f32[2,22,22], index: 1, kind: input, shape index: {}]   ;;  %s2475_s2 = inlined_call_operand.vmem [shape: f32[12,22], index: 2, kind: input, shape index: {}]   ;;  %s2476_s3 = inlined_call_operand.vmem [shape: f32[22,12], index: 3, kind: input, shape index: {}]   ;;  %s2477_s4 = inlined_call_operand.vmem [shape: f32[11,22], index: 4, kind: input, shape index: {}]   ;;  %s2478_s5 = inlined_call_operand.vmem [shape: f32[22,11], index: 5, kind: input, shape index: {}]   ;;  %s2479_s6 = inlined_call_operand.hbm [shape: f32[2,1,1], index: 6, kind: output, shape index: {0}]   ;;  %s2480_s7 = inlined_call_operand.vmem [shape: f32[2,1,1], index: 7, kind: output, shape index: {1}]   ;;  %s2481_s8 = inlined_call_operand.vmem [shape: f32[2,11,11], index: 8, kind: output, shape index: {2}]   ;;  %s2482_s9 = inlined_call_operand.vmem [shape: f32[2,11,11], index: 9, kind: output, shape index: {3}]  }
   0x1   :  { %17 = vsyncpa [#allocation3 + $0x1], 0  ;;  %s2258_s30 = smov 0   ;;  %s2260_s10 = smov 0  }
   0x2   :  { %s2262_s11 = smov 0   ;;  %s2264_s12 = smov 0  }
   0x3 LB: > { %s2279_s13 = sadd.s32 4294967295, %s2205_s12   ;;  %s1786_s14 = sadd.s32 4294967294, %s2205_s12   ;;  %s2205_s12 = sphi %s2264_s12, %s2488_s12   ;;  %s2201_s11 = sphi %s2262_s11, %s2487_s11   ;;  %s2197_s10 = sphi %s2260_s10, %s2486_s10   ;;  %s2193_s30 = sphi %s2258_s30, %s2485_s30  }
   0x4   : > { %s2283_s15 = sadd.s32 1, %s2205_s12   ;;  %s166_s16 = sadd.s32 1, %s2201_s11 }
   0x5   : > { %s163_s17 = ssub.s32 %s2205_s12, %s2283_s15  ;;  %p176_p0 = scmp.ne.s32.totalorder %s2201_s11, %s2197_s10 }
   0x6   : > { %p164_p1 = scmp.eq.s32.totalorder %s163_s17, 0  ;;  %p177_p2 = scmp.eq.s32.totalorder %s2279_s13, 1 }
   0x7   : > { %p182_p3 = scmp.ne.s32.totalorder %s2197_s10, %s2193_s30  ;;  %p183_p4 = scmp.eq.s32.totalorder %s1786_s14, 1 }
   0x8   : > { %s2294_s18 = scalar_select %p164_p1, %s2201_s11, %s166_s16  }
   0x9   : > { %p2296_p5 = por %p177_p2, %p176_p0  ;;  %p2300_p6 = por %p183_p4, %p182_p3 }
   0xa   : > { %p1789_p7 = scmp.ge.s32.totalorder %s2205_s12, 1  ;;  %p307_p8 = scmp.lt.s32.totalorder %s2205_s12, 3 }
   0xc   : > { %p308_p9 = pnand %p1789_p7, %p307_p8 }
   0xd   : > { %p360_p10 = scmp.lt.s32.totalorder (!%p308_p9), %s2279_s13, 1  ;;  %v389_v0 = vld [vmem:[%s2475_s2] sm:$0xff] (!%p308_p9)  ;;  %vm394_vm0 = vcmask (!%p308_p9), 179200   ;;  %v392_v2 = vld [vmem:[%s2476_s3 + $0x8] sm:$0xff] (!%p308_p9)  ;;  %vm401_vm1 = vcmask (!%p308_p9), 1045504   ;;  %vm1251_vm2 = vcmask (!%p308_p9), 93184  }
   0xe   : > { %311 = sbr.rel (%p308_p9) target bundleno = 677 (0x2a5), region = 44  ;;  %1919 = vmatprep.mubr.msk.f32.mxu0 (!%p308_p9), %vm394_vm0, %v389_v0  ;;  %v391_v1 = vld [vmem:[%s2476_s3] sm:$0xff] (!%p308_p9)  ;;  %v390_v11 = vld [vmem:[%s2475_s2 + $0x8] sm:$0xf] (!%p308_p9)  ;;  %v393_v27 = vld [vmem:[%s2476_s3 + $0x10] sm:$0x3f] (!%p308_p9) }
   0xf   : > { %v2320_v3 = vpack.c.bf16 (!%p308_p9), %v392_v2, %v391_v1  ;;  %v1283_v25 = vld [vmem:[%s2477_s4] sm:$0xff] (!%p308_p9)  ;;  %v1284_v26 = vld [vmem:[%s2477_s4 + $0x8] sm:$0x7] (!%p308_p9)  ;;  %v1287_v41 = vld [vmem:[%s2478_s5 + $0x10] sm:$0x3f] (!%p308_p9)  ;;  %vm1247_vm3 = vcmask (!%p308_p9), 97280  }
  0x10   : > { %v1285_v36 = vld [vmem:[%s2478_s5] sm:$0xff] (!%p308_p9)  ;;  %v1286_v37 = vld [vmem:[%s2478_s5 + $0x8] sm:$0xff] (!%p308_p9)  ;;  %vm1455_vm4 = vcmask (!%p308_p9), 83968   ;;  %vm1453_vm5 = vcmask (!%p308_p9), 89088   ;;  %vm1255_vm6 = vcmask (!%p308_p9), 1043456   ;;  %vm1265_vm7 = vcmask (!%p308_p9), 0  }
  0x11   : > { %2044 = vmatprep.subr.bf16.mxu1 (!%p308_p9), %v2320_v3  ;;  %v2083_v38 = vpack.c.bf16 (!%p308_p9), %v1286_v37, %v1285_v36 }
  0x12   : > { %2046 = vmatpush3.bf16.msra.mxu1 (!%p308_p9), %v2320_v3 }
  0x13   : > { %1926 = vmatprep.subr.msk.mxu1 (!%p308_p9), %vm401_vm1, %v393_v27 }
  0x15   : > { %s2315_s25 = scalar_select %p360_p10, %s2279_s13, 1 }
  0x16   : > { %1927 = vmatpush3.msk.msra.mxu1 %vm401_vm1, %v393_v27 }
  0x17   : > { %s2095_s28 = smul.u32 24, %s2315_s25  ;;  %2052 = vmatprep.subr.bf16.mxu1 %v2320_v3  ;;  %s1841_s27 = sshll.u32 %s2315_s25, 4 }
  0x18   : > { %s377_s14 = scalar_lea.vmem %s2481_s8, %s1841_s27  ;;  %s382_s21 = scalar_lea.vmem %s2482_s9, %s1841_s27 }
  0x19   : > { %s364_s16 = scalar_lea.vmem %s2473_s0, %s2095_s28  ;;  %s369_s22 = scalar_lea.vmem %s2474_s1, %s2095_s28 }
  0x1a   : > { %v383_v4 = vld [vmem:[%s364_s16] sm:$0xff]  ;;  %v384_v5 = vld [vmem:[%s364_s16 + $0x8] sm:$0xff]  ;;  %v385_v7 = vld [vmem:[%s364_s16 + $0x10] sm:$0x3f]  ;;  %s372_s26 = scalar_lea.vmem %s2480_s7, %s2315_s25  ;;  %s1838_s27 = sshll.u32 %s2279_s13, 4 }
  0x1b   : > { %v2039_v6 = vpack.c.bf16 %v384_v5, %v383_v4  ;;  %v386_v8 = vld [vmem:[%s369_s22] sm:$0xff]  ;;  %v387_v9 = vld [vmem:[%s369_s22 + $0x8] sm:$0xff]  ;;  %v723_v12 = vmul.f32 %v383_v4, %v383_v4  ;;  %v724_v13 = vmul.f32 %v384_v5, %v384_v5  ;;  %v388_v14 = vld [vmem:[%s369_s22 + $0x10] sm:$0x3f]  ;;  %v725_v16 = vmul.f32 %v385_v7, %v385_v7  ;;  %s339_s22 = sand.u32 1, %s2197_s10   ;;  %s2431_s17 = scalar_lea.hbm %s2479_s6, %s1838_s27 }
  0x1c   : > { %v2047_v10 = vpack.c.bf16 %v387_v9, %v386_v8  ;;  %v885_v17 = vmul.f32 %v386_v8, %v386_v8  ;;  %v886_v18 = vmul.f32 %v387_v9, %v387_v9  ;;  %v887_v20 = vmul.f32 %v388_v14, %v388_v14  ;;  %s340_s28 = scalar_lea.vmem [#allocation2], %s339_s22  ;;  %s1616_s25 = scalar_lea.sflag [#allocation3], %s339_s22 }
  0x1d   : > { %2040 = vmatprep.subr.bf16.mxu0 %v2039_v6  ;;  %v2055_v15 = vpack.c.bf16 %v724_v13, %v723_v12  ;;  %v1047_v21 = vmul.f32 %v386_v8, %v383_v4  ;;  %v1048_v22 = vmul.f32 %v387_v9, %v384_v5  ;;  %v1049_v24 = vmul.f32 %v388_v14, %v385_v7  ;;  %s1641_s29 = sshll.u32 %s340_s28, 4  ;;  %s2207_s13 = smov [#allocation2]   ;;  %s2433_s29 = int_to_ptr.vmem [resolvable:$true] %s1641_s29 }
  0x1e   : > { %2042 = vmatpush3.bf16.msra.mxu0 %v2039_v6  ;;  %v2063_v19 = vpack.c.bf16 %v886_v18, %v885_v17  ;;  %s2147_s23 = sshll.u32 %s2207_s13, 4  ;;  %s2148_s23 = int_to_ptr.vmem [resolvable:$false] %s2147_s23 }
  0x1f   : > { %1917 = vmatprep.subr.msk.mxu0 %vm401_vm1, %v385_v7  ;;  %v2071_v23 = vpack.c.bf16 %v1048_v22, %v1047_v21  ;;  %s2149_s24 = scalar_lea.vmem %s2148_s23, 32  ;;  %p2150_p0 = scmp.lt.s32.totalorder %s2433_s29, %s2148_s23 }
  0x22   : > { %1918 = vmatpush3.msk.msra.mxu0 %vm401_vm1, %v385_v7 }
  0x23   : > { %1920 = vmatmul.mubr.msk.f32.vlgmr.msra.gmra.mrb[0].mxu0 %vm394_vm0, %v390_v11  ;;  %2048 = vmatprep.subr.bf16.mxu0 %v2047_v10 }
  0x24   : > { %2050 = vmatpush3.bf16.msra.mxu0 %v2047_v10  ;;  %1937 = vmatprep.mubr.msk.f32.mxu0 %vm394_vm0, %v389_v0 }
  0x25   : > { %1935 = vmatprep.subr.msk.mxu0 %vm401_vm1, %v388_v14 }
  0x28   : > { %1936 = vmatpush3.msk.msra.mxu0 %vm401_vm1, %v388_v14 }
  0x29   : > { %1938 = vmatmul.mubr.msk.f32.vlgmr.msra.gmra.mrb[2].mxu0 %vm394_vm0, %v390_v11  ;;  %2056 = vmatprep.subr.bf16.mxu0 %v2055_v15 }
  0x2a   : > { %2058 = vmatpush3.bf16.msra.mxu0 %v2055_v15  ;;  %1955 = vmatprep.mubr.msk.f32.mxu0 %vm394_vm0, %v389_v0 }
  0x2b   : > { %1953 = vmatprep.subr.msk.mxu0 %vm401_vm1, %v725_v16 }
  0x2e   : > { %1954 = vmatpush3.msk.msra.mxu0 %vm401_vm1, %v725_v16 }
  0x2f   : > { %1956 = vmatmul.mubr.msk.f32.vlgmr.msra.gmra.mrb[4].mxu0 %vm394_vm0, %v390_v11  ;;  %2064 = vmatprep.subr.bf16.mxu0 %v2063_v19 }
  0x30   : > { %2066 = vmatpush3.bf16.msra.mxu0 %v2063_v19  ;;  %1973 = vmatprep.mubr.msk.f32.mxu0 %vm394_vm0, %v389_v0 }
  0x31   : > { %1971 = vmatprep.subr.msk.mxu0 %vm401_vm1, %v887_v20 }
  0x34   : > { %1972 = vmatpush3.msk.msra.mxu0 %vm401_vm1, %v887_v20 }
  0x35   : > { %1974 = vmatmul.mubr.msk.f32.vlgmr.msra.gmra.mrb[6].mxu0 %vm394_vm0, %v390_v11  ;;  %2072 = vmatprep.subr.bf16.mxu0 %v2071_v23 }
  0x36   : > { %2074 = vmatpush3.bf16.msra.mxu0 %v2071_v23  ;;  %1991 = vmatprep.mubr.msk.f32.mxu0 %vm394_vm0, %v389_v0 }
  0x37   : > { %1989 = vmatprep.subr.msk.mxu0 %vm401_vm1, %v1049_v24 }
  0x3a   : > { %1990 = vmatpush3.msk.msra.mxu0 %vm401_vm1, %v1049_v24 }
  0x3b   : > { %1992 = vmatmul.mubr.msk.f32.vlgmr.msra.gmra.mrb[8].mxu0 %vm394_vm0, %v390_v11  ;;  %2080 = vmatprep.subr.bf16.mxu0 %v2039_v6 }
  0x3c   : > { %2082 = vmatpush3.bf16.msra.mxu0 %v2039_v6  ;;  %2009 = vmatprep.mubr.msk.f32.mxu0 %vm394_vm0, %v1283_v25 }
  0x3d   : > { %2007 = vmatprep.subr.msk.mxu0 %vm401_vm1, %v385_v7 }
  0x40   : > { %2008 = vmatpush3.msk.msra.mxu0 %vm401_vm1, %v385_v7 }
  0x41   : > { %2010 = vmatmul.mubr.msk.f32.vlgmr.msra.gmra.mrb[10].mxu0 %vm394_vm0, %v1284_v26  ;;  %2088 = vmatprep.subr.bf16.mxu0 %v2047_v10 }
  0x42   : > { %2090 = vmatpush3.bf16.msra.mxu0 %v2047_v10  ;;  %2027 = vmatprep.mubr.msk.f32.mxu0 %vm394_vm0, %v1283_v25 }
  0x43   : > { %2025 = vmatprep.subr.msk.mxu0 %vm401_vm1, %v388_v14 }
  0x46   : > { %2026 = vmatpush3.msk.msra.mxu0 %vm401_vm1, %v388_v14 }
  0x47   : > { %2028 = vmatmul.mubr.msk.f32.vlgmr.msra.gmra.mrb[12].mxu0 %vm394_vm0, %v1284_v26 }
  0xf6   : > { %v1921_v28 = vpop.f32.mrb[0].mxu0 }
  0xf7   : > { %v471_v29 = vpop.f32.mrb[1].mxu0 }
  0xf8   : > { %1928 = vmatprep.mubr.msk.f32.mxu1 %vm394_vm0, %v471_v29 }
  0xf9   : > { %1929 = vmatmul.mubr.msk.f32.vlgmr.msra.gmra.mrb[0].mxu1 %vm394_vm0, %v1921_v28 }
  0xfa   : > { %2054 = vmatpush3.bf16.msra.mxu1 %v2320_v3 }
  0xfb   : > { %1944 = vmatprep.subr.msk.mxu1 %vm401_vm1, %v393_v27 }
  0xfc   : > { %v1939_v30 = vpop.f32.mrb[2].mxu0 }
  0xfd   : > { %v633_v31 = vpop.f32.mrb[3].mxu0 }
  0xfe   : > { %1945 = vmatpush3.msk.msra.mxu1 %vm401_vm1, %v393_v27  ;;  %1946 = vmatprep.mubr.msk.f32.mxu1 %vm394_vm0, %v633_v31 }
  0xff   : > { %1947 = vmatmul.mubr.msk.f32.vlgmr.msra.gmra.mrb[2].mxu1 %vm394_vm0, %v1939_v30  ;;  %2060 = vmatprep.subr.bf16.mxu1 %v2320_v3 }
 0x100   : > { %2062 = vmatpush3.bf16.msra.mxu1 %v2320_v3 }
 0x101   : > { %1962 = vmatprep.subr.msk.mxu1 %vm401_vm1, %v393_v27 }
 0x102   : > { %v1957_v32 = vpop.f32.mrb[4].mxu0 }
 0x103   : > { %v795_v33 = vpop.f32.mrb[5].mxu0 }
 0x104   : > { %1963 = vmatpush3.msk.msra.mxu1 %vm401_vm1, %v393_v27  ;;  %1964 = vmatprep.mubr.msk.f32.mxu1 %vm394_vm0, %v795_v33 }
 0x105   : > { %1965 = vmatmul.mubr.msk.f32.vlgmr.msra.gmra.mrb[4].mxu1 %vm394_vm0, %v1957_v32  ;;  %2068 = vmatprep.subr.bf16.mxu1 %v2320_v3 }
 0x106   : > { %2070 = vmatpush3.bf16.msra.mxu1 %v2320_v3 }
 0x107   : > { %1980 = vmatprep.subr.msk.mxu1 %vm401_vm1, %v393_v27 }
 0x108   : > { %v1975_v34 = vpop.f32.mrb[6].mxu0 }
 0x109   : > { %v957_v35 = vpop.f32.mrb[7].mxu0 }
 0x10a   : > { %1981 = vmatpush3.msk.msra.mxu1 %vm401_vm1, %v393_v27  ;;  %1982 = vmatprep.mubr.msk.f32.mxu1 %vm394_vm0, %v957_v35 }
 0x10b   : > { %1983 = vmatmul.mubr.msk.f32.vlgmr.msra.gmra.mrb[6].mxu1 %vm394_vm0, %v1975_v34  ;;  %2076 = vmatprep.subr.bf16.mxu1 %v2320_v3 }
 0x10c   : > { %2078 = vmatpush3.bf16.msra.mxu1 %v2320_v3 }
 0x10d   : > { %1998 = vmatprep.subr.msk.mxu1 %vm401_vm1, %v393_v27 }
 0x10e   : > { %v1993_v39 = vpop.f32.mrb[8].mxu0 }
 0x10f   : > { %v1119_v40 = vpop.f32.mrb[9].mxu0 }
 0x110   : > { %1999 = vmatpush3.msk.msra.mxu1 %vm401_vm1, %v393_v27  ;;  %2000 = vmatprep.mubr.msk.f32.mxu1 %vm394_vm0, %v1119_v40 }
 0x111   : > { %2001 = vmatmul.mubr.msk.f32.vlgmr.msra.gmra.mrb[8].mxu1 %vm394_vm0, %v1993_v39  ;;  %2084 = vmatprep.subr.bf16.mxu1 %v2083_v38 }
 0x112   : > { %2086 = vmatpush3.bf16.msra.mxu1 %v2083_v38 }
 0x113   : > { %2016 = vmatprep.subr.msk.mxu1 %vm401_vm1, %v1287_v41 }
 0x114   : > { %v2011_v42 = vpop.f32.mrb[10].mxu0 }
 0x115   : > { %v1360_v43 = vpop.f32.mrb[11].mxu0 }
 0x116   : > { %2017 = vmatpush3.msk.msra.mxu1 %vm401_vm1, %v1287_v41  ;;  %2018 = vmatprep.mubr.msk.f32.mxu1 %vm394_vm0, %v1360_v43 }
 0x117   : > { %2019 = vmatmul.mubr.msk.f32.vlgmr.msra.gmra.mrb[10].mxu1 %vm394_vm0, %v2011_v42  ;;  %2092 = vmatprep.subr.bf16.mxu1 %v2083_v38 }
 0x118   : > { %2094 = vmatpush3.bf16.msra.mxu1 %v2083_v38 }
 0x119   : > { %2034 = vmatprep.subr.msk.mxu1 %vm401_vm1, %v1287_v41 }
 0x11a   : > { %v2029_v44 = vpop.f32.mrb[12].mxu0 }
 0x11b   : > { %v1523_v45 = vpop.f32.mrb[13].mxu0 }
 0x11c   : > { %2035 = vmatpush3.msk.msra.mxu1 %vm401_vm1, %v1287_v41  ;;  %2036 = vmatprep.mubr.msk.f32.mxu1 %vm394_vm0, %v1523_v45 }
 0x11d   : > { %2037 = vmatmul.mubr.msk.f32.vlgmr.msra.gmra.mrb[12].mxu1 %vm394_vm0, %v2029_v44 }
 0x1cc   : > { %v1930_v46 = vpop.f32.mrb[0].mxu1 }
 0x1cd   : > { %v555_v47 = vpop.f32.mrb[1].mxu1  ;;  %v1210_v49 = vmul.f32 %v1930_v46, %v1930_v46 }
 0x1ce   : > { %v1209_v53 = vmul.f32 %v555_v47, %v555_v47 }
 0x1d2   : > { %v1948_v48 = vpop.f32.mrb[2].mxu1 }
 0x1d3   : > { %v1212_v50 = vmul.f32 %v1948_v48, %v1948_v48  ;;  %v1214_v51 = vmul.f32 %v1948_v48, %v1930_v46  ;;  %v714_v52 = vpop.f32.mrb[3].mxu1 }
 0x1d4   : > { %v1211_v54 = vmul.f32 %v714_v52, %v714_v52  ;;  %v1213_v55 = vmul.f32 %v714_v52, %v555_v47 }
 0x1d5   : > { %v1238_v56 = vadd.f32 %v1212_v50, %v1210_v49  ;;  %v1234_v0 = vmul.f32 2.0, %v1214_v51 }
 0x1d6   : > { %v1237_v57 = vadd.f32 %v1211_v54, %v1209_v53  ;;  %v1233_v2 = vmul.f32 2.0, %v1213_v55 }
 0x1d7   : > { %v1240_v58 = vadd.f32 6.5025, %v1238_v56  ;;  %v1236_v7 = vadd.f32 6.5025, %v1234_v0 }
 0x1d8   : > { %v1239_v59 = vadd.f32 6.5025, %v1237_v57  ;;  %v1966_v60 = vpop.f32.mrb[4].mxu1  ;;  %v1235_v10 = vadd.f32 6.5025, %v1233_v2 }
 0x1d9   : > { %2135 = vrcp.f32 %v1240_v58  ;;  %v1216_v61 = vsub.f32 %v1966_v60, %v1210_v49  ;;  %v876_v62 = vpop.f32.mrb[5].mxu1 }
 0x1da   : > { %2137 = vrcp.f32 %v1239_v59  ;;  %v1215_v63 = vsub.f32 %v876_v62, %v1209_v53 }
 0x1de   : > { %v1984_v1 = vpop.f32.mrb[6].mxu1 }
 0x1df   : > { %v1218_v3 = vsub.f32 %v1984_v1, %v1212_v50  ;;  %v1038_v4 = vpop.f32.mrb[7].mxu1 }
 0x1e0   : > { %v1217_v5 = vsub.f32 %v1038_v4, %v1211_v54 }
 0x1e1   : > { %v1226_v6 = vadd.f32 %v1218_v3, %v1216_v61 }
 0x1e2   : > { %v1225_v8 = vadd.f32 %v1217_v5, %v1215_v63 }
 0x1e3   : > { %v2136_v9 = vpop.eup %2135  ;;  %v1228_v11 = vadd.f32 58.5225, %v1226_v6 }
 0x1e4   : > { %v2138_v12 = vpop.eup %2137  ;;  %v1227_v13 = vadd.f32 58.5225, %v1225_v8  ;;  %v2002_v14 = vpop.f32.mrb[8].mxu1  ;;  %v1244_v15 = vmul.f32 %v2136_v9, %v1236_v7 }
 0x1e5   : > { %2139 = vrcp.f32 %v1228_v11  ;;  %v1220_v16 = vsub.f32 %v2002_v14, %v1214_v51  ;;  %v1200_v17 = vpop.f32.mrb[9].mxu1  ;;  %v1242_v18 = vmul.f32 %v2138_v12, %v1235_v10 }
 0x1e6   : > { %2141 = vrcp.f32 %v1227_v13  ;;  %v1219_v19 = vsub.f32 %v1200_v17, %v1213_v55 }
 0x1e7   : > { %v1222_v20 = vmul.f32 2.0, %v1220_v16 }
 0x1e8   : > { %v1221_v21 = vmul.f32 2.0, %v1219_v19 }
 0x1e9   : > { %v1224_v22 = vadd.f32 58.5225, %v1222_v20 }
 0x1ea   : > { %v1223_v24 = vadd.f32 58.5225, %v1221_v21  ;;  %v2020_v34 = vpop.f32.mrb[10].mxu1 }
 0x1eb   : > { %v1444_v35 = vpop.f32.mrb[11].mxu1  ;;  %1456 = vst.msk [vmem:[%s377_s14 + $0x8] sm:$0x7] %vm1455_vm4, %v2020_v34 }
 0x1ec   : > { %1454 = vst.msk [vmem:[%s377_s14] sm:$0xff] %vm1453_vm5, %v1444_v35 }
 0x1ef   : > { %v2140_v23 = vpop.eup %2139 }
 0x1f0   : > { %v2142_v25 = vpop.eup %2141  ;;  %v1232_v26 = vmul.f32 %v2140_v23, %v1224_v22  ;;  %v2038_v36 = vpop.f32.mrb[12].mxu1 }
 0x1f1   : > { %v1230_v27 = vmul.f32 %v2142_v25, %v1223_v24  ;;  %v1604_v37 = vpop.f32.mrb[13].mxu1  ;;  %1614 = vst.msk [vmem:[%s382_s21 + $0x8] sm:$0x7] %vm1455_vm4, %v2038_v36 }
 0x1f2   : > { %v1270_v28 = vsel %vm1251_vm2, %v1232_v26, 0.0  ;;  %v1246_v29 = vmul.f32 %v1244_v15, %v1232_v26  ;;  %1613 = vst.msk [vmem:[%s382_s21] sm:$0xff] %vm1453_vm5, %v1604_v37  ;;  %s2143_s21 = scalar_lea.vmem %s2433_s29, 16 }
 0x1f3   : > { %1271 = vadd.xlane.f32.xlu1 %v1270_v28  ;;  %v1245_v30 = vmul.f32 %v1242_v18, %v1230_v27  ;;  %v1267_v32 = vsel %vm1247_vm3, %v1230_v27, 0.0  ;;  %p2144_p11 = scmp.ne.s32.totalorder %s2433_s29, %s2143_s21  ;;  %p2151_p1 = scmp.lt.s32.totalorder %s2149_s24, %s2143_s21 }
 0x1f4   : > { %v1252_v31 = vsel %vm1251_vm2, %v1246_v29, 0.0 }
 0x1f5   : > { %1253 = vadd.xlane.f32.xlu0 %v1252_v31  ;;  %v1248_v33 = vsel %vm1247_vm3, %v1245_v30, 0.0  ;;  %p2145_p12 = pnand %p2144_p11, %p2296_p5  ;;  %p2152_p2 = por %p2151_p1, %p2150_p0 }
 0x1f7   : > { %1268 = vadd.xlane.f32.xlu1 %v1267_v32  ;;  %p2146_p13 = pneg %p2145_p12 }
 0x1f9   : > { %1249 = vadd.xlane.f32.xlu0 %v1248_v33  ;;  %p2153_p3 = pnand %p2152_p2, %p2146_p13 }
 0x280   : > { %v1272_v38 = vpop.xlane.xlu1 %1271 }
 0x281   : > { %v1273_v40 = vsel %vm1255_vm6, %v1272_v38, 0.0 }
 0x282   : > { %v1254_v39 = vpop.xlane.xlu0 %1253 }
 0x283   : > { %v1256_v43 = vsel %vm1255_vm6, %v1254_v39, 0.0 }
 0x284   : > { %v1269_v41 = vpop.xlane.xlu1 %1268 }
 0x285   : > { %v1274_v42 = vadd.f32 %v1273_v40, %v1269_v41 }
 0x286   : > { %v1250_v44 = vpop.xlane.xlu0 %1249 }
 0x287   : > { %v1275_v45 = vrot.slane %v1274_v42, 4  ;;  %v1257_v46 = vadd.f32 %v1256_v43, %v1250_v44 }
 0x289   : > { %v1276_v47 = vadd.f32 %v1275_v45, %v1274_v42  ;;  %v1258_v48 = vrot.slane %v1257_v46, 4 }
 0x28b   : > { %v1277_v49 = vrot.slane %v1276_v47, 2  ;;  %v1259_v50 = vadd.f32 %v1258_v48, %v1257_v46 }
 0x28d   : > { %v1278_v51 = vadd.f32 %v1277_v49, %v1276_v47  ;;  %v1260_v52 = vrot.slane %v1259_v50, 2 }
 0x28f   : > { %v1279_v53 = vrot.slane %v1278_v51, 1  ;;  %v1261_v54 = vadd.f32 %v1260_v52, %v1259_v50 }
 0x291   : > { %v1280_v55 = vadd.f32 %v1279_v53, %v1278_v51  ;;  %v1262_v56 = vrot.slane %v1261_v54, 1 }
 0x293   : > { %v1281_v57 = vmul.f32 0.0069444445, %v1280_v55  ;;  %v1263_v58 = vadd.f32 %v1262_v56, %v1261_v54 }
 0x295   : > { %v1264_v59 = vmul.f32 0.0069444445, %v1263_v58  ;;  %1282 = vst.msk [vmem:[%s372_s26] sm:$0x1] %vm1265_vm7, %v1281_v57 }
 0x297   : > { %1266 = vst.msk [vmem:[%s340_s28] sm:$0x1] %vm1265_vm7, %v1264_v59 }
 0x298   : > { %2156 = shalt.err (!%p2153_p3)
}
 0x299   : > { %s2157_s22 = scalar_lea.hbm %s2431_s17, 16  ;;  %s2161_s28 = scalar_lea.hbm %s2479_s6, 32 }
 0x29a   : > { %p2158_p4 = scmp.ne.s32.totalorder %s2431_s17, %s2157_s22  ;;  %p2162_p9 = scmp.lt.u32.totalorder %s2431_s17, %s2479_s6 }
 0x29b   : > { %p2163_p10 = scmp.lt.u32.totalorder %s2161_s28, %s2157_s22  ;;  %p2165_p12 = scmp.lt.u32.totalorder %s2157_s22, %s2431_s17 }
 0x29c   : > { %p2159_p7 = pnand %p2158_p4, %p2296_p5 }
 0x29d   : > { %p2164_p11 = por %p2163_p10, %p2162_p9 }
 0x29e   : > { %p2160_p8 = pneg %p2159_p7 }
 0x29f   : > { %p2166_p13 = por %p2165_p12, %p2164_p11 }
 0x2a1   : > { %p2167_p0 = pnand %p2166_p13, %p2160_p8 }
 0x2a3   : > { %2170 = shalt.err (!%p2167_p0)
}
 0x2a4   : > { %2096 = dma.vmem_to_hbm [thread:$0]  (%p2296_p5), %s2433_s29, 16, %s2431_s17, %s1616_s25  }
 0x2a5 PF: > { %p2102_p1 = scmp.ge.s32.totalorder %s2205_s12, 2  ;;  %s1662_s21 = sand.u32 1, %s2193_s30  }
 0x2a6   : > { %s1663_s13 = scalar_lea.sflag [#allocation3], %s1662_s21 }
 0x2a7   : > { %p2099_p2 = pnand %p2102_p1, %p2300_p6 }
 0x2a9   : > { %2188 = dma.done.wait (!%p2099_p2), %s1663_s13, 16  }
 0x2aa   : > { %2190 = vsyncadd (!%p2099_p2), %s1663_s13, 4294967280  ;;  %p20_p3 = scmp.ge.s32.totalorder %s2283_s15, 4   ;;  %s2485_s30 = smov %s2197_s10 }
 0x2ab   : > { %s2486_s10 = smov %s2201_s11  ;;  %s2487_s11 = smov %s2294_s18 }
 0x2ac   : > { %s2488_s12 = smov %s2283_s15  ;;  %22 = sbr.rel (!%p20_p3) target bundleno = 3 (0x3), region = 118 }
 0x2b3   :  { %1689 = vsyncpa [#allocation3], 1 }
 0x2b4   :  { %1691 = vsyncpa [#allocation3 + $0x1], 1 }

// kernel: ms_ssim_loss.7
= control target key start
LH: loop header
LB: loop body
LE: loop exit
PB: predicated region body
PF: predicated region fallthrough
CT: control target
= control target key end

     0   :  { %15 = vsyncpa [#allocation3], 0  ;;  %s3716_s0 = inlined_call_operand.vmem [shape: f32[2,44,44], index: 0, kind: input, shape index: {}]   ;;  %s3717_s1 = inlined_call_operand.vmem [shape: f32[2,44,44], index: 1, kind: input, shape index: {}]   ;;  %s3718_s2 = inlined_call_operand.vmem [shape: f32[34,44], index: 2, kind: input, shape index: {}]   ;;  %s3719_s3 = inlined_call_operand.vmem [shape: f32[44,34], index: 3, kind: input, shape index: {}]   ;;  %s3720_s4 = inlined_call_operand.vmem [shape: f32[22,44], index: 4, kind: input, shape index: {}]   ;;  %s3721_s5 = inlined_call_operand.vmem [shape: f32[44,22], index: 5, kind: input, shape index: {}]   ;;  %s3722_s6 = inlined_call_operand.hbm [shape: f32[2,1,1], index: 6, kind: output, shape index: {0}]   ;;  %s3723_s7 = inlined_call_operand.vmem [shape: f32[2,1,1], index: 7, kind: output, shape index: {1}]   ;;  %s3724_s8 = inlined_call_operand.vmem [shape: f32[2,22,22], index: 8, kind: output, shape index: {2}]   ;;  %s3725_s9 = inlined_call_operand.vmem [shape: f32[2,22,22], index: 9, kind: output, shape index: {3}]  }
   0x1   :  { %17 = vsyncpa [#allocation3 + $0x1], 0  ;;  %s3038_s30 = smov 0   ;;  %s3040_s10 = smov 0  }
   0x2   :  { %s3042_s11 = smov 0   ;;  %s3044_s12 = smov 0  }
   0x3 LB: > { %s3059_s13 = sadd.s32 4294967295, %s2981_s12   ;;  %s2127_s14 = sadd.s32 4294967294, %s2981_s12   ;;  %s2981_s12 = sphi %s3044_s12, %s3735_s12   ;;  %s2977_s11 = sphi %s3042_s11, %s3734_s11   ;;  %s2973_s10 = sphi %s3040_s10, %s3733_s10   ;;  %s2969_s30 = sphi %s3038_s30, %s3732_s30  }
   0x4   : > { %s3063_s15 = sadd.s32 1, %s2981_s12   ;;  %s166_s16 = sadd.s32 1, %s2977_s11 }
   0x5   : > { %s163_s17 = ssub.s32 %s2981_s12, %s3063_s15  ;;  %p176_p0 = scmp.ne.s32.totalorder %s2977_s11, %s2973_s10 }
   0x6   : > { %p164_p1 = scmp.eq.s32.totalorder %s163_s17, 0  ;;  %p177_p2 = scmp.eq.s32.totalorder %s3059_s13, 1 }
   0x7   : > { %p182_p3 = scmp.ne.s32.totalorder %s2973_s10, %s2969_s30  ;;  %p183_p4 = scmp.eq.s32.totalorder %s2127_s14, 1 }
   0x8   : > { %s3074_s18 = scalar_select %p164_p1, %s2977_s11, %s166_s16  }
   0x9   : > { %p3076_p5 = por %p177_p2, %p176_p0  ;;  %p3080_p6 = por %p183_p4, %p182_p3 }
   0xa   : > { %3726 = sst [smem:[#allocation5_spill]] %s3074_s18  ;;  %p2130_p7 = scmp.ge.s32.totalorder %s2981_s12, 1 }
   0xb   : > { %p307_p8 = scmp.lt.s32.totalorder %s2981_s12, 3 }
   0xd   : > { %p308_p9 = pnand %p2130_p7, %p307_p8 }
   0xe   : > { %p360_p10 = scmp.lt.s32.totalorder (!%p308_p9), %s3059_s13, 1  ;;  %v2983_v0 = vmov (!%p308_p9), 0.0|0.0   ;;  %vm2984_vm0 = vmmov (!%p308_p9), 0   ;;  %v2985_v1 = vmov (!%p308_p9), 0.0   ;;  %v400_v2 = vld [vmem:[%s3719_s3] sm:$0xff] (!%p308_p9)  ;;  %v401_v3 = vld [vmem:[%s3719_s3 + $0x8] sm:$0xff] (!%p308_p9) }
   0xf   : > { %311 = sbr.rel (%p308_p9) target bundleno = 747 (0x2eb), region = 44  ;;  %2714 = vmatprep.subr.bf16.mxu0 (!%p308_p9), %v2983_v0  ;;  %2724 = vmatprep.subr.bf16.mxu1 (!%p308_p9), %v2983_v0  ;;  %v3103_v4 = vpack.c.bf16 (!%p308_p9), %v401_v3, %v400_v2  ;;  %v402_v5 = vld [vmem:[%s3719_s3 + $0x10] sm:$0xff] (!%p308_p9)  ;;  %v403_v6 = vld [vmem:[%s3719_s3 + $0x18] sm:$0xff] (!%p308_p9)  ;;  %v404_v10 = vld [vmem:[%s3719_s3 + $0x20] sm:$0xff] (!%p308_p9)  ;;  %vm422_vm1 = vcmask (!%p308_p9), 1043456   ;;  %vm2986_vm2 = vmmov (!%p308_p9), 1  }
  0x10   : > { %2372 = vmatprep.mubr.msk.f32.mxu0 (!%p308_p9), %vm2984_vm0, %v2985_v1  ;;  %2399 = vmatprep.mubr.msk.f32.mxu1 (!%p308_p9), %vm2984_vm0, %v2985_v1  ;;  %v405_v11 = vld [vmem:[%s3719_s3 + $0x28] sm:$0xf] (!%p308_p9)  ;;  %v3137_v16 = vpack.c.bf16 (!%p308_p9), %v403_v6, %v402_v5  ;;  %vm3181_vm3 = vmpackc.low (!%p308_p9), %vm422_vm1, %vm2986_vm2  ;;  %v3199_v36 = vld [vmem:[%s3718_s2] sm:$0xff] (!%p308_p9)  ;;  %vm406_vm4 = vcmask (!%p308_p9), 359424   ;;  %vm1529_vm5 = vcmask (!%p308_p9), 277504   ;;  %vm1542_vm6 = vcmask (!%p308_p9), 271360  }
  0x11   : > { %2726 = vmatpush3.bf16.msra.mxu1 (!%p308_p9), %v3103_v4  ;;  %v3172_v30 = vpack.c.bf16 (!%p308_p9), %v405_v11, %v404_v10  ;;  %v3214_v38 = vld [vmem:[%s3718_s2 + $0x8] sm:$0xff] (!%p308_p9)  ;;  %v3228_v40 = vld [vmem:[%s3718_s2 + $0x10] sm:$0xff] (!%p308_p9)  ;;  %v3243_v42 = vld [vmem:[%s3718_s2 + $0x18] sm:$0xff] (!%p308_p9)  ;;  %vm1779_vm7 = vcmask (!%p308_p9), 179200   ;;  %vm1782_vm8 = vcmask (!%p308_p9), 177152   ;;  %vm1549_vm9 = vcmask (!%p308_p9), 1041408  }
  0x12   : > { %2727 = vmatprep.subr.bf16.mxu1 (!%p308_p9), %v2983_v0  ;;  %v3260_v45 = vld [vmem:[%s3718_s2 + $0x20] sm:$0x3] (!%p308_p9)  ;;  %v1590_v63 = vld [vmem:[%s3720_s4 + $0x8] sm:$0xff] (!%p308_p9)  ;;  %v1591_v2 = vld [vmem:[%s3720_s4 + $0x10] sm:$0x3f] (!%p308_p9)  ;;  %s339_s29 = sand.u32 (!%p308_p9), 1, %s2973_s10  }
  0x13   : > { %v1589_v62 = vld [vmem:[%s3720_s4] sm:$0xff] (!%p308_p9)  ;;  %s2211_s18 = sshll.u32 (!%p308_p9), %s3059_s13, 4  ;;  %vm1559_vm10 = vcmask (!%p308_p9), 0   ;;  %s1957_s25 = scalar_lea.sflag (!%p308_p9), [#allocation3], %s339_s29 }
  0x15   : > { %2729 = vmatpush3.bf16.msra.mxu1 (!%p308_p9), %v3137_v16 }
  0x16   : > { %s3090_s21 = scalar_select %p360_p10, %s3059_s13, 1  ;;  %2730 = vmatprep.subr.bf16.mxu1 %v2983_v0 }
  0x18   : > { %s2854_s26 = smul.u32 48, %s3090_s21 }
  0x19   : > { %2733 = vmatpush3.bf16.msk.msra.mxu1 %vm3181_vm3, %v3172_v30  ;;  %s2855_s17 = smul.u32 24, %s3090_s21 }
  0x1a   : > { %s364_s22 = scalar_lea.vmem %s3716_s0, %s2854_s26  ;;  %s369_s24 = scalar_lea.vmem %s3717_s1, %s2854_s26  ;;  %2744 = vmatprep.subr.bf16.mxu1 %v2983_v0 }
  0x1b   : > { %v3118_v7 = vld [vmem:[%s364_s22] sm:$0xff]  ;;  %v3120_v8 = vld [vmem:[%s364_s22 + $0x8] sm:$0xff]  ;;  %v385_v14 = vld [vmem:[%s364_s22 + $0x10] sm:$0xff]  ;;  %s382_s28 = scalar_lea.vmem %s3725_s9, %s2855_s17  ;;  %s340_s26 = scalar_lea.vmem [#allocation2], %s339_s29 }
  0x1c   : > { %v3122_v9 = vld [vmem:[%s369_s24] sm:$0xff]  ;;  %v3131_v12 = vld [vmem:[%s369_s24 + $0x8] sm:$0xff]  ;;  %v3135_v13 = vpack.c.bf16 %v3120_v8, %v3118_v7  ;;  %v386_v15 = vld [vmem:[%s364_s22 + $0x18] sm:$0xff]  ;;  %v822_v43 = vmul.f32 %v3118_v7, %v3118_v7  ;;  %v823_v44 = vmul.f32 %v3120_v8, %v3120_v8  ;;  %v824_v46 = vmul.f32 %v385_v14, %v385_v14  ;;  %s1982_s14 = sshll.u32 %s340_s26, 4  ;;  %s3665_s14 = int_to_ptr.vmem [resolvable:$true] %s1982_s14 }
  0x1d   : > { %v3139_v17 = vld [vmem:[%s369_s24 + $0x10] sm:$0xff]  ;;  %v3141_v18 = vld [vmem:[%s369_s24 + $0x18] sm:$0xff]  ;;  %v387_v19 = vld [vmem:[%s364_s22 + $0x20] sm:$0xff]  ;;  %v3146_v20 = vmul.f32 %v3122_v9, %v3118_v7  ;;  %v3150_v21 = vmul.f32 %v3131_v12, %v3120_v8  ;;  %v3152_v22 = vpack.c.bf16 %v386_v15, %v385_v14  ;;  %v3203_v37 = vpack.c.bf16 %v3131_v12, %v3122_v9  ;;  %s2919_s27 = scalar_lea.vmem %s3665_s14, 16 }
  0x1e   : > { %2716 = vmatpush3.bf16.msra.mxu0 %v3135_v13  ;;  %v388_v23 = vld [vmem:[%s364_s22 + $0x28] sm:$0xf]  ;;  %v3154_v24 = vld [vmem:[%s369_s24 + $0x20] sm:$0xff]  ;;  %v3160_v26 = vmul.f32 %v3139_v17, %v385_v14  ;;  %v3163_v27 = vmul.f32 %v3141_v18, %v386_v15  ;;  %v3218_v39 = vpack.c.bf16 %v3141_v18, %v3139_v17  ;;  %v825_v47 = vmul.f32 %v386_v15, %v386_v15  ;;  %s3663_s22 = scalar_lea.hbm %s3722_s6, %s2211_s18  ;;  %p2920_p11 = scmp.ne.s32.totalorder %s3665_s14, %s2919_s27 }
  0x1f   : > { %v3156_v25 = vld [vmem:[%s369_s24 + $0x28] sm:$0xf]  ;;  %2717 = vmatprep.subr.bf16.mxu0 %v2983_v0  ;;  %v3166_v28 = vmul.f32 %v3154_v24, %v387_v19  ;;  %v3176_v31 = vpack.c.bf16 %v388_v23, %v387_v19  ;;  %v2795_v32 = vpack.c.bf16 %v3150_v21, %v3146_v20  ;;  %v2755_v48 = vpack.c.bf16 %v823_v44, %v822_v43  ;;  %s377_s24 = scalar_lea.vmem %s3724_s8, %s2855_s17 }
  0x20   : > { %v3169_v29 = vmul.f32 %v3156_v25, %v388_v23  ;;  %v2798_v34 = vpack.c.bf16 %v3163_v27, %v3160_v26  ;;  %v3233_v41 = vpack.c.bf16 %v3156_v25, %v3154_v24  ;;  %v826_v49 = vmul.f32 %v387_v19, %v387_v19  ;;  %p2921_p12 = pnand %p2920_p11, %p3076_p5 }
  0x21   : > { %v827_v50 = vmul.f32 %v388_v23, %v388_v23  ;;  %v2758_v51 = vpack.c.bf16 %v825_v47, %v824_v46  ;;  %v1026_v53 = vmul.f32 %v3122_v9, %v3122_v9  ;;  %v1027_v54 = vmul.f32 %v3131_v12, %v3131_v12 }
  0x22   : > { %2719 = vmatpush3.bf16.msra.mxu0 %v3152_v22  ;;  %v2801_v35 = vpack.c.bf16 %v3169_v29, %v3166_v28  ;;  %v1028_v56 = vmul.f32 %v3139_v17, %v3139_v17  ;;  %v1029_v57 = vmul.f32 %v3141_v18, %v3141_v18  ;;  %v1030_v59 = vmul.f32 %v3154_v24, %v3154_v24  ;;  %p2922_p13 = pneg %p2921_p12 }
  0x23   : > { %2720 = vmatprep.subr.bf16.mxu0 %v2983_v0  ;;  %v2761_v52 = vpack.c.bf16 %v827_v50, %v826_v49  ;;  %v2775_v55 = vpack.c.bf16 %v1027_v54, %v1026_v53  ;;  %v1031_v60 = vmul.f32 %v3156_v25, %v3156_v25  ;;  %v1592_v54 = vld [vmem:[%s3721_s5] sm:$0xff] }
  0x24   : > { %v2778_v58 = vpack.c.bf16 %v1029_v57, %v1028_v56  ;;  %v1594_v57 = vld [vmem:[%s3721_s5 + $0x10] sm:$0xff] }
  0x25   : > { %v2781_v61 = vpack.c.bf16 %v1031_v60, %v1030_v59  ;;  %v1596_v60 = vld [vmem:[%s3721_s5 + $0x20] sm:$0xff] }
  0x26   : > { %2723 = vmatpush3.bf16.msk.msra.mxu0 %vm3181_vm3, %v3176_v31 }
  0x27   : > { %2734 = vmatprep.subr.bf16.mxu0 %v2983_v0 }
  0x29   : > { %2373 = vmatmul.mubr.msk.f32.vlgmr.msra.gmra.mrb[0].mxu0 %vm406_vm4, %v3199_v36 }
  0x2a   : > { %2736 = vmatpush3.bf16.msra.mxu0 %v3203_v37  ;;  %2375 = vmatprep.mubr.msk.f32.mxu0 %vm2984_vm0, %v2985_v1 }
  0x2b   : > { %2737 = vmatprep.subr.bf16.mxu0 %v2983_v0 }
  0x2d   : > { %2376 = vmatmul.mubr.msk.f32.gmra.mrb[2].mxu0 %vm406_vm4, %v3214_v38 }
  0x2e   : > { %2378 = vmatprep.mubr.msk.f32.mxu0 %vm2984_vm0, %v2985_v1  ;;  %2739 = vmatpush3.bf16.msra.mxu0 %v3218_v39 }
  0x2f   : > { %2740 = vmatprep.subr.bf16.mxu0 %v2983_v0 }
  0x31   : > { %2379 = vmatmul.mubr.msk.f32.gmra.mrb[4].mxu0 %vm406_vm4, %v3228_v40 }
  0x32   : > { %2381 = vmatprep.mubr.msk.f32.mxu0 %vm2984_vm0, %v2985_v1  ;;  %2743 = vmatpush3.bf16.msk.msra.mxu0 %vm3181_vm3, %v3233_v41 }
  0x33   : > { %2754 = vmatprep.subr.bf16.mxu0 %v2983_v0 }
  0x35   : > { %2382 = vmatmul.mubr.msk.f32.gmra.mrb[6].mxu0 %vm406_vm4, %v3243_v42 }
  0x36   : > { %2384 = vmatprep.mubr.msk.f32.mxu0 %vm2984_vm0, %v2985_v1 }
  0x39   : > { %2385 = vmatmul.mubr.msk.f32.gmra.mrb[8].mxu0 %vm406_vm4, %v3260_v45 }
  0x3a   : > { %2426 = vmatprep.mubr.msk.f32.mxu0 %vm2984_vm0, %v2985_v1 }
  0x3d   : > { %2427 = vmatmul.mubr.msk.f32.vlgmr.msra.gmra.mrb[10].mxu0 %vm406_vm4, %v3199_v36 }
  0x3e   : > { %2756 = vmatpush3.bf16.msra.mxu0 %v2755_v48  ;;  %2429 = vmatprep.mubr.msk.f32.mxu0 %vm2984_vm0, %v2985_v1 }
  0x3f   : > { %2757 = vmatprep.subr.bf16.mxu0 %v2983_v0 }
  0x41   : > { %2430 = vmatmul.mubr.msk.f32.gmra.mrb[12].mxu0 %vm406_vm4, %v3214_v38 }
  0x42   : > { %2432 = vmatprep.mubr.msk.f32.mxu0 %vm2984_vm0, %v2985_v1  ;;  %2759 = vmatpush3.bf16.msra.mxu0 %v2758_v51 }
  0x43   : > { %2760 = vmatprep.subr.bf16.mxu0 %v2983_v0 }
  0x45   : > { %2433 = vmatmul.mubr.msk.f32.gmra.mrb[14].mxu0 %vm406_vm4, %v3228_v40 }
  0x46   : > { %2435 = vmatprep.mubr.msk.f32.mxu0 %vm2984_vm0, %v2985_v1  ;;  %2763 = vmatpush3.bf16.msk.msra.mxu0 %vm3181_vm3, %v2761_v52 }
  0x47   : > { %2774 = vmatprep.subr.bf16.mxu0 %v2983_v0 }
  0x49   : > { %2436 = vmatmul.mubr.msk.f32.gmra.mrb[16].mxu0 %vm406_vm4, %v3243_v42 }
  0x4a   : > { %2438 = vmatprep.mubr.msk.f32.mxu0 %vm2984_vm0, %v2985_v1 }
  0x4d   : > { %2439 = vmatmul.mubr.msk.f32.gmra.mrb[18].mxu0 %vm406_vm4, %v3260_v45 }
  0x4e   : > { %2480 = vmatprep.mubr.msk.f32.mxu0 %vm2984_vm0, %v2985_v1 }
  0x51   : > { %2481 = vmatmul.mubr.msk.f32.vlgmr.msra.gmra.mrb[20].mxu0 %vm406_vm4, %v3199_v36 }
  0x52   : > { %2776 = vmatpush3.bf16.msra.mxu0 %v2775_v55  ;;  %2483 = vmatprep.mubr.msk.f32.mxu0 %vm2984_vm0, %v2985_v1  ;;  %v1593_v55 = vld [vmem:[%s3721_s5 + $0x8] sm:$0xff] }
  0x53   : > { %2777 = vmatprep.subr.bf16.mxu0 %v2983_v0  ;;  %v2825_v56 = vpack.c.bf16 %v1593_v55, %v1592_v54 }
  0x55   : > { %2484 = vmatmul.mubr.msk.f32.gmra.mrb[22].mxu0 %vm406_vm4, %v3214_v38 }
  0x56   : > { %2486 = vmatprep.mubr.msk.f32.mxu0 %vm2984_vm0, %v2985_v1  ;;  %2779 = vmatpush3.bf16.msra.mxu0 %v2778_v58  ;;  %v1595_v58 = vld [vmem:[%s3721_s5 + $0x18] sm:$0xff] }
  0x57   : > { %2780 = vmatprep.subr.bf16.mxu0 %v2983_v0  ;;  %v2828_v59 = vpack.c.bf16 %v1595_v58, %v1594_v57 }
  0x59   : > { %2487 = vmatmul.mubr.msk.f32.gmra.mrb[24].mxu0 %vm406_vm4, %v3228_v40 }
  0x5a   : > { %2489 = vmatprep.mubr.msk.f32.mxu0 %vm2984_vm0, %v2985_v1  ;;  %2783 = vmatpush3.bf16.msk.msra.mxu0 %vm3181_vm3, %v2781_v61  ;;  %v1597_v61 = vld [vmem:[%s3721_s5 + $0x28] sm:$0xf] }
  0x5b   : > { %2794 = vmatprep.subr.bf16.mxu0 %v2983_v0 }
  0x5d   : > { %2490 = vmatmul.mubr.msk.f32.gmra.mrb[26].mxu0 %vm406_vm4, %v3243_v42 }
  0x5e   : > { %2492 = vmatprep.mubr.msk.f32.mxu0 %vm2984_vm0, %v2985_v1 }
  0x61   : > { %2493 = vmatmul.mubr.msk.f32.gmra.mrb[28].mxu0 %vm406_vm4, %v3260_v45 }
  0x62   : > { %2534 = vmatprep.mubr.msk.f32.mxu0 %vm2984_vm0, %v2985_v1 }
  0x65   : > { %2535 = vmatmul.mubr.msk.f32.vlgmr.msra.gmra.mrb[30].mxu0 %vm406_vm4, %v3199_v36 }
  0x66   : > { %2796 = vmatpush3.bf16.msra.mxu0 %v2795_v32  ;;  %2537 = vmatprep.mubr.msk.f32.mxu0 %vm2984_vm0, %v2985_v1 }
  0x67   : > { %2797 = vmatprep.subr.bf16.mxu0 %v2983_v0 }
  0x69   : > { %2538 = vmatmul.mubr.msk.f32.gmra.mrb[32].mxu0 %vm406_vm4, %v3214_v38 }
  0x6a   : > { %2540 = vmatprep.mubr.msk.f32.mxu0 %vm2984_vm0, %v2985_v1  ;;  %2799 = vmatpush3.bf16.msra.mxu0 %v2798_v34 }
  0x6b   : > { %2800 = vmatprep.subr.bf16.mxu0 %v2983_v0 }
  0x6d   : > { %2541 = vmatmul.mubr.msk.f32.gmra.mrb[34].mxu0 %vm406_vm4, %v3228_v40 }
  0x6e   : > { %2543 = vmatprep.mubr.msk.f32.mxu0 %vm2984_vm0, %v2985_v1  ;;  %2803 = vmatpush3.bf16.msk.msra.mxu0 %vm3181_vm3, %v2801_v35 }
  0x6f   : > { %2814 = vmatprep.subr.bf16.mxu0 %v2983_v0 }
  0x71   : > { %2544 = vmatmul.mubr.msk.f32.gmra.mrb[36].mxu0 %vm406_vm4, %v3243_v42 }
  0x72   : > { %2546 = vmatprep.mubr.msk.f32.mxu0 %vm2984_vm0, %v2985_v1 }
  0x75   : > { %2547 = vmatmul.mubr.msk.f32.gmra.mrb[38].mxu0 %vm406_vm4, %v3260_v45 }
  0x76   : > { %2588 = vmatprep.mubr.msk.f32.mxu0 %vm2984_vm0, %v2985_v1 }
  0x79   : > { %2589 = vmatmul.mubr.msk.f32.vlgmr.msra.gmra.mrb[40].mxu0 %vm406_vm4, %v3199_v36 }
  0x7a   : > { %2591 = vmatprep.mubr.msk.f32.mxu0 %vm2984_vm0, %v2985_v1  ;;  %2816 = vmatpush3.bf16.msra.mxu0 %v3135_v13 }
  0x7b   : > { %2817 = vmatprep.subr.bf16.mxu0 %v2983_v0 }
  0x7d   : > { %2592 = vmatmul.mubr.msk.f32.gmra.mrb[42].mxu0 %vm406_vm4, %v3214_v38 }
  0x7e   : > { %2594 = vmatprep.mubr.msk.f32.mxu0 %vm2984_vm0, %v2985_v1  ;;  %2819 = vmatpush3.bf16.msra.mxu0 %v3152_v22 }
  0x7f   : > { %2820 = vmatprep.subr.bf16.mxu0 %v2983_v0 }
  0x81   : > { %2595 = vmatmul.mubr.msk.f32.gmra.mrb[44].mxu0 %vm406_vm4, %v3228_v40 }
  0x82   : > { %2597 = vmatprep.mubr.msk.f32.mxu0 %vm2984_vm0, %v2985_v1  ;;  %2823 = vmatpush3.bf16.msk.msra.mxu0 %vm3181_vm3, %v3176_v31 }
  0x83   : > { %2834 = vmatprep.subr.bf16.mxu0 %v2983_v0 }
  0x85   : > { %2598 = vmatmul.mubr.msk.f32.gmra.mrb[46].mxu0 %vm406_vm4, %v3243_v42 }
  0x86   : > { %2600 = vmatprep.mubr.msk.f32.mxu0 %vm2984_vm0, %v2985_v1 }
  0x89   : > { %2601 = vmatmul.mubr.msk.f32.gmra.mrb[48].mxu0 %vm406_vm4, %v3260_v45 }
  0x8a   : > { %2642 = vmatprep.mubr.msk.f32.mxu0 %vm2984_vm0, %v2985_v1 }
  0x8d   : > { %2643 = vmatmul.mubr.msk.f32.vlgmr.msra.gmra.mrb[50].mxu0 %vm406_vm4, %v1589_v62 }
  0x8e   : > { %2836 = vmatpush3.bf16.msra.mxu0 %v3203_v37  ;;  %2645 = vmatprep.mubr.msk.f32.mxu0 %vm2984_vm0, %v2985_v1 }
  0x8f   : > { %2837 = vmatprep.subr.bf16.mxu0 %v2983_v0 }
  0x91   : > { %2646 = vmatmul.mubr.msk.f32.gmra.mrb[52].mxu0 %vm406_vm4, %v1590_v63 }
  0x92   : > { %2839 = vmatpush3.bf16.msra.mxu0 %v3218_v39  ;;  %2648 = vmatprep.mubr.msk.f32.mxu0 %vm2984_vm0, %v2985_v1 }
  0x93   : > { %2840 = vmatprep.subr.bf16.mxu0 %v2983_v0 }
  0x95   : > { %2649 = vmatmul.mubr.msk.f32.gmra.mrb[54].mxu0 %vm406_vm4, %v1591_v2 }
  0x96   : > { %2843 = vmatpush3.bf16.msk.msra.mxu0 %vm3181_vm3, %v3233_v41  ;;  %2684 = vmatprep.mubr.msk.f32.mxu0 %vm2984_vm0, %v2985_v1 }
  0x99   : > { %2685 = vmatmul.mubr.msk.f32.vlgmr.msra.gmra.mrb[56].mxu0 %vm406_vm4, %v1589_v62  ;;  %v2831_v62 = vpack.c.bf16 %v1597_v61, %v1596_v60 }
  0x9a   : > { %2687 = vmatprep.mubr.msk.f32.mxu0 %vm2984_vm0, %v2985_v1 }
  0x9d   : > { %2688 = vmatmul.mubr.msk.f32.gmra.mrb[58].mxu0 %vm406_vm4, %v1590_v63 }
  0x9e   : > { %2690 = vmatprep.mubr.msk.f32.mxu0 %vm2984_vm0, %v2985_v1 }
  0xa1   : > { %2691 = vmatmul.mubr.msk.f32.gmra.mrb[60].mxu0 %vm406_vm4, %v1591_v2 }
  0xfc   : > { %v492_v3 = vpop.f32.mrb[0].mxu0 }
  0xfd   : > { %v2374_v5 = vpop.f32.mrb[1].mxu0  ;;  %2400 = vmatmul.mubr.msk.f32.vlgmr.msra.gmra.mrb[0].mxu1 %vm406_vm4, %v492_v3 }
  0xfe   : > { %2746 = vmatpush3.bf16.msra.mxu1 %v3103_v4  ;;  %2402 = vmatprep.mubr.msk.f32.mxu1 %vm2984_vm0, %v2985_v1 }
  0xff   : > { %2747 = vmatprep.subr.bf16.mxu1 %v2983_v0 }
 0x100   : > { %v497_v6 = vpop.f32.mrb[2].mxu0 }
 0x101   : > { %v2377_v7 = vpop.f32.mrb[3].mxu0  ;;  %2403 = vmatmul.mubr.msk.f32.gmra.mrb[2].mxu1 %vm406_vm4, %v497_v6 }
 0x102   : > { %2405 = vmatprep.mubr.msk.f32.mxu1 %vm2984_vm0, %v2985_v1  ;;  %2749 = vmatpush3.bf16.msra.mxu1 %v3137_v16 }
 0x103   : > { %2750 = vmatprep.subr.bf16.mxu1 %v2983_v0 }
 0x104   : > { %v502_v8 = vpop.f32.mrb[4].mxu0 }
 0x105   : > { %v2380_v9 = vpop.f32.mrb[5].mxu0  ;;  %2406 = vmatmul.mubr.msk.f32.gmra.mrb[4].mxu1 %vm406_vm4, %v502_v8 }
 0x106   : > { %2408 = vmatprep.mubr.msk.f32.mxu1 %vm2984_vm0, %v2985_v1  ;;  %2753 = vmatpush3.bf16.msk.msra.mxu1 %vm3181_vm3, %v3172_v30 }
 0x107   : > { %2764 = vmatprep.subr.bf16.mxu1 %v2983_v0 }
 0x108   : > { %v507_v10 = vpop.f32.mrb[6].mxu0 }
 0x109   : > { %v2383_v11 = vpop.f32.mrb[7].mxu0  ;;  %2409 = vmatmul.mubr.msk.f32.gmra.mrb[6].mxu1 %vm406_vm4, %v507_v10 }
 0x10a   : > { %2411 = vmatprep.mubr.msk.f32.mxu1 %vm2984_vm0, %v2985_v1 }
 0x10c   : > { %v512_v12 = vpop.f32.mrb[8].mxu0 }
 0x10d   : > { %v2386_v13 = vpop.f32.mrb[9].mxu0  ;;  %2412 = vmatmul.mubr.msk.f32.gmra.mrb[8].mxu1 %vm406_vm4, %v512_v12 }
 0x10e   : > { %2453 = vmatprep.mubr.msk.f32.mxu1 %vm2984_vm0, %v2985_v1 }
 0x110   : > { %v693_v14 = vpop.f32.mrb[10].mxu0 }
 0x111   : > { %v2428_v15 = vpop.f32.mrb[11].mxu0  ;;  %2454 = vmatmul.mubr.msk.f32.vlgmr.msra.gmra.mrb[10].mxu1 %vm406_vm4, %v693_v14 }
 0x112   : > { %2766 = vmatpush3.bf16.msra.mxu1 %v3103_v4  ;;  %2456 = vmatprep.mubr.msk.f32.mxu1 %vm2984_vm0, %v2985_v1 }
 0x113   : > { %2767 = vmatprep.subr.bf16.mxu1 %v2983_v0 }
 0x114   : > { %v698_v17 = vpop.f32.mrb[12].mxu0 }
 0x115   : > { %v2431_v18 = vpop.f32.mrb[13].mxu0  ;;  %2457 = vmatmul.mubr.msk.f32.gmra.mrb[12].mxu1 %vm406_vm4, %v698_v17 }
 0x116   : > { %2459 = vmatprep.mubr.msk.f32.mxu1 %vm2984_vm0, %v2985_v1  ;;  %2769 = vmatpush3.bf16.msra.mxu1 %v3137_v16 }
 0x117   : > { %2770 = vmatprep.subr.bf16.mxu1 %v2983_v0 }
 0x118   : > { %v703_v19 = vpop.f32.mrb[14].mxu0 }
 0x119   : > { %v2434_v20 = vpop.f32.mrb[15].mxu0  ;;  %2460 = vmatmul.mubr.msk.f32.gmra.mrb[14].mxu1 %vm406_vm4, %v703_v19 }
 0x11a   : > { %2462 = vmatprep.mubr.msk.f32.mxu1 %vm2984_vm0, %v2985_v1  ;;  %2773 = vmatpush3.bf16.msk.msra.mxu1 %vm3181_vm3, %v3172_v30 }
 0x11b   : > { %2784 = vmatprep.subr.bf16.mxu1 %v2983_v0 }
 0x11c   : > { %v708_v21 = vpop.f32.mrb[16].mxu0 }
 0x11d   : > { %v2437_v22 = vpop.f32.mrb[17].mxu0  ;;  %2463 = vmatmul.mubr.msk.f32.gmra.mrb[16].mxu1 %vm406_vm4, %v708_v21 }
 0x11e   : > { %2465 = vmatprep.mubr.msk.f32.mxu1 %vm2984_vm0, %v2985_v1 }
 0x120   : > { %v713_v23 = vpop.f32.mrb[18].mxu0 }
 0x121   : > { %v2440_v24 = vpop.f32.mrb[19].mxu0  ;;  %2466 = vmatmul.mubr.msk.f32.gmra.mrb[18].mxu1 %vm406_vm4, %v713_v23 }
 0x122   : > { %2507 = vmatprep.mubr.msk.f32.mxu1 %vm2984_vm0, %v2985_v1 }
 0x124   : > { %v897_v25 = vpop.f32.mrb[20].mxu0 }
 0x125   : > { %v2482_v26 = vpop.f32.mrb[21].mxu0  ;;  %2508 = vmatmul.mubr.msk.f32.vlgmr.msra.gmra.mrb[20].mxu1 %vm406_vm4, %v897_v25 }
 0x126   : > { %2786 = vmatpush3.bf16.msra.mxu1 %v3103_v4  ;;  %2510 = vmatprep.mubr.msk.f32.mxu1 %vm2984_vm0, %v2985_v1 }
 0x127   : > { %2787 = vmatprep.subr.bf16.mxu1 %v2983_v0 }
 0x128   : > { %v902_v27 = vpop.f32.mrb[22].mxu0 }
 0x129   : > { %v2485_v28 = vpop.f32.mrb[23].mxu0  ;;  %2511 = vmatmul.mubr.msk.f32.gmra.mrb[22].mxu1 %vm406_vm4, %v902_v27 }
 0x12a   : > { %2513 = vmatprep.mubr.msk.f32.mxu1 %vm2984_vm0, %v2985_v1  ;;  %2789 = vmatpush3.bf16.msra.mxu1 %v3137_v16 }
 0x12b   : > { %2790 = vmatprep.subr.bf16.mxu1 %v2983_v0 }
 0x12c   : > { %v907_v29 = vpop.f32.mrb[24].mxu0 }
 0x12d   : > { %v2488_v31 = vpop.f32.mrb[25].mxu0  ;;  %2514 = vmatmul.mubr.msk.f32.gmra.mrb[24].mxu1 %vm406_vm4, %v907_v29 }
 0x12e   : > { %2516 = vmatprep.mubr.msk.f32.mxu1 %vm2984_vm0, %v2985_v1  ;;  %2793 = vmatpush3.bf16.msk.msra.mxu1 %vm3181_vm3, %v3172_v30 }
 0x12f   : > { %2804 = vmatprep.subr.bf16.mxu1 %v2983_v0 }
 0x130   : > { %v912_v32 = vpop.f32.mrb[26].mxu0 }
 0x131   : > { %v2491_v34 = vpop.f32.mrb[27].mxu0  ;;  %2517 = vmatmul.mubr.msk.f32.gmra.mrb[26].mxu1 %vm406_vm4, %v912_v32 }
 0x132   : > { %2519 = vmatprep.mubr.msk.f32.mxu1 %vm2984_vm0, %v2985_v1 }
 0x134   : > { %v917_v35 = vpop.f32.mrb[28].mxu0 }
 0x135   : > { %v2494_v36 = vpop.f32.mrb[29].mxu0  ;;  %2520 = vmatmul.mubr.msk.f32.gmra.mrb[28].mxu1 %vm406_vm4, %v917_v35 }
 0x136   : > { %2561 = vmatprep.mubr.msk.f32.mxu1 %vm2984_vm0, %v2985_v1 }
 0x138   : > { %v1101_v37 = vpop.f32.mrb[30].mxu0 }
 0x139   : > { %v2536_v38 = vpop.f32.mrb[31].mxu0  ;;  %2562 = vmatmul.mubr.msk.f32.vlgmr.msra.gmra.mrb[30].mxu1 %vm406_vm4, %v1101_v37 }
 0x13a   : > { %2806 = vmatpush3.bf16.msra.mxu1 %v3103_v4  ;;  %2564 = vmatprep.mubr.msk.f32.mxu1 %vm2984_vm0, %v2985_v1 }
 0x13b   : > { %2807 = vmatprep.subr.bf16.mxu1 %v2983_v0 }
 0x13c   : > { %v1106_v39 = vpop.f32.mrb[32].mxu0 }
 0x13d   : > { %v2539_v40 = vpop.f32.mrb[33].mxu0  ;;  %2565 = vmatmul.mubr.msk.f32.gmra.mrb[32].mxu1 %vm406_vm4, %v1106_v39 }
 0x13e   : > { %2567 = vmatprep.mubr.msk.f32.mxu1 %vm2984_vm0, %v2985_v1  ;;  %2809 = vmatpush3.bf16.msra.mxu1 %v3137_v16 }
 0x13f   : > { %2810 = vmatprep.subr.bf16.mxu1 %v2983_v0 }
 0x140   : > { %v1111_v41 = vpop.f32.mrb[34].mxu0 }
 0x141   : > { %v2542_v42 = vpop.f32.mrb[35].mxu0  ;;  %2568 = vmatmul.mubr.msk.f32.gmra.mrb[34].mxu1 %vm406_vm4, %v1111_v41 }
 0x142   : > { %2570 = vmatprep.mubr.msk.f32.mxu1 %vm2984_vm0, %v2985_v1  ;;  %2813 = vmatpush3.bf16.msk.msra.mxu1 %vm3181_vm3, %v3172_v30 }
 0x143   : > { %2824 = vmatprep.subr.bf16.mxu1 %v2983_v0 }
 0x144   : > { %v1116_v4 = vpop.f32.mrb[36].mxu0 }
 0x145   : > { %v2545_v43 = vpop.f32.mrb[37].mxu0  ;;  %2571 = vmatmul.mubr.msk.f32.gmra.mrb[36].mxu1 %vm406_vm4, %v1116_v4 }
 0x146   : > { %2573 = vmatprep.mubr.msk.f32.mxu1 %vm2984_vm0, %v2985_v1 }
 0x148   : > { %v1121_v16 = vpop.f32.mrb[38].mxu0 }
 0x149   : > { %v2548_v44 = vpop.f32.mrb[39].mxu0  ;;  %2574 = vmatmul.mubr.msk.f32.gmra.mrb[38].mxu1 %vm406_vm4, %v1121_v16 }
 0x14a   : > { %2615 = vmatprep.mubr.msk.f32.mxu1 %vm2984_vm0, %v2985_v1 }
 0x14c   : > { %v1305_v45 = vpop.f32.mrb[40].mxu0 }
 0x14d   : > { %v2590_v46 = vpop.f32.mrb[41].mxu0  ;;  %2616 = vmatmul.mubr.msk.f32.vlgmr.msra.gmra.mrb[40].mxu1 %vm406_vm4, %v1305_v45 }
 0x14e   : > { %2618 = vmatprep.mubr.msk.f32.mxu1 %vm2984_vm0, %v2985_v1  ;;  %2826 = vmatpush3.bf16.msra.mxu1 %v2825_v56 }
 0x14f   : > { %2827 = vmatprep.subr.bf16.mxu1 %v2983_v0 }
 0x150   : > { %v1310_v30 = vpop.f32.mrb[42].mxu0 }
 0x151   : > { %v2593_v47 = vpop.f32.mrb[43].mxu0  ;;  %2619 = vmatmul.mubr.msk.f32.gmra.mrb[42].mxu1 %vm406_vm4, %v1310_v30 }
 0x152   : > { %2621 = vmatprep.mubr.msk.f32.mxu1 %vm2984_vm0, %v2985_v1  ;;  %2829 = vmatpush3.bf16.msra.mxu1 %v2828_v59 }
 0x153   : > { %2830 = vmatprep.subr.bf16.mxu1 %v2983_v0 }
 0x154   : > { %v1315_v48 = vpop.f32.mrb[44].mxu0 }
 0x155   : > { %v2596_v49 = vpop.f32.mrb[45].mxu0  ;;  %2622 = vmatmul.mubr.msk.f32.gmra.mrb[44].mxu1 %vm406_vm4, %v1315_v48 }
 0x156   : > { %2624 = vmatprep.mubr.msk.f32.mxu1 %vm2984_vm0, %v2985_v1  ;;  %2833 = vmatpush3.bf16.msk.msra.mxu1 %vm3181_vm3, %v2831_v62 }
 0x157   : > { %2844 = vmatprep.subr.bf16.mxu1 %v2983_v0 }
 0x158   : > { %v1320_v50 = vpop.f32.mrb[46].mxu0 }
 0x159   : > { %v2599_v51 = vpop.f32.mrb[47].mxu0  ;;  %2625 = vmatmul.mubr.msk.f32.gmra.mrb[46].mxu1 %vm406_vm4, %v1320_v50 }
 0x15a   : > { %2627 = vmatprep.mubr.msk.f32.mxu1 %vm2984_vm0, %v2985_v1 }
 0x15c   : > { %v1325_v52 = vpop.f32.mrb[48].mxu0 }
 0x15d   : > { %v2602_v53 = vpop.f32.mrb[49].mxu0  ;;  %2628 = vmatmul.mubr.msk.f32.gmra.mrb[48].mxu1 %vm406_vm4, %v1325_v52 }
 0x15e   : > { %2663 = vmatprep.mubr.msk.f32.mxu1 %vm2984_vm0, %v2985_v1 }
 0x160   : > { %v1673_v63 = vpop.f32.mrb[50].mxu0 }
 0x161   : > { %v2644_v2 = vpop.f32.mrb[51].mxu0  ;;  %2664 = vmatmul.mubr.msk.f32.vlgmr.msra.gmra.mrb[50].mxu1 %vm406_vm4, %v1673_v63 }
 0x162   : > { %2846 = vmatpush3.bf16.msra.mxu1 %v2825_v56  ;;  %2666 = vmatprep.mubr.msk.f32.mxu1 %vm2984_vm0, %v2985_v1 }
 0x163   : > { %2847 = vmatprep.subr.bf16.mxu1 %v2983_v0 }
 0x164   : > { %v1678_v3 = vpop.f32.mrb[52].mxu0 }
 0x165   : > { %v2647_v5 = vpop.f32.mrb[53].mxu0  ;;  %2667 = vmatmul.mubr.msk.f32.gmra.mrb[52].mxu1 %vm406_vm4, %v1678_v3 }
 0x166   : > { %2849 = vmatpush3.bf16.msra.mxu1 %v2828_v59  ;;  %2669 = vmatprep.mubr.msk.f32.mxu1 %vm2984_vm0, %v2985_v1 }
 0x167   : > { %2850 = vmatprep.subr.bf16.mxu1 %v2983_v0 }
 0x168   : > { %v1683_v6 = vpop.f32.mrb[54].mxu0 }
 0x169   : > { %v2650_v7 = vpop.f32.mrb[55].mxu0  ;;  %2670 = vmatmul.mubr.msk.f32.gmra.mrb[54].mxu1 %vm406_vm4, %v1683_v6 }
 0x16a   : > { %2853 = vmatpush3.bf16.msk.msra.mxu1 %vm3181_vm3, %v2831_v62  ;;  %2705 = vmatprep.mubr.msk.f32.mxu1 %vm2984_vm0, %v2985_v1 }
 0x16c   : > { %v1850_v8 = vpop.f32.mrb[56].mxu0 }
 0x16d   : > { %v2686_v9 = vpop.f32.mrb[57].mxu0  ;;  %2706 = vmatmul.mubr.msk.f32.vlgmr.msra.gmra.mrb[56].mxu1 %vm406_vm4, %v1850_v8 }
 0x16e   : > { %2708 = vmatprep.mubr.msk.f32.mxu1 %vm2984_vm0, %v2985_v1 }
 0x170   : > { %v1855_v10 = vpop.f32.mrb[58].mxu0 }
 0x171   : > { %v2689_v11 = vpop.f32.mrb[59].mxu0  ;;  %2709 = vmatmul.mubr.msk.f32.gmra.mrb[58].mxu1 %vm406_vm4, %v1855_v10 }
 0x172   : > { %2711 = vmatprep.mubr.msk.f32.mxu1 %vm2984_vm0, %v2985_v1 }
 0x174   : > { %v1860_v0 = vpop.f32.mrb[60].mxu0 }
 0x175   : > { %v2692_v33 = vpop.f32.mrb[61].mxu0  ;;  %2712 = vmatmul.mubr.msk.f32.gmra.mrb[60].mxu1 %vm406_vm4, %v1860_v0 }
 0x1d0   : > { %v600_v12 = vpop.f32.mrb[0].mxu1 }
 0x1d1   : > { %v2401_v13 = vpop.f32.mrb[1].mxu1  ;;  %v3572_v24 = vmul.f32 %v600_v12, %v600_v12 }
 0x1d4   : > { %v605_v14 = vpop.f32.mrb[2].mxu1 }
 0x1d5   : > { %v2404_v15 = vpop.f32.mrb[3].mxu1  ;;  %v3580_v29 = vmul.f32 %v605_v14, %v605_v14 }
 0x1d8   : > { %v610_v17 = vpop.f32.mrb[4].mxu1 }
 0x1d9   : > { %v2407_v18 = vpop.f32.mrb[5].mxu1  ;;  %v3588_v38 = vmul.f32 %v610_v17, %v610_v17 }
 0x1dc   : > { %v615_v19 = vpop.f32.mrb[6].mxu1 }
 0x1dd   : > { %v2410_v20 = vpop.f32.mrb[7].mxu1  ;;  %v3597_v44 = vmul.f32 %v615_v19, %v615_v19 }
 0x1e0   : > { %v620_v21 = vpop.f32.mrb[8].mxu1 }
 0x1e1   : > { %v2413_v22 = vpop.f32.mrb[9].mxu1  ;;  %v3606_v53 = vmul.f32 %v620_v21, %v620_v21 }
 0x1e4   : > { %v798_v23 = vpop.f32.mrb[10].mxu1 }
 0x1e5   : > { %v3574_v25 = vmul.f32 %v798_v23, %v798_v23  ;;  %v3576_v1 = vmul.f32 %v798_v23, %v600_v12  ;;  %v2455_v26 = vpop.f32.mrb[11].mxu1 }
 0x1e7   : > { %v1504_v27 = vadd.f32 %v3574_v25, %v3572_v24  ;;  %v1494_v43 = vmul.f32 2.0, %v3576_v1 }
 0x1e8   : > { %v803_v28 = vpop.f32.mrb[12].mxu1 }
 0x1e9   : > { %v1509_v31 = vadd.f32 6.5025, %v1504_v27  ;;  %v3582_v32 = vmul.f32 %v803_v28, %v803_v28  ;;  %v3584_v34 = vmul.f32 %v803_v28, %v605_v14  ;;  %v2458_v35 = vpop.f32.mrb[13].mxu1  ;;  %v1499_v49 = vadd.f32 6.5025, %v1494_v43 }
 0x1eb   : > { %2899 = vrcp.f32 %v1509_v31  ;;  %v1505_v36 = vadd.f32 %v3582_v32, %v3580_v29  ;;  %v1495_v50 = vmul.f32 2.0, %v3584_v34 }
 0x1ec   : > { %v808_v37 = vpop.f32.mrb[14].mxu1 }
 0x1ed   : > { %v1510_v39 = vadd.f32 6.5025, %v1505_v36  ;;  %v3590_v40 = vmul.f32 %v808_v37, %v808_v37  ;;  %v3592_v41 = vmul.f32 %v808_v37, %v610_v17  ;;  %v2461_v42 = vpop.f32.mrb[15].mxu1  ;;  %v1500_v60 = vadd.f32 6.5025, %v1495_v50 }
 0x1ef   : > { %2901 = vrcp.f32 %v1510_v39  ;;  %v1506_v4 = vadd.f32 %v3590_v40, %v3588_v38  ;;  %v1496_v61 = vmul.f32 2.0, %v3592_v41 }
 0x1f0   : > { %v813_v16 = vpop.f32.mrb[16].mxu1 }
 0x1f1   : > { %v1511_v45 = vadd.f32 6.5025, %v1506_v4  ;;  %v3599_v46 = vmul.f32 %v813_v16, %v813_v16  ;;  %v3601_v30 = vmul.f32 %v813_v16, %v615_v19  ;;  %v2464_v47 = vpop.f32.mrb[17].mxu1  ;;  %v1501_v7 = vadd.f32 6.5025, %v1496_v61 }
 0x1f3   : > { %2903 = vrcp.f32 %v1511_v45  ;;  %v1507_v48 = vadd.f32 %v3599_v46, %v3597_v44  ;;  %v1497_v8 = vmul.f32 2.0, %v3601_v30 }
 0x1f4   : > { %v818_v51 = vpop.f32.mrb[18].mxu1 }
 0x1f5   : > { %v2900_v52 = vpop.eup %2899  ;;  %v1512_v54 = vadd.f32 6.5025, %v1507_v48  ;;  %v1443_v55 = vmul.f32 %v818_v51, %v818_v51  ;;  %v3608_v56 = vmul.f32 %v818_v51, %v620_v21  ;;  %v2467_v57 = vpop.f32.mrb[19].mxu1  ;;  %v1502_v12 = vadd.f32 6.5025, %v1497_v8 }
 0x1f6   : > { %v3610_v58 = vmul.f32 %v2900_v52, %v1499_v49 }
 0x1f7   : > { %2905 = vrcp.f32 %v1512_v54  ;;  %v1508_v59 = vadd.f32 %v1443_v55, %v3606_v53  ;;  %v1498_v13 = vmul.f32 2.0, %v3608_v56 }
 0x1f8   : > { %v1002_v62 = vpop.f32.mrb[20].mxu1 }
 0x1f9   : > { %v2902_v63 = vpop.eup %2901  ;;  %v1513_v2 = vadd.f32 6.5025, %v1508_v59  ;;  %v1449_v3 = vsub.f32 %v1002_v62, %v3572_v24  ;;  %v2509_v5 = vpop.f32.mrb[21].mxu1  ;;  %v1503_v20 = vadd.f32 6.5025, %v1498_v13 }
 0x1fa   : > { %v3615_v6 = vmul.f32 %v2902_v63, %v1500_v60 }
 0x1fb   : > { %2907 = vrcp.f32 %v1513_v2 }
 0x1fc   : > { %v1007_v9 = vpop.f32.mrb[22].mxu1 }
 0x1fd   : > { %v2904_v10 = vpop.eup %2903  ;;  %v1450_v11 = vsub.f32 %v1007_v9, %v3580_v29  ;;  %v2512_v0 = vpop.f32.mrb[23].mxu1 }
 0x1fe   : > { %v3619_v33 = vmul.f32 %v2904_v10, %v1501_v7 }
 0x200   : > { %v1012_v14 = vpop.f32.mrb[24].mxu1 }
 0x201   : > { %v2906_v15 = vpop.eup %2905  ;;  %v1451_v17 = vsub.f32 %v1012_v14, %v3588_v38  ;;  %v2515_v18 = vpop.f32.mrb[25].mxu1 }
 0x202   : > { %v3623_v19 = vmul.f32 %v2906_v15, %v1502_v12 }
 0x204   : > { %v1017_v21 = vpop.f32.mrb[26].mxu1 }
 0x205   : > { %v2908_v22 = vpop.eup %2907  ;;  %v1452_v23 = vsub.f32 %v1017_v21, %v3597_v44  ;;  %v2518_v24 = vpop.f32.mrb[27].mxu1 }
 0x206   : > { %v3626_v26 = vmul.f32 %v2908_v22, %v1503_v20 }
 0x208   : > { %v1022_v27 = vpop.f32.mrb[28].mxu1 }
 0x209   : > { %v1453_v28 = vsub.f32 %v1022_v27, %v3606_v53  ;;  %v2521_v29 = vpop.f32.mrb[29].mxu1 }
 0x20c   : > { %v1206_v31 = vpop.f32.mrb[30].mxu1 }
 0x20d   : > { %v1454_v35 = vsub.f32 %v1206_v31, %v3574_v25  ;;  %v2563_v36 = vpop.f32.mrb[31].mxu1 }
 0x20f   : > { %v1474_v37 = vadd.f32 %v1454_v35, %v1449_v3 }
 0x210   : > { %v1211_v38 = vpop.f32.mrb[32].mxu1 }
 0x211   : > { %v1455_v39 = vsub.f32 %v1211_v38, %v3582_v32  ;;  %v2566_v42 = vpop.f32.mrb[33].mxu1  ;;  %v1479_v47 = vadd.f32 58.5225, %v1474_v37 }
 0x213   : > { %v1475_v4 = vadd.f32 %v1455_v39, %v1450_v11  ;;  %2909 = vrcp.f32 %v1479_v47 }
 0x214   : > { %v1216_v43 = vpop.f32.mrb[34].mxu1 }
 0x215   : > { %v1456_v16 = vsub.f32 %v1216_v43, %v3590_v40  ;;  %v2569_v44 = vpop.f32.mrb[35].mxu1  ;;  %v1480_v25 = vadd.f32 58.5225, %v1475_v4 }
 0x217   : > { %v1476_v45 = vadd.f32 %v1456_v16, %v1451_v17  ;;  %2911 = vrcp.f32 %v1480_v25 }
 0x218   : > { %v1221_v48 = vpop.f32.mrb[36].mxu1 }
 0x219   : > { %v1457_v49 = vsub.f32 %v1221_v48, %v3599_v46  ;;  %v2572_v50 = vpop.f32.mrb[37].mxu1  ;;  %v1481_v32 = vadd.f32 58.5225, %v1476_v45 }
 0x21b   : > { %v1477_v51 = vadd.f32 %v1457_v49, %v1452_v23  ;;  %2913 = vrcp.f32 %v1481_v32 }
 0x21c   : > { %v1226_v52 = vpop.f32.mrb[38].mxu1 }
 0x21d   : > { %v1458_v53 = vsub.f32 %v1226_v52, %v1443_v55  ;;  %v2575_v54 = vpop.f32.mrb[39].mxu1  ;;  %v1482_v62 = vadd.f32 58.5225, %v1477_v51  ;;  %v2910_v5 = vpop.eup %2909 }
 0x21f   : > { %v1478_v57 = vadd.f32 %v1458_v53, %v1453_v28  ;;  %2915 = vrcp.f32 %v1482_v62 }
 0x220   : > { %v1410_v59 = vpop.f32.mrb[40].mxu1 }
 0x221   : > { %v1459_v60 = vsub.f32 %v1410_v59, %v3576_v1  ;;  %v2617_v40 = vpop.f32.mrb[41].mxu1  ;;  %v1483_v8 = vadd.f32 58.5225, %v1478_v57  ;;  %v2912_v13 = vpop.eup %2911 }
 0x223   : > { %v1464_v61 = vmul.f32 2.0, %v1459_v60  ;;  %2917 = vrcp.f32 %v1483_v8 }
 0x224   : > { %v1415_v63 = vpop.f32.mrb[42].mxu1 }
 0x225   : > { %v1469_v2 = vadd.f32 58.5225, %v1464_v61  ;;  %v1460_v46 = vsub.f32 %v1415_v63, %v3584_v34  ;;  %v2620_v3 = vpop.f32.mrb[43].mxu1  ;;  %v2914_v23 = vpop.eup %2913 }
 0x227   : > { %v1465_v7 = vmul.f32 2.0, %v1460_v46  ;;  %v1485_v55 = vmul.f32 %v2910_v5, %v1469_v2 }
 0x228   : > { %v1420_v9 = vpop.f32.mrb[44].mxu1 }
 0x229   : > { %v1470_v10 = vadd.f32 58.5225, %v1465_v7  ;;  %v1461_v11 = vsub.f32 %v1420_v9, %v3592_v41  ;;  %v2623_v1 = vpop.f32.mrb[45].mxu1  ;;  %v1561_v0 = vsel %vm1529_vm5, %v1485_v55, 0.0  ;;  %v1524_v12 = vmul.f32 %v3610_v58, %v1485_v55  ;;  %v2916_v37 = vpop.eup %2915 }
 0x22a   : > { %1562 = vadd.xlane.f32.xlu1 %v1561_v0 }
 0x22b   : > { %v1466_v14 = vmul.f32 2.0, %v1461_v11  ;;  %v1530_v34 = vsel %vm1529_vm5, %v1524_v12, 0.0  ;;  %v1487_v15 = vmul.f32 %v2912_v13, %v1470_v10 }
 0x22c   : > { %1531 = vadd.xlane.f32.xlu0 %v1530_v34  ;;  %v1425_v17 = vpop.f32.mrb[46].mxu1 }
 0x22d   : > { %v1471_v18 = vadd.f32 58.5225, %v1466_v14  ;;  %v1462_v20 = vsub.f32 %v1425_v17, %v3601_v30  ;;  %v2626_v21 = vpop.f32.mrb[47].mxu1  ;;  %v1564_v41 = vsel %vm1529_vm5, %v1487_v15, 0.0  ;;  %v1525_v22 = vmul.f32 %v3615_v6, %v1487_v15  ;;  %v2918_v43 = vpop.eup %2917 }
 0x22e   : > { %1565 = vadd.xlane.f32.xlu1 %v1564_v41 }
 0x22f   : > { %v1467_v58 = vmul.f32 2.0, %v1462_v20  ;;  %v1533_v24 = vsel %vm1529_vm5, %v1525_v22, 0.0  ;;  %v1489_v27 = vmul.f32 %v2914_v23, %v1471_v18 }
 0x230   : > { %1534 = vadd.xlane.f32.xlu0 %v1533_v24  ;;  %v1430_v28 = vpop.f32.mrb[48].mxu1 }
 0x231   : > { %v1472_v29 = vadd.f32 58.5225, %v1467_v58  ;;  %v1463_v31 = vsub.f32 %v1430_v28, %v3608_v56  ;;  %v2629_v35 = vpop.f32.mrb[49].mxu1  ;;  %v1567_v36 = vsel %vm1529_vm5, %v1489_v27, 0.0  ;;  %v1526_v30 = vmul.f32 %v3619_v33, %v1489_v27 }
 0x232   : > { %1568 = vadd.xlane.f32.xlu1 %v1567_v36 }
 0x233   : > { %v1491_v38 = vmul.f32 %v2916_v37, %v1472_v29  ;;  %v1468_v6 = vmul.f32 2.0, %v1463_v31  ;;  %v1536_v39 = vsel %vm1529_vm5, %v1526_v30, 0.0 }
 0x234   : > { %1537 = vadd.xlane.f32.xlu0 %v1536_v39  ;;  %v1765_v48 = vpop.f32.mrb[50].mxu1 }
 0x235   : > { %v1473_v42 = vadd.f32 58.5225, %v1468_v6  ;;  %v1527_v4 = vmul.f32 %v3623_v19, %v1491_v38  ;;  %v1570_v33 = vsel %vm1529_vm5, %v1491_v38, 0.0  ;;  %v2665_v19 = vpop.f32.mrb[51].mxu1  ;;  %1780 = vst.msk [vmem:[%s377_s24] sm:$0xff] %vm1779_vm7, %v1765_v48 }
 0x237   : > { %v1493_v16 = vmul.f32 %v2918_v43, %v1473_v42  ;;  %v1539_v56 = vsel %vm1529_vm5, %v1527_v4, 0.0 }
 0x238   : > { %1540 = vadd.xlane.f32.xlu0 %v1539_v56  ;;  %v1770_v49 = vpop.f32.mrb[52].mxu1 }
 0x239   : > { %v1528_v44 = vmul.f32 %v3626_v26, %v1493_v16  ;;  %v1573_v47 = vsel %vm1542_vm6, %v1493_v16, 0.0  ;;  %1781 = vst.msk [vmem:[%s377_s24 + $0x8] sm:$0xff] %vm1779_vm7, %v1770_v49  ;;  %v2668_v26 = vpop.f32.mrb[53].mxu1 }
 0x23b   : > { %v1543_v45 = vsel %vm1542_vm6, %v1528_v44, 0.0 }
 0x23c   : > { %1571 = vadd.xlane.f32.xlu0 %v1570_v33  ;;  %1544 = vadd.xlane.f32.xlu1 %v1543_v45  ;;  %v1775_v50 = vpop.f32.mrb[54].mxu1 }
 0x23d   : > { %v2671_v51 = vpop.f32.mrb[55].mxu1  ;;  %1783 = vst.msk [vmem:[%s377_s24 + $0x10] sm:$0x3f] %vm1782_vm8, %v1775_v50  ;;  %s372_s24 = scalar_lea.vmem %s3723_s7, %s3090_s21 }
 0x240   : > { %1574 = vadd.xlane.f32.xlu1 %v1573_v47  ;;  %v1939_v25 = vpop.f32.mrb[56].mxu1 }
 0x241   : > { %v2707_v52 = vpop.f32.mrb[57].mxu1  ;;  %1953 = vst.msk [vmem:[%s382_s28] sm:$0xff] %vm1779_vm7, %v1939_v25 }
 0x244   : > { %v1944_v53 = vpop.f32.mrb[58].mxu1 }
 0x245   : > { %1954 = vst.msk [vmem:[%s382_s28 + $0x8] sm:$0xff] %vm1779_vm7, %v1944_v53  ;;  %v2710_v54 = vpop.f32.mrb[59].mxu1 }
 0x248   : > { %v1949_v57 = vpop.f32.mrb[60].mxu1 }
 0x249   : > { %1955 = vst.msk [vmem:[%s382_s28 + $0x10] sm:$0x3f] %vm1782_vm8, %v1949_v57  ;;  %v2713_v32 = vpop.f32.mrb[61].mxu1  ;;  %s2987_s28 = smov [#allocation2]  }
 0x24a   : > { %s2923_s18 = sshll.u32 %s2987_s28, 4  ;;  %s2924_s18 = int_to_ptr.vmem [resolvable:$false] %s2923_s18 }
 0x24b   : > { %s2925_s16 = scalar_lea.vmem %s2924_s18, 32  ;;  %p2926_p0 = scmp.lt.s32.totalorder %s3665_s14, %s2924_s18 }
 0x24c   : > { %p2927_p1 = scmp.lt.s32.totalorder %s2925_s16, %s2919_s27 }
 0x24e   : > { %p2928_p2 = por %p2927_p1, %p2926_p0 }
 0x250   : > { %p2929_p3 = pnand %p2928_p2, %p2922_p13 }
 0x2b7   : > { %v1563_v59 = vpop.xlane.xlu1 %1562 }
 0x2b9   : > { %v1532_v60 = vpop.xlane.xlu0 %1531 }
 0x2bb   : > { %v1566_v61 = vpop.xlane.xlu1 %1565 }
 0x2bc   : > { %v1576_v5 = vadd.f32 %v1566_v61, %v1563_v59 }
 0x2bd   : > { %v1535_v40 = vpop.xlane.xlu0 %1534 }
 0x2be   : > { %v1546_v63 = vadd.f32 %v1535_v40, %v1532_v60 }
 0x2bf   : > { %v1569_v2 = vpop.xlane.xlu1 %1568 }
 0x2c0   : > { %v1577_v10 = vadd.f32 %v1576_v5, %v1569_v2 }
 0x2c1   : > { %v1538_v62 = vpop.xlane.xlu0 %1537 }
 0x2c2   : > { %v1547_v3 = vadd.f32 %v1546_v63, %v1538_v62 }
 0x2c5   : > { %v1541_v46 = vpop.xlane.xlu0 %1540 }
 0x2c6   : > { %v1548_v7 = vadd.f32 %v1547_v3, %v1541_v46 }
 0x2c9   : > { %v1545_v55 = vpop.xlane.xlu1 %1544  ;;  %v1572_v8 = vpop.xlane.xlu0 %1571 }
 0x2ca   : > { %v1550_v9 = vsel %vm1549_vm9, %v1545_v55, 0.0  ;;  %v1578_v1 = vadd.f32 %v1577_v10, %v1572_v8 }
 0x2cb   : > { %v1551_v11 = vadd.f32 %v1550_v9, %v1548_v7 }
 0x2cd   : > { %v1552_v0 = vrot.slane %v1551_v11, 4  ;;  %v1575_v12 = vpop.xlane.xlu1 %1574 }
 0x2ce   : > { %v1579_v13 = vsel %vm1549_vm9, %v1575_v12, 0.0 }
 0x2cf   : > { %v1553_v14 = vadd.f32 %v1552_v0, %v1551_v11  ;;  %v1580_v34 = vadd.f32 %v1579_v13, %v1578_v1 }
 0x2d1   : > { %v1554_v15 = vrot.slane %v1553_v14, 2  ;;  %v1581_v17 = vrot.slane %v1580_v34, 4 }
 0x2d3   : > { %v1555_v18 = vadd.f32 %v1554_v15, %v1553_v14  ;;  %v1582_v20 = vadd.f32 %v1581_v17, %v1580_v34 }
 0x2d5   : > { %v1556_v21 = vrot.slane %v1555_v18, 1  ;;  %v1583_v41 = vrot.slane %v1582_v20, 2 }
 0x2d7   : > { %v1557_v22 = vadd.f32 %v1556_v21, %v1555_v18  ;;  %v1584_v23 = vadd.f32 %v1583_v41, %v1582_v20 }
 0x2d9   : > { %v1585_v58 = vrot.slane %v1584_v23, 1  ;;  %v1558_v24 = vmul.f32 0.00086505193, %v1557_v22 }
 0x2db   : > { %v1586_v27 = vadd.f32 %v1585_v58, %v1584_v23  ;;  %1560 = vst.msk [vmem:[%s340_s26] sm:$0x1] %vm1559_vm10, %v1558_v24 }
 0x2dc   : > { %2932 = shalt.err (!%p2929_p3)
}
 0x2dd   : > { %s2933_s29 = scalar_lea.hbm %s3663_s22, 16  ;;  %s2937_s13 = scalar_lea.hbm %s3722_s6, 32 }
 0x2de   : > { %p2934_p4 = scmp.ne.s32.totalorder %s3663_s22, %s2933_s29  ;;  %p2938_p9 = scmp.lt.u32.totalorder %s3663_s22, %s3722_s6 }
 0x2df   : > { %p2939_p10 = scmp.lt.u32.totalorder %s2937_s13, %s2933_s29  ;;  %p2941_p12 = scmp.lt.u32.totalorder %s2933_s29, %s3663_s22 }
 0x2e0   : > { %p2935_p7 = pnand %p2934_p4, %p3076_p5 }
 0x2e1   : > { %p2940_p11 = por %p2939_p10, %p2938_p9 }
 0x2e2   : > { %p2936_p8 = pneg %p2935_p7 }
 0x2e3   : > { %p2942_p13 = por %p2941_p12, %p2940_p11 }
 0x2e5   : > { %p2943_p0 = pnand %p2942_p13, %p2936_p8 }
 0x2e7   : > { %2946 = shalt.err (!%p2943_p0)
}
 0x2e8   : > { %2856 = dma.vmem_to_hbm [thread:$0]  (%p3076_p5), %s3665_s14, 16, %s3663_s22, %s1957_s25   ;;  %v1587_v28 = vmul.f32 0.00086505193, %v1586_v27 }
 0x2ea   : > { %1588 = vst.msk [vmem:[%s372_s24] sm:$0x1] %vm1559_vm10, %v1587_v28 }
 0x2eb PF: > { %p2862_p1 = scmp.ge.s32.totalorder %s2981_s12, 2  ;;  %s2003_s16 = sand.u32 1, %s2969_s30  }
 0x2ec   : > { %s2004_s19 = scalar_lea.sflag [#allocation3], %s2003_s16 }
 0x2ed   : > { %p2859_p2 = pnand %p2862_p1, %p3080_p6 }
 0x2ef   : > { %2964 = dma.done.wait (!%p2859_p2), %s2004_s19, 16  }
 0x2f0   : > { %2966 = vsyncadd (!%p2859_p2), %s2004_s19, 4294967280  ;;  %s3731_s14 = sld [smem:[#allocation5_spill]]  ;;  %p20_p5 = scmp.ge.s32.totalorder %s3063_s15, 4  }
 0x2f1   : > { %s3732_s30 = smov %s2973_s10  ;;  %s3733_s10 = smov %s2977_s11 }
 0x2f2   : > { %s3735_s12 = smov %s3063_s15  ;;  %22 = sbr.rel (!%p20_p5) target bundleno = 3 (0x3), region = 118 }
 0x2f6   : > { %s3734_s11 = smov %s3731_s14 }
 0x2f9   :  { %2030 = vsyncpa [#allocation3], 1 }
 0x2fa   :  { %2032 = vsyncpa [#allocation3 + $0x1], 1 }

// kernel: ms_ssim_loss.6
= control target key start
LH: loop header
LB: loop body
LE: loop exit
PB: predicated region body
PF: predicated region fallthrough
CT: control target
= control target key end

     0   :  { %15 = vsyncpa [#allocation3], 0  ;;  %s5035_s0 = inlined_call_operand.vmem [shape: f32[2,88,88], index: 0, kind: input, shape index: {}]   ;;  %s5036_s1 = inlined_call_operand.vmem [shape: f32[2,88,88], index: 1, kind: input, shape index: {}]   ;;  %s5037_s2 = inlined_call_operand.vmem [shape: f32[78,88], index: 2, kind: input, shape index: {}]   ;;  %s5038_s3 = inlined_call_operand.vmem [shape: f32[88,78], index: 3, kind: input, shape index: {}]   ;;  %s5039_s4 = inlined_call_operand.vmem [shape: f32[44,88], index: 4, kind: input, shape index: {}]   ;;  %s5040_s5 = inlined_call_operand.vmem [shape: f32[88,44], index: 5, kind: input, shape index: {}]   ;;  %s5041_s6 = inlined_call_operand.hbm [shape: f32[2,1,1], index: 6, kind: output, shape index: {0}]   ;;  %s5042_s7 = inlined_call_operand.vmem [shape: f32[2,1,1], index: 7, kind: output, shape index: {1}]   ;;  %s5043_s8 = inlined_call_operand.vmem [shape: f32[2,44,44], index: 8, kind: output, shape index: {2}]   ;;  %s5044_s9 = inlined_call_operand.vmem [shape: f32[2,44,44], index: 9, kind: output, shape index: {3}]  }
   0x1   :  { %17 = vsyncpa [#allocation3 + $0x1], 0  ;;  %s4099_s30 = smov 0   ;;  %s4101_s10 = smov 0  }
   0x2   :  { %s4103_s11 = smov 0   ;;  %s4105_s12 = smov 0  }
   0x3 LB: > { %s4120_s13 = sadd.s32 4294967295, %s4046_s12   ;;  %s2716_s14 = sadd.s32 4294967294, %s4046_s12   ;;  %s4046_s12 = sphi %s4105_s12, %s5050_s12   ;;  %s4042_s11 = sphi %s4103_s11, %s5049_s11   ;;  %s4038_s10 = sphi %s4101_s10, %s5048_s10   ;;  %s4034_s30 = sphi %s4099_s30, %s5047_s30  }
   0x4   : > { %s4124_s15 = sadd.s32 1, %s4046_s12   ;;  %s166_s16 = sadd.s32 1, %s4042_s11 }
   0x5   : > { %s163_s17 = ssub.s32 %s4046_s12, %s4124_s15  ;;  %p176_p0 = scmp.ne.s32.totalorder %s4042_s11, %s4038_s10 }
   0x6   : > { %p164_p1 = scmp.eq.s32.totalorder %s163_s17, 0  ;;  %p177_p2 = scmp.eq.s32.totalorder %s4120_s13, 1 }
   0x7   : > { %p182_p3 = scmp.ne.s32.totalorder %s4038_s10, %s4034_s30  ;;  %p183_p4 = scmp.eq.s32.totalorder %s2716_s14, 1 }
   0x8   : > { %s4135_s18 = scalar_select %p164_p1, %s4042_s11, %s166_s16  }
   0x9   : > { %p4137_p5 = por %p177_p2, %p176_p0  ;;  %p4141_p6 = por %p183_p4, %p182_p3 }
   0xa   : > { %p2719_p7 = scmp.ge.s32.totalorder %s4046_s12, 1  ;;  %p307_p8 = scmp.lt.s32.totalorder %s4046_s12, 3 }
   0xc   : > { %p308_p9 = pnand %p2719_p7, %p307_p8 }
   0xd   : > { %p360_p10 = scmp.lt.s32.totalorder (!%p308_p9), %s4120_s13, 1  ;;  %v4151_v0 = vld [vmem:[%s5037_s2] sm:$0xff] (!%p308_p9)  ;;  %vm426_vm0 = vcmask (!%p308_p9), 719872   ;;  %v416_v32 = vld [vmem:[%s5038_s3 + $0x8] sm:$0xff] (!%p308_p9)  ;;  %v417_v33 = vld [vmem:[%s5038_s3 + $0x10] sm:$0xff] (!%p308_p9)  ;;  %vm1980_vm1 = vcmask (!%p308_p9), 637952  }
   0xe   : > { %311 = sbr.rel (%p308_p9) target bundleno = 784 (0x310), region = 44  ;;  %3151 = vmatprep.mubr.msk.f32.mxu0 (!%p308_p9), %vm426_vm0, %v4151_v0  ;;  %v415_v27 = vld [vmem:[%s5038_s3] sm:$0xff] (!%p308_p9)  ;;  %v418_v34 = vld [vmem:[%s5038_s3 + $0x18] sm:$0xff] (!%p308_p9)  ;;  %v420_v48 = vld [vmem:[%s5038_s3 + $0x28] sm:$0xff] (!%p308_p9)  ;;  %vm2008_vm2 = vcmask (!%p308_p9), 635904   ;;  %vm2323_vm3 = vcmask (!%p308_p9), 359424  }
   0xf   : > { %v4296_v44 = vpack.c.bf16 (!%p308_p9), %v416_v32, %v415_v27  ;;  %v4298_v45 = vpack.c.bf16 (!%p308_p9), %v418_v34, %v417_v33  ;;  %v419_v47 = vld [vmem:[%s5038_s3 + $0x20] sm:$0xff] (!%p308_p9)  ;;  %v421_v52 = vld [vmem:[%s5038_s3 + $0x30] sm:$0xff] (!%p308_p9)  ;;  %v422_v53 = vld [vmem:[%s5038_s3 + $0x38] sm:$0xff] (!%p308_p9)  ;;  %vm2329_vm4 = vcmask (!%p308_p9), 355328   ;;  %vm2020_vm5 = vcmask (!%p308_p9), 1045504   ;;  %s339_s28 = sand.u32 (!%p308_p9), 1, %s4038_s10  }
  0x10   : > { %v4316_v50 = vpack.c.bf16 (!%p308_p9), %v420_v48, %v419_v47  ;;  %v4333_v54 = vld [vmem:[%s5037_s2 + $0x8] sm:$0xff] (!%p308_p9)  ;;  %v4339_v55 = vld [vmem:[%s5037_s2 + $0x10] sm:$0xff] (!%p308_p9)  ;;  %v4347_v57 = vpack.c.bf16 (!%p308_p9), %v422_v53, %v421_v52  ;;  %v423_v58 = vld [vmem:[%s5038_s3 + $0x40] sm:$0xff] (!%p308_p9)  ;;  %s340_s29 = scalar_lea.vmem (!%p308_p9), [#allocation2], %s339_s28  ;;  %vm2030_vm6 = vcmask (!%p308_p9), 0   ;;  %s2546_s25 = scalar_lea.sflag (!%p308_p9), [#allocation3], %s339_s28 }
  0x11   : > { %3644 = vmatprep.subr.bf16.mxu1 (!%p308_p9), %v4296_v44  ;;  %v424_v59 = vld [vmem:[%s5038_s3 + $0x48] sm:$0xff] (!%p308_p9)  ;;  %v4364_v60 = vld [vmem:[%s5037_s2 + $0x18] sm:$0xff] (!%p308_p9)  ;;  %v4370_v61 = vld [vmem:[%s5037_s2 + $0x20] sm:$0xff] (!%p308_p9)  ;;  %s2571_s16 = sshll.u32 (!%p308_p9), %s340_s29, 4  ;;  %s4984_s16 = int_to_ptr.vmem [resolvable:$true] %s2571_s16 }
  0x12   : > { %3646 = vmatpush3.bf16.msra.mxu1 (!%p308_p9), %v4296_v44  ;;  %v4378_v63 = vpack.c.bf16 (!%p308_p9), %v424_v59, %v423_v58  ;;  %v4410_v27 = vld [vmem:[%s5037_s2 + $0x38] sm:$0xff] (!%p308_p9) }
  0x13   : > { %3648 = vmatprep.subr.bf16.mxu1 (!%p308_p9), %v4298_v45 }
  0x15   : > { %s4156_s23 = scalar_select %p360_p10, %s4120_s13, 1 }
  0x16   : > { %3650 = vmatpush3.bf16.msra.mxu1 %v4298_v45 }
  0x17   : > { %s3903_s24 = smul.u32 88, %s4156_s23  ;;  %3652 = vmatprep.subr.bf16.mxu1 %v4316_v50 }
  0x18   : > { %s3904_s17 = smul.u32 48, %s4156_s23 }
  0x19   : > { %s4162_s27 = scalar_lea.vmem %s5035_s0, %s3903_s24  ;;  %s4200_s14 = scalar_lea.vmem %s5036_s1, %s3903_s24 }
  0x1a   : > { %v4165_v1 = vld [vmem:[%s4162_s27] sm:$0xff]  ;;  %v4168_v2 = vld [vmem:[%s4162_s27 + $0x8] sm:$0xff]  ;;  %v4171_v3 = vld [vmem:[%s4162_s27 + $0x10] sm:$0xff]  ;;  %3654 = vmatpush3.bf16.msra.mxu1 %v4316_v50  ;;  %s377_s24 = scalar_lea.vmem %s5043_s8, %s3904_s17  ;;  %s382_s26 = scalar_lea.vmem %s5044_s9, %s3904_s17 }
  0x1b   : > { %v4175_v4 = vpack.c.bf16 %v4168_v2, %v4165_v1  ;;  %v4178_v5 = vld [vmem:[%s4162_s27 + $0x18] sm:$0xff]  ;;  %v4185_v7 = vld [vmem:[%s4162_s27 + $0x20] sm:$0xff]  ;;  %v4188_v8 = vld [vmem:[%s4162_s27 + $0x28] sm:$0xff]  ;;  %3656 = vmatprep.subr.bf16.mxu1 %v4347_v57  ;;  %v977_v32 = vmul.f32 %v4165_v1, %v4165_v1  ;;  %v978_v33 = vmul.f32 %v4168_v2, %v4168_v2 }
  0x1c   : > { %v4182_v6 = vpack.c.bf16 %v4178_v5, %v4171_v3  ;;  %v4195_v9 = vpack.c.bf16 %v4188_v8, %v4185_v7  ;;  %v4203_v10 = vld [vmem:[%s4162_s27 + $0x30] sm:$0xff]  ;;  %v4206_v11 = vld [vmem:[%s4162_s27 + $0x38] sm:$0xff]  ;;  %v4210_v12 = vld [vmem:[%s4162_s27 + $0x40] sm:$0xff] }
  0x1d   : > { %3624 = vmatprep.subr.bf16.mxu0 %v4175_v4  ;;  %v4213_v13 = vld [vmem:[%s4162_s27 + $0x48] sm:$0xff]  ;;  %v4216_v14 = vld [vmem:[%s4200_s14] sm:$0xff]  ;;  %v4221_v15 = vpack.c.bf16 %v4206_v11, %v4203_v10  ;;  %v4227_v17 = vld [vmem:[%s4200_s14 + $0x10] sm:$0xff]  ;;  %v985_v47 = vmul.f32 %v4210_v12, %v4210_v12 }
  0x1e   : > { %3626 = vmatpush3.bf16.msra.mxu0 %v4175_v4  ;;  %v4224_v16 = vld [vmem:[%s4200_s14 + $0x8] sm:$0xff]  ;;  %v4230_v18 = vld [vmem:[%s4200_s14 + $0x18] sm:$0xff]  ;;  %v4233_v19 = vld [vmem:[%s4200_s14 + $0x20] sm:$0xff]  ;;  %v1519_v24 = vmul.f32 %v4216_v14, %v4165_v1  ;;  %v1521_v26 = vmul.f32 %v4227_v17, %v4171_v3  ;;  %v4259_v28 = vpack.c.bf16 %v4213_v13, %v4210_v12  ;;  %3658 = vmatpush3.bf16.msra.mxu1 %v4347_v57 }
  0x1f   : > { %3628 = vmatprep.subr.bf16.mxu0 %v4182_v6  ;;  %v4236_v20 = vld [vmem:[%s4200_s14 + $0x28] sm:$0xff]  ;;  %v4239_v21 = vld [vmem:[%s4200_s14 + $0x30] sm:$0xff]  ;;  %v4242_v22 = vld [vmem:[%s4200_s14 + $0x38] sm:$0xff]  ;;  %v1520_v25 = vmul.f32 %v4224_v16, %v4168_v2  ;;  %v1522_v29 = vmul.f32 %v4230_v18, %v4178_v5  ;;  %v1523_v30 = vmul.f32 %v4233_v19, %v4185_v7  ;;  %v4322_v51 = vpack.c.bf16 %v4224_v16, %v4216_v14 }
  0x20   : > { %v4245_v23 = vld [vmem:[%s4200_s14 + $0x40] sm:$0xff]  ;;  %v1524_v31 = vmul.f32 %v4236_v20, %v4188_v8  ;;  %v4278_v35 = vld [vmem:[%s4200_s14 + $0x48] sm:$0xff]  ;;  %v1525_v37 = vmul.f32 %v4239_v21, %v4203_v10  ;;  %v1526_v38 = vmul.f32 %v4242_v22, %v4206_v11  ;;  %v4312_v49 = vld [vmem:[%s4162_s27 + $0x50] sm:$0xff]  ;;  %v4343_v56 = vpack.c.bf16 %v4230_v18, %v4227_v17  ;;  %3660 = vmatprep.subr.bf16.mxu1 %v4378_v63  ;;  %s372_s27 = scalar_lea.vmem %s5042_s7, %s4156_s23 }
  0x21   : > { %v4280_v36 = vpack.c.bf16 %v1520_v25, %v1519_v24  ;;  %v1527_v39 = vmul.f32 %v4245_v23, %v4210_v12  ;;  %v4288_v40 = vpack.c.bf16 %v1522_v29, %v1521_v26  ;;  %v1528_v42 = vmul.f32 %v4278_v35, %v4213_v13  ;;  %v4388_v24 = vld [vmem:[%s5037_s2 + $0x28] sm:$0xff]  ;;  %v4394_v25 = vld [vmem:[%s5037_s2 + $0x30] sm:$0xff]  ;;  %v4416_v29 = vld [vmem:[%s5037_s2 + $0x40] sm:$0xff] }
  0x22   : > { %3630 = vmatpush3.bf16.msra.mxu0 %v4182_v6  ;;  %v4290_v41 = vpack.c.bf16 %v1524_v31, %v1523_v30  ;;  %v4294_v43 = vpack.c.bf16 %v1526_v38, %v1525_v37  ;;  %v4374_v62 = vpack.c.bf16 %v4236_v20, %v4233_v19  ;;  %v4398_v26 = vpack.c.bf16 %v4242_v22, %v4239_v21  ;;  %v4431_v31 = vld [vmem:[%s5037_s2 + $0x48] sm:$0x3f]  ;;  %v4439_v34 = vld [vmem:[%s4200_s14 + $0x50] sm:$0xff]  ;;  %s2848_s14 = sshll.u32 %s4120_s13, 4 }
  0x23   : > { %3632 = vmatprep.subr.bf16.mxu0 %v4195_v9  ;;  %v4301_v46 = vpack.c.bf16 %v1528_v42, %v1527_v39  ;;  %v4420_v30 = vpack.c.bf16 %v4278_v35, %v4245_v23  ;;  %3662 = vmatpush3.bf16.msra.mxu1 %v4378_v63  ;;  %v979_v37 = vmul.f32 %v4171_v3, %v4171_v3  ;;  %s4982_s22 = scalar_lea.hbm %s5041_s6, %s2848_s14  ;;  %s4048_s14 = smov [#allocation2]  }
  0x24   : > { %v980_v38 = vmul.f32 %v4178_v5, %v4178_v5  ;;  %v3703_v1 = vpack.c.bf16 %v978_v33, %v977_v32  ;;  %v981_v39 = vmul.f32 %v4185_v7, %v4185_v7  ;;  %v982_v42 = vmul.f32 %v4188_v8, %v4188_v8  ;;  %s3988_s17 = sshll.u32 %s4048_s14, 4  ;;  %s3989_s17 = int_to_ptr.vmem [resolvable:$false] %s3988_s17 }
  0x25   : > { %v983_v5 = vmul.f32 %v4203_v10, %v4203_v10  ;;  %v984_v7 = vmul.f32 %v4206_v11, %v4206_v11  ;;  %v986_v48 = vmul.f32 %v4213_v13, %v4213_v13  ;;  %v987_v11 = vmul.f32 %v4312_v49, %v4312_v49  ;;  %s3990_s21 = scalar_lea.vmem %s3989_s17, 32  ;;  %p3991_p0 = scmp.lt.s32.totalorder %s4984_s16, %s3989_s17 }
  0x26   : > { %3634 = vmatpush3.bf16.msra.mxu0 %v4195_v9  ;;  %v3707_v2 = vpack.c.bf16 %v980_v38, %v979_v37  ;;  %v3711_v3 = vpack.c.bf16 %v982_v42, %v981_v39  ;;  %v1248_v12 = vmul.f32 %v4216_v14, %v4216_v14  ;;  %v1249_v13 = vmul.f32 %v4224_v16, %v4224_v16 }
  0x27   : > { %3636 = vmatprep.subr.bf16.mxu0 %v4221_v15  ;;  %v3715_v8 = vpack.c.bf16 %v984_v7, %v983_v5  ;;  %v3719_v10 = vpack.c.bf16 %v986_v48, %v985_v47  ;;  %v1250_v52 = vmul.f32 %v4227_v17, %v4227_v17  ;;  %v1251_v53 = vmul.f32 %v4230_v18, %v4230_v18 }
  0x28   : > { %v3743_v58 = vpack.c.bf16 %v1249_v13, %v1248_v12  ;;  %v1252_v14 = vmul.f32 %v4233_v19, %v4233_v19  ;;  %v1253_v16 = vmul.f32 %v4236_v20, %v4236_v20  ;;  %v1254_v18 = vmul.f32 %v4239_v21, %v4239_v21 }
  0x29   : > { %v3747_v59 = vpack.c.bf16 %v1251_v53, %v1250_v52  ;;  %v1255_v19 = vmul.f32 %v4242_v22, %v4242_v22  ;;  %v1256_v32 = vmul.f32 %v4245_v23, %v4245_v23  ;;  %v1257_v33 = vmul.f32 %v4278_v35, %v4278_v35  ;;  %v4563_v35 = vld [vmem:[%s5038_s3 + $0x50] sm:$0xff] }
  0x2a   : > { %3638 = vmatpush3.bf16.msra.mxu0 %v4221_v15  ;;  %v3751_v17 = vpack.c.bf16 %v1253_v16, %v1252_v14  ;;  %v1258_v22 = vmul.f32 %v4439_v34, %v4439_v34  ;;  %v1529_v23 = vmul.f32 %v4439_v34, %v4312_v49  ;;  %3186 = vmatprep.subr.mxu1 %v4563_v35 }
  0x2b   : > { %3640 = vmatprep.subr.bf16.mxu0 %v4259_v28  ;;  %v3755_v20 = vpack.c.bf16 %v1255_v19, %v1254_v18  ;;  %v3759_v21 = vpack.c.bf16 %v1257_v33, %v1256_v32  ;;  %3187 = vmatpush3.msra.mxu1 %v4563_v35  ;;  %v2086_v19 = vld [vmem:[%s5040_s5] sm:$0xff]  ;;  %v2088_v33 = vld [vmem:[%s5040_s5 + $0x10] sm:$0xff] }
  0x2c   : > { %3684 = vmatprep.subr.bf16.mxu1 %v4296_v44 }
  0x2e   : > { %3642 = vmatpush3.bf16.msra.mxu0 %v4259_v28 }
  0x2f   : > { %3149 = vmatprep.subr.mxu0 %v4312_v49 }
  0x32   : > { %3150 = vmatpush3.msra.mxu0 %v4312_v49 }
  0x33   : > { %3152 = vmatmul.mubr.msk.f32.vlgmr.msra.gmra.mrb[0].mxu0 %vm426_vm0, %v4333_v54  ;;  %3664 = vmatprep.subr.bf16.mxu0 %v4322_v51 }
  0x34   : > { %3666 = vmatpush3.bf16.msra.mxu0 %v4322_v51  ;;  %3154 = vmatprep.mubr.msk.f32.mxu0 %vm426_vm0, %v4339_v55 }
  0x35   : > { %3668 = vmatprep.subr.bf16.mxu0 %v4343_v56 }
  0x37   : > { %3155 = vmatmul.mubr.msk.f32.gmra.mrb[2].mxu0 %vm426_vm0, %v4364_v60 }
  0x38   : > { %3670 = vmatpush3.bf16.msra.mxu0 %v4343_v56  ;;  %3157 = vmatprep.mubr.msk.f32.mxu0 %vm426_vm0, %v4370_v61 }
  0x39   : > { %3672 = vmatprep.subr.bf16.mxu0 %v4374_v62 }
  0x3b   : > { %3158 = vmatmul.mubr.msk.f32.gmra.mrb[4].mxu0 %vm426_vm0, %v4388_v24 }
  0x3c   : > { %3674 = vmatpush3.bf16.msra.mxu0 %v4374_v62  ;;  %3160 = vmatprep.mubr.msk.f32.mxu0 %vm426_vm0, %v4394_v25 }
  0x3d   : > { %3676 = vmatprep.subr.bf16.mxu0 %v4398_v26 }
  0x3f   : > { %3161 = vmatmul.mubr.msk.f32.gmra.mrb[6].mxu0 %vm426_vm0, %v4410_v27 }
  0x40   : > { %3678 = vmatpush3.bf16.msra.mxu0 %v4398_v26  ;;  %3163 = vmatprep.mubr.msk.f32.mxu0 %vm426_vm0, %v4416_v29 }
  0x41   : > { %3680 = vmatprep.subr.bf16.mxu0 %v4420_v30 }
  0x43   : > { %3164 = vmatmul.mubr.msk.f32.gmra.mrb[8].mxu0 %vm426_vm0, %v4431_v31 }
  0x44   : > { %3682 = vmatpush3.bf16.msra.mxu0 %v4420_v30  ;;  %3225 = vmatprep.mubr.msk.f32.mxu0 %vm426_vm0, %v4151_v0 }
  0x45   : > { %3223 = vmatprep.subr.mxu0 %v4439_v34 }
  0x48   : > { %3224 = vmatpush3.msra.mxu0 %v4439_v34 }
  0x49   : > { %3226 = vmatmul.mubr.msk.f32.vlgmr.msra.gmra.mrb[10].mxu0 %vm426_vm0, %v4333_v54  ;;  %3704 = vmatprep.subr.bf16.mxu0 %v3703_v1 }
  0x4a   : > { %3706 = vmatpush3.bf16.msra.mxu0 %v3703_v1  ;;  %3228 = vmatprep.mubr.msk.f32.mxu0 %vm426_vm0, %v4339_v55 }
  0x4b   : > { %3708 = vmatprep.subr.bf16.mxu0 %v3707_v2 }
  0x4d   : > { %3229 = vmatmul.mubr.msk.f32.gmra.mrb[12].mxu0 %vm426_vm0, %v4364_v60 }
  0x4e   : > { %3710 = vmatpush3.bf16.msra.mxu0 %v3707_v2  ;;  %3231 = vmatprep.mubr.msk.f32.mxu0 %vm426_vm0, %v4370_v61 }
  0x4f   : > { %3712 = vmatprep.subr.bf16.mxu0 %v3711_v3 }
  0x51   : > { %3232 = vmatmul.mubr.msk.f32.gmra.mrb[14].mxu0 %vm426_vm0, %v4388_v24 }
  0x52   : > { %3714 = vmatpush3.bf16.msra.mxu0 %v3711_v3  ;;  %3234 = vmatprep.mubr.msk.f32.mxu0 %vm426_vm0, %v4394_v25 }
  0x53   : > { %3716 = vmatprep.subr.bf16.mxu0 %v3715_v8 }
  0x55   : > { %3235 = vmatmul.mubr.msk.f32.gmra.mrb[16].mxu0 %vm426_vm0, %v4410_v27 }
  0x56   : > { %3718 = vmatpush3.bf16.msra.mxu0 %v3715_v8  ;;  %3237 = vmatprep.mubr.msk.f32.mxu0 %vm426_vm0, %v4416_v29 }
  0x57   : > { %3720 = vmatprep.subr.bf16.mxu0 %v3719_v10 }
  0x59   : > { %3238 = vmatmul.mubr.msk.f32.gmra.mrb[18].mxu0 %vm426_vm0, %v4431_v31 }
  0x5a   : > { %3722 = vmatpush3.bf16.msra.mxu0 %v3719_v10  ;;  %3299 = vmatprep.mubr.msk.f32.mxu0 %vm426_vm0, %v4151_v0 }
  0x5b   : > { %3297 = vmatprep.subr.mxu0 %v987_v11 }
  0x5e   : > { %3298 = vmatpush3.msra.mxu0 %v987_v11 }
  0x5f   : > { %3300 = vmatmul.mubr.msk.f32.vlgmr.msra.gmra.mrb[20].mxu0 %vm426_vm0, %v4333_v54  ;;  %3744 = vmatprep.subr.bf16.mxu0 %v3743_v58 }
  0x60   : > { %3746 = vmatpush3.bf16.msra.mxu0 %v3743_v58  ;;  %3302 = vmatprep.mubr.msk.f32.mxu0 %vm426_vm0, %v4339_v55 }
  0x61   : > { %3748 = vmatprep.subr.bf16.mxu0 %v3747_v59 }
  0x63   : > { %3303 = vmatmul.mubr.msk.f32.gmra.mrb[22].mxu0 %vm426_vm0, %v4364_v60 }
  0x64   : > { %3750 = vmatpush3.bf16.msra.mxu0 %v3747_v59  ;;  %3305 = vmatprep.mubr.msk.f32.mxu0 %vm426_vm0, %v4370_v61 }
  0x65   : > { %3752 = vmatprep.subr.bf16.mxu0 %v3751_v17 }
  0x67   : > { %3306 = vmatmul.mubr.msk.f32.gmra.mrb[24].mxu0 %vm426_vm0, %v4388_v24 }
  0x68   : > { %3754 = vmatpush3.bf16.msra.mxu0 %v3751_v17  ;;  %3308 = vmatprep.mubr.msk.f32.mxu0 %vm426_vm0, %v4394_v25 }
  0x69   : > { %3756 = vmatprep.subr.bf16.mxu0 %v3755_v20 }
  0x6b   : > { %3309 = vmatmul.mubr.msk.f32.gmra.mrb[26].mxu0 %vm426_vm0, %v4410_v27 }
  0x6c   : > { %3758 = vmatpush3.bf16.msra.mxu0 %v3755_v20  ;;  %3311 = vmatprep.mubr.msk.f32.mxu0 %vm426_vm0, %v4416_v29  ;;  %v2087_v20 = vld [vmem:[%s5040_s5 + $0x8] sm:$0xff] }
  0x6d   : > { %3760 = vmatprep.subr.bf16.mxu0 %v3759_v21  ;;  %v3843_v32 = vpack.c.bf16 %v2087_v20, %v2086_v19 }
  0x6f   : > { %3312 = vmatmul.mubr.msk.f32.gmra.mrb[28].mxu0 %vm426_vm0, %v4431_v31 }
  0x70   : > { %3762 = vmatpush3.bf16.msra.mxu0 %v3759_v21  ;;  %3373 = vmatprep.mubr.msk.f32.mxu0 %vm426_vm0, %v4151_v0  ;;  %v2089_v21 = vld [vmem:[%s5040_s5 + $0x18] sm:$0xff] }
  0x71   : > { %3371 = vmatprep.subr.mxu0 %v1258_v22 }
  0x74   : > { %3372 = vmatpush3.msra.mxu0 %v1258_v22  ;;  %v3847_v22 = vpack.c.bf16 %v2089_v21, %v2088_v33 }
  0x75   : > { %3374 = vmatmul.mubr.msk.f32.vlgmr.msra.gmra.mrb[30].mxu0 %vm426_vm0, %v4333_v54  ;;  %3784 = vmatprep.subr.bf16.mxu0 %v4280_v36 }
  0x76   : > { %3786 = vmatpush3.bf16.msra.mxu0 %v4280_v36  ;;  %3376 = vmatprep.mubr.msk.f32.mxu0 %vm426_vm0, %v4339_v55 }
  0x77   : > { %3788 = vmatprep.subr.bf16.mxu0 %v4288_v40 }
  0x79   : > { %3377 = vmatmul.mubr.msk.f32.gmra.mrb[32].mxu0 %vm426_vm0, %v4364_v60 }
  0x7a   : > { %3790 = vmatpush3.bf16.msra.mxu0 %v4288_v40  ;;  %3379 = vmatprep.mubr.msk.f32.mxu0 %vm426_vm0, %v4370_v61 }
  0x7b   : > { %3792 = vmatprep.subr.bf16.mxu0 %v4290_v41 }
  0x7d   : > { %3380 = vmatmul.mubr.msk.f32.gmra.mrb[34].mxu0 %vm426_vm0, %v4388_v24 }
  0x7e   : > { %3794 = vmatpush3.bf16.msra.mxu0 %v4290_v41  ;;  %3382 = vmatprep.mubr.msk.f32.mxu0 %vm426_vm0, %v4394_v25 }
  0x7f   : > { %3796 = vmatprep.subr.bf16.mxu0 %v4294_v43 }
  0x81   : > { %3383 = vmatmul.mubr.msk.f32.gmra.mrb[36].mxu0 %vm426_vm0, %v4410_v27 }
  0x82   : > { %3798 = vmatpush3.bf16.msra.mxu0 %v4294_v43  ;;  %3385 = vmatprep.mubr.msk.f32.mxu0 %vm426_vm0, %v4416_v29 }
  0x83   : > { %3800 = vmatprep.subr.bf16.mxu0 %v4301_v46 }
  0x85   : > { %3386 = vmatmul.mubr.msk.f32.gmra.mrb[38].mxu0 %vm426_vm0, %v4431_v31 }
  0x86   : > { %3802 = vmatpush3.bf16.msra.mxu0 %v4301_v46  ;;  %3447 = vmatprep.mubr.msk.f32.mxu0 %vm426_vm0, %v4151_v0  ;;  %v2080_v0 = vld [vmem:[%s5039_s4] sm:$0xff] }
  0x87   : > { %3445 = vmatprep.subr.mxu0 %v1529_v23 }
  0x8a   : > { %3446 = vmatpush3.msra.mxu0 %v1529_v23  ;;  %v2090_v23 = vld [vmem:[%s5040_s5 + $0x20] sm:$0xff] }
  0x8b   : > { %3448 = vmatmul.mubr.msk.f32.vlgmr.msra.gmra.mrb[40].mxu0 %vm426_vm0, %v4333_v54  ;;  %3824 = vmatprep.subr.bf16.mxu0 %v4175_v4 }
  0x8c   : > { %3450 = vmatprep.mubr.msk.f32.mxu0 %vm426_vm0, %v4339_v55  ;;  %3826 = vmatpush3.bf16.msra.mxu0 %v4175_v4  ;;  %v2081_v4 = vld [vmem:[%s5039_s4 + $0x8] sm:$0xff] }
  0x8d   : > { %3828 = vmatprep.subr.bf16.mxu0 %v4182_v6 }
  0x8f   : > { %3451 = vmatmul.mubr.msk.f32.gmra.mrb[42].mxu0 %vm426_vm0, %v4364_v60 }
  0x90   : > { %3453 = vmatprep.mubr.msk.f32.mxu0 %vm426_vm0, %v4370_v61  ;;  %3830 = vmatpush3.bf16.msra.mxu0 %v4182_v6  ;;  %v2082_v6 = vld [vmem:[%s5039_s4 + $0x10] sm:$0xff] }
  0x91   : > { %3832 = vmatprep.subr.bf16.mxu0 %v4195_v9 }
  0x93   : > { %3454 = vmatmul.mubr.msk.f32.gmra.mrb[44].mxu0 %vm426_vm0, %v4388_v24 }
  0x94   : > { %3456 = vmatprep.mubr.msk.f32.mxu0 %vm426_vm0, %v4394_v25  ;;  %3834 = vmatpush3.bf16.msra.mxu0 %v4195_v9  ;;  %v2083_v9 = vld [vmem:[%s5039_s4 + $0x18] sm:$0xff] }
  0x95   : > { %3836 = vmatprep.subr.bf16.mxu0 %v4221_v15 }
  0x97   : > { %3457 = vmatmul.mubr.msk.f32.gmra.mrb[46].mxu0 %vm426_vm0, %v4410_v27 }
  0x98   : > { %3459 = vmatprep.mubr.msk.f32.mxu0 %vm426_vm0, %v4416_v29  ;;  %3838 = vmatpush3.bf16.msra.mxu0 %v4221_v15  ;;  %v2084_v15 = vld [vmem:[%s5039_s4 + $0x20] sm:$0xff] }
  0x99   : > { %3840 = vmatprep.subr.bf16.mxu0 %v4259_v28 }
  0x9b   : > { %3460 = vmatmul.mubr.msk.f32.gmra.mrb[48].mxu0 %vm426_vm0, %v4431_v31 }
  0x9c   : > { %3842 = vmatpush3.bf16.msra.mxu0 %v4259_v28  ;;  %3521 = vmatprep.mubr.msk.f32.mxu0 %vm426_vm0, %v2080_v0  ;;  %v2085_v28 = vld [vmem:[%s5039_s4 + $0x28] sm:$0xf] }
  0x9d   : > { %3519 = vmatprep.subr.mxu0 %v4312_v49 }
  0xa0   : > { %3520 = vmatpush3.msra.mxu0 %v4312_v49 }
  0xa1   : > { %3864 = vmatprep.subr.bf16.mxu0 %v4322_v51  ;;  %3522 = vmatmul.mubr.msk.f32.vlgmr.msra.gmra.mrb[50].mxu0 %vm426_vm0, %v2081_v4 }
  0xa2   : > { %3866 = vmatpush3.bf16.msra.mxu0 %v4322_v51  ;;  %3524 = vmatprep.mubr.msk.f32.mxu0 %vm426_vm0, %v2082_v6 }
  0xa3   : > { %3868 = vmatprep.subr.bf16.mxu0 %v4343_v56 }
  0xa5   : > { %3525 = vmatmul.mubr.msk.f32.gmra.mrb[52].mxu0 %vm426_vm0, %v2083_v9 }
  0xa6   : > { %3870 = vmatpush3.bf16.msra.mxu0 %v4343_v56  ;;  %3527 = vmatprep.mubr.msk.f32.mxu0 %vm426_vm0, %v2084_v15 }
  0xa7   : > { %3872 = vmatprep.subr.bf16.mxu0 %v4374_v62 }
  0xa9   : > { %3528 = vmatmul.mubr.msk.f32.gmra.mrb[54].mxu0 %vm426_vm0, %v2085_v28 }
  0xaa   : > { %3874 = vmatpush3.bf16.msra.mxu0 %v4374_v62  ;;  %3583 = vmatprep.mubr.msk.f32.mxu0 %vm426_vm0, %v2080_v0 }
  0xab   : > { %3876 = vmatprep.subr.bf16.mxu0 %v4398_v26 }
  0xae   : > { %3878 = vmatpush3.bf16.msra.mxu0 %v4398_v26 }
  0xaf   : > { %3880 = vmatprep.subr.bf16.mxu0 %v4420_v30 }
  0xb2   : > { %3882 = vmatpush3.bf16.msra.mxu0 %v4420_v30 }
  0xb3   : > { %3581 = vmatprep.subr.mxu0 %v4439_v34 }
  0xb6   : > { %3582 = vmatpush3.msra.mxu0 %v4439_v34 }
  0xb7   : > { %3584 = vmatmul.mubr.msk.f32.vlgmr.msra.gmra.mrb[56].mxu0 %vm426_vm0, %v2081_v4  ;;  %v2092_v4 = vld [vmem:[%s5040_s5 + $0x30] sm:$0xff] }
  0xb8   : > { %3586 = vmatprep.mubr.msk.f32.mxu0 %vm426_vm0, %v2082_v6  ;;  %v2093_v6 = vld [vmem:[%s5040_s5 + $0x38] sm:$0xff] }
  0xbb   : > { %3587 = vmatmul.mubr.msk.f32.gmra.mrb[58].mxu0 %vm426_vm0, %v2083_v9  ;;  %v3855_v9 = vpack.c.bf16 %v2093_v6, %v2092_v4 }
  0xbc   : > { %3589 = vmatprep.mubr.msk.f32.mxu0 %vm426_vm0, %v2084_v15  ;;  %v2094_v15 = vld [vmem:[%s5040_s5 + $0x40] sm:$0xff] }
  0xbf   : > { %3590 = vmatmul.mubr.msk.f32.gmra.mrb[60].mxu0 %vm426_vm0, %v2085_v28  ;;  %v2095_v28 = vld [vmem:[%s5040_s5 + $0x48] sm:$0xff] }
 0x106   : > { %v3153_v36 = vpop.f32.mrb[0].mxu0 }
 0x107   : > { %v523_v40 = vpop.f32.mrb[1].mxu0 }
 0x108   : > { %3188 = vmatprep.mubr.msk.f32.mxu1 %vm426_vm0, %v523_v40  ;;  %v2096_v40 = vld [vmem:[%s5040_s5 + $0x50] sm:$0xff] }
 0x109   : > { %3189 = vmatmul.mubr.msk.f32.vlgmr.msra.gmra.mrb[0].mxu1 %vm426_vm0, %v3153_v36  ;;  %v3859_v36 = vpack.c.bf16 %v2095_v28, %v2094_v15 }
 0x10a   : > { %v3156_v41 = vpop.f32.mrb[2].mxu0  ;;  %3686 = vmatpush3.bf16.msra.mxu1 %v4296_v44 }
 0x10b   : > { %v533_v43 = vpop.f32.mrb[3].mxu0  ;;  %3688 = vmatprep.subr.bf16.mxu1 %v4298_v45 }
 0x10c   : > { %3191 = vmatprep.mubr.msk.f32.mxu1 %vm426_vm0, %v533_v43 }
 0x10d   : > { %3192 = vmatmul.mubr.msk.f32.gmra.mrb[2].mxu1 %vm426_vm0, %v3156_v41 }
 0x10e   : > { %v3159_v46 = vpop.f32.mrb[4].mxu0  ;;  %3690 = vmatpush3.bf16.msra.mxu1 %v4298_v45 }
 0x10f   : > { %v543_v49 = vpop.f32.mrb[5].mxu0  ;;  %3692 = vmatprep.subr.bf16.mxu1 %v4316_v50 }
 0x110   : > { %3194 = vmatprep.mubr.msk.f32.mxu1 %vm426_vm0, %v543_v49 }
 0x111   : > { %3195 = vmatmul.mubr.msk.f32.gmra.mrb[4].mxu1 %vm426_vm0, %v3159_v46 }
 0x112   : > { %v3162_v51 = vpop.f32.mrb[6].mxu0  ;;  %3694 = vmatpush3.bf16.msra.mxu1 %v4316_v50 }
 0x113   : > { %v553_v54 = vpop.f32.mrb[7].mxu0  ;;  %3696 = vmatprep.subr.bf16.mxu1 %v4347_v57 }
 0x114   : > { %3197 = vmatprep.mubr.msk.f32.mxu1 %vm426_vm0, %v553_v54 }
 0x115   : > { %3198 = vmatmul.mubr.msk.f32.gmra.mrb[6].mxu1 %vm426_vm0, %v3162_v51 }
 0x116   : > { %v3165_v55 = vpop.f32.mrb[8].mxu0  ;;  %3698 = vmatpush3.bf16.msra.mxu1 %v4347_v57 }
 0x117   : > { %v563_v56 = vpop.f32.mrb[9].mxu0  ;;  %3700 = vmatprep.subr.bf16.mxu1 %v4378_v63 }
 0x118   : > { %3200 = vmatprep.mubr.msk.f32.mxu1 %vm426_vm0, %v563_v56 }
 0x119   : > { %3201 = vmatmul.mubr.msk.f32.gmra.mrb[8].mxu1 %vm426_vm0, %v3165_v55 }
 0x11a   : > { %3702 = vmatpush3.bf16.msra.mxu1 %v4378_v63 }
 0x11b   : > { %3260 = vmatprep.subr.mxu1 %v4563_v35 }
 0x11c   : > { %v3227_v60 = vpop.f32.mrb[10].mxu0 }
 0x11d   : > { %v783_v61 = vpop.f32.mrb[11].mxu0 }
 0x11e   : > { %3261 = vmatpush3.msra.mxu1 %v4563_v35  ;;  %3262 = vmatprep.mubr.msk.f32.mxu1 %vm426_vm0, %v783_v61 }
 0x11f   : > { %3263 = vmatmul.mubr.msk.f32.vlgmr.msra.gmra.mrb[10].mxu1 %vm426_vm0, %v3227_v60  ;;  %3724 = vmatprep.subr.bf16.mxu1 %v4296_v44 }
 0x120   : > { %v3230_v62 = vpop.f32.mrb[12].mxu0  ;;  %3726 = vmatpush3.bf16.msra.mxu1 %v4296_v44 }
 0x121   : > { %v793_v24 = vpop.f32.mrb[13].mxu0  ;;  %3728 = vmatprep.subr.bf16.mxu1 %v4298_v45 }
 0x122   : > { %3265 = vmatprep.mubr.msk.f32.mxu1 %vm426_vm0, %v793_v24 }
 0x123   : > { %3266 = vmatmul.mubr.msk.f32.gmra.mrb[12].mxu1 %vm426_vm0, %v3230_v62 }
 0x124   : > { %v3233_v25 = vpop.f32.mrb[14].mxu0  ;;  %3730 = vmatpush3.bf16.msra.mxu1 %v4298_v45 }
 0x125   : > { %v803_v26 = vpop.f32.mrb[15].mxu0  ;;  %3732 = vmatprep.subr.bf16.mxu1 %v4316_v50 }
 0x126   : > { %3268 = vmatprep.mubr.msk.f32.mxu1 %vm426_vm0, %v803_v26 }
 0x127   : > { %3269 = vmatmul.mubr.msk.f32.gmra.mrb[14].mxu1 %vm426_vm0, %v3233_v25 }
 0x128   : > { %v3236_v27 = vpop.f32.mrb[16].mxu0  ;;  %3734 = vmatpush3.bf16.msra.mxu1 %v4316_v50 }
 0x129   : > { %v813_v29 = vpop.f32.mrb[17].mxu0  ;;  %3736 = vmatprep.subr.bf16.mxu1 %v4347_v57 }
 0x12a   : > { %3271 = vmatprep.mubr.msk.f32.mxu1 %vm426_vm0, %v813_v29 }
 0x12b   : > { %3272 = vmatmul.mubr.msk.f32.gmra.mrb[16].mxu1 %vm426_vm0, %v3236_v27 }
 0x12c   : > { %v3239_v30 = vpop.f32.mrb[18].mxu0  ;;  %3738 = vmatpush3.bf16.msra.mxu1 %v4347_v57 }
 0x12d   : > { %v823_v31 = vpop.f32.mrb[19].mxu0  ;;  %3740 = vmatprep.subr.bf16.mxu1 %v4378_v63 }
 0x12e   : > { %3274 = vmatprep.mubr.msk.f32.mxu1 %vm426_vm0, %v823_v31 }
 0x12f   : > { %3275 = vmatmul.mubr.msk.f32.gmra.mrb[18].mxu1 %vm426_vm0, %v3239_v30 }
 0x130   : > { %3742 = vmatpush3.bf16.msra.mxu1 %v4378_v63 }
 0x131   : > { %3334 = vmatprep.subr.mxu1 %v4563_v35 }
 0x132   : > { %v3301_v34 = vpop.f32.mrb[20].mxu0 }
 0x133   : > { %v1054_v37 = vpop.f32.mrb[21].mxu0 }
 0x134   : > { %3335 = vmatpush3.msra.mxu1 %v4563_v35  ;;  %3336 = vmatprep.mubr.msk.f32.mxu1 %vm426_vm0, %v1054_v37 }
 0x135   : > { %3337 = vmatmul.mubr.msk.f32.vlgmr.msra.gmra.mrb[20].mxu1 %vm426_vm0, %v3301_v34  ;;  %3764 = vmatprep.subr.bf16.mxu1 %v4296_v44 }
 0x136   : > { %v3304_v38 = vpop.f32.mrb[22].mxu0  ;;  %3766 = vmatpush3.bf16.msra.mxu1 %v4296_v44 }
 0x137   : > { %v1064_v1 = vpop.f32.mrb[23].mxu0  ;;  %3768 = vmatprep.subr.bf16.mxu1 %v4298_v45 }
 0x138   : > { %3339 = vmatprep.mubr.msk.f32.mxu1 %vm426_vm0, %v1064_v1 }
 0x139   : > { %3340 = vmatmul.mubr.msk.f32.gmra.mrb[22].mxu1 %vm426_vm0, %v3304_v38 }
 0x13a   : > { %v3307_v2 = vpop.f32.mrb[24].mxu0  ;;  %3770 = vmatpush3.bf16.msra.mxu1 %v4298_v45 }
 0x13b   : > { %v1074_v39 = vpop.f32.mrb[25].mxu0  ;;  %3772 = vmatprep.subr.bf16.mxu1 %v4316_v50 }
 0x13c   : > { %3342 = vmatprep.mubr.msk.f32.mxu1 %vm426_vm0, %v1074_v39 }
 0x13d   : > { %3343 = vmatmul.mubr.msk.f32.gmra.mrb[24].mxu1 %vm426_vm0, %v3307_v2 }
 0x13e   : > { %v3310_v42 = vpop.f32.mrb[26].mxu0  ;;  %3774 = vmatpush3.bf16.msra.mxu1 %v4316_v50 }
 0x13f   : > { %v1084_v3 = vpop.f32.mrb[27].mxu0  ;;  %3776 = vmatprep.subr.bf16.mxu1 %v4347_v57 }
 0x140   : > { %3345 = vmatprep.mubr.msk.f32.mxu1 %vm426_vm0, %v1084_v3 }
 0x141   : > { %3346 = vmatmul.mubr.msk.f32.gmra.mrb[26].mxu1 %vm426_vm0, %v3310_v42 }
 0x142   : > { %v3313_v5 = vpop.f32.mrb[28].mxu0  ;;  %3778 = vmatpush3.bf16.msra.mxu1 %v4347_v57 }
 0x143   : > { %v1094_v7 = vpop.f32.mrb[29].mxu0  ;;  %3780 = vmatprep.subr.bf16.mxu1 %v4378_v63 }
 0x144   : > { %3348 = vmatprep.mubr.msk.f32.mxu1 %vm426_vm0, %v1094_v7 }
 0x145   : > { %3349 = vmatmul.mubr.msk.f32.gmra.mrb[28].mxu1 %vm426_vm0, %v3313_v5 }
 0x146   : > { %3782 = vmatpush3.bf16.msra.mxu1 %v4378_v63 }
 0x147   : > { %3408 = vmatprep.subr.mxu1 %v4563_v35 }
 0x148   : > { %v3375_v8 = vpop.f32.mrb[30].mxu0 }
 0x149   : > { %v1325_v47 = vpop.f32.mrb[31].mxu0 }
 0x14a   : > { %3409 = vmatpush3.msra.mxu1 %v4563_v35  ;;  %3410 = vmatprep.mubr.msk.f32.mxu1 %vm426_vm0, %v1325_v47 }
 0x14b   : > { %3411 = vmatmul.mubr.msk.f32.vlgmr.msra.gmra.mrb[30].mxu1 %vm426_vm0, %v3375_v8  ;;  %3804 = vmatprep.subr.bf16.mxu1 %v4296_v44 }
 0x14c   : > { %v3378_v48 = vpop.f32.mrb[32].mxu0  ;;  %3806 = vmatpush3.bf16.msra.mxu1 %v4296_v44 }
 0x14d   : > { %v1335_v10 = vpop.f32.mrb[33].mxu0  ;;  %3808 = vmatprep.subr.bf16.mxu1 %v4298_v45 }
 0x14e   : > { %3413 = vmatprep.mubr.msk.f32.mxu1 %vm426_vm0, %v1335_v10 }
 0x14f   : > { %3414 = vmatmul.mubr.msk.f32.gmra.mrb[32].mxu1 %vm426_vm0, %v3378_v48 }
 0x150   : > { %v3381_v11 = vpop.f32.mrb[34].mxu0  ;;  %3810 = vmatpush3.bf16.msra.mxu1 %v4298_v45 }
 0x151   : > { %v1345_v12 = vpop.f32.mrb[35].mxu0  ;;  %3812 = vmatprep.subr.bf16.mxu1 %v4316_v50 }
 0x152   : > { %3416 = vmatprep.mubr.msk.f32.mxu1 %vm426_vm0, %v1345_v12 }
 0x153   : > { %3417 = vmatmul.mubr.msk.f32.gmra.mrb[34].mxu1 %vm426_vm0, %v3381_v11 }
 0x154   : > { %v3384_v13 = vpop.f32.mrb[36].mxu0  ;;  %3814 = vmatpush3.bf16.msra.mxu1 %v4316_v50 }
 0x155   : > { %v1355_v44 = vpop.f32.mrb[37].mxu0  ;;  %3816 = vmatprep.subr.bf16.mxu1 %v4347_v57 }
 0x156   : > { %3419 = vmatprep.mubr.msk.f32.mxu1 %vm426_vm0, %v1355_v44 }
 0x157   : > { %3420 = vmatmul.mubr.msk.f32.gmra.mrb[36].mxu1 %vm426_vm0, %v3384_v13 }
 0x158   : > { %v3387_v52 = vpop.f32.mrb[38].mxu0  ;;  %3818 = vmatpush3.bf16.msra.mxu1 %v4347_v57 }
 0x159   : > { %v1365_v45 = vpop.f32.mrb[39].mxu0  ;;  %3820 = vmatprep.subr.bf16.mxu1 %v4378_v63 }
 0x15a   : > { %3422 = vmatprep.mubr.msk.f32.mxu1 %vm426_vm0, %v1365_v45 }
 0x15b   : > { %3423 = vmatmul.mubr.msk.f32.gmra.mrb[38].mxu1 %vm426_vm0, %v3387_v52 }
 0x15c   : > { %3822 = vmatpush3.bf16.msra.mxu1 %v4378_v63 }
 0x15d   : > { %3482 = vmatprep.subr.mxu1 %v4563_v35 }
 0x15e   : > { %v3449_v50 = vpop.f32.mrb[40].mxu0 }
 0x15f   : > { %v1596_v53 = vpop.f32.mrb[41].mxu0 }
 0x160   : > { %3483 = vmatpush3.msra.mxu1 %v4563_v35  ;;  %3484 = vmatprep.mubr.msk.f32.mxu1 %vm426_vm0, %v1596_v53  ;;  %v2091_v35 = vld [vmem:[%s5040_s5 + $0x28] sm:$0xff] }
 0x161   : > { %3485 = vmatmul.mubr.msk.f32.vlgmr.msra.gmra.mrb[40].mxu1 %vm426_vm0, %v3449_v50  ;;  %3844 = vmatprep.subr.bf16.mxu1 %v3843_v32  ;;  %v3851_v0 = vpack.c.bf16 %v2091_v35, %v2090_v23 }
 0x162   : > { %v3452_v57 = vpop.f32.mrb[42].mxu0  ;;  %3846 = vmatpush3.bf16.msra.mxu1 %v3843_v32 }
 0x163   : > { %v1606_v58 = vpop.f32.mrb[43].mxu0  ;;  %3848 = vmatprep.subr.bf16.mxu1 %v3847_v22 }
 0x164   : > { %3487 = vmatprep.mubr.msk.f32.mxu1 %vm426_vm0, %v1606_v58 }
 0x165   : > { %3488 = vmatmul.mubr.msk.f32.gmra.mrb[42].mxu1 %vm426_vm0, %v3452_v57 }
 0x166   : > { %v3455_v59 = vpop.f32.mrb[44].mxu0  ;;  %3850 = vmatpush3.bf16.msra.mxu1 %v3847_v22 }
 0x167   : > { %v1616_v14 = vpop.f32.mrb[45].mxu0  ;;  %3852 = vmatprep.subr.bf16.mxu1 %v3851_v0 }
 0x168   : > { %3490 = vmatprep.mubr.msk.f32.mxu1 %vm426_vm0, %v1616_v14 }
 0x169   : > { %3491 = vmatmul.mubr.msk.f32.gmra.mrb[44].mxu1 %vm426_vm0, %v3455_v59 }
 0x16a   : > { %v3458_v63 = vpop.f32.mrb[46].mxu0  ;;  %3854 = vmatpush3.bf16.msra.mxu1 %v3851_v0 }
 0x16b   : > { %v1626_v16 = vpop.f32.mrb[47].mxu0  ;;  %3856 = vmatprep.subr.bf16.mxu1 %v3855_v9 }
 0x16c   : > { %3493 = vmatprep.mubr.msk.f32.mxu1 %vm426_vm0, %v1626_v16 }
 0x16d   : > { %3494 = vmatmul.mubr.msk.f32.gmra.mrb[46].mxu1 %vm426_vm0, %v3458_v63 }
 0x16e   : > { %v3461_v17 = vpop.f32.mrb[48].mxu0  ;;  %3858 = vmatpush3.bf16.msra.mxu1 %v3855_v9 }
 0x16f   : > { %v1636_v18 = vpop.f32.mrb[49].mxu0  ;;  %3860 = vmatprep.subr.bf16.mxu1 %v3859_v36 }
 0x170   : > { %3496 = vmatprep.mubr.msk.f32.mxu1 %vm426_vm0, %v1636_v18 }
 0x171   : > { %3497 = vmatmul.mubr.msk.f32.gmra.mrb[48].mxu1 %vm426_vm0, %v3461_v17 }
 0x172   : > { %3862 = vmatpush3.bf16.msra.mxu1 %v3859_v36 }
 0x173   : > { %3550 = vmatprep.subr.mxu1 %v2096_v40 }
 0x174   : > { %v3523_v41 = vpop.f32.mrb[50].mxu0 }
 0x175   : > { %v2181_v43 = vpop.f32.mrb[51].mxu0 }
 0x176   : > { %3551 = vmatpush3.msra.mxu1 %v2096_v40  ;;  %3552 = vmatprep.mubr.msk.f32.mxu1 %vm426_vm0, %v2181_v43 }
 0x177   : > { %3884 = vmatprep.subr.bf16.mxu1 %v3843_v32  ;;  %3553 = vmatmul.mubr.msk.f32.vlgmr.msra.gmra.mrb[50].mxu1 %vm426_vm0, %v3523_v41 }
 0x178   : > { %3886 = vmatpush3.bf16.msra.mxu1 %v3843_v32  ;;  %v3526_v46 = vpop.f32.mrb[52].mxu0 }
 0x179   : > { %3888 = vmatprep.subr.bf16.mxu1 %v3847_v22  ;;  %v2191_v49 = vpop.f32.mrb[53].mxu0 }
 0x17a   : > { %3555 = vmatprep.mubr.msk.f32.mxu1 %vm426_vm0, %v2191_v49 }
 0x17b   : > { %3556 = vmatmul.mubr.msk.f32.gmra.mrb[52].mxu1 %vm426_vm0, %v3526_v46 }
 0x17c   : > { %3890 = vmatpush3.bf16.msra.mxu1 %v3847_v22  ;;  %v3529_v51 = vpop.f32.mrb[54].mxu0 }
 0x17d   : > { %3892 = vmatprep.subr.bf16.mxu1 %v3851_v0  ;;  %v2201_v54 = vpop.f32.mrb[55].mxu0 }
 0x17e   : > { %3558 = vmatprep.mubr.msk.f32.mxu1 %vm426_vm0, %v2201_v54 }
 0x17f   : > { %3559 = vmatmul.mubr.msk.f32.gmra.mrb[54].mxu1 %vm426_vm0, %v3529_v51 }
 0x180   : > { %3894 = vmatpush3.bf16.msra.mxu1 %v3851_v0 }
 0x181   : > { %3896 = vmatprep.subr.bf16.mxu1 %v3855_v9 }
 0x184   : > { %3898 = vmatpush3.bf16.msra.mxu1 %v3855_v9 }
 0x185   : > { %3900 = vmatprep.subr.bf16.mxu1 %v3859_v36 }
 0x188   : > { %3902 = vmatpush3.bf16.msra.mxu1 %v3859_v36 }
 0x189   : > { %3612 = vmatprep.subr.mxu1 %v2096_v40 }
 0x18a   : > { %v3585_v55 = vpop.f32.mrb[56].mxu0 }
 0x18b   : > { %v2397_v56 = vpop.f32.mrb[57].mxu0 }
 0x18c   : > { %3613 = vmatpush3.msra.mxu1 %v2096_v40  ;;  %3614 = vmatprep.mubr.msk.f32.mxu1 %vm426_vm0, %v2397_v56 }
 0x18d   : > { %3615 = vmatmul.mubr.msk.f32.vlgmr.msra.gmra.mrb[56].mxu1 %vm426_vm0, %v3585_v55 }
 0x18e   : > { %v3588_v60 = vpop.f32.mrb[58].mxu0 }
 0x18f   : > { %v2407_v61 = vpop.f32.mrb[59].mxu0 }
 0x190   : > { %3617 = vmatprep.mubr.msk.f32.mxu1 %vm426_vm0, %v2407_v61 }
 0x191   : > { %3618 = vmatmul.mubr.msk.f32.gmra.mrb[58].mxu1 %vm426_vm0, %v3588_v60 }
 0x192   : > { %v3591_v62 = vpop.f32.mrb[60].mxu0 }
 0x193   : > { %v2417_v24 = vpop.f32.mrb[61].mxu0 }
 0x194   : > { %3620 = vmatprep.mubr.msk.f32.mxu1 %vm426_vm0, %v2417_v24 }
 0x195   : > { %3621 = vmatmul.mubr.msk.f32.gmra.mrb[60].mxu1 %vm426_vm0, %v3591_v62 }
 0x1dc   : > { %v3190_v25 = vpop.f32.mrb[0].mxu1 }
 0x1dd   : > { %v668_v26 = vpop.f32.mrb[1].mxu1  ;;  %v4786_v39 = vmul.f32 %v3190_v25, %v3190_v25 }
 0x1de   : > { %v4792_v7 = vmul.f32 %v668_v26, %v668_v26 }
 0x1e0   : > { %v3193_v27 = vpop.f32.mrb[2].mxu1 }
 0x1e1   : > { %v678_v29 = vpop.f32.mrb[3].mxu1  ;;  %v4802_v12 = vmul.f32 %v3193_v27, %v3193_v27 }
 0x1e2   : > { %v4808_v50 = vmul.f32 %v678_v29, %v678_v29 }
 0x1e4   : > { %v3196_v30 = vpop.f32.mrb[4].mxu1 }
 0x1e5   : > { %v688_v31 = vpop.f32.mrb[5].mxu1  ;;  %v4818_v16 = vmul.f32 %v3196_v30, %v3196_v30 }
 0x1e6   : > { %v4824_v32 = vmul.f32 %v688_v31, %v688_v31 }
 0x1e8   : > { %v3199_v34 = vpop.f32.mrb[6].mxu1 }
 0x1e9   : > { %v698_v37 = vpop.f32.mrb[7].mxu1  ;;  %v4832_v35 = vmul.f32 %v3199_v34, %v3199_v34 }
 0x1ea   : > { %v4837_v9 = vmul.f32 %v698_v37, %v698_v37 }
 0x1ec   : > { %v4782_v38 = vpop.f32.mrb[8].mxu1 }
 0x1ed   : > { %v4784_v1 = vpop.f32.mrb[9].mxu1  ;;  %v4850_v51 = vmul.f32 %v4782_v38, %v4782_v38 }
 0x1ee   : > { %v4857_v56 = vmul.f32 %v4784_v1, %v4784_v1 }
 0x1f2   : > { %v3264_v2 = vpop.f32.mrb[10].mxu1 }
 0x1f3   : > { %v4788_v42 = vmul.f32 %v3264_v2, %v3264_v2  ;;  %v4790_v3 = vmul.f32 %v3264_v2, %v3190_v25  ;;  %v928_v5 = vpop.f32.mrb[11].mxu1 }
 0x1f4   : > { %v4794_v8 = vmul.f32 %v928_v5, %v928_v5  ;;  %v4796_v47 = vmul.f32 %v928_v5, %v668_v26 }
 0x1f5   : > { %v1931_v48 = vadd.f32 %v4788_v42, %v4786_v39  ;;  %v1911_v0 = vmul.f32 2.0, %v4790_v3 }
 0x1f6   : > { %v1930_v10 = vadd.f32 %v4794_v8, %v4792_v7  ;;  %v3267_v11 = vpop.f32.mrb[12].mxu1  ;;  %v1910_v41 = vmul.f32 2.0, %v4796_v47 }
 0x1f7   : > { %v1941_v13 = vadd.f32 6.5025, %v1931_v48  ;;  %v4804_v44 = vmul.f32 %v3267_v11, %v3267_v11  ;;  %v4806_v52 = vmul.f32 %v3267_v11, %v3193_v27  ;;  %v938_v45 = vpop.f32.mrb[13].mxu1  ;;  %v1921_v60 = vadd.f32 6.5025, %v1911_v0 }
 0x1f8   : > { %v1940_v53 = vadd.f32 6.5025, %v1930_v10  ;;  %v4810_v57 = vmul.f32 %v938_v45, %v938_v45  ;;  %v4812_v58 = vmul.f32 %v938_v45, %v678_v29 }
 0x1f9   : > { %3944 = vrcp.f32 %v1941_v13  ;;  %v1933_v59 = vadd.f32 %v4804_v44, %v4802_v12  ;;  %v1913_v54 = vmul.f32 2.0, %v4806_v52 }
 0x1fa   : > { %3946 = vrcp.f32 %v1940_v53  ;;  %v1932_v14 = vadd.f32 %v4810_v57, %v4808_v50  ;;  %v3270_v63 = vpop.f32.mrb[14].mxu1  ;;  %v1912_v25 = vmul.f32 2.0, %v4812_v58 }
 0x1fb   : > { %v1943_v17 = vadd.f32 6.5025, %v1933_v59  ;;  %v4820_v18 = vmul.f32 %v3270_v63, %v3270_v63  ;;  %v4822_v19 = vmul.f32 %v3270_v63, %v3196_v30  ;;  %v948_v20 = vpop.f32.mrb[15].mxu1  ;;  %v1923_v48 = vadd.f32 6.5025, %v1913_v54 }
 0x1fc   : > { %v1942_v33 = vadd.f32 6.5025, %v1932_v14  ;;  %v4826_v21 = vmul.f32 %v948_v20, %v948_v20  ;;  %v4828_v22 = vmul.f32 %v948_v20, %v688_v31  ;;  %v1922_v59 = vadd.f32 6.5025, %v1912_v25 }
 0x1fd   : > { %3948 = vrcp.f32 %v1943_v17  ;;  %v1935_v23 = vadd.f32 %v4820_v18, %v4818_v16  ;;  %v1915_v13 = vmul.f32 2.0, %v4822_v19 }
 0x1fe   : > { %3950 = vrcp.f32 %v1942_v33  ;;  %v1934_v4 = vadd.f32 %v4826_v21, %v4824_v32  ;;  %v3273_v6 = vpop.f32.mrb[16].mxu1 }
 0x1ff   : > { %v1945_v15 = vadd.f32 6.5025, %v1935_v23  ;;  %v4839_v28 = vmul.f32 %v3273_v6, %v3273_v6  ;;  %v4841_v36 = vmul.f32 %v3273_v6, %v3199_v34  ;;  %v958_v40 = vpop.f32.mrb[17].mxu1  ;;  %v1920_v34 = vadd.f32 6.5025, %v1910_v41 }
 0x200   : > { %v1944_v43 = vadd.f32 6.5025, %v1934_v4  ;;  %v4844_v46 = vmul.f32 %v958_v40, %v958_v40  ;;  %v4846_v49 = vmul.f32 %v958_v40, %v698_v37  ;;  %v1925_v6 = vadd.f32 6.5025, %v1915_v13 }
 0x201   : > { %3952 = vrcp.f32 %v1945_v15  ;;  %v1937_v55 = vadd.f32 %v4839_v28, %v4832_v35  ;;  %v1917_v15 = vmul.f32 2.0, %v4841_v36 }
 0x202   : > { %3954 = vrcp.f32 %v1944_v43  ;;  %v1936_v61 = vadd.f32 %v4844_v46, %v4837_v9  ;;  %v3276_v62 = vpop.f32.mrb[18].mxu1  ;;  %v1916_v54 = vmul.f32 2.0, %v4846_v49 }
 0x203   : > { %v3945_v24 = vpop.eup %3944  ;;  %v1947_v26 = vadd.f32 6.5025, %v1937_v55  ;;  %v4862_v27 = vmul.f32 %v3276_v62, %v3276_v62  ;;  %v4865_v29 = vmul.f32 %v3276_v62, %v4782_v38  ;;  %v968_v30 = vpop.f32.mrb[19].mxu1  ;;  %v1927_v25 = vadd.f32 6.5025, %v1917_v15 }
 0x204   : > { %v3947_v31 = vpop.eup %3946  ;;  %v1946_v37 = vadd.f32 6.5025, %v1936_v61  ;;  %v4867_v2 = vmul.f32 %v968_v30, %v968_v30  ;;  %v4870_v5 = vmul.f32 %v968_v30, %v4784_v1  ;;  %v4874_v11 = vmul.f32 %v3945_v24, %v1921_v60 }
 0x205   : > { %3956 = vrcp.f32 %v1947_v26  ;;  %v1939_v10 = vadd.f32 %v4862_v27, %v4850_v51  ;;  %v4879_v45 = vmul.f32 %v3947_v31, %v1920_v34  ;;  %v1914_v1 = vmul.f32 2.0, %v4828_v22 }
 0x206   : > { %3958 = vrcp.f32 %v1946_v37  ;;  %v1938_v38 = vadd.f32 %v4867_v2, %v4857_v56  ;;  %v1919_v26 = vmul.f32 2.0, %v4865_v29  ;;  %v1918_v34 = vmul.f32 2.0, %v4870_v5 }
 0x207   : > { %v3949_v53 = vpop.eup %3948  ;;  %v1949_v14 = vadd.f32 6.5025, %v1939_v10  ;;  %v1924_v43 = vadd.f32 6.5025, %v1914_v1 }
 0x208   : > { %v3951_v63 = vpop.eup %3950  ;;  %v1948_v17 = vadd.f32 6.5025, %v1938_v38  ;;  %v3338_v20 = vpop.f32.mrb[20].mxu1  ;;  %v4882_v33 = vmul.f32 %v3949_v53, %v1923_v48  ;;  %v1929_v53 = vadd.f32 6.5025, %v1919_v26 }
 0x209   : > { %3960 = vrcp.f32 %v1949_v14  ;;  %v1821_v23 = vsub.f32 %v3338_v20, %v4786_v39  ;;  %v1199_v0 = vpop.f32.mrb[21].mxu1  ;;  %v4885_v4 = vmul.f32 %v3951_v63, %v1922_v59  ;;  %v1928_v14 = vadd.f32 6.5025, %v1918_v34 }
 0x20a   : > { %3962 = vrcp.f32 %v1948_v17  ;;  %v1820_v40 = vsub.f32 %v1199_v0, %v4792_v7  ;;  %v1926_v7 = vadd.f32 6.5025, %v1916_v54 }
 0x20b   : > { %v3953_v41 = vpop.eup %3952 }
 0x20c   : > { %v3955_v55 = vpop.eup %3954  ;;  %v3341_v60 = vpop.f32.mrb[22].mxu1  ;;  %v4890_v61 = vmul.f32 %v3953_v41, %v1925_v6 }
 0x20d   : > { %v1823_v62 = vsub.f32 %v3341_v60, %v4802_v12  ;;  %v1209_v39 = vpop.f32.mrb[23].mxu1  ;;  %v4893_v24 = vmul.f32 %v3955_v55, %v1924_v43 }
 0x20e   : > { %v1822_v30 = vsub.f32 %v1209_v39, %v4808_v50 }
 0x20f   : > { %v3957_v31 = vpop.eup %3956 }
 0x210   : > { %v3959_v37 = vpop.eup %3958  ;;  %v3344_v48 = vpop.f32.mrb[24].mxu1  ;;  %v4898_v10 = vmul.f32 %v3957_v31, %v1927_v25 }
 0x211   : > { %v1825_v13 = vsub.f32 %v3344_v48, %v4818_v16  ;;  %v1219_v38 = vpop.f32.mrb[25].mxu1  ;;  %v4901_v12 = vmul.f32 %v3959_v37, %v1926_v7 }
 0x212   : > { %v1824_v59 = vsub.f32 %v1219_v38, %v4824_v32 }
 0x213   : > { %v3961_v1 = vpop.eup %3960 }
 0x214   : > { %v3963_v63 = vpop.eup %3962  ;;  %v3347_v50 = vpop.f32.mrb[26].mxu1  ;;  %v4904_v17 = vmul.f32 %v3961_v1, %v1929_v53 }
 0x215   : > { %v1827_v20 = vsub.f32 %v3347_v50, %v4832_v35  ;;  %v1229_v0 = vpop.f32.mrb[27].mxu1  ;;  %v4907_v6 = vmul.f32 %v3963_v63, %v1928_v14 }
 0x216   : > { %v1826_v15 = vsub.f32 %v1229_v0, %v4837_v9 }
 0x218   : > { %v3350_v16 = vpop.f32.mrb[28].mxu1 }
 0x219   : > { %v1829_v41 = vsub.f32 %v3350_v16, %v4850_v51  ;;  %v1239_v43 = vpop.f32.mrb[29].mxu1 }
 0x21a   : > { %v1828_v54 = vsub.f32 %v1239_v43, %v4857_v56 }
 0x21e   : > { %v3412_v32 = vpop.f32.mrb[30].mxu1 }
 0x21f   : > { %v1831_v55 = vsub.f32 %v3412_v32, %v4788_v42  ;;  %v1470_v60 = vpop.f32.mrb[31].mxu1 }
 0x220   : > { %v1830_v39 = vsub.f32 %v1470_v60, %v4794_v8 }
 0x221   : > { %v1871_v25 = vadd.f32 %v1831_v55, %v1821_v23 }
 0x222   : > { %v1870_v26 = vadd.f32 %v1830_v39, %v1820_v40  ;;  %v3415_v35 = vpop.f32.mrb[32].mxu1 }
 0x223   : > { %v1833_v31 = vsub.f32 %v3415_v35, %v4804_v44  ;;  %v1480_v7 = vpop.f32.mrb[33].mxu1  ;;  %v1881_v40 = vadd.f32 58.5225, %v1871_v25 }
 0x224   : > { %v1832_v9 = vsub.f32 %v1480_v7, %v4810_v57  ;;  %v1880_v14 = vadd.f32 58.5225, %v1870_v26 }
 0x225   : > { %v1873_v34 = vadd.f32 %v1833_v31, %v1823_v62  ;;  %3964 = vrcp.f32 %v1881_v40 }
 0x226   : > { %v1872_v37 = vadd.f32 %v1832_v9, %v1822_v30  ;;  %v3418_v51 = vpop.f32.mrb[34].mxu1  ;;  %3966 = vrcp.f32 %v1880_v14 }
 0x227   : > { %v1835_v48 = vsub.f32 %v3418_v51, %v4820_v18  ;;  %v1490_v56 = vpop.f32.mrb[35].mxu1  ;;  %v1883_v18 = vadd.f32 58.5225, %v1873_v34 }
 0x228   : > { %v1834_v38 = vsub.f32 %v1490_v56, %v4826_v21 }
 0x229   : > { %v1875_v42 = vadd.f32 %v1835_v48, %v1825_v13  ;;  %v1882_v13 = vadd.f32 58.5225, %v1872_v37  ;;  %3968 = vrcp.f32 %v1883_v18 }
 0x22a   : > { %v1874_v53 = vadd.f32 %v1834_v38, %v1824_v59  ;;  %v3421_v1 = vpop.f32.mrb[36].mxu1 }
 0x22b   : > { %v1837_v8 = vsub.f32 %v3421_v1, %v4839_v28  ;;  %v1500_v23 = vpop.f32.mrb[37].mxu1  ;;  %v1885_v28 = vadd.f32 58.5225, %v1875_v42  ;;  %3970 = vrcp.f32 %v1882_v13 }
 0x22c   : > { %v1836_v44 = vsub.f32 %v1500_v23, %v4844_v46  ;;  %v1884_v46 = vadd.f32 58.5225, %v1874_v53 }
 0x22d   : > { %v1877_v63 = vadd.f32 %v1837_v8, %v1827_v20  ;;  %3972 = vrcp.f32 %v1885_v28 }
 0x22e   : > { %v1876_v57 = vadd.f32 %v1836_v44, %v1826_v15  ;;  %v3424_v62 = vpop.f32.mrb[38].mxu1  ;;  %3974 = vrcp.f32 %v1884_v46 }
 0x22f   : > { %v1839_v30 = vsub.f32 %v3424_v62, %v4862_v27  ;;  %v1510_v50 = vpop.f32.mrb[39].mxu1  ;;  %v1887_v27 = vadd.f32 58.5225, %v1877_v63  ;;  %v3965_v25 = vpop.eup %3964 }
 0x230   : > { %v1838_v21 = vsub.f32 %v1510_v50, %v4867_v2  ;;  %v1886_v55 = vadd.f32 58.5225, %v1876_v57 }
 0x231   : > { %v1879_v59 = vadd.f32 %v1839_v30, %v1829_v41  ;;  %3976 = vrcp.f32 %v1887_v27 }
 0x232   : > { %v1878_v0 = vadd.f32 %v1838_v21, %v1828_v54  ;;  %3978 = vrcp.f32 %v1886_v55 }
 0x233   : > { %v1889_v31 = vadd.f32 58.5225, %v1879_v59 }
 0x234   : > { %v3486_v16 = vpop.f32.mrb[40].mxu1  ;;  %v1888_v9 = vadd.f32 58.5225, %v1878_v0 }
 0x235   : > { %v1841_v20 = vsub.f32 %v3486_v16, %v4790_v3  ;;  %v1741_v15 = vpop.f32.mrb[41].mxu1  ;;  %v3967_v3 = vpop.eup %3966  ;;  %3980 = vrcp.f32 %v1889_v31 }
 0x236   : > { %v1840_v43 = vsub.f32 %v1741_v15, %v4796_v47  ;;  %3982 = vrcp.f32 %v1888_v9 }
 0x237   : > { %v1851_v32 = vmul.f32 2.0, %v1841_v20 }
 0x238   : > { %v1850_v60 = vmul.f32 2.0, %v1840_v43  ;;  %v3489_v2 = vpop.f32.mrb[42].mxu1 }
 0x239   : > { %v1861_v39 = vadd.f32 58.5225, %v1851_v32  ;;  %v1843_v41 = vsub.f32 %v3489_v2, %v4806_v52  ;;  %v1751_v54 = vpop.f32.mrb[43].mxu1 }
 0x23a   : > { %v1860_v26 = vadd.f32 58.5225, %v1850_v60  ;;  %v1842_v35 = vsub.f32 %v1751_v54, %v4812_v58  ;;  %v3969_v58 = vpop.eup %3968 }
 0x23b   : > { %v1853_v47 = vmul.f32 2.0, %v1843_v41  ;;  %v1893_v7 = vmul.f32 %v3965_v25, %v1861_v39  ;;  %v3971_v23 = vpop.eup %3970 }
 0x23c   : > { %v1852_v34 = vmul.f32 2.0, %v1842_v35  ;;  %v3492_v37 = vpop.f32.mrb[44].mxu1  ;;  %v1891_v51 = vmul.f32 %v3967_v3, %v1860_v26 }
 0x23d   : > { %v1863_v48 = vadd.f32 58.5225, %v1853_v47  ;;  %v1845_v56 = vsub.f32 %v3492_v37, %v4822_v19  ;;  %v1761_v52 = vpop.f32.mrb[45].mxu1  ;;  %v2035_v38 = vsel %vm1980_vm1, %v1893_v7, 0.0  ;;  %v1971_v42 = vmul.f32 %v4874_v11, %v1893_v7 }
 0x23e   : > { %v1862_v53 = vadd.f32 58.5225, %v1852_v34  ;;  %v1844_v1 = vsub.f32 %v1761_v52, %v4828_v22  ;;  %2036 = vadd.xlane.f32.xlu1 %v2035_v38  ;;  %v1970_v8 = vmul.f32 %v4879_v45, %v1891_v51  ;;  %v2032_v22 = vsel %vm1980_vm1, %v1891_v51, 0.0  ;;  %v3973_v45 = vpop.eup %3972 }
 0x23f   : > { %v1855_v40 = vmul.f32 2.0, %v1845_v56  ;;  %v1984_v44 = vsel %vm1980_vm1, %v1971_v42, 0.0  ;;  %v1897_v14 = vmul.f32 %v3969_v58, %v1863_v48  ;;  %v3975_v59 = vpop.eup %3974 }
 0x240   : > { %v1854_v19 = vmul.f32 2.0, %v1844_v1  ;;  %1985 = vadd.xlane.f32.xlu0 %v1984_v44  ;;  %v3495_v63 = vpop.f32.mrb[46].mxu1  ;;  %v1895_v57 = vmul.f32 %v3971_v23, %v1862_v53  ;;  %v1981_v28 = vsel %vm1980_vm1, %v1970_v8, 0.0  ;;  %v3977_v15 = vpop.eup %3976 }
 0x241   : > { %v1865_v62 = vadd.f32 58.5225, %v1855_v40  ;;  %v1847_v11 = vsub.f32 %v3495_v63, %v4841_v36  ;;  %v1771_v30 = vpop.f32.mrb[47].mxu1  ;;  %v1973_v50 = vmul.f32 %v4882_v33, %v1897_v14  ;;  %v2041_v32 = vsel %vm1980_vm1, %v1897_v14, 0.0  ;;  %v3979_v55 = vpop.eup %3978 }
 0x242   : > { %v1864_v18 = vadd.f32 58.5225, %v1854_v19  ;;  %v1846_v21 = vsub.f32 %v1771_v30, %v4846_v49  ;;  %2033 = vadd.xlane.f32.xlu1 %v2032_v22  ;;  %v1972_v13 = vmul.f32 %v4885_v4, %v1895_v57  ;;  %v2038_v3 = vsel %vm1980_vm1, %v1895_v57, 0.0 }
 0x243   : > { %v1857_v0 = vmul.f32 2.0, %v1847_v11  ;;  %v1901_v16 = vmul.f32 %v3973_v45, %v1865_v62  ;;  %v1990_v41 = vsel %vm1980_vm1, %v1973_v50, 0.0 }
 0x244   : > { %v1856_v46 = vmul.f32 2.0, %v1846_v21  ;;  %1982 = vadd.xlane.f32.xlu0 %v1981_v28  ;;  %v3498_v36 = vpop.f32.mrb[48].mxu1  ;;  %v1899_v20 = vmul.f32 %v3975_v59, %v1864_v18 }
 0x245   : > { %v1867_v43 = vadd.f32 58.5225, %v1857_v0  ;;  %v1849_v33 = vsub.f32 %v3498_v36, %v4865_v29  ;;  %v1781_v27 = vpop.f32.mrb[49].mxu1  ;;  %v1975_v49 = vmul.f32 %v4890_v61, %v1901_v16  ;;  %v3981_v29 = vpop.eup %3980  ;;  %v2047_v34 = vsel %vm1980_vm1, %v1901_v16, 0.0 }
 0x246   : > { %v1866_v4 = vadd.f32 58.5225, %v1856_v46  ;;  %v1848_v60 = vsub.f32 %v1781_v27, %v4870_v5  ;;  %2042 = vadd.xlane.f32.xlu1 %v2041_v32  ;;  %v1974_v2 = vmul.f32 %v4893_v24, %v1899_v20  ;;  %v3983_v31 = vpop.eup %3982  ;;  %v1987_v24 = vsel %vm1980_vm1, %v1972_v13, 0.0 }
 0x247   : > { %v1859_v39 = vmul.f32 2.0, %v1849_v33  ;;  %v1905_v54 = vmul.f32 %v3977_v15, %v1867_v43  ;;  %v1996_v48 = vsel %vm1980_vm1, %v1975_v49, 0.0 }
 0x248   : > { %v1858_v25 = vmul.f32 2.0, %v1848_v60  ;;  %1991 = vadd.xlane.f32.xlu0 %v1990_v41  ;;  %v1903_v26 = vmul.f32 %v3979_v55, %v1866_v4 }
 0x249   : > { %v1869_v35 = vadd.f32 58.5225, %v1859_v39  ;;  %v1977_v61 = vmul.f32 %v4898_v10, %v1905_v54  ;;  %v2044_v10 = vsel %vm1980_vm1, %v1899_v20, 0.0  ;;  %v2053_v56 = vsel %vm1980_vm1, %v1905_v54, 0.0 }
 0x24a   : > { %v1868_v47 = vadd.f32 58.5225, %v1858_v25  ;;  %2039 = vadd.xlane.f32.xlu1 %v2038_v3  ;;  %v1976_v5 = vmul.f32 %v4901_v12, %v1903_v26  ;;  %v1993_v12 = vsel %vm1980_vm1, %v1974_v2, 0.0  ;;  %v3554_v1 = vpop.f32.mrb[50].mxu1 }
 0x24b   : > { %v1909_v7 = vmul.f32 %v3981_v29, %v1869_v35  ;;  %v2002_v52 = vsel %vm1980_vm1, %v1977_v61, 0.0  ;;  %v2294_v8 = vpop.f32.mrb[51].mxu1  ;;  %2325 = vst.msk [vmem:[%s377_s24 + $0x8] sm:$0xff] %vm2323_vm3, %v3554_v1 }
 0x24c   : > { %v1907_v9 = vmul.f32 %v3983_v31, %v1868_v47  ;;  %1988 = vadd.xlane.f32.xlu0 %v1987_v24  ;;  %2324 = vst.msk [vmem:[%s377_s24] sm:$0xff] %vm2323_vm3, %v2294_v8 }
 0x24d   : > { %v1979_v37 = vmul.f32 %v4904_v17, %v1909_v7  ;;  %v2050_v17 = vsel %vm1980_vm1, %v1903_v26, 0.0  ;;  %v2059_v58 = vsel %vm2008_vm2, %v1909_v7, 0.0 }
 0x24e   : > { %2048 = vadd.xlane.f32.xlu1 %v2047_v34  ;;  %v1978_v51 = vmul.f32 %v4907_v6, %v1907_v9  ;;  %v1999_v6 = vsel %vm1980_vm1, %v1976_v5, 0.0  ;;  %v2056_v53 = vsel %vm1980_vm1, %v1907_v9, 0.0  ;;  %v3557_v23 = vpop.f32.mrb[52].mxu1 }
 0x24f   : > { %v2009_v38 = vsel %vm2008_vm2, %v1979_v37, 0.0  ;;  %2327 = vst.msk [vmem:[%s377_s24 + $0x18] sm:$0xff] %vm2323_vm3, %v3557_v23  ;;  %v2304_v40 = vpop.f32.mrb[53].mxu1 }
 0x250   : > { %1997 = vadd.xlane.f32.xlu0 %v1996_v48  ;;  %v2005_v42 = vsel %vm1980_vm1, %v1978_v51, 0.0  ;;  %2326 = vst.msk [vmem:[%s377_s24 + $0x10] sm:$0xff] %vm2323_vm3, %v2304_v40 }
 0x252   : > { %2045 = vadd.xlane.f32.xlu1 %v2044_v10  ;;  %v3560_v44 = vpop.f32.mrb[54].mxu1 }
 0x253   : > { %v2314_v14 = vpop.f32.mrb[55].mxu1  ;;  %2330 = vst.msk [vmem:[%s377_s24 + $0x28] sm:$0xf] %vm2329_vm4, %v3560_v44 }
 0x254   : > { %1994 = vadd.xlane.f32.xlu0 %v1993_v12  ;;  %2328 = vst.msk [vmem:[%s377_s24 + $0x20] sm:$0xff] %vm2323_vm3, %v2314_v14 }
 0x256   : > { %2054 = vadd.xlane.f32.xlu1 %v2053_v56 }
 0x258   : > { %2003 = vadd.xlane.f32.xlu0 %v2002_v52 }
 0x25a   : > { %2051 = vadd.xlane.f32.xlu1 %v2050_v17 }
 0x25c   : > { %2000 = vadd.xlane.f32.xlu0 %v1999_v6 }
 0x25e   : > { %2010 = vadd.xlane.f32.xlu1 %v2009_v38 }
 0x260   : > { %2006 = vadd.xlane.f32.xlu0 %v2005_v42  ;;  %v3616_v19 = vpop.f32.mrb[56].mxu1 }
 0x261   : > { %v2510_v63 = vpop.f32.mrb[57].mxu1  ;;  %2540 = vst.msk [vmem:[%s382_s26 + $0x8] sm:$0xff] %vm2323_vm3, %v3616_v19 }
 0x262   : > { %2060 = vadd.xlane.f32.xlu1 %v2059_v58  ;;  %2539 = vst.msk [vmem:[%s382_s26] sm:$0xff] %vm2323_vm3, %v2510_v63 }
 0x264   : > { %2057 = vadd.xlane.f32.xlu0 %v2056_v53  ;;  %v3619_v57 = vpop.f32.mrb[58].mxu1 }
 0x265   : > { %2542 = vst.msk [vmem:[%s382_s26 + $0x18] sm:$0xff] %vm2323_vm3, %v3619_v57  ;;  %v2520_v62 = vpop.f32.mrb[59].mxu1 }
 0x266   : > { %2541 = vst.msk [vmem:[%s382_s26 + $0x10] sm:$0xff] %vm2323_vm3, %v2520_v62 }
 0x268   : > { %v3622_v11 = vpop.f32.mrb[60].mxu1 }
 0x269   : > { %2544 = vst.msk [vmem:[%s382_s26 + $0x28] sm:$0xf] %vm2329_vm4, %v3622_v11  ;;  %v2530_v30 = vpop.f32.mrb[61].mxu1 }
 0x26a   : > { %2543 = vst.msk [vmem:[%s382_s26 + $0x20] sm:$0xff] %vm2323_vm3, %v2530_v30  ;;  %s3984_s26 = scalar_lea.vmem %s4984_s16, 16 }
 0x26b   : > { %p3985_p11 = scmp.ne.s32.totalorder %s4984_s16, %s3984_s26  ;;  %p3992_p1 = scmp.lt.s32.totalorder %s3990_s21, %s3984_s26 }
 0x26d   : > { %p3986_p12 = pnand %p3985_p11, %p4137_p5  ;;  %p3993_p2 = por %p3992_p1, %p3991_p0 }
 0x26f   : > { %p3987_p13 = pneg %p3986_p12 }
 0x271   : > { %p3994_p3 = pnand %p3993_p2, %p3987_p13 }
 0x2cb   : > { %v2037_v22 = vpop.xlane.xlu1 %2036 }
 0x2cd   : > { %v1986_v50 = vpop.xlane.xlu0 %1985 }
 0x2cf   : > { %v2034_v45 = vpop.xlane.xlu1 %2033 }
 0x2d0   : > { %v2062_v36 = vadd.f32 %v2037_v22, %v2034_v45 }
 0x2d1   : > { %v1983_v18 = vpop.xlane.xlu0 %1982 }
 0x2d2   : > { %v2012_v16 = vadd.f32 %v1986_v50, %v1983_v18 }
 0x2d3   : > { %v2043_v21 = vpop.xlane.xlu1 %2042 }
 0x2d5   : > { %v1992_v13 = vpop.xlane.xlu0 %1991 }
 0x2d7   : > { %v2040_v59 = vpop.xlane.xlu1 %2039 }
 0x2d8   : > { %v2063_v43 = vadd.f32 %v2062_v36, %v2040_v59 }
 0x2d9   : > { %v1989_v0 = vpop.xlane.xlu0 %1988 }
 0x2da   : > { %v2013_v20 = vadd.f32 %v2012_v16, %v1989_v0  ;;  %v2064_v49 = vadd.f32 %v2063_v43, %v2043_v21 }
 0x2db   : > { %v2049_v28 = vpop.xlane.xlu1 %2048 }
 0x2dc   : > { %v2014_v27 = vadd.f32 %v2013_v20, %v1992_v13 }
 0x2dd   : > { %v1998_v46 = vpop.xlane.xlu0 %1997 }
 0x2df   : > { %v2046_v15 = vpop.xlane.xlu1 %2045 }
 0x2e0   : > { %v2065_v60 = vadd.f32 %v2064_v49, %v2046_v15 }
 0x2e1   : > { %v1995_v33 = vpop.xlane.xlu0 %1994 }
 0x2e2   : > { %v2015_v55 = vadd.f32 %v2014_v27, %v1995_v33  ;;  %v2066_v54 = vadd.f32 %v2065_v60, %v2049_v28 }
 0x2e3   : > { %v2055_v32 = vpop.xlane.xlu1 %2054 }
 0x2e4   : > { %v2016_v39 = vadd.f32 %v2015_v55, %v1998_v46 }
 0x2e5   : > { %v2004_v4 = vpop.xlane.xlu0 %2003 }
 0x2e7   : > { %v2052_v2 = vpop.xlane.xlu1 %2051 }
 0x2e8   : > { %v2067_v29 = vadd.f32 %v2066_v54, %v2052_v2 }
 0x2e9   : > { %v2001_v41 = vpop.xlane.xlu0 %2000 }
 0x2ea   : > { %v2017_v25 = vadd.f32 %v2016_v39, %v2001_v41  ;;  %v2068_v7 = vadd.f32 %v2067_v29, %v2055_v32 }
 0x2eb   : > { %v2011_v26 = vpop.xlane.xlu1 %2010 }
 0x2ec   : > { %v2018_v35 = vadd.f32 %v2017_v25, %v2004_v4  ;;  %v2021_v31 = vsel %vm2020_vm5, %v2011_v26, 0.0 }
 0x2ed   : > { %v2007_v3 = vpop.xlane.xlu0 %2006 }
 0x2ee   : > { %v2019_v61 = vadd.f32 %v2018_v35, %v2007_v3 }
 0x2ef   : > { %v2061_v5 = vpop.xlane.xlu1 %2060 }
 0x2f0   : > { %v2022_v47 = vadd.f32 %v2021_v31, %v2019_v61  ;;  %v2070_v37 = vsel %vm2020_vm5, %v2061_v5, 0.0 }
 0x2f1   : > { %v2058_v24 = vpop.xlane.xlu0 %2057 }
 0x2f2   : > { %v2023_v9 = vrot.slane %v2022_v47, 4  ;;  %v2069_v34 = vadd.f32 %v2068_v7, %v2058_v24 }
 0x2f4   : > { %v2024_v51 = vadd.f32 %v2023_v9, %v2022_v47  ;;  %v2071_v48 = vadd.f32 %v2070_v37, %v2069_v34 }
 0x2f6   : > { %v2025_v10 = vrot.slane %v2024_v51, 2  ;;  %v2072_v12 = vrot.slane %v2071_v48, 4 }
 0x2f8   : > { %v2026_v56 = vadd.f32 %v2025_v10, %v2024_v51  ;;  %v2073_v52 = vadd.f32 %v2072_v12, %v2071_v48 }
 0x2fa   : > { %v2027_v17 = vrot.slane %v2026_v56, 1  ;;  %v2074_v6 = vrot.slane %v2073_v52, 2 }
 0x2fc   : > { %v2075_v38 = vadd.f32 %v2074_v6, %v2073_v52  ;;  %v2028_v42 = vadd.f32 %v2027_v17, %v2026_v56 }
 0x2fe   : > { %v2076_v58 = vrot.slane %v2075_v38, 1  ;;  %v2029_v53 = vmul.f32 0.00016436556, %v2028_v42 }
 0x300   : > { %v2077_v1 = vadd.f32 %v2076_v58, %v2075_v38  ;;  %2031 = vst.msk [vmem:[%s340_s29] sm:$0x1] %vm2030_vm6, %v2029_v53 }
 0x301   : > { %3997 = shalt.err (!%p3994_p3)
}
 0x302   : > { %s3998_s28 = scalar_lea.hbm %s4982_s22, 16  ;;  %s4002_s24 = scalar_lea.hbm %s5041_s6, 32 }
 0x303   : > { %p3999_p4 = scmp.ne.s32.totalorder %s4982_s22, %s3998_s28  ;;  %p4003_p9 = scmp.lt.u32.totalorder %s4982_s22, %s5041_s6 }
 0x304   : > { %p4004_p10 = scmp.lt.u32.totalorder %s4002_s24, %s3998_s28  ;;  %p4006_p12 = scmp.lt.u32.totalorder %s3998_s28, %s4982_s22 }
 0x305   : > { %p4000_p7 = pnand %p3999_p4, %p4137_p5 }
 0x306   : > { %p4005_p11 = por %p4004_p10, %p4003_p9 }
 0x307   : > { %p4001_p8 = pneg %p4000_p7 }
 0x308   : > { %p4007_p13 = por %p4006_p12, %p4005_p11 }
 0x30a   : > { %p4008_p0 = pnand %p4007_p13, %p4001_p8 }
 0x30c   : > { %4011 = shalt.err (!%p4008_p0)
}
 0x30d   : > { %3905 = dma.vmem_to_hbm [thread:$0]  (%p4137_p5), %s4984_s16, 16, %s4982_s22, %s2546_s25   ;;  %v2078_v8 = vmul.f32 0.00016436556, %v2077_v1 }
 0x30f   : > { %2079 = vst.msk [vmem:[%s372_s27] sm:$0x1] %vm2030_vm6, %v2078_v8 }
 0x310 PF: > { %p3911_p1 = scmp.ge.s32.totalorder %s4046_s12, 2  ;;  %s2592_s28 = sand.u32 1, %s4034_s30  }
 0x311   : > { %s2593_s19 = scalar_lea.sflag [#allocation3], %s2592_s28 }
 0x312   : > { %p3908_p2 = pnand %p3911_p1, %p4141_p6 }
 0x314   : > { %4029 = dma.done.wait (!%p3908_p2), %s2593_s19, 16  }
 0x315   : > { %4031 = vsyncadd (!%p3908_p2), %s2593_s19, 4294967280  ;;  %p20_p5 = scmp.ge.s32.totalorder %s4124_s15, 4   ;;  %s5047_s30 = smov %s4038_s10 }
 0x316   : > { %s5048_s10 = smov %s4042_s11  ;;  %s5049_s11 = smov %s4135_s18 }
 0x317   : > { %s5050_s12 = smov %s4124_s15  ;;  %22 = sbr.rel (!%p20_p5) target bundleno = 3 (0x3), region = 118 }
 0x31e   :  { %2619 = vsyncpa [#allocation3], 1 }
 0x31f   :  { %2621 = vsyncpa [#allocation3 + $0x1], 1 }

// kernel: ms_ssim_loss.9
= control target key start
LH: loop header
LB: loop body
LE: loop exit
PB: predicated region body
PF: predicated region fallthrough
CT: control target
= control target key end

     0   :  { %11 = vsyncpa [#allocation3], 0  ;;  %s1649_s0 = inlined_call_operand.vmem [shape: f32[2,11,11], index: 0, kind: input, shape index: {}]   ;;  %s1650_s1 = inlined_call_operand.vmem [shape: f32[2,11,11], index: 1, kind: input, shape index: {}]   ;;  %s1651_s2 = inlined_call_operand.vmem [shape: f32[1,11], index: 2, kind: input, shape index: {}]   ;;  %s1652_s3 = inlined_call_operand.vmem [shape: f32[11,1], index: 3, kind: input, shape index: {}]   ;;  %s1653_s4 = inlined_call_operand.vmem [shape: f32[2,1,1], index: 4, kind: output, shape index: {0}]   ;;  %s1654_s5 = inlined_call_operand.hbm [shape: f32[2,1,1], index: 5, kind: output, shape index: {1}]  }
   0x1   :  { %13 = vsyncpa [#allocation3 + $0x1], 0  ;;  %s1452_s18 = smov 0   ;;  %s1454_s19 = smov 0  }
   0x2   :  { %s1456_s20 = smov 0   ;;  %s1458_s21 = smov 0  }
   0x3 LB: > { %s1473_s22 = sadd.s32 4294967295, %s1415_s21   ;;  %s1133_s23 = sadd.s32 4294967294, %s1415_s21   ;;  %s1415_s21 = sphi %s1458_s21, %s1662_s21   ;;  %s1411_s20 = sphi %s1456_s20, %s1661_s20   ;;  %s1407_s19 = sphi %s1454_s19, %s1660_s19   ;;  %s1403_s18 = sphi %s1452_s18, %s1659_s18  }
   0x4   : > { %s1477_s24 = sadd.s32 1, %s1415_s21   ;;  %s146_s25 = sadd.s32 1, %s1411_s20 }
   0x5   : > { %s143_s26 = ssub.s32 %s1415_s21, %s1477_s24  ;;  %p156_p0 = scmp.ne.s32.totalorder %s1411_s20, %s1407_s19 }
   0x6   : > { %p144_p1 = scmp.eq.s32.totalorder %s143_s26, 0  ;;  %p157_p2 = scmp.eq.s32.totalorder %s1473_s22, 1 }
   0x7   : > { %p162_p3 = scmp.ne.s32.totalorder %s1407_s19, %s1403_s18  ;;  %p163_p4 = scmp.eq.s32.totalorder %s1133_s23, 1 }
   0x8   : > { %s1488_s27 = scalar_select %p144_p1, %s1411_s20, %s146_s25  }
   0x9   : > { %p1490_p5 = por %p157_p2, %p156_p0  ;;  %p1494_p6 = por %p163_p4, %p162_p3 }
   0xa   : > { %p1136_p7 = scmp.ge.s32.totalorder %s1415_s21, 1  ;;  %p203_p8 = scmp.lt.s32.totalorder %s1415_s21, 3 }
   0xc   : > { %p204_p9 = pnand %p1136_p7, %p203_p8 }
   0xd   : > { %p238_p10 = scmp.lt.s32.totalorder (!%p204_p9), %s1473_s22, 1  ;;  %vm262_vm0 = vcmask (!%p204_p9), 1042432   ;;  %v256_v0 = vld [vmem:[%s1652_s3] sm:$0xff] (!%p204_p9)  ;;  %v1417_v1 = vmov (!%p204_p9), 0.0|0.0   ;;  %v257_v2 = vld [vmem:[%s1652_s3 + $0x8] sm:$0x7] (!%p204_p9) }
   0xe   : > { %207 = sbr.rel (%p204_p9) target bundleno = 500 (0x1f4), region = 36  ;;  %1266 = vmatprep.subr.bf16.mxu0 (!%p204_p9), %v1417_v1  ;;  %1270 = vmatprep.subr.bf16.mxu1 (!%p204_p9), %v1417_v1  ;;  %vm1418_vm1 = vmmov (!%p204_p9), 0   ;;  %v1419_v3 = vmov (!%p204_p9), 0.0   ;;  %v1514_v4 = vpack.c.bf16 (!%p204_p9), %v257_v2, %v256_v0  ;;  %vm1420_vm2 = vmmov (!%p204_p9), 1   ;;  %v255_v13 = vld [vmem:[%s1651_s2] sm:$0x1] (!%p204_p9) }
   0xf   : > { %1200 = vmatprep.mubr.msk.f32.mxu0 (!%p204_p9), %vm1418_vm1, %v1419_v3  ;;  %1207 = vmatprep.mubr.msk.f32.mxu1 (!%p204_p9), %vm1418_vm1, %v1419_v3  ;;  %vm1518_vm3 = vmpackc.low (!%p204_p9), %vm262_vm0, %vm1420_vm2  ;;  %vm258_vm4 = vcmask (!%p204_p9), 89088   ;;  %s236_s25 = sand.u32 (!%p204_p9), 1, %s1407_s19   ;;  %s1161_s26 = sshll.u32 (!%p204_p9), %s1473_s22, 4  ;;  %vm1023_vm5 = vcmask (!%p204_p9), 0  }
  0x10   : > { %1273 = vmatpush3.bf16.msk.msra.mxu1 (!%p204_p9), %vm1518_vm3, %v1514_v4  ;;  %s237_s30 = scalar_lea.vmem (!%p204_p9), [#allocation2], %s236_s25  ;;  %s1421_s15 = smov (!%p204_p9), [#allocation2]  }
  0x11   : > { %1278 = vmatprep.subr.bf16.mxu1 (!%p204_p9), %v1417_v1  ;;  %s1047_s6 = sshll.u32 (!%p204_p9), %s237_s30, 4  ;;  %s1598_s6 = int_to_ptr.vmem [resolvable:$true] %s1047_s6 }
  0x12   : > { %s1353_s14 = scalar_lea.vmem (!%p204_p9), %s1598_s6, 16 }
  0x13   : > { %p1354_p11 = scmp.ne.s32.totalorder (!%p204_p9), %s1598_s6, %s1353_s14 }
  0x15   : > { %s1510_s9 = scalar_select %p238_p10, %s1473_s22, 1 }
  0x16   : > { %p1355_p12 = pnand %p1354_p11, %p1490_p5 }
  0x17   : > { %s1164_s10 = sshll.u32 %s1510_s9, 4  ;;  %s250_s22 = scalar_lea.vmem %s1653_s4, %s1510_s9 }
  0x18   : > { %s242_s13 = scalar_lea.vmem %s1649_s0, %s1164_s10  ;;  %s247_s16 = scalar_lea.vmem %s1650_s1, %s1164_s10 }
  0x19   : > { %v251_v6 = vld [vmem:[%s242_s13] sm:$0xff]  ;;  %v252_v7 = vld [vmem:[%s242_s13 + $0x8] sm:$0x7]  ;;  %s1596_s10 = scalar_lea.hbm %s1654_s5, %s1161_s26  ;;  %s1032_s13 = scalar_lea.sflag [#allocation3], %s236_s25 }
  0x1a   : > { %v253_v8 = vld [vmem:[%s247_s16] sm:$0xff]  ;;  %v254_v9 = vld [vmem:[%s247_s16 + $0x8] sm:$0x7]  ;;  %v1267_v10 = vpack.c.bf16 %v252_v7, %v251_v6  ;;  %v558_v11 = vmul.f32 %v251_v6, %v251_v6  ;;  %v559_v12 = vmul.f32 %v252_v7, %v252_v7  ;;  %p1356_p13 = pneg %p1355_p12  ;;  %s1357_s16 = sshll.u32 %s1421_s15, 4  ;;  %s1358_s16 = int_to_ptr.vmem [resolvable:$false] %s1357_s16 }
  0x1b   : > { %v1275_v14 = vpack.c.bf16 %v254_v9, %v253_v8  ;;  %v706_v16 = vmul.f32 %v253_v8, %v253_v8  ;;  %v707_v17 = vmul.f32 %v254_v9, %v254_v9  ;;  %v854_v18 = vmul.f32 %v253_v8, %v251_v6  ;;  %s1359_s17 = scalar_lea.vmem %s1358_s16, 32  ;;  %p1360_p0 = scmp.lt.s32.totalorder %s1598_s6, %s1358_s16 }
  0x1c   : > { %1269 = vmatpush3.bf16.msk.msra.mxu0 %vm1518_vm3, %v1267_v10  ;;  %v1283_v15 = vpack.c.bf16 %v559_v12, %v558_v11  ;;  %v855_v19 = vmul.f32 %v254_v9, %v252_v7  ;;  %p1361_p1 = scmp.lt.s32.totalorder %s1359_s17, %s1353_s14 }
  0x1d   : > { %1274 = vmatprep.subr.bf16.mxu0 %v1417_v1  ;;  %v1291_v20 = vpack.c.bf16 %v707_v17, %v706_v16 }
  0x1e   : > { %v1299_v21 = vpack.c.bf16 %v855_v19, %v854_v18  ;;  %p1362_p2 = por %p1361_p1, %p1360_p0 }
  0x1f   : > { %1201 = vmatmul.mubr.msk.f32.vlgmr.msra.gmra.mrb[0].mxu0 %vm258_vm4, %v255_v13 }
  0x20   : > { %1277 = vmatpush3.bf16.msk.msra.mxu0 %vm1518_vm3, %v1275_v14  ;;  %1214 = vmatprep.mubr.msk.f32.mxu0 %vm1418_vm1, %v1419_v3  ;;  %p1363_p3 = pnand %p1362_p2, %p1356_p13 }
  0x21   : > { %1282 = vmatprep.subr.bf16.mxu0 %v1417_v1 }
  0x23   : > { %1215 = vmatmul.mubr.msk.f32.vlgmr.msra.gmra.mrb[2].mxu0 %vm258_vm4, %v255_v13 }
  0x24   : > { %1285 = vmatpush3.bf16.msk.msra.mxu0 %vm1518_vm3, %v1283_v15  ;;  %1228 = vmatprep.mubr.msk.f32.mxu0 %vm1418_vm1, %v1419_v3 }
  0x25   : > { %1290 = vmatprep.subr.bf16.mxu0 %v1417_v1 }
  0x27   : > { %1229 = vmatmul.mubr.msk.f32.vlgmr.msra.gmra.mrb[4].mxu0 %vm258_vm4, %v255_v13 }
  0x28   : > { %1293 = vmatpush3.bf16.msk.msra.mxu0 %vm1518_vm3, %v1291_v20  ;;  %1242 = vmatprep.mubr.msk.f32.mxu0 %vm1418_vm1, %v1419_v3 }
  0x29   : > { %1298 = vmatprep.subr.bf16.mxu0 %v1417_v1 }
  0x2b   : > { %1243 = vmatmul.mubr.msk.f32.vlgmr.msra.gmra.mrb[6].mxu0 %vm258_vm4, %v255_v13 }
  0x2c   : > { %1301 = vmatpush3.bf16.msk.msra.mxu0 %vm1518_vm3, %v1299_v21  ;;  %1256 = vmatprep.mubr.msk.f32.mxu0 %vm1418_vm1, %v1419_v3 }
  0x2f   : > { %1257 = vmatmul.mubr.msk.f32.vlgmr.msra.gmra.mrb[8].mxu0 %vm258_vm4, %v255_v13 }
  0xf2   : > { %v332_v22 = vpop.f32.mrb[0].mxu0 }
  0xf3   : > { %v1202_v23 = vpop.f32.mrb[1].mxu0  ;;  %1208 = vmatmul.mubr.msk.f32.vlgmr.msra.gmra.mrb[0].mxu1 %vm258_vm4, %v332_v22 }
  0xf4   : > { %1281 = vmatpush3.bf16.msk.msra.mxu1 %vm1518_vm3, %v1514_v4  ;;  %1221 = vmatprep.mubr.msk.f32.mxu1 %vm1418_vm1, %v1419_v3 }
  0xf5   : > { %1286 = vmatprep.subr.bf16.mxu1 %v1417_v1 }
  0xf6   : > { %v481_v24 = vpop.f32.mrb[2].mxu0 }
  0xf7   : > { %v1216_v25 = vpop.f32.mrb[3].mxu0  ;;  %1222 = vmatmul.mubr.msk.f32.vlgmr.msra.gmra.mrb[2].mxu1 %vm258_vm4, %v481_v24 }
  0xf8   : > { %1289 = vmatpush3.bf16.msk.msra.mxu1 %vm1518_vm3, %v1514_v4  ;;  %1235 = vmatprep.mubr.msk.f32.mxu1 %vm1418_vm1, %v1419_v3 }
  0xf9   : > { %1294 = vmatprep.subr.bf16.mxu1 %v1417_v1 }
  0xfa   : > { %v629_v26 = vpop.f32.mrb[4].mxu0 }
  0xfb   : > { %v1230_v27 = vpop.f32.mrb[5].mxu0  ;;  %1236 = vmatmul.mubr.msk.f32.vlgmr.msra.gmra.mrb[4].mxu1 %vm258_vm4, %v629_v26 }
  0xfc   : > { %1297 = vmatpush3.bf16.msk.msra.mxu1 %vm1518_vm3, %v1514_v4  ;;  %1249 = vmatprep.mubr.msk.f32.mxu1 %vm1418_vm1, %v1419_v3 }
  0xfd   : > { %1302 = vmatprep.subr.bf16.mxu1 %v1417_v1 }
  0xfe   : > { %v777_v28 = vpop.f32.mrb[6].mxu0 }
  0xff   : > { %v1244_v29 = vpop.f32.mrb[7].mxu0  ;;  %1250 = vmatmul.mubr.msk.f32.vlgmr.msra.gmra.mrb[6].mxu1 %vm258_vm4, %v777_v28 }
 0x100   : > { %1305 = vmatpush3.bf16.msk.msra.mxu1 %vm1518_vm3, %v1514_v4  ;;  %1263 = vmatprep.mubr.msk.f32.mxu1 %vm1418_vm1, %v1419_v3 }
 0x102   : > { %v925_v30 = vpop.f32.mrb[8].mxu0 }
 0x103   : > { %1264 = vmatmul.mubr.msk.f32.vlgmr.msra.gmra.mrb[8].mxu1 %vm258_vm4, %v925_v30  ;;  %v1258_v31 = vpop.f32.mrb[9].mxu0 }
 0x1c6   : > { %v408_v32 = vpop.f32.mrb[0].mxu1 }
 0x1c7   : > { %v1209_v33 = vpop.f32.mrb[1].mxu1  ;;  %v1002_v35 = vmul.f32 %v408_v32, %v408_v32 }
 0x1ca   : > { %v554_v34 = vpop.f32.mrb[2].mxu1 }
 0x1cb   : > { %v1003_v36 = vmul.f32 %v554_v34, %v554_v34  ;;  %v1004_v37 = vmul.f32 %v554_v34, %v408_v32  ;;  %v1223_v38 = vpop.f32.mrb[3].mxu1 }
 0x1cd   : > { %v1016_v39 = vadd.f32 %v1003_v36, %v1002_v35  ;;  %v1014_v48 = vmul.f32 2.0, %v1004_v37 }
 0x1ce   : > { %v702_v40 = vpop.f32.mrb[4].mxu1 }
 0x1cf   : > { %v1017_v41 = vadd.f32 6.5025, %v1016_v39  ;;  %v1005_v42 = vsub.f32 %v702_v40, %v1002_v35  ;;  %v1237_v43 = vpop.f32.mrb[5].mxu1  ;;  %v1015_v53 = vadd.f32 6.5025, %v1014_v48 }
 0x1d1   : > { %1349 = vrcp.f32 %v1017_v41 }
 0x1d2   : > { %v850_v44 = vpop.f32.mrb[6].mxu1 }
 0x1d3   : > { %v1006_v45 = vsub.f32 %v850_v44, %v1003_v36  ;;  %v1251_v46 = vpop.f32.mrb[7].mxu1 }
 0x1d5   : > { %v1010_v47 = vadd.f32 %v1006_v45, %v1005_v42 }
 0x1d6   : > { %v998_v49 = vpop.f32.mrb[8].mxu1 }
 0x1d7   : > { %v1011_v50 = vadd.f32 58.5225, %v1010_v47  ;;  %v1007_v51 = vsub.f32 %v998_v49, %v1004_v37  ;;  %v1265_v52 = vpop.f32.mrb[9].mxu1 }
 0x1d9   : > { %1351 = vrcp.f32 %v1011_v50  ;;  %v1008_v56 = vmul.f32 2.0, %v1007_v51 }
 0x1db   : > { %v1350_v54 = vpop.eup %1349  ;;  %v1009_v57 = vadd.f32 58.5225, %v1008_v56 }
 0x1dc   : > { %v1019_v55 = vmul.f32 %v1350_v54, %v1015_v53 }
 0x1e3   : > { %v1352_v58 = vpop.eup %1351 }
 0x1e4   : > { %v1013_v59 = vmul.f32 %v1352_v58, %v1009_v57 }
 0x1e6   : > { %v1020_v60 = vmul.f32 %v1019_v55, %v1013_v59  ;;  %1027 = vst.msk [vmem:[%s237_s30] sm:$0x1] %vm1023_vm5, %v1013_v59 }
 0x1e7   : > { %1366 = shalt.err (!%p1363_p3)
}
 0x1e8   : > { %s1367_s23 = scalar_lea.hbm %s1596_s10, 16  ;;  %s1371_s30 = scalar_lea.hbm %s1654_s5, 32 }
 0x1e9   : > { %p1368_p4 = scmp.ne.s32.totalorder %s1596_s10, %s1367_s23  ;;  %p1372_p9 = scmp.lt.u32.totalorder %s1596_s10, %s1654_s5 }
 0x1ea   : > { %p1373_p10 = scmp.lt.u32.totalorder %s1371_s30, %s1367_s23  ;;  %p1375_p12 = scmp.lt.u32.totalorder %s1367_s23, %s1596_s10 }
 0x1eb   : > { %p1369_p7 = pnand %p1368_p4, %p1490_p5 }
 0x1ec   : > { %p1374_p11 = por %p1373_p10, %p1372_p9 }
 0x1ed   : > { %p1370_p8 = pneg %p1369_p7 }
 0x1ee   : > { %p1376_p13 = por %p1375_p12, %p1374_p11 }
 0x1f0   : > { %p1377_p0 = pnand %p1376_p13, %p1370_p8 }
 0x1f2   : > { %1380 = shalt.err (!%p1377_p0)
}
 0x1f3   : > { %1306 = dma.vmem_to_hbm [thread:$0]  (%p1490_p5), %s1598_s6, 16, %s1596_s10, %s1032_s13   ;;  %1024 = vst.msk [vmem:[%s250_s22] sm:$0x1] %vm1023_vm5, %v1020_v60 }
 0x1f4 PF: > { %p1312_p1 = scmp.ge.s32.totalorder %s1415_s21, 2  ;;  %s1065_s14 = sand.u32 1, %s1403_s18  }
 0x1f5   : > { %s1066_s15 = scalar_lea.sflag [#allocation3], %s1065_s14 }
 0x1f6   : > { %p1309_p2 = pnand %p1312_p1, %p1494_p6 }
 0x1f8   : > { %1398 = dma.done.wait (!%p1309_p2), %s1066_s15, 16  }
 0x1f9   : > { %1400 = vsyncadd (!%p1309_p2), %s1066_s15, 4294967280  ;;  %p16_p5 = scmp.ge.s32.totalorder %s1477_s24, 4   ;;  %s1659_s18 = smov %s1407_s19 }
 0x1fa   : > { %s1660_s19 = smov %s1411_s20  ;;  %s1661_s20 = smov %s1488_s27 }
 0x1fb   : > { %s1662_s21 = smov %s1477_s24  ;;  %18 = sbr.rel (!%p16_p5) target bundleno = 3 (0x3), region = 86 }
 0x202   :  { %1070 = vsyncpa [#allocation3], 1 }
 0x203   :  { %1072 = vsyncpa [#allocation3 + $0x1], 1 }

// kernel: ms_ssim_loss.5
= control target key start
LH: loop header
LB: loop body
LE: loop exit
PB: predicated region body
PF: predicated region fallthrough
CT: control target
= control target key end

     0   :  { %s10361_s0 = inlined_call_operand.hbm [shape: f32[2,176,176], index: 0, kind: input, shape index: {}]   ;;  %s10362_s1 = inlined_call_operand.hbm [shape: f32[2,176,176], index: 1, kind: input, shape index: {}]   ;;  %s10363_s2 = inlined_call_operand.hbm [shape: f32[166,176], index: 2, kind: input, shape index: {}]   ;;  %s10364_s3 = inlined_call_operand.hbm [shape: f32[176,166], index: 3, kind: input, shape index: {}]   ;;  %s10365_s4 = inlined_call_operand.hbm [shape: f32[88,176], index: 4, kind: input, shape index: {}]   ;;  %s10366_s5 = inlined_call_operand.hbm [shape: f32[176,88], index: 5, kind: input, shape index: {}]   ;;  %s10367_s6 = inlined_call_operand.hbm [shape: f32[2,1,1], index: 6, kind: output, shape index: {0}]   ;;  %s10368_s7 = inlined_call_operand.vmem [shape: f32[2,1,1], index: 7, kind: output, shape index: {1}]   ;;  %s10369_s8 = inlined_call_operand.vmem [shape: f32[2,88,88], index: 8, kind: output, shape index: {2}]   ;;  %s10370_s9 = inlined_call_operand.vmem [shape: f32[2,88,88], index: 9, kind: output, shape index: {3}]  }
   0x1   :  { %10808 = sst [smem:[#allocation188_spill]] %s10361_s0 }
   0x2   :  { %10809 = sst [smem:[#allocation189_spill]] %s10363_s2 }
   0x3   :  { %10810 = sst [smem:[#allocation190_spill]] %s10364_s3 }
   0x4   :  { %10811 = sst [smem:[#allocation191_spill]] %s10368_s7 }
   0x5   :  { %15 = vsyncpa [#allocation3], 0 }
   0x6   :  { %17 = vsyncpa [#allocation3 + $0x1], 0 }
   0x7   :  { %18 = vsyncpa [#allocation6], 0 }
   0x8   :  { %20 = vsyncpa [#allocation6 + $0x1], 0 }
   0x9   :  { %21 = vsyncpa [#allocation9], 0 }
   0xa   :  { %22 = vsyncpa [#allocation12], 0 }
   0xb   :  { %23 = vsyncpa [#allocation4], 0 }
   0xc   :  { %25 = vsyncpa [#allocation4 + $0x1], 0  ;;  %s6547_s30 = smov 0   ;;  %s6549_s10 = smov 0  }
   0xd   :  { %s6551_s11 = smov 0   ;;  %s6553_s12 = smov 0  }
   0xe LB: > { %10812 = sst [smem:[#allocation20_spill]] %s6471_s30  ;;  %s6568_s13 = sadd.s32 4294967295, %s6483_s12   ;;  %s6483_s12 = sphi %s6553_s12, %s11702_s12   ;;  %s6479_s11 = sphi %s6551_s11, %s11701_s11   ;;  %s6475_s10 = sphi %s6549_s10, %s11700_s10   ;;  %s6471_s30 = sphi %s6547_s30, %s11699_s30  }
   0xf   : > { %s5005_s14 = sadd.s32 4294967294, %s6483_s12   ;;  %p51_p0 = scmp.ne.s32.totalorder %s6475_s10, %s6471_s30 }
  0x10   : > { %p10371_p1 = scmp.eq.s32.totalorder %s6568_s13, 0  ;;  %p191_p3 = scmp.eq.s32.totalorder %s5005_s14, 1 }
  0x11   : > { %p5006_p5 = scmp.ge.s32.totalorder %s6483_s12, 1  ;;  %p276_p7 = scmp.lt.s32.totalorder %s6483_s12, 3 }
  0x12   : > { %p6577_p4 = por %p10371_p1, %p51_p0  ;;  %p6582_p6 = por %p191_p3, %p51_p0 }
  0x13   : > { %p6587_p8 = pnand %p5006_p5, %p276_p7  ;;  %s6485_s18 = smov [#allocation7]  }
  0x14   : > { %s10813_s15 = scalar_select %p6577_p4, 1, 0 }
  0x15   : > { %s10814_s16 = scalar_select %p6582_p6, 1, 0 }
  0x16   : > { %s10816_s17 = scalar_select %p6587_p8, 1, 0 }
  0x17   : > { %10815 = sst [smem:[#allocation21_spill]] %s10814_s16  ;;  %s288_s19 = sshll.u32 %s6485_s18, 4  ;;  %s6591_s19 = int_to_ptr.vmem [resolvable:$true] %s288_s19 }
  0x18   : > { %p5900_p9 = pneg %p6587_p8  ;;  %s6486_s21 = smov [#allocation8]  }
  0x19   : > { %s301_s22 = sshll.u32 %s6486_s21, 4  ;;  %s6487_s23 = smov [#allocation10]   ;;  %s6602_s22 = int_to_ptr.vmem [resolvable:$true] %s301_s22 }
  0x1a   : > { %p6598_p11 = pnand %p5900_p9, %p10371_p1  ;;  %s6604_s24 = sshll.u32 %s6487_s23, 4  ;;  %s315_s24 = int_to_ptr.vmem [resolvable:$true] %s6604_s24 }
  0x1b   : > { %s10818_s2 = sld [smem:[#allocation189_spill]] }
  0x1c   : > { %p6614_p13 = pneg %p6598_p11 }
  0x21   : > { %s6229_s27 = scalar_lea.hbm %s10818_s2, 5376 }
  0x22   : > { %p6230_p12 = scmp.ne.s32.totalorder %s10818_s2, %s6229_s27  ;;  %p6236_p5 = scmp.lt.u32.totalorder %s6229_s27, %s10818_s2 }
  0x24   : > { %p6232_p0 = pnand %p6614_p13, %p6230_p12 }
  0x26   : > { %p6233_p3 = pneg %p6232_p0 }
  0x28   : > { %p6238_p7 = pnand %p6236_p5, %p6233_p3 }
  0x2a   : > { %6241 = shalt.err (!%p6238_p7)
}
  0x2b   : > { %s6242_s23 = scalar_lea.vmem %s6591_s19, 5376  ;;  %p6250_p2 = scmp.lt.s32.totalorder %s6591_s19, %s6591_s19 }
  0x2c   : > { %p6243_p9 = scmp.ne.s32.totalorder %s6591_s19, %s6242_s23  ;;  %p6251_p6 = scmp.lt.s32.totalorder %s6242_s23, %s6242_s23 }
  0x2e   : > { %p6245_p10 = pnand %p6243_p9, %p6614_p13  ;;  %p6252_p12 = por %p6251_p6, %p6250_p2 }
  0x30   : > { %p6246_p1 = pneg %p6245_p10 }
  0x32   : > { %p6253_p0 = pnand %p6252_p12, %p6246_p1 }
  0x34   : > { %6256 = shalt.err (!%p6253_p0)
}
  0x35   : > { %s10377_s25 = smov 256   ;;  %s10380_s26 = smov 16  }
  0x36   : > { %5903 = dma.hbm_to_vmem [thread:$0]  (!%p6598_p11), %s10818_s2, 5376, %s6591_s19, [#allocation6], %s10377_s25, %s10377_s25, %s10380_s26  }
  0x37   : > { %s10820_s3 = sld [smem:[#allocation190_spill]] }
  0x3d   : > { %s6257_s21 = scalar_lea.hbm %s10820_s3, 5632 }
  0x3e   : > { %p6258_p1 = scmp.ne.s32.totalorder %s10820_s3, %s6257_s21  ;;  %p6264_p10 = scmp.lt.u32.totalorder %s6257_s21, %s10820_s3 }
  0x40   : > { %p6260_p2 = pnand %p6258_p1, %p6614_p13 }
  0x42   : > { %p6261_p6 = pneg %p6260_p2 }
  0x44   : > { %p6266_p3 = pnand %p6264_p10, %p6261_p6 }
  0x46   : > { %6269 = shalt.err (!%p6266_p3)
}
  0x47   : > { %s6270_s19 = scalar_lea.vmem %s6602_s22, 5632  ;;  %p6278_p12 = scmp.lt.s32.totalorder %s6602_s22, %s6602_s22 }
  0x48   : > { %p6271_p5 = scmp.ne.s32.totalorder %s6602_s22, %s6270_s19  ;;  %p6279_p0 = scmp.lt.s32.totalorder %s6270_s19, %s6270_s19 }
  0x4a   : > { %p6273_p7 = pnand %p6271_p5, %p6614_p13  ;;  %p6280_p1 = por %p6279_p0, %p6278_p12 }
  0x4c   : > { %p6274_p9 = pneg %p6273_p7 }
  0x4e   : > { %p6281_p2 = pnand %p6280_p1, %p6274_p9 }
  0x50   : > { %6284 = shalt.err (!%p6281_p2)
}
  0x51   : > { %5906 = dma.hbm_to_vmem [thread:$0]  (!%p6598_p11), %s10820_s3, 5632, %s6602_s22, [#allocation9], %s10377_s25, %s10377_s25, %s10380_s26  }
  0x52   : > { %s6285_s28 = scalar_lea.hbm %s10365_s4, 2816 }
  0x53   : > { %p6286_p6 = scmp.ne.s32.totalorder %s10365_s4, %s6285_s28  ;;  %p6292_p5 = scmp.lt.u32.totalorder %s6285_s28, %s10365_s4 }
  0x55   : > { %p6288_p10 = pnand %p6286_p6, %p6614_p13 }
  0x57   : > { %p6289_p3 = pneg %p6288_p10 }
  0x59   : > { %p6294_p7 = pnand %p6292_p5, %p6289_p3 }
  0x5b   : > { %6297 = shalt.err (!%p6294_p7)
}
  0x5c   : > { %s6298_s19 = scalar_lea.vmem %s315_s24, 2816  ;;  %p6306_p1 = scmp.lt.s32.totalorder %s315_s24, %s315_s24 }
  0x5d   : > { %p6299_p9 = scmp.ne.s32.totalorder %s315_s24, %s6298_s19  ;;  %p6307_p2 = scmp.lt.s32.totalorder %s6298_s19, %s6298_s19 }
  0x5f   : > { %p6301_p12 = pnand %p6299_p9, %p6614_p13  ;;  %p6308_p4 = por %p6307_p2, %p6306_p1 }
  0x61   : > { %p6302_p0 = pneg %p6301_p12 }
  0x63   : > { %p6309_p8 = pnand %p6308_p4, %p6302_p0 }
  0x65   : > { %6312 = shalt.err (!%p6309_p8)
}
  0x66   : > { %5909 = dma.hbm_to_vmem [thread:$0]  (!%p6598_p11), %s10365_s4, 2816, %s315_s24, [#allocation9], %s10377_s25, %s10377_s25, %s10380_s26  }
  0x67   : > { %s6490_s30 = smov [#allocation11]   ;;  %s6313_s29 = scalar_lea.hbm %s10366_s5, 2816 }
  0x68   : > { %s327_s16 = sshll.u32 %s6490_s30, 4  ;;  %p6314_p4 = scmp.ne.s32.totalorder %s10366_s5, %s6313_s29  ;;  %s328_s16 = int_to_ptr.vmem [resolvable:$true] %s327_s16 }
  0x69   : > { %p6320_p10 = scmp.lt.u32.totalorder %s6313_s29, %s10366_s5 }
  0x6a   : > { %p6316_p8 = pnand %p6314_p4, %p6614_p13 }
  0x6c   : > { %p6317_p6 = pneg %p6316_p8 }
  0x6e   : > { %p6322_p3 = pnand %p6320_p10, %p6317_p6 }
  0x70   : > { %6325 = shalt.err (!%p6322_p3)
}
  0x71   : > { %s6326_s24 = scalar_lea.vmem %s328_s16, 2816  ;;  %p6334_p12 = scmp.lt.s32.totalorder %s328_s16, %s328_s16 }
  0x72   : > { %p6327_p5 = scmp.ne.s32.totalorder %s328_s16, %s6326_s24  ;;  %p6335_p0 = scmp.lt.s32.totalorder %s6326_s24, %s6326_s24 }
  0x74   : > { %p6329_p7 = pnand %p6327_p5, %p6614_p13  ;;  %p6336_p1 = por %p6335_p0, %p6334_p12 }
  0x76   : > { %p6330_p9 = pneg %p6329_p7 }
  0x78   : > { %p6337_p2 = pnand %p6336_p1, %p6330_p9 }
  0x7a   : > { %6340 = shalt.err (!%p6337_p2)
}
  0x7b   : > { %s6491_s22 = smov 128   ;;  %s6492_s14 = smov 8  }
  0x7c   : > { %5912 = dma.hbm_to_vmem [thread:$0]  (!%p6598_p11), %s10366_s5, 2816, %s328_s16, [#allocation12], %s6491_s22, %s6491_s22, %s6492_s14  }
  0x7d   : > { %s6705_s27 = sadd.s32 1, %s6483_s12   ;;  %s38_s29 = sadd.s32 1, %s6479_s11 }
  0x7e   : > { %s35_s28 = ssub.s32 %s6483_s12, %s6705_s27  ;;  %p45_p4 = scmp.ne.s32.totalorder %s6479_s11, %s6475_s10 }
  0x7f   : > { %p36_p13 = scmp.eq.s32.totalorder %s35_s28, 0  ;;  %p46_p8 = scmp.eq.s32.totalorder %s6483_s12, 0 }
  0x80   : > { %p10821_p10 = scmp.eq.s32.totalorder %s6568_s13, 1  ;;  %p5928_p5 = scmp.lt.s32.totalorder %s6483_s12, 2 }
  0x81   : > { %s6714_s18 = scalar_select %p36_p13, %s6479_s11, %s38_s29  }
  0x82   : > { %p47_p6 = por %p46_p8, %p45_p4  ;;  %p6718_p3 = por %p10821_p10, %p45_p4 }
  0x83   : > { %s341_s21 = sand.u32 1, %s6479_s11   ;;  %s10379_s23 = smul.u32 5632, %s6483_s12 }
  0x84   : > { %s6724_s16 = smul.u32 352, %s341_s21  ;;  %p6727_p11 = pnand %p5928_p5, %p47_p6 }
  0x85   : > { %s10824_s0 = sld [smem:[#allocation188_spill]]  ;;  %s6742_s29 = scalar_lea.sflag [#allocation3], %s341_s21 }
  0x86   : > { %s345_s30 = scalar_lea.vmem [#allocation2], %s6724_s16  ;;  %p6343_p9 = pneg %p6727_p11 }
  0x87   : > { %s352_s28 = sshll.u32 %s345_s30, 4  ;;  %s6740_s28 = int_to_ptr.vmem [resolvable:$true] %s352_s28 }
  0x8b   : > { %s6737_s7 = scalar_lea.hbm %s10824_s0, %s10379_s23  ;;  %s6346_s24 = scalar_lea.hbm %s10824_s0, 11264 }
  0x8c   : > { %s6341_s25 = scalar_lea.hbm %s6737_s7, 5632  ;;  %p6347_p1 = scmp.lt.u32.totalorder %s6737_s7, %s10824_s0 }
  0x8d   : > { %p6342_p7 = scmp.ne.s32.totalorder %s6737_s7, %s6341_s25  ;;  %p6348_p2 = scmp.lt.u32.totalorder %s6346_s24, %s6341_s25 }
  0x8e   : > { %p6350_p4 = scmp.lt.u32.totalorder %s6341_s25, %s6737_s7 }
  0x8f   : > { %p6344_p12 = pnand %p6343_p9, %p6342_p7  ;;  %p6349_p13 = por %p6348_p2, %p6347_p1 }
  0x91   : > { %p6345_p0 = pneg %p6344_p12  ;;  %p6351_p8 = por %p6350_p4, %p6349_p13 }
  0x93   : > { %p6352_p6 = pnand %p6351_p8, %p6345_p0 }
  0x95   : > { %6355 = shalt.err (!%p6352_p6)
}
  0x96   : > { %s6356_s21 = scalar_lea.vmem %s6740_s28, 5632  ;;  %s6493_s30 = smov [#allocation2]  }
  0x97   : > { %p6357_p10 = scmp.ne.s32.totalorder %s6740_s28, %s6356_s21  ;;  %s6361_s22 = sshll.u32 %s6493_s30, 4  ;;  %s6362_s22 = int_to_ptr.vmem [resolvable:$false] %s6361_s22 }
  0x98   : > { %s6363_s26 = scalar_lea.vmem %s6362_s22, 11264  ;;  %p6364_p12 = scmp.lt.s32.totalorder %s6740_s28, %s6362_s22 }
  0x99   : > { %p6359_p5 = pnand %p6357_p10, %p6343_p9  ;;  %p6365_p1 = scmp.lt.s32.totalorder %s6363_s26, %s6356_s21 }
  0x9b   : > { %p6360_p7 = pneg %p6359_p5  ;;  %p6366_p2 = por %p6365_p1, %p6364_p12 }
  0x9d   : > { %p6367_p13 = pnand %p6366_p2, %p6360_p7 }
  0x9f   : > { %6370 = shalt.err (!%p6367_p13)
}
  0xa0   : > { %s10825_s25 = smov 16   ;;  %s10826_s23 = smov 256  }
  0xa1   : > { %5916 = dma.hbm_to_vmem [thread:$0]  (!%p6727_p11), %s6737_s7, 5632, %s6740_s28, %s6742_s29, %s10826_s23, %s10826_s23, %s10825_s25  }
  0xa2   : > { %s10827_s24 = smul.u32 5632, %s6483_s12  ;;  %s366_s22 = scalar_lea.vmem [#allocation5], %s6724_s16 }
  0xa3   : > { %s373_s26 = sshll.u32 %s366_s22, 4  ;;  %s10828_s0 = sand.u32 1, %s6483_s12   ;;  %s6781_s26 = int_to_ptr.vmem [resolvable:$true] %s373_s26 }
  0xa4   : > { %s6778_s21 = scalar_lea.hbm %s10362_s1, %s10827_s24  ;;  %s6785_s2 = scalar_lea.sflag [#allocation6], %s10828_s0 }
  0xa5   : > { %s6371_s3 = scalar_lea.hbm %s6778_s21, 5632  ;;  %s6376_s29 = scalar_lea.hbm %s10362_s1, 11264 }
  0xa6   : > { %p6372_p0 = scmp.ne.s32.totalorder %s6778_s21, %s6371_s3  ;;  %p6377_p6 = scmp.lt.u32.totalorder %s6778_s21, %s10362_s1 }
  0xa7   : > { %p6378_p10 = scmp.lt.u32.totalorder %s6376_s29, %s6371_s3  ;;  %p6380_p7 = scmp.lt.u32.totalorder %s6371_s3, %s6778_s21 }
  0xa8   : > { %p6374_p4 = pnand %p6372_p0, %p6343_p9 }
  0xa9   : > { %p6379_p5 = por %p6378_p10, %p6377_p6 }
  0xaa   : > { %p6375_p8 = pneg %p6374_p4 }
  0xab   : > { %p6381_p12 = por %p6380_p7, %p6379_p5 }
  0xad   : > { %p6382_p1 = pnand %p6381_p12, %p6375_p8 }
  0xaf   : > { %6385 = shalt.err (!%p6382_p1)
}
  0xb0   : > { %s6386_s0 = scalar_lea.vmem %s6781_s26, 5632  ;;  %s6494_s16 = smov [#allocation5]  }
  0xb1   : > { %p6387_p2 = scmp.ne.s32.totalorder %s6781_s26, %s6386_s0  ;;  %s6391_s30 = sshll.u32 %s6494_s16, 4  ;;  %s6392_s30 = int_to_ptr.vmem [resolvable:$false] %s6391_s30 }
  0xb2   : > { %s6393_s22 = scalar_lea.vmem %s6392_s30, 11264  ;;  %p6394_p4 = scmp.lt.s32.totalorder %s6781_s26, %s6392_s30 }
  0xb3   : > { %p6389_p13 = pnand %p6387_p2, %p6343_p9  ;;  %p6395_p6 = scmp.lt.s32.totalorder %s6393_s22, %s6386_s0 }
  0xb5   : > { %p6390_p0 = pneg %p6389_p13  ;;  %p6396_p10 = por %p6395_p6, %p6394_p4 }
  0xb7   : > { %p6397_p5 = pnand %p6396_p10, %p6390_p0 }
  0xb9   : > { %6400 = shalt.err (!%p6397_p5)
}
  0xba   : > { %5919 = dma.hbm_to_vmem [thread:$0]  (!%p6727_p11), %s6778_s21, 5632, %s6781_s26, %s6785_s2, %s10826_s23, %s10826_s23, %s10825_s25  }
  0xbb   : > { %p10829_p9 = scmp.ne.s32.totalorder %s10816_s17, 0 }
  0xbd   : > { %385 = sbr.rel (%p10829_p9) target bundleno = 1295 (0x50f), region = 44 }
  0xc4   : > { %s6817_s3 = sand.u32 1, %s6475_s10   ;;  %p10830_p8 = scmp.ne.s32.totalorder %s10813_s15, 0 }
  0xc5   : > { %s5876_s7 = smul.u32 352, %s6817_s3  ;;  %s388_s28 = scalar_lea.sflag [#allocation3], %s6817_s3 }
  0xc7   : > { %s6821_s29 = scalar_lea.vmem [#allocation2], %s5876_s7 }
  0xc8   : > { %6446 = dma.done.wait (%p10830_p8), %s388_s28, 5632  }
  0xc9   : > { %6448 = vsyncadd (%p10830_p8), %s388_s28, 4294961664  ;;  %s396_s2 = sand.u32 1, %s6568_s13   ;;  %s6828_s19 = scalar_lea.vmem [#allocation5], %s5876_s7 }
  0xca   : > { %s397_s17 = scalar_lea.sflag [#allocation6], %s396_s2 }
  0xcb   : > { %6450 = dma.done.wait (%p10830_p8), %s397_s17, 5632  }
  0xcc   : > { %6452 = vsyncadd (%p10830_p8), %s397_s17, 4294961664  ;;  %p10831_p11 = scmp.eq.s32.totalorder %s6568_s13, 0 }
  0xce   : > { %6454 = dma.done.wait (%p10831_p11), [#allocation6], 5376   ;;  %p10832_p7 = pmov %p10831_p11 }
  0xd0   : > { %6456 = vsyncadd (%p10832_p7), [#allocation6], 4294961920  ;;  %p10833_p12 = pmov %p10832_p7 }
  0xd1   : > { %p10834_p1 = pmov %p10832_p7 }
  0xd2   : > { %6458 = dma.done.wait (%p10833_p12), [#allocation9], 8448  }
  0xd3   : > { %6460 = vsyncadd (%p10834_p1), [#allocation9], 4294958848  ;;  %p10835_p2 = pmov %p10834_p1 }
  0xd4   : > { %p10836_p13 = pmov %p10834_p1 }
  0xd5   : > { %6462 = dma.done.wait (%p10835_p2), [#allocation12], 2816  }
  0xd6   : > { %6464 = vsyncadd (%p10836_p13), [#allocation12], 4294964480  ;;  %v6847_v0 = vld [vmem:[%s6821_s29 + $0x8] sm:$0xff]  ;;  %v6850_v1 = vld [vmem:[%s6821_s29 + $0x18] sm:$0xff]  ;;  %vm655_vm0 = vcmask 392192   ;;  %vm3874_vm1 = vcmask 310272  }
  0xd7   : > { %v6853_v2 = vld [vmem:[%s6821_s29] sm:$0xff]  ;;  %v6857_v3 = vpack.c.bf16 %v6850_v1, %v6847_v0  ;;  %v6860_v4 = vld [vmem:[%s6821_s29 + $0x10] sm:$0xff]  ;;  %v6867_v6 = vld [vmem:[%s6821_s29 + $0x28] sm:$0xff]  ;;  %p468_p0 = scmp.lt.s32.totalorder %s6568_s13, 1  ;;  %vm4467_vm2 = vcmask 719872   ;;  %vm3955_vm3 = vcmask 1045504  }
  0xd8   : > { %10837 = vst [vmem:[#allocation22_spill] sm:$0xff] %v6853_v2  ;;  %10839 = vst [vmem:[#allocation24_spill] sm:$0xff] %v6860_v4  ;;  %v6864_v5 = vpack.c.bf16 %v6860_v4, %v6853_v2  ;;  %v6870_v7 = vld [vmem:[%s6821_s29 + $0x38] sm:$0xff]  ;;  %v6873_v8 = vld [vmem:[%s6821_s29 + $0x20] sm:$0xff]  ;;  %v6896_v14 = vmul.f32 %v6853_v2, %v6853_v2  ;;  %v6900_v15 = vmul.f32 %v6860_v4, %v6860_v4  ;;  %vm3957_vm4 = vcmask 308224   ;;  %s5275_s16 = sshll.u32 %s6568_s13, 4 }
  0xd9   : > { %10838 = vst [vmem:[#allocation23_spill] sm:$0xff] %v6857_v3  ;;  %10841 = vst [vmem:[#allocation26_spill] sm:$0xff] %v6873_v8  ;;  %5279 = vmatprep.subr.bf16.mxu0 %v6857_v3  ;;  %v6878_v9 = vpack.c.bf16 %v6870_v7, %v6867_v6  ;;  %v6881_v10 = vld [vmem:[%s6821_s29 + $0x30] sm:$0xff]  ;;  %v6889_v12 = vld [vmem:[%s6821_s29 + $0x48] sm:$0xff]  ;;  %v6950_v29 = vmul.f32 %v6873_v8, %v6873_v8  ;;  %s10215_s15 = scalar_select %p468_p0, %s6568_s13, 1  ;;  %vm3990_vm5 = vcmask 0  }
  0xda   : > { %10840 = vst [vmem:[#allocation25_spill] sm:$0xff] %v6864_v5  ;;  %10843 = vst [vmem:[#allocation28_spill] sm:$0xff] %v6881_v10  ;;  %5281 = vmatpush1.bf16.msra.mxu0 %v6864_v5  ;;  %v6886_v11 = vpack.c.bf16 %v6881_v10, %v6873_v8  ;;  %v6892_v13 = vld [vmem:[%s6821_s29 + $0x58] sm:$0xff]  ;;  %v6908_v17 = vld [vmem:[%s6821_s29 + $0x40] sm:$0xff]  ;;  %v6954_v30 = vmul.f32 %v6881_v10, %v6881_v10  ;;  %s448_s30 = scalar_lea.vmem [#allocation13], %s6817_s3  ;;  %s11694_s17 = sld [smem:[#allocation191_spill]] }
  0xdb   : > { %10842 = vst [vmem:[#allocation27_spill] sm:$0xff] %v6878_v9  ;;  %5283 = vmatprep.subr.bf16.mxu0 %v6878_v9  ;;  %v6905_v16 = vpack.c.bf16 %v6892_v13, %v6889_v12  ;;  %10846 = vst [vmem:[#allocation31_spill] sm:$0xff] %v6908_v17  ;;  %v6911_v18 = vld [vmem:[%s6821_s29 + $0x50] sm:$0xff]  ;;  %v6914_v19 = vld [vmem:[%s6821_s29 + $0x68] sm:$0xff]  ;;  %v6999_v43 = vmul.f32 %v6908_v17, %v6908_v17  ;;  %s5877_s25 = smul.u32 88, %s10215_s15  ;;  %s4800_s22 = sshll.u32 %s448_s30, 4  ;;  %s10308_s22 = int_to_ptr.vmem [resolvable:$true] %s4800_s22 }
  0xdc   : > { %10844 = vst [vmem:[#allocation29_spill] sm:$0xff] %v6886_v11  ;;  %10847 = vst [vmem:[#allocation32_spill] sm:$0xff] %v6911_v18  ;;  %v6917_v20 = vld [vmem:[%s6821_s29 + $0x78] sm:$0xff]  ;;  %v6922_v21 = vpack.c.bf16 %v6911_v18, %v6908_v17  ;;  %v6930_v23 = vld [vmem:[%s6821_s29 + $0x60] sm:$0xff]  ;;  %v7003_v44 = vmul.f32 %v6911_v18, %v6911_v18  ;;  %s6401_s23 = scalar_lea.vmem %s10308_s22, 16  ;;  %s6496_s21 = smov [#allocation13]  }
  0xdd   : > { %10845 = vst [vmem:[#allocation30_spill] sm:$0xff] %v6905_v16  ;;  %v6927_v22 = vpack.c.bf16 %v6917_v20, %v6914_v19  ;;  %10850 = vst [vmem:[#allocation35_spill] sm:$0xff] %v6930_v23  ;;  %v6933_v24 = vld [vmem:[%s6821_s29 + $0x70] sm:$0xff]  ;;  %v6938_v26 = vld [vmem:[%s6821_s29 + $0x88] sm:$0xff]  ;;  %v7031_v52 = vmul.f32 %v6930_v23, %v6930_v23  ;;  %s10237_s26 = scalar_lea.vmem %s10369_s8, %s5877_s25  ;;  %s10275_s0 = scalar_lea.vmem %s10370_s9, %s5877_s25 }
  0xde   : > { %5285 = vmatpush1.bf16.msra.mxu0 %v6886_v11  ;;  %10848 = vst [vmem:[#allocation33_spill] sm:$0xff] %v6922_v21  ;;  %10851 = vst [vmem:[#allocation36_spill] sm:$0xff] %v6933_v24  ;;  %v6941_v27 = vld [vmem:[%s6821_s29 + $0x98] sm:$0xff]  ;;  %v6946_v28 = vpack.c.bf16 %v6933_v24, %v6930_v23  ;;  %v6962_v32 = vld [vmem:[%s6821_s29 + $0x80] sm:$0xff]  ;;  %v7035_v53 = vmul.f32 %v6933_v24, %v6933_v24  ;;  %s4775_s25 = scalar_lea.sflag [#allocation4], %s6817_s3  ;;  %p6402_p4 = scmp.ne.s32.totalorder %s10308_s22, %s6401_s23 }
  0xdf   : > { %5287 = vmatprep.subr.bf16.mxu0 %v6905_v16  ;;  %10849 = vst [vmem:[#allocation34_spill] sm:$0xff] %v6927_v22  ;;  %v6959_v31 = vpack.c.bf16 %v6941_v27, %v6938_v26  ;;  %10854 = vst [vmem:[#allocation39_spill] sm:$0xff] %v6962_v32  ;;  %v6965_v33 = vld [vmem:[%s6821_s29 + $0x90] sm:$0xff]  ;;  %v6968_v34 = vld [vmem:[%s6821_s29 + $0xa8] sm:$0xff] }
  0xe0   : > { %10852 = vst [vmem:[#allocation37_spill] sm:$0xff] %v6946_v28  ;;  %10855 = vst [vmem:[#allocation40_spill] sm:$0xff] %v6965_v33  ;;  %v6971_v35 = vld [vmem:[%s6821_s29 + $0xb8] sm:$0xff]  ;;  %v6976_v36 = vpack.c.bf16 %v6965_v33, %v6962_v32  ;;  %v6984_v38 = vld [vmem:[%s6821_s29 + $0xa0] sm:$0xff]  ;;  %p6403_p6 = pnand %p6402_p4, %p6718_p3 }
  0xe1   : > { %10853 = vst [vmem:[#allocation38_spill] sm:$0xff] %v6959_v31  ;;  %v6981_v37 = vpack.c.bf16 %v6971_v35, %v6968_v34  ;;  %10858 = vst [vmem:[#allocation43_spill] sm:$0xff] %v6984_v38  ;;  %v6987_v39 = vld [vmem:[%s6821_s29 + $0xb0] sm:$0xff]  ;;  %v6992_v41 = vld [vmem:[%s6821_s29 + $0xc8] sm:$0xff] }
  0xe2   : > { %5289 = vmatpush1.bf16.msra.mxu0 %v6922_v21  ;;  %10856 = vst [vmem:[#allocation41_spill] sm:$0xff] %v6976_v36  ;;  %10859 = vst [vmem:[#allocation44_spill] sm:$0xff] %v6987_v39  ;;  %v6995_v42 = vld [vmem:[%s6821_s29 + $0xd8] sm:$0xff]  ;;  %v7008_v45 = vpack.c.bf16 %v6987_v39, %v6984_v38  ;;  %v7016_v47 = vld [vmem:[%s6821_s29 + $0xc0] sm:$0xff]  ;;  %p6404_p10 = pneg %p6403_p6 }
  0xe3   : > { %5291 = vmatprep.subr.bf16.mxu0 %v6927_v22  ;;  %10857 = vst [vmem:[#allocation42_spill] sm:$0xff] %v6981_v37  ;;  %v7013_v46 = vpack.c.bf16 %v6995_v42, %v6992_v41  ;;  %10862 = vst [vmem:[#allocation47_spill] sm:$0xff] %v7016_v47  ;;  %v7019_v48 = vld [vmem:[%s6821_s29 + $0xd0] sm:$0xff]  ;;  %v7022_v49 = vld [vmem:[%s6821_s29 + $0xe8] sm:$0xff] }
  0xe4   : > { %10860 = vst [vmem:[#allocation45_spill] sm:$0xff] %v7008_v45  ;;  %10863 = vst [vmem:[#allocation48_spill] sm:$0xff] %v7019_v48  ;;  %v7025_v50 = vld [vmem:[%s6821_s29 + $0xf8] sm:$0xff]  ;;  %v7027_v51 = vld [vmem:[#allocation7 + $0x8] sm:$0xff]  ;;  %v7044_v55 = vpack.c.bf16 %v7019_v48, %v7016_v47  ;;  %v7179_v24 = vmul.f32 %v7019_v48, %v7019_v48 }
  0xe5   : > { %10861 = vst [vmem:[#allocation46_spill] sm:$0xff] %v7013_v46  ;;  %5021 = vmatprep.mubr.msk.f32.mxu0 %vm655_vm0, %v7027_v51  ;;  %v7049_v56 = vpack.c.bf16 %v7025_v50, %v7022_v49  ;;  %v7052_v57 = vld [vmem:[%s6821_s29 + $0xe0] sm:$0xff]  ;;  %v7055_v58 = vld [vmem:[%s6821_s29 + $0xf0] sm:$0xff]  ;;  %v7058_v59 = vld [vmem:[%s6821_s29 + $0x108] sm:$0xff] }
  0xe6   : > { %5293 = vmatpush1.bf16.msra.mxu0 %v6946_v28  ;;  %10864 = vst [vmem:[#allocation49_spill] sm:$0xff] %v7044_v55  ;;  %10866 = vst [vmem:[#allocation51_spill] sm:$0xff] %v7052_v57  ;;  %v7061_v60 = vld [vmem:[%s6821_s29 + $0x118] sm:$0xff]  ;;  %v7068_v62 = vpack.c.bf16 %v7055_v58, %v7052_v57  ;;  %v7076_v54 = vld [vmem:[%s6821_s29 + $0x100] sm:$0xff]  ;;  %v7245_v4 = vmul.f32 %v7055_v58, %v7055_v58 }
  0xe7   : > { %5295 = vmatprep.subr.bf16.mxu0 %v6959_v31  ;;  %10865 = vst [vmem:[#allocation50_spill] sm:$0xff] %v7049_v56  ;;  %10867 = vst [vmem:[#allocation52_spill] sm:$0xff] %v7055_v58  ;;  %v7073_v63 = vpack.c.bf16 %v7061_v60, %v7058_v59  ;;  %v7079_v40 = vld [vmem:[%s6821_s29 + $0x110] sm:$0xff]  ;;  %v7082_v61 = vld [vmem:[%s6821_s29 + $0x128] sm:$0xff] }
  0xe8   : > { %10868 = vst [vmem:[#allocation53_spill] sm:$0xff] %v7068_v62  ;;  %10870 = vst [vmem:[#allocation55_spill] sm:$0xff] %v7076_v54  ;;  %v7085_v25 = vld [vmem:[%s6821_s29 + $0x138] sm:$0xff]  ;;  %v7112_v31 = vld [vmem:[%s6821_s29 + $0x148] sm:$0xff] }
  0xe9   : > { %10869 = vst [vmem:[#allocation54_spill] sm:$0xff] %v7073_v63  ;;  %10871 = vst [vmem:[#allocation56_spill] sm:$0xff] %v7079_v40  ;;  %v7130_v21 = vld [vmem:[%s6821_s29 + $0x140] sm:$0xff]  ;;  %v7133_v16 = vld [vmem:[%s6821_s29 + $0x150] sm:$0xff] }
  0xea   : > { %5297 = vmatpush1.bf16.msra.mxu0 %v6976_v36  ;;  %10872 = vst [vmem:[#allocation57_spill] sm:$0xff] %v7085_v25  ;;  %v7109_v36 = vld [vmem:[%s6821_s29 + $0x130] sm:$0xff]  ;;  %10877 = vst [vmem:[#allocation62_spill] sm:$0xff] %v7112_v31  ;;  %v7136_v11 = vld [vmem:[%s6828_s19 + $0x8] sm:$0xff]  ;;  %v7152_v9 = vpack.c.bf16 %v7133_v16, %v7130_v21 }
  0xeb   : > { %5299 = vmatprep.subr.bf16.mxu0 %v6981_v37  ;;  %v7106_v37 = vld [vmem:[%s6821_s29 + $0x120] sm:$0xff]  ;;  %10876 = vst [vmem:[#allocation61_spill] sm:$0xff] %v7109_v36  ;;  %10881 = vst [vmem:[#allocation66_spill] sm:$0xff] %v7130_v21  ;;  %v7139_v28 = vld [vmem:[%s6828_s19 + $0x18] sm:$0xff] }
  0xec   : > { %10875 = vst [vmem:[#allocation60_spill] sm:$0xff] %v7106_v37  ;;  %10882 = vst [vmem:[#allocation67_spill] sm:$0xff] %v7133_v16  ;;  %v7155_v5 = vld [vmem:[%s6828_s19] sm:$0xff]  ;;  %v7158_v3 = vld [vmem:[%s6828_s19 + $0x10] sm:$0xff] }
  0xed   : > { %10883 = vst [vmem:[#allocation68_spill] sm:$0xff] %v7136_v11  ;;  %10884 = vst [vmem:[#allocation69_spill] sm:$0xff] %v7139_v28  ;;  %v7186_v23 = vpack.c.bf16 %v7158_v3, %v7155_v5  ;;  %v7189_v18 = vld [vmem:[%s6828_s19 + $0x20] sm:$0xff]  ;;  %v7202_v48 = vld [vmem:[%s6828_s19 + $0x48] sm:$0xff] }
  0xee   : > { %5301 = vmatpush1.bf16.msra.mxu0 %v7008_v45  ;;  %v7103_v45 = vpack.c.bf16 %v7085_v25, %v7082_v61  ;;  %10885 = vst [vmem:[#allocation70_spill] sm:$0xff] %v7152_v9  ;;  %10886 = vst [vmem:[#allocation71_spill] sm:$0xff] %v7155_v5  ;;  %v7205_v17 = vld [vmem:[%s6828_s19 + $0x58] sm:$0xff]  ;;  %v7223_v8 = vld [vmem:[%s6828_s19 + $0x50] sm:$0xff] }
  0xef   : > { %5303 = vmatprep.subr.bf16.mxu0 %v7013_v46  ;;  %v7098_v46 = vpack.c.bf16 %v7079_v40, %v7076_v54  ;;  %10887 = vst [vmem:[#allocation72_spill] sm:$0xff] %v7158_v3  ;;  %10891 = vst [vmem:[#allocation76_spill] sm:$0xff] %v7186_v23  ;;  %v7225_v3 = vld [vmem:[#allocation7 + $0x28] sm:$0xff]  ;;  %v7262_v5 = vld [vmem:[#allocation7 + $0x38] sm:$0xff] }
  0xf0   : > { %10874 = vst [vmem:[#allocation59_spill] sm:$0xff] %v7103_v45  ;;  %10892 = vst [vmem:[#allocation77_spill] sm:$0xff] %v7189_v18  ;;  %v7273_v2 = vld [vmem:[%s6828_s19 + $0x98] sm:$0xff]  ;;  %v7429_v25 = vld [vmem:[#allocation7 + $0x88] sm:$0xff] }
  0xf1   : > { %10873 = vst [vmem:[#allocation58_spill] sm:$0xff] %v7098_v46  ;;  %10895 = vst [vmem:[#allocation80_spill] sm:$0xff] %v7202_v48 }
  0xf2   : > { %5305 = vmatpush1.bf16.msra.mxu0 %v7044_v55  ;;  %v7089_v55 = vmul.f32 %v6962_v32, %v6962_v32  ;;  %v7175_v32 = vmul.f32 %v7016_v47, %v7016_v47  ;;  %v7195_v47 = vld [vmem:[#allocation7 + $0x18] sm:$0xff]  ;;  %10896 = vst [vmem:[#allocation81_spill] sm:$0xff] %v7205_v17  ;;  %10899 = vst [vmem:[#allocation84_spill] sm:$0xff] %v7223_v8 }
  0xf3   : > { %5307 = vmatprep.subr.bf16.mxu0 %v7049_v56  ;;  %v7093_v56 = vmul.f32 %v6965_v33, %v6965_v33  ;;  %v7169_v33 = vld [vmem:[%s6828_s19 + $0x38] sm:$0xff]  ;;  %10904 = vst [vmem:[#allocation89_spill] sm:$0xff] %v7245_v4  ;;  %10910 = vst [vmem:[#allocation95_spill] sm:$0xff] %v7273_v2 }
  0xf4   : > { %10890 = vst [vmem:[#allocation75_spill] sm:$0xff] %v7169_v33  ;;  %v7409_v4 = vld [vmem:[%s6828_s19 + $0x118] sm:$0xff]  ;;  %10943 = vst [vmem:[#allocation128_spill] sm:$0xff] %v7429_v25 }
  0xf5   : > { %10938 = vst [vmem:[#allocation123_spill] sm:$0xff] %v7409_v4 }
  0xf6   : > { %5309 = vmatpush1.bf16.msra.mxu0 %v7068_v62  ;;  %v7115_v62 = vld [vmem:[%s6821_s29 + $0x158] sm:$0xff] }
  0xf7   : > { %5311 = vmatprep.subr.bf16.mxu0 %v7073_v63  ;;  %10878 = vst [vmem:[#allocation63_spill] sm:$0xff] %v7115_v62  ;;  %v7122_v63 = vpack.c.bf16 %v7109_v36, %v7106_v37  ;;  %v7127_v22 = vpack.c.bf16 %v7115_v62, %v7112_v31  ;;  %v7330_v62 = vld [vmem:[#allocation7 + $0x58] sm:$0xff] }
  0xf8   : > { %v7341_v31 = vld [vmem:[%s6828_s19 + $0xd8] sm:$0xff] }
  0xf9   : > { %10879 = vst [vmem:[#allocation64_spill] sm:$0xff] %v7122_v63  ;;  %10880 = vst [vmem:[#allocation65_spill] sm:$0xff] %v7127_v22 }
  0xfa   : > { %5313 = vmatpush1.bf16.msra.mxu0 %v7098_v46  ;;  %v7143_v46 = vmul.f32 %v6984_v38, %v6984_v38  ;;  %v7163_v38 = vpack.c.bf16 %v7139_v28, %v7136_v11  ;;  %v7293_v28 = vld [vmem:[#allocation7 + $0x48] sm:$0xff]  ;;  %v7313_v11 = vmul.f32 %v7079_v40, %v7079_v40  ;;  %10924 = vst [vmem:[#allocation109_spill] sm:$0xff] %v7341_v31 }
  0xfb   : > { %5315 = vmatprep.subr.bf16.mxu0 %v7103_v45  ;;  %v7147_v45 = vmul.f32 %v6987_v39, %v6987_v39  ;;  %v7166_v39 = vld [vmem:[%s6828_s19 + $0x28] sm:$0xff] }
  0xfc   : > { %10888 = vst [vmem:[#allocation73_spill] sm:$0xff] %v7163_v38  ;;  %10889 = vst [vmem:[#allocation74_spill] sm:$0xff] %v7166_v39 }
  0xfd   : > { %10918 = vst [vmem:[#allocation103_spill] sm:$0xff] %v7313_v11 }
  0xfe   : > { %5317 = vmatpush1.bf16.msra.mxu0 %v7122_v63  ;;  %v7192_v63 = vld [vmem:[%s6828_s19 + $0x30] sm:$0xff] }
  0xff   : > { %5319 = vmatprep.subr.bf16.mxu0 %v7127_v22  ;;  %v7182_v22 = vld [vmem:[#allocation7] sm:$0xff]  ;;  %10893 = vst [vmem:[#allocation78_spill] sm:$0xff] %v7192_v63  ;;  %v7215_v10 = vpack.c.bf16 %v7192_v63, %v7189_v18  ;;  %v7233_v63 = vld [vmem:[%s6828_s19 + $0x68] sm:$0xff]  ;;  %v7236_v18 = vld [vmem:[%s6828_s19 + $0x78] sm:$0xff] }
 0x100   : > { %10901 = vst [vmem:[#allocation86_spill] sm:$0xff] %v7233_v63  ;;  %10902 = vst [vmem:[#allocation87_spill] sm:$0xff] %v7236_v18  ;;  %v7267_v58 = vpack.c.bf16 %v7236_v18, %v7233_v63  ;;  %v7288_v63 = vld [vmem:[%s6828_s19 + $0x80] sm:$0xff]  ;;  %v7309_v18 = vmul.f32 %v7076_v54, %v7076_v54  ;;  %v7328_v54 = vld [vmem:[%s6828_s19 + $0xb0] sm:$0xff] }
 0x101   : > { %10897 = vst [vmem:[#allocation82_spill] sm:$0xff] %v7215_v10  ;;  %10912 = vst [vmem:[#allocation97_spill] sm:$0xff] %v7288_v63 }
 0x102   : > { %5321 = vmatpush1.bf16.msra.mxu0 %v7152_v9  ;;  %v7199_v9 = vpack.c.bf16 %v7169_v33, %v7166_v39  ;;  %v7220_v39 = vld [vmem:[%s6828_s19 + $0x40] sm:$0xff]  ;;  %v7241_v33 = vmul.f32 %v7052_v57, %v7052_v57  ;;  %v7260_v57 = vld [vmem:[%s6828_s19 + $0x70] sm:$0xff]  ;;  %10908 = vst [vmem:[#allocation93_spill] sm:$0xff] %v7267_v58  ;;  %10917 = vst [vmem:[#allocation102_spill] sm:$0xff] %v7309_v18  ;;  %v7380_v18 = vmul.f32 %v7109_v36, %v7109_v36 }
 0x103   : > { %5367 = vmatprep.subr.bf16.mxu0 %v7163_v38  ;;  %v7211_v38 = vld [vmem:[#allocation7 + $0x10] sm:$0xff]  ;;  %10898 = vst [vmem:[#allocation83_spill] sm:$0xff] %v7220_v39  ;;  %10907 = vst [vmem:[#allocation92_spill] sm:$0xff] %v7260_v57  ;;  %v7398_v36 = vld [vmem:[#allocation7 + $0x78] sm:$0xff] }
 0x104   : > { %10894 = vst [vmem:[#allocation79_spill] sm:$0xff] %v7199_v9  ;;  %10903 = vst [vmem:[#allocation88_spill] sm:$0xff] %v7241_v33  ;;  %v7361_v33 = vld [vmem:[#allocation7 + $0x68] sm:$0xff] }
 0x105   : > { %784 = vmatmul.mubr.f32.vlgmr.msra.gmra.mrb[0].mxu0 %v7182_v22  ;;  %10921 = vst [vmem:[#allocation106_spill] sm:$0xff] %v7328_v54  ;;  %10932 = vst [vmem:[#allocation117_spill] sm:$0xff] %v7380_v18 }
 0x106   : > { %5369 = vmatpush1.bf16.msra.mxu0 %v7186_v23  ;;  %5022 = vmatprep.mubr.msk.f32.mxu0 %vm655_vm0, %v7195_v47  ;;  %v7230_v23 = vpack.c.bf16 %v7205_v17, %v7202_v48  ;;  %v7254_v17 = vpack.c.bf16 %v7223_v8, %v7220_v39  ;;  %v7257_v48 = vld [vmem:[%s6828_s19 + $0x60] sm:$0xff]  ;;  %v7278_v8 = vld [vmem:[#allocation7 + $0x30] sm:$0xff] }
 0x107   : > { %5371 = vmatprep.subr.bf16.mxu0 %v7199_v9  ;;  %v7249_v9 = vld [vmem:[#allocation7 + $0x20] sm:$0xff]  ;;  %10906 = vst [vmem:[#allocation91_spill] sm:$0xff] %v7257_v48  ;;  %v7291_v39 = vld [vmem:[%s6828_s19 + $0x90] sm:$0xff] }
 0x108   : > { %10900 = vst [vmem:[#allocation85_spill] sm:$0xff] %v7230_v23  ;;  %10905 = vst [vmem:[#allocation90_spill] sm:$0xff] %v7254_v17 }
 0x109   : > { %790 = vmatmul.mubr.f32.gmra.mrb[2].mxu0 %v7211_v38  ;;  %10913 = vst [vmem:[#allocation98_spill] sm:$0xff] %v7291_v39 }
 0x10a   : > { %5023 = vmatprep.mubr.msk.f32.mxu0 %vm655_vm0, %v7225_v3  ;;  %5373 = vmatpush1.bf16.msra.mxu0 %v7215_v10  ;;  %v7270_v10 = vld [vmem:[%s6828_s19 + $0x88] sm:$0xff] }
 0x10b   : > { %5375 = vmatprep.subr.bf16.mxu0 %v7230_v23  ;;  %10909 = vst [vmem:[#allocation94_spill] sm:$0xff] %v7270_v10  ;;  %v7283_v23 = vpack.c.bf16 %v7260_v57, %v7257_v48  ;;  %v7301_v57 = vld [vmem:[%s6828_s19 + $0xa8] sm:$0xff]  ;;  %v7304_v48 = vld [vmem:[%s6828_s19 + $0xb8] sm:$0xff] }
 0x10c   : > { %10915 = vst [vmem:[#allocation100_spill] sm:$0xff] %v7301_v57  ;;  %10916 = vst [vmem:[#allocation101_spill] sm:$0xff] %v7304_v48  ;;  %v7335_v40 = vpack.c.bf16 %v7304_v48, %v7301_v57  ;;  %v7356_v57 = vld [vmem:[%s6828_s19 + $0xc0] sm:$0xff]  ;;  %v7376_v48 = vmul.f32 %v7106_v37, %v7106_v37 }
 0x10d   : > { %796 = vmatmul.mubr.f32.gmra.mrb[4].mxu0 %v7249_v9  ;;  %10911 = vst [vmem:[#allocation96_spill] sm:$0xff] %v7283_v23  ;;  %10926 = vst [vmem:[#allocation111_spill] sm:$0xff] %v7356_v57  ;;  %v7393_v37 = vld [vmem:[%s6828_s19 + $0xe0] sm:$0xff] }
 0x10e   : > { %5024 = vmatprep.mubr.msk.f32.mxu0 %vm655_vm0, %v7262_v5  ;;  %5377 = vmatpush1.bf16.msra.mxu0 %v7254_v17  ;;  %v7298_v17 = vpack.c.bf16 %v7273_v2, %v7270_v10  ;;  %v7322_v2 = vpack.c.bf16 %v7291_v39, %v7288_v63  ;;  %v7325_v10 = vld [vmem:[%s6828_s19 + $0xa0] sm:$0xff]  ;;  %10922 = vst [vmem:[#allocation107_spill] sm:$0xff] %v7335_v40  ;;  %v7346_v39 = vld [vmem:[#allocation7 + $0x50] sm:$0xff]  ;;  %10931 = vst [vmem:[#allocation116_spill] sm:$0xff] %v7376_v48 }
 0x10f   : > { %5379 = vmatprep.subr.bf16.mxu0 %v7267_v58  ;;  %v7317_v58 = vld [vmem:[#allocation7 + $0x40] sm:$0xff]  ;;  %10920 = vst [vmem:[#allocation105_spill] sm:$0xff] %v7325_v10  ;;  %v7359_v63 = vld [vmem:[%s6828_s19 + $0xd0] sm:$0xff]  ;;  %10934 = vst [vmem:[#allocation119_spill] sm:$0xff] %v7393_v37 }
 0x110   : > { %10914 = vst [vmem:[#allocation99_spill] sm:$0xff] %v7298_v17  ;;  %10919 = vst [vmem:[#allocation104_spill] sm:$0xff] %v7322_v2  ;;  %v7440_v48 = vld [vmem:[%s6828_s19 + $0x138] sm:$0xff] }
 0x111   : > { %802 = vmatmul.mubr.f32.gmra.mrb[6].mxu0 %v7278_v8  ;;  %10927 = vst [vmem:[#allocation112_spill] sm:$0xff] %v7359_v63  ;;  %10946 = vst [vmem:[#allocation131_spill] sm:$0xff] %v7440_v48 }
 0x112   : > { %5025 = vmatprep.mubr.msk.f32.mxu0 %vm655_vm0, %v7293_v28  ;;  %5381 = vmatpush1.bf16.msra.mxu0 %v7283_v23  ;;  %v7338_v23 = vld [vmem:[%s6828_s19 + $0xc8] sm:$0xff] }
 0x113   : > { %5383 = vmatprep.subr.bf16.mxu0 %v7298_v17  ;;  %10923 = vst [vmem:[#allocation108_spill] sm:$0xff] %v7338_v23  ;;  %v7351_v17 = vpack.c.bf16 %v7328_v54, %v7325_v10  ;;  %v7369_v54 = vld [vmem:[%s6828_s19 + $0xe8] sm:$0xff]  ;;  %v7372_v10 = vld [vmem:[%s6828_s19 + $0xf8] sm:$0xff] }
 0x114   : > { %10929 = vst [vmem:[#allocation114_spill] sm:$0xff] %v7369_v54  ;;  %10930 = vst [vmem:[#allocation115_spill] sm:$0xff] %v7372_v10  ;;  %v7403_v11 = vpack.c.bf16 %v7372_v10, %v7369_v54  ;;  %v7424_v10 = vld [vmem:[%s6828_s19 + $0x100] sm:$0xff]  ;;  %v7427_v54 = vld [vmem:[%s6828_s19 + $0x110] sm:$0xff] }
 0x115   : > { %808 = vmatmul.mubr.f32.gmra.mrb[8].mxu0 %v7317_v58  ;;  %10925 = vst [vmem:[#allocation110_spill] sm:$0xff] %v7351_v17  ;;  %10941 = vst [vmem:[#allocation126_spill] sm:$0xff] %v7424_v10 }
 0x116   : > { %5026 = vmatprep.mubr.msk.f32.mxu0 %vm655_vm0, %v7330_v62  ;;  %5385 = vmatpush1.bf16.msra.mxu0 %v7322_v2  ;;  %v7366_v2 = vpack.c.bf16 %v7341_v31, %v7338_v23  ;;  %v7390_v31 = vpack.c.bf16 %v7359_v63, %v7356_v57  ;;  %v7396_v23 = vld [vmem:[%s6828_s19 + $0xf0] sm:$0xff]  ;;  %10936 = vst [vmem:[#allocation121_spill] sm:$0xff] %v7403_v11  ;;  %10942 = vst [vmem:[#allocation127_spill] sm:$0xff] %v7427_v54 }
 0x117   : > { %5387 = vmatprep.subr.bf16.mxu0 %v7335_v40  ;;  %v7385_v40 = vld [vmem:[#allocation7 + $0x60] sm:$0xff]  ;;  %10935 = vst [vmem:[#allocation120_spill] sm:$0xff] %v7396_v23  ;;  %v7416_v57 = vld [vmem:[#allocation7 + $0x70] sm:$0xff] }
 0x118   : > { %10928 = vst [vmem:[#allocation113_spill] sm:$0xff] %v7366_v2  ;;  %10933 = vst [vmem:[#allocation118_spill] sm:$0xff] %v7390_v31 }
 0x119   : > { %814 = vmatmul.mubr.f32.gmra.mrb[10].mxu0 %v7346_v39  ;;  %10939 = vst [vmem:[#allocation124_spill] sm:$0xff] %v7416_v57 }
 0x11a   : > { %5027 = vmatprep.mubr.msk.f32.mxu0 %vm655_vm0, %v7361_v33  ;;  %5389 = vmatpush1.bf16.msra.mxu0 %v7351_v17  ;;  %v7406_v17 = vld [vmem:[%s6828_s19 + $0x108] sm:$0xff] }
 0x11b   : > { %5391 = vmatprep.subr.bf16.mxu0 %v7366_v2  ;;  %10937 = vst [vmem:[#allocation122_spill] sm:$0xff] %v7406_v17  ;;  %v7421_v2 = vpack.c.bf16 %v7396_v23, %v7393_v37  ;;  %v7434_v63 = vpack.c.bf16 %v7409_v4, %v7406_v17  ;;  %v7444_v23 = vmul.f32 %v7130_v21, %v7130_v21  ;;  %v7461_v21 = vld [vmem:[%s6828_s19 + $0x120] sm:$0xff]  ;;  %v7464_v17 = vld [vmem:[%s6828_s19 + $0x130] sm:$0xff] }
 0x11c   : > { %v7448_v37 = vmul.f32 %v7133_v16, %v7133_v16  ;;  %v7458_v4 = vpack.c.bf16 %v7427_v54, %v7424_v10  ;;  %10950 = vst [vmem:[#allocation135_spill] sm:$0xff] %v7461_v21  ;;  %10951 = vst [vmem:[#allocation136_spill] sm:$0xff] %v7464_v17  ;;  %v7466_v16 = vld [vmem:[#allocation7 + $0x98] sm:$0xff]  ;;  %v7484_v10 = vld [vmem:[#allocation7 + $0x90] sm:$0xff] }
 0x11d   : > { %820 = vmatmul.mubr.f32.gmra.mrb[12].mxu0 %v7385_v40  ;;  %10940 = vst [vmem:[#allocation125_spill] sm:$0xff] %v7421_v2  ;;  %10944 = vst [vmem:[#allocation129_spill] sm:$0xff] %v7434_v63 }
 0x11e   : > { %5028 = vmatprep.mubr.msk.f32.mxu0 %vm655_vm0, %v7398_v36  ;;  %5393 = vmatpush1.bf16.msra.mxu0 %v7390_v31  ;;  %v7437_v31 = vld [vmem:[%s6828_s19 + $0x128] sm:$0xff]  ;;  %10947 = vst [vmem:[#allocation132_spill] sm:$0xff] %v7444_v23  ;;  %10948 = vst [vmem:[#allocation133_spill] sm:$0xff] %v7448_v37  ;;  %v1610_v23 = vmul.f32 %v6847_v0, %v6847_v0  ;;  %v613_v37 = vld [vmem:[#allocation8 + $0x10] sm:$0xff] }
 0x11f   : > { %5395 = vmatprep.subr.bf16.mxu0 %v7403_v11  ;;  %10945 = vst [vmem:[#allocation130_spill] sm:$0xff] %v7437_v31  ;;  %v7453_v11 = vld [vmem:[#allocation7 + $0x80] sm:$0xff]  ;;  %10949 = vst [vmem:[#allocation134_spill] sm:$0xff] %v7458_v4  ;;  %v7471_v18 = vpack.c.bf16 %v7440_v48, %v7437_v31  ;;  %v7495_v31 = vld [vmem:[%s6828_s19 + $0x150] sm:$0xff] }
 0x120   : > { %v7492_v48 = vld [vmem:[%s6828_s19 + $0x140] sm:$0xff]  ;;  %10957 = vst [vmem:[#allocation142_spill] sm:$0xff] %v7495_v31 }
 0x121   : > { %826 = vmatmul.mubr.f32.gmra.mrb[14].mxu0 %v7416_v57  ;;  %10952 = vst [vmem:[#allocation137_spill] sm:$0xff] %v7471_v18  ;;  %10956 = vst [vmem:[#allocation141_spill] sm:$0xff] %v7492_v48  ;;  %v7497_v57 = vld [vmem:[#allocation7 + $0xa8] sm:$0xff] }
 0x122   : > { %5029 = vmatprep.mubr.msk.f32.mxu0 %vm655_vm0, %v7429_v25  ;;  %5397 = vmatpush1.bf16.msra.mxu0 %v7421_v2  ;;  %v7474_v25 = vld [vmem:[%s6828_s19 + $0x148] sm:$0xff]  ;;  %v7477_v2 = vld [vmem:[%s6828_s19 + $0x158] sm:$0xff]  ;;  %10958 = vst [vmem:[#allocation143_spill] sm:$0xff] %v7497_v57 }
 0x123   : > { %5399 = vmatprep.subr.bf16.mxu0 %v7434_v63  ;;  %10953 = vst [vmem:[#allocation138_spill] sm:$0xff] %v7474_v25  ;;  %10954 = vst [vmem:[#allocation139_spill] sm:$0xff] %v7477_v2  ;;  %v7489_v63 = vpack.c.bf16 %v7464_v17, %v7461_v21  ;;  %v7502_v54 = vpack.c.bf16 %v7477_v2, %v7474_v25  ;;  %v7511_v17 = vld [vmem:[#allocation7 + $0xa0] sm:$0xff]  ;;  %v7518_v2 = vld [vmem:[#allocation7 + $0xb8] sm:$0xff] }
 0x124   : > { %10960 = vst [vmem:[#allocation145_spill] sm:$0xff] %v7511_v17  ;;  %10962 = vst [vmem:[#allocation147_spill] sm:$0xff] %v7518_v2  ;;  %v612_v25 = vld [vmem:[#allocation8 + $0x8] sm:$0xff]  ;;  %v611_v21 = vld [vmem:[#allocation8] sm:$0xff] }
 0x125   : > { %832 = vmatmul.mubr.f32.gmra.mrb[16].mxu0 %v7453_v11  ;;  %10955 = vst [vmem:[#allocation140_spill] sm:$0xff] %v7489_v63  ;;  %10959 = vst [vmem:[#allocation144_spill] sm:$0xff] %v7502_v54 }
 0x126   : > { %5030 = vmatprep.mubr.msk.f32.mxu0 %vm655_vm0, %v7466_v16  ;;  %5401 = vmatpush1.bf16.msra.mxu0 %v7458_v4  ;;  %v1612_v4 = vmul.f32 %v6850_v1, %v6850_v1  ;;  %v614_v1 = vld [vmem:[#allocation8 + $0x18] sm:$0xff] }
 0x127   : > { %5403 = vmatprep.subr.bf16.mxu0 %v7471_v18  ;;  %v7516_v18 = vpack.c.bf16 %v7495_v31, %v7492_v48  ;;  %v7529_v31 = vpack.c.bf16 %v613_v37, %v611_v21  ;;  %v7531_v48 = vld [vmem:[#allocation7 + $0xc8] sm:$0xff]  ;;  %v7540_v21 = vld [vmem:[#allocation7 + $0xc0] sm:$0xff]  ;;  %v7544_v37 = vld [vmem:[#allocation7 + $0xd8] sm:$0xff] }
 0x128   : > { %v5454_v0 = vpack.c.bf16 %v1612_v4, %v1610_v23  ;;  %10965 = vst [vmem:[#allocation150_spill] sm:$0xff] %v7531_v48  ;;  %v616_v4 = vld [vmem:[#allocation8 + $0x28] sm:$0xff]  ;;  %v618_v23 = vld [vmem:[#allocation8 + $0x38] sm:$0xff]  ;;  %10967 = vst [vmem:[#allocation152_spill] sm:$0xff] %v7540_v21 }
 0x129   : > { %838 = vmatmul.mubr.f32.gmra.mrb[18].mxu0 %v7484_v10  ;;  %10961 = vst [vmem:[#allocation146_spill] sm:$0xff] %v7516_v18  ;;  %10964 = vst [vmem:[#allocation149_spill] sm:$0xff] %v7529_v31 }
 0x12a   : > { %5031 = vmatprep.mubr.msk.f32.mxu0 %vm655_vm0, %v7497_v57  ;;  %5405 = vmatpush1.bf16.msra.mxu0 %v7489_v63  ;;  %v7524_v57 = vld [vmem:[#allocation7 + $0xb0] sm:$0xff]  ;;  %v7527_v63 = vpack.c.bf16 %v614_v1, %v612_v25  ;;  %10969 = vst [vmem:[#allocation154_spill] sm:$0xff] %v7544_v37  ;;  %v622_v1 = vld [vmem:[#allocation8 + $0x58] sm:$0xff] }
 0x12b   : > { %5407 = vmatprep.subr.bf16.mxu0 %v7502_v54  ;;  %v7536_v54 = vpack.c.bf16 %v618_v23, %v616_v4  ;;  %v619_v4 = vld [vmem:[#allocation8 + $0x40] sm:$0xff]  ;;  %v621_v23 = vld [vmem:[#allocation8 + $0x50] sm:$0xff] }
 0x12c   : > { %10963 = vst [vmem:[#allocation148_spill] sm:$0xff] %v7527_v63  ;;  %5323 = vmatprep.subr.bf16.mxu1 %v7527_v63 }
 0x12d   : > { %844 = vmatmul.mubr.f32.gmra.mrb[20].mxu0 %v7511_v17  ;;  %5325 = vmatpush1.bf16.msra.mxu1 %v7529_v31  ;;  %10966 = vst [vmem:[#allocation151_spill] sm:$0xff] %v7536_v54  ;;  %v617_v17 = vld [vmem:[#allocation8 + $0x30] sm:$0xff] }
 0x12e   : > { %5032 = vmatprep.mubr.msk.f32.mxu0 %vm655_vm0, %v7518_v2  ;;  %5409 = vmatpush1.bf16.msra.mxu0 %v7516_v18  ;;  %v615_v2 = vld [vmem:[#allocation8 + $0x20] sm:$0xff] }
 0x12f   : > { %5455 = vmatprep.subr.bf16.mxu0 %v5454_v0  ;;  %v7542_v25 = vpack.c.bf16 %v617_v17, %v615_v2  ;;  %5327 = vmatprep.subr.bf16.mxu1 %v7536_v54  ;;  %v620_v0 = vld [vmem:[#allocation8 + $0x48] sm:$0xff]  ;;  %v7551_v18 = vld [vmem:[#allocation7 + $0xd0] sm:$0xff]  ;;  %v7555_v2 = vpack.c.bf16 %v621_v23, %v619_v4  ;;  %v7557_v17 = vld [vmem:[#allocation7 + $0xe8] sm:$0xff] }
 0x130   : > { %10970 = vst [vmem:[#allocation155_spill] sm:$0xff] %v7551_v18  ;;  %v7553_v31 = vpack.c.bf16 %v622_v1, %v620_v0  ;;  %10973 = vst [vmem:[#allocation158_spill] sm:$0xff] %v7557_v17  ;;  %v624_v54 = vld [vmem:[#allocation8 + $0x68] sm:$0xff]  ;;  %v7566_v0 = vld [vmem:[#allocation7 + $0xe0] sm:$0xff] }
 0x131   : > { %850 = vmatmul.mubr.f32.gmra.mrb[22].mxu0 %v7524_v57  ;;  %10968 = vst [vmem:[#allocation153_spill] sm:$0xff] %v7542_v25  ;;  %5329 = vmatpush1.bf16.msra.mxu1 %v7542_v25  ;;  %10972 = vst [vmem:[#allocation157_spill] sm:$0xff] %v7555_v2  ;;  %v7570_v4 = vld [vmem:[#allocation7 + $0xf8] sm:$0xff] }
 0x132   : > { %5033 = vmatprep.mubr.msk.f32.mxu0 %vm655_vm0, %v7531_v48  ;;  %10971 = vst [vmem:[#allocation156_spill] sm:$0xff] %v7553_v31  ;;  %5331 = vmatprep.subr.bf16.mxu1 %v7553_v31  ;;  %v626_v48 = vld [vmem:[#allocation8 + $0x78] sm:$0xff]  ;;  %10975 = vst [vmem:[#allocation160_spill] sm:$0xff] %v7566_v0  ;;  %v628_v23 = vld [vmem:[#allocation8 + $0x88] sm:$0xff] }
 0x133   : > { %v7562_v25 = vpack.c.bf16 %v626_v48, %v624_v54  ;;  %10977 = vst [vmem:[#allocation162_spill] sm:$0xff] %v7570_v4  ;;  %v630_v31 = vld [vmem:[#allocation8 + $0x98] sm:$0xff]  ;;  %v627_v48 = vld [vmem:[#allocation8 + $0x80] sm:$0xff]  ;;  %v629_v54 = vld [vmem:[#allocation8 + $0x90] sm:$0xff] }
 0x135   : > { %856 = vmatmul.mubr.f32.gmra.mrb[24].mxu0 %v7540_v21  ;;  %5333 = vmatpush1.bf16.msra.mxu1 %v7555_v2  ;;  %10974 = vst [vmem:[#allocation159_spill] sm:$0xff] %v7562_v25  ;;  %v623_v21 = vld [vmem:[#allocation8 + $0x60] sm:$0xff] }
 0x136   : > { %5034 = vmatprep.mubr.msk.f32.mxu0 %vm655_vm0, %v7544_v37  ;;  %v625_v37 = vld [vmem:[#allocation8 + $0x70] sm:$0xff]  ;;  %5335 = vmatprep.subr.bf16.mxu1 %v7562_v25  ;;  %v7577_v2 = vld [vmem:[#allocation7 + $0xf0] sm:$0xff]  ;;  %v632_v25 = vld [vmem:[#allocation8 + $0xa8] sm:$0xff] }
 0x137   : > { %v7568_v1 = vpack.c.bf16 %v625_v37, %v623_v21  ;;  %10978 = vst [vmem:[#allocation163_spill] sm:$0xff] %v7577_v2  ;;  %v7581_v21 = vpack.c.bf16 %v629_v54, %v627_v48  ;;  %v7583_v37 = vld [vmem:[#allocation7 + $0x108] sm:$0xff]  ;;  %v7596_v48 = vld [vmem:[#allocation7 + $0x118] sm:$0xff] }
 0x138   : > { %10981 = vst [vmem:[#allocation166_spill] sm:$0xff] %v7583_v37  ;;  %10985 = vst [vmem:[#allocation170_spill] sm:$0xff] %v7596_v48  ;;  %v636_v54 = vld [vmem:[#allocation8 + $0xc8] sm:$0xff] }
 0x139   : > { %862 = vmatmul.mubr.f32.gmra.mrb[26].mxu0 %v7551_v18  ;;  %10976 = vst [vmem:[#allocation161_spill] sm:$0xff] %v7568_v1  ;;  %5337 = vmatpush1.bf16.msra.mxu1 %v7568_v1  ;;  %10980 = vst [vmem:[#allocation165_spill] sm:$0xff] %v7581_v21  ;;  %v634_v18 = vld [vmem:[#allocation8 + $0xb8] sm:$0xff] }
 0x13a   : > { %5035 = vmatprep.mubr.msk.f32.mxu0 %vm655_vm0, %v7557_v17  ;;  %v7579_v17 = vpack.c.bf16 %v630_v31, %v628_v23  ;;  %v7588_v1 = vpack.c.bf16 %v634_v18, %v632_v25  ;;  %v7592_v31 = vld [vmem:[#allocation7 + $0x100] sm:$0xff]  ;;  %v635_v25 = vld [vmem:[#allocation8 + $0xc0] sm:$0xff] }
 0x13b   : > { %10983 = vst [vmem:[#allocation168_spill] sm:$0xff] %v7592_v31 }
 0x13c   : > { %10979 = vst [vmem:[#allocation164_spill] sm:$0xff] %v7579_v17  ;;  %5339 = vmatprep.subr.bf16.mxu1 %v7579_v17  ;;  %10982 = vst [vmem:[#allocation167_spill] sm:$0xff] %v7588_v1  ;;  %v638_v17 = vld [vmem:[#allocation8 + $0xd8] sm:$0xff] }
 0x13d   : > { %868 = vmatmul.mubr.f32.gmra.mrb[28].mxu0 %v7566_v0  ;;  %5341 = vmatpush1.bf16.msra.mxu1 %v7581_v21  ;;  %v631_v0 = vld [vmem:[#allocation8 + $0xa0] sm:$0xff]  ;;  %v7601_v18 = vpack.c.bf16 %v638_v17, %v636_v54  ;;  %v637_v21 = vld [vmem:[#allocation8 + $0xd0] sm:$0xff] }
 0x13e   : > { %5036 = vmatprep.mubr.msk.f32.mxu0 %vm655_vm0, %v7570_v4  ;;  %v633_v4 = vld [vmem:[#allocation8 + $0xb0] sm:$0xff]  ;;  %5343 = vmatprep.subr.bf16.mxu1 %v7588_v1  ;;  %v640_v1 = vld [vmem:[#allocation8 + $0xe8] sm:$0xff]  ;;  %v639_v54 = vld [vmem:[#allocation8 + $0xe0] sm:$0xff] }
 0x13f   : > { %v7594_v23 = vpack.c.bf16 %v633_v4, %v631_v0  ;;  %10986 = vst [vmem:[#allocation171_spill] sm:$0xff] %v7601_v18  ;;  %v7607_v0 = vpack.c.bf16 %v637_v21, %v635_v25  ;;  %v7609_v4 = vld [vmem:[#allocation7 + $0x128] sm:$0xff]  ;;  %v7622_v25 = vld [vmem:[#allocation7 + $0x138] sm:$0xff] }
 0x140   : > { %10989 = vst [vmem:[#allocation174_spill] sm:$0xff] %v7609_v4  ;;  %10993 = vst [vmem:[#allocation178_spill] sm:$0xff] %v7622_v25 }
 0x141   : > { %874 = vmatmul.mubr.f32.gmra.mrb[30].mxu0 %v7577_v2  ;;  %10984 = vst [vmem:[#allocation169_spill] sm:$0xff] %v7594_v23  ;;  %5345 = vmatpush1.bf16.msra.mxu1 %v7594_v23  ;;  %10988 = vst [vmem:[#allocation173_spill] sm:$0xff] %v7607_v0  ;;  %v642_v2 = vld [vmem:[#allocation8 + $0xf8] sm:$0xff]  ;;  %v641_v23 = vld [vmem:[#allocation8 + $0xf0] sm:$0xff] }
 0x142   : > { %5037 = vmatprep.mubr.msk.f32.mxu0 %vm655_vm0, %v7583_v37  ;;  %v7605_v37 = vld [vmem:[#allocation7 + $0x110] sm:$0xff]  ;;  %5347 = vmatprep.subr.bf16.mxu1 %v7601_v18  ;;  %v7614_v17 = vpack.c.bf16 %v642_v2, %v640_v1  ;;  %v7620_v21 = vpack.c.bf16 %v641_v23, %v639_v54  ;;  %v644_v18 = vld [vmem:[#allocation8 + $0x108] sm:$0xff]  ;;  %v7635_v54 = vld [vmem:[#allocation7 + $0x148] sm:$0x3f] }
 0x143   : > { %10987 = vst [vmem:[#allocation172_spill] sm:$0xff] %v7605_v37  ;;  %v643_v1 = vld [vmem:[#allocation8 + $0x100] sm:$0xff]  ;;  %10997 = vst [vmem:[#allocation182_spill] sm:$0xff] %v7635_v54 }
 0x144   : > { %10990 = vst [vmem:[#allocation175_spill] sm:$0xff] %v7614_v17  ;;  %10992 = vst [vmem:[#allocation177_spill] sm:$0xff] %v7620_v21 }
 0x145   : > { %880 = vmatmul.mubr.f32.gmra.mrb[32].mxu0 %v7592_v31  ;;  %5349 = vmatpush1.bf16.msra.mxu1 %v7607_v0  ;;  %v646_v31 = vld [vmem:[#allocation8 + $0x118] sm:$0xff]  ;;  %v645_v0 = vld [vmem:[#allocation8 + $0x110] sm:$0xff] }
 0x146   : > { %5038 = vmatprep.mubr.msk.f32.mxu0 %vm655_vm0, %v7596_v48  ;;  %v7618_v48 = vld [vmem:[#allocation7 + $0x120] sm:$0xff]  ;;  %5351 = vmatprep.subr.bf16.mxu1 %v7614_v17  ;;  %v7627_v2 = vpack.c.bf16 %v646_v31, %v644_v18  ;;  %v7633_v23 = vpack.c.bf16 %v645_v0, %v643_v1  ;;  %v648_v17 = vld [vmem:[#allocation8 + $0x128] sm:$0xff]  ;;  %v647_v18 = vld [vmem:[#allocation8 + $0x120] sm:$0xff]  ;;  %v1614_v1 = vmul.f32 %v6867_v6, %v6867_v6 }
 0x147   : > { %10991 = vst [vmem:[#allocation176_spill] sm:$0xff] %v7618_v48 }
 0x148   : > { %10994 = vst [vmem:[#allocation179_spill] sm:$0xff] %v7627_v2  ;;  %10996 = vst [vmem:[#allocation181_spill] sm:$0xff] %v7633_v23 }
 0x149   : > { %886 = vmatmul.mubr.f32.gmra.mrb[34].mxu0 %v7605_v37  ;;  %5353 = vmatpush1.bf16.msra.mxu1 %v7620_v21  ;;  %v650_v37 = vld [vmem:[#allocation8 + $0x138] sm:$0xff]  ;;  %v649_v21 = vld [vmem:[#allocation8 + $0x130] sm:$0xff] }
 0x14a   : > { %5039 = vmatprep.mubr.msk.f32.mxu0 %vm655_vm0, %v7609_v4  ;;  %v7631_v4 = vld [vmem:[#allocation7 + $0x130] sm:$0xff]  ;;  %5355 = vmatprep.subr.bf16.mxu1 %v7627_v2  ;;  %v7640_v31 = vpack.c.bf16 %v650_v37, %v648_v17  ;;  %v7646_v0 = vpack.c.bf16 %v649_v21, %v647_v18  ;;  %v1616_v2 = vmul.f32 %v6870_v7, %v6870_v7  ;;  %v654_v37 = vld [vmem:[#allocation8 + $0x158] sm:$0xff] }
 0x14b   : > { %10995 = vst [vmem:[#allocation180_spill] sm:$0xff] %v7631_v4  ;;  %v1618_v7 = vmul.f32 %v6889_v12, %v6889_v12  ;;  %v1620_v18 = vmul.f32 %v6892_v13, %v6892_v13  ;;  %v1622_v12 = vmul.f32 %v6914_v19, %v6914_v19  ;;  %v1624_v13 = vmul.f32 %v6917_v20, %v6917_v20 }
 0x14c   : > { %10998 = vst [vmem:[#allocation183_spill] sm:$0xff] %v7640_v31  ;;  %11000 = vst [vmem:[#allocation185_spill] sm:$0xff] %v7646_v0  ;;  %v5458_v6 = vpack.c.bf16 %v1616_v2, %v1614_v1  ;;  %v1626_v2 = vmul.f32 %v6938_v26, %v6938_v26  ;;  %v1628_v19 = vmul.f32 %v6941_v27, %v6941_v27  ;;  %v11011_v1 = vld [vmem:[#allocation124_spill] sm:$0xff] }
 0x14d   : > { %892 = vmatmul.mubr.f32.gmra.mrb[36].mxu0 %v7618_v48  ;;  %5357 = vmatpush1.bf16.msra.mxu1 %v7633_v23  ;;  %v652_v23 = vld [vmem:[#allocation8 + $0x148] sm:$0xff]  ;;  %v11005_v20 = vpack.c.bf16 %v7003_v44, %v6999_v43  ;;  %v1632_v26 = vmul.f32 %v6971_v35, %v6971_v35  ;;  %v11006_v27 = vpack.c.bf16 %v7035_v53, %v7031_v52 }
 0x14e   : > { %5040 = vmatprep.mubr.msk.f32.mxu0 %vm655_vm0, %v7622_v25  ;;  %v7644_v25 = vld [vmem:[#allocation7 + $0x140] sm:$0x3f]  ;;  %5359 = vmatprep.subr.bf16.mxu1 %v7640_v31  ;;  %v7655_v17 = vpack.c.bf16 %v654_v37, %v652_v23  ;;  %v11003_v23 = vpack.c.bf16 %v6900_v15, %v6896_v14  ;;  %v11004_v14 = vpack.c.bf16 %v6954_v30, %v6950_v29  ;;  %v11013_v37 = vld [vmem:[#allocation89_spill] sm:$0xff] }
 0x14f   : > { %10999 = vst [vmem:[#allocation184_spill] sm:$0xff] %v7644_v25  ;;  %v5466_v15 = vpack.c.bf16 %v1624_v13, %v1622_v12  ;;  %v5470_v29 = vpack.c.bf16 %v1628_v19, %v1626_v2  ;;  %v1630_v30 = vmul.f32 %v6968_v34, %v6968_v34  ;;  %v1634_v44 = vmul.f32 %v6992_v41, %v6992_v41  ;;  %v11019_v12 = vld [vmem:[#allocation102_spill] sm:$0xff]  ;;  %v11022_v19 = vld [vmem:[#allocation69_spill] sm:$0xff] }
 0x150   : > { %11001 = vst [vmem:[#allocation186_spill] sm:$0xff] %v7655_v17  ;;  %v1636_v34 = vmul.f32 %v6995_v42, %v6995_v42  ;;  %v11007_v35 = vpack.c.bf16 %v7093_v56, %v7089_v55  ;;  %v1638_v53 = vmul.f32 %v7022_v49, %v7022_v49  ;;  %v1640_v41 = vmul.f32 %v7025_v50, %v7025_v50 }
 0x151   : > { %898 = vmatmul.mubr.f32.gmra.mrb[38].mxu0 %v7631_v4  ;;  %5361 = vmatpush1.bf16.msra.mxu1 %v7646_v0  ;;  %v653_v4 = vld [vmem:[#allocation8 + $0x150] sm:$0xff]  ;;  %v5474_v43 = vpack.c.bf16 %v1632_v26, %v1630_v30  ;;  %v11008_v42 = vpack.c.bf16 %v7147_v45, %v7143_v46  ;;  %v1642_v56 = vmul.f32 %v7058_v59, %v7058_v59 }
 0x152   : > { %5041 = vmatprep.mubr.msk.f32.mxu0 %vm655_vm0, %v7635_v54  ;;  %v651_v54 = vld [vmem:[#allocation8 + $0x140] sm:$0xff]  ;;  %5363 = vmatprep.subr.bf16.mxu1 %v7655_v17  ;;  %v5478_v52 = vpack.c.bf16 %v1636_v34, %v1634_v44  ;;  %v5482_v55 = vpack.c.bf16 %v1640_v41, %v1638_v53  ;;  %v1644_v49 = vmul.f32 %v7061_v60, %v7061_v60  ;;  %v11012_v60 = vld [vmem:[#allocation128_spill] sm:$0xff]  ;;  %v11024_v30 = vld [vmem:[#allocation71_spill] sm:$0xff] }
 0x153   : > { %v7659_v21 = vpack.c.bf16 %v653_v4, %v651_v54  ;;  %v5462_v4 = vpack.c.bf16 %v1620_v18, %v1618_v7  ;;  %v11009_v50 = vpack.c.bf16 %v7179_v24, %v7175_v32  ;;  %v1646_v46 = vmul.f32 %v7082_v61, %v7082_v61  ;;  %v11010_v54 = vld [vmem:[#allocation57_spill] sm:$0xff]  ;;  %v11016_v32 = vld [vmem:[#allocation62_spill] sm:$0xff]  ;;  %v11029_v34 = vld [vmem:[#allocation143_spill] sm:$0xff] }
 0x154   : > { %v5486_v45 = vpack.c.bf16 %v1644_v49, %v1642_v56  ;;  %v1648_v59 = vmul.f32 %v11010_v54, %v11010_v54  ;;  %v1650_v18 = vmul.f32 %v11016_v32, %v11016_v32  ;;  %v11035_v56 = vld [vmem:[#allocation133_spill] sm:$0xff]  ;;  %v11036_v49 = vld [vmem:[#allocation132_spill] sm:$0xff]  ;;  %v2098_v17 = vmul.f32 %v11024_v30, %v11024_v30 }
 0x155   : > { %904 = vmatmul.mubr.f32.gmra.mrb[40].mxu0 %v7644_v25  ;;  %11002 = vst [vmem:[#allocation187_spill] sm:$0xff] %v7659_v21  ;;  %5365 = vmatpush1.bf16.msra.mxu1 %v7659_v21  ;;  %v11039_v54 = vld [vmem:[#allocation77_spill] sm:$0xff]  ;;  %v11045_v32 = vld [vmem:[#allocation152_spill] sm:$0xff] }
 0x156   : > { %5063 = vmatprep.mubr.msk.f32.mxu0 %vm655_vm0, %v7027_v51  ;;  %5411 = vmatprep.subr.bf16.mxu1 %v7527_v63  ;;  %v5490_v24 = vpack.c.bf16 %v1648_v59, %v1646_v46  ;;  %v11038_v46 = vld [vmem:[#allocation26_spill] sm:$0xff]  ;;  %v11079_v63 = vld [vmem:[#allocation44_spill] sm:$0xff] }
 0x157   : > { %v7783_v59 = vmul.f32 %v11039_v54, %v11038_v46  ;;  %v11064_v46 = vld [vmem:[#allocation166_spill] sm:$0xff] }
 0x159   : > { %1229 = vmatmul.mubr.f32.vlgmr.msra.gmra.mrb[42].mxu0 %v7182_v22  ;;  %11040 = vst [vmem:[#allocation128_spill] sm:$0xff] %v7783_v59  ;;  %v11074_v59 = vld [vmem:[#allocation174_spill] sm:$0xff] }
 0x15a   : > { %5457 = vmatpush1.bf16.msra.mxu0 %v11003_v23  ;;  %5064 = vmatprep.mubr.msk.f32.mxu0 %vm655_vm0, %v7195_v47  ;;  %v11017_v23 = vld [vmem:[#allocation63_spill] sm:$0xff] }
 0x15b   : > { %5459 = vmatprep.subr.bf16.mxu0 %v5458_v6  ;;  %v11014_v6 = vld [vmem:[#allocation88_spill] sm:$0xff]  ;;  %v1652_v61 = vmul.f32 %v11017_v23, %v11017_v23 }
 0x15c   : > { %v11015_v7 = vpack.c.bf16 %v11013_v37, %v11014_v6  ;;  %v11041_v37 = vld [vmem:[#allocation28_spill] sm:$0xff]  ;;  %v11042_v6 = vld [vmem:[#allocation78_spill] sm:$0xff] }
 0x15d   : > { %1235 = vmatmul.mubr.f32.gmra.mrb[44].mxu0 %v7211_v38 }
 0x15e   : > { %5065 = vmatprep.mubr.msk.f32.mxu0 %vm655_vm0, %v7225_v3  ;;  %5461 = vmatpush1.bf16.msra.mxu0 %v11004_v14  ;;  %v5494_v14 = vpack.c.bf16 %v1652_v61, %v1650_v18  ;;  %v11046_v18 = vld [vmem:[#allocation154_spill] sm:$0xff]  ;;  %v11047_v61 = vld [vmem:[#allocation155_spill] sm:$0xff] }
 0x15f   : > { %5463 = vmatprep.subr.bf16.mxu0 %v5462_v4  ;;  %v11018_v4 = vld [vmem:[#allocation103_spill] sm:$0xff] }
 0x160   : > { %v11020_v13 = vpack.c.bf16 %v11018_v4, %v11019_v12  ;;  %v11048_v4 = vld [vmem:[#allocation31_spill] sm:$0xff] }
 0x161   : > { %1241 = vmatmul.mubr.f32.gmra.mrb[46].mxu0 %v7249_v9  ;;  %v11049_v12 = vld [vmem:[#allocation83_spill] sm:$0xff] }
 0x162   : > { %5066 = vmatprep.mubr.msk.f32.mxu0 %vm655_vm0, %v7262_v5  ;;  %5465 = vmatpush1.bf16.msra.mxu0 %v11005_v20  ;;  %v2101_v20 = vmul.f32 %v11022_v19, %v11022_v19  ;;  %v11054_v19 = vld [vmem:[#allocation158_spill] sm:$0xff] }
 0x163   : > { %5467 = vmatprep.subr.bf16.mxu0 %v5466_v15  ;;  %v11021_v15 = vld [vmem:[#allocation68_spill] sm:$0xff] }
 0x164   : > { %v2099_v2 = vmul.f32 %v11021_v15, %v11021_v15  ;;  %v11052_v15 = vld [vmem:[#allocation84_spill] sm:$0xff] }
 0x165   : > { %1247 = vmatmul.mubr.f32.gmra.mrb[48].mxu0 %v7278_v8 }
 0x166   : > { %5067 = vmatprep.mubr.msk.f32.mxu0 %vm655_vm0, %v7293_v28  ;;  %5469 = vmatpush1.bf16.msra.mxu0 %v11006_v27  ;;  %v11026_v27 = vld [vmem:[#allocation24_spill] sm:$0xff]  ;;  %v5542_v41 = vpack.c.bf16 %v2101_v20, %v2099_v2 }
 0x167   : > { %5471 = vmatprep.subr.bf16.mxu0 %v5470_v29  ;;  %v11023_v29 = vld [vmem:[#allocation22_spill] sm:$0xff]  ;;  %v11055_v20 = vld [vmem:[#allocation160_spill] sm:$0xff] }
 0x168   : > { %v7761_v26 = vmul.f32 %v11024_v30, %v11023_v29  ;;  %v11056_v29 = vld [vmem:[#allocation162_spill] sm:$0xff]  ;;  %v2102_v30 = vmul.f32 %v11039_v54, %v11039_v54  ;;  %v2106_v54 = vmul.f32 %v11049_v12, %v11049_v12 }
 0x169   : > { %1253 = vmatmul.mubr.f32.gmra.mrb[50].mxu0 %v7317_v58 }
 0x16a   : > { %5068 = vmatprep.mubr.msk.f32.mxu0 %vm655_vm0, %v7330_v62  ;;  %5473 = vmatpush1.bf16.msra.mxu0 %v11007_v35  ;;  %11025 = vst [vmem:[#allocation57_spill] sm:$0xff] %v7761_v26  ;;  %v11030_v35 = vld [vmem:[#allocation117_spill] sm:$0xff]  ;;  %v11081_v26 = vld [vmem:[#allocation180_spill] sm:$0xff] }
 0x16b   : > { %5475 = vmatprep.subr.bf16.mxu0 %v5474_v43  ;;  %v11027_v43 = vld [vmem:[#allocation72_spill] sm:$0xff] }
 0x16c   : > { %v7765_v44 = vmul.f32 %v11027_v43, %v11026_v27  ;;  %v11067_v27 = vld [vmem:[#allocation39_spill] sm:$0xff] }
 0x16d   : > { %1259 = vmatmul.mubr.f32.gmra.mrb[52].mxu0 %v7346_v39 }
 0x16e   : > { %5069 = vmatprep.mubr.msk.f32.mxu0 %vm655_vm0, %v7361_v33  ;;  %5477 = vmatpush1.bf16.msra.mxu0 %v11008_v42  ;;  %11028 = vst [vmem:[#allocation124_spill] sm:$0xff] %v7765_v44  ;;  %v11033_v42 = vld [vmem:[#allocation145_spill] sm:$0xff]  ;;  %v11082_v44 = vld [vmem:[#allocation182_spill] sm:$0xff] }
 0x16f   : > { %5479 = vmatprep.subr.bf16.mxu0 %v5478_v52  ;;  %v11031_v52 = vld [vmem:[#allocation116_spill] sm:$0xff] }
 0x170   : > { %v11032_v53 = vpack.c.bf16 %v11030_v35, %v11031_v52  ;;  %v11057_v35 = vld [vmem:[#allocation35_spill] sm:$0xff] }
 0x171   : > { %1265 = vmatmul.mubr.f32.gmra.mrb[54].mxu0 %v7385_v40  ;;  %v11058_v52 = vld [vmem:[#allocation91_spill] sm:$0xff] }
 0x172   : > { %5070 = vmatprep.mubr.msk.f32.mxu0 %vm655_vm0, %v7398_v36  ;;  %5481 = vmatpush1.bf16.msra.mxu0 %v11009_v50  ;;  %v11037_v50 = vpack.c.bf16 %v11035_v56, %v11036_v49  ;;  %v11061_v56 = vld [vmem:[#allocation92_spill] sm:$0xff] }
 0x173   : > { %5483 = vmatprep.subr.bf16.mxu0 %v5482_v55  ;;  %v11034_v55 = vld [vmem:[#allocation147_spill] sm:$0xff] }
 0x175   : > { %1271 = vmatmul.mubr.f32.gmra.mrb[56].mxu0 %v11011_v1 }
 0x176   : > { %5071 = vmatprep.mubr.msk.f32.mxu0 %vm655_vm0, %v11012_v60  ;;  %5485 = vmatpush1.bf16.msra.mxu0 %v11015_v7  ;;  %v7787_v7 = vmul.f32 %v11042_v6, %v11041_v37  ;;  %v11065_v37 = vld [vmem:[#allocation168_spill] sm:$0xff] }
 0x177   : > { %5487 = vmatprep.subr.bf16.mxu0 %v5486_v45  ;;  %v11070_v45 = vld [vmem:[#allocation40_spill] sm:$0xff] }
 0x178   : > { %11043 = vst [vmem:[#allocation89_spill] sm:$0xff] %v7787_v7 }
 0x179   : > { %1277 = vmatmul.mubr.f32.gmra.mrb[58].mxu0 %v7453_v11 }
 0x17a   : > { %5072 = vmatprep.mubr.msk.f32.mxu0 %vm655_vm0, %v7466_v16  ;;  %5489 = vmatpush1.bf16.msra.mxu0 %v11020_v13  ;;  %v7799_v13 = vmul.f32 %v11049_v12, %v11048_v4  ;;  %v2100_v4 = vmul.f32 %v11027_v43, %v11027_v43  ;;  %v2104_v43 = vmul.f32 %v11042_v6, %v11042_v6 }
 0x17b   : > { %5491 = vmatprep.subr.bf16.mxu0 %v5490_v24  ;;  %v11044_v24 = vld [vmem:[#allocation150_spill] sm:$0xff]  ;;  %v2108_v6 = vmul.f32 %v11052_v15, %v11052_v15 }
 0x17c   : > { %11050 = vst [vmem:[#allocation88_spill] sm:$0xff] %v7799_v13  ;;  %v5544_v31 = vpack.c.bf16 %v2100_v4, %v2098_v17 }
 0x17d   : > { %1283 = vmatmul.mubr.f32.gmra.mrb[60].mxu0 %v7484_v10 }
 0x17e   : > { %5073 = vmatprep.mubr.msk.f32.mxu0 %vm655_vm0, %v11029_v34  ;;  %5493 = vmatpush1.bf16.msra.mxu0 %v11032_v53  ;;  %v7814_v53 = vmul.f32 %v11058_v52, %v11057_v35  ;;  %v11068_v35 = vld [vmem:[#allocation97_spill] sm:$0xff] }
 0x17f   : > { %5495 = vmatprep.subr.bf16.mxu0 %v5494_v14  ;;  %v11051_v14 = vld [vmem:[#allocation32_spill] sm:$0xff]  ;;  %v7830_v23 = vmul.f32 %v11068_v35, %v11067_v27  ;;  %v11077_v27 = vld [vmem:[#allocation105_spill] sm:$0xff] }
 0x180   : > { %v7803_v2 = vmul.f32 %v11052_v15, %v11051_v14  ;;  %11059 = vst [vmem:[#allocation63_spill] sm:$0xff] %v7814_v53  ;;  %v11066_v14 = vld [vmem:[#allocation170_spill] sm:$0xff]  ;;  %v11094_v15 = vld [vmem:[#allocation95_spill] sm:$0xff] }
 0x181   : > { %1289 = vmatmul.mubr.f32.gmra.mrb[62].mxu0 %v11033_v42  ;;  %11069 = vst [vmem:[#allocation102_spill] sm:$0xff] %v7830_v23  ;;  %v11075_v53 = vld [vmem:[#allocation178_spill] sm:$0xff] }
 0x182   : > { %5074 = vmatprep.mubr.msk.f32.mxu0 %vm655_vm0, %v11034_v55  ;;  %5497 = vmatpush1.bf16.msra.mxu0 %v11037_v50  ;;  %11053 = vst [vmem:[#allocation62_spill] sm:$0xff] %v7803_v2  ;;  %v11063_v50 = vld [vmem:[#allocation163_spill] sm:$0xff]  ;;  %v11073_v2 = vld [vmem:[#allocation172_spill] sm:$0xff]  ;;  %v11083_v23 = vld [vmem:[#allocation74_spill] sm:$0xff] }
 0x183   : > { %5543 = vmatprep.subr.bf16.mxu0 %v5542_v41  ;;  %v11060_v41 = vld [vmem:[#allocation36_spill] sm:$0xff] }
 0x184   : > { %v7818_v49 = vmul.f32 %v11061_v56, %v11060_v41  ;;  %v11071_v41 = vld [vmem:[#allocation98_spill] sm:$0xff] }
 0x185   : > { %1295 = vmatmul.mubr.f32.gmra.mrb[64].mxu0 %v7524_v57  ;;  %v7834_v13 = vmul.f32 %v11071_v41, %v11070_v45  ;;  %v11080_v45 = vld [vmem:[#allocation106_spill] sm:$0xff] }
 0x186   : > { %5075 = vmatprep.mubr.msk.f32.mxu0 %vm655_vm0, %v11044_v24  ;;  %11062 = vst [vmem:[#allocation103_spill] sm:$0xff] %v7818_v49  ;;  %v11076_v49 = vld [vmem:[#allocation43_spill] sm:$0xff]  ;;  %v7850_v21 = vmul.f32 %v11080_v45, %v11079_v63 }
 0x187   : > { %11072 = vst [vmem:[#allocation68_spill] sm:$0xff] %v7834_v13  ;;  %v7846_v7 = vmul.f32 %v11077_v27, %v11076_v49  ;;  %v2103_v13 = vmul.f32 %v11083_v23, %v11083_v23  ;;  %v11084_v49 = vld [vmem:[#allocation75_spill] sm:$0xff]  ;;  %v11085_v23 = vld [vmem:[#allocation80_spill] sm:$0xff] }
 0x188   : > { %v2105_v0 = vmul.f32 %v11084_v49, %v11084_v49  ;;  %v11086_v49 = vld [vmem:[#allocation81_spill] sm:$0xff] }
 0x189   : > { %1301 = vmatmul.mubr.f32.gmra.mrb[66].mxu0 %v11045_v32  ;;  %11078 = vst [vmem:[#allocation69_spill] sm:$0xff] %v7846_v7  ;;  %v11089_v7 = vld [vmem:[#allocation48_spill] sm:$0xff] }
 0x18a   : > { %5076 = vmatprep.mubr.msk.f32.mxu0 %vm655_vm0, %v11046_v18 }
 0x18d   : > { %1307 = vmatmul.mubr.f32.gmra.mrb[68].mxu0 %v11047_v61 }
 0x18e   : > { %5077 = vmatprep.mubr.msk.f32.mxu0 %vm655_vm0, %v11054_v19 }
 0x191   : > { %1313 = vmatmul.mubr.f32.gmra.mrb[70].mxu0 %v11055_v20 }
 0x192   : > { %5078 = vmatprep.mubr.msk.f32.mxu0 %vm655_vm0, %v11056_v29 }
 0x195   : > { %1319 = vmatmul.mubr.f32.gmra.mrb[72].mxu0 %v11063_v50 }
 0x196   : > { %5079 = vmatprep.mubr.msk.f32.mxu0 %vm655_vm0, %v11064_v46 }
 0x199   : > { %1325 = vmatmul.mubr.f32.gmra.mrb[74].mxu0 %v11065_v37 }
 0x19a   : > { %5080 = vmatprep.mubr.msk.f32.mxu0 %vm655_vm0, %v11066_v14 }
 0x19d   : > { %1331 = vmatmul.mubr.f32.gmra.mrb[76].mxu0 %v11073_v2 }
 0x19e   : > { %5081 = vmatprep.mubr.msk.f32.mxu0 %vm655_vm0, %v11074_v59 }
 0x1a1   : > { %1337 = vmatmul.mubr.f32.gmra.mrb[78].mxu0 %v7618_v48  ;;  %v11088_v48 = vld [vmem:[#allocation111_spill] sm:$0xff] }
 0x1a2   : > { %5082 = vmatprep.mubr.msk.f32.mxu0 %vm655_vm0, %v11075_v53  ;;  %v11087_v53 = vld [vmem:[#allocation47_spill] sm:$0xff] }
 0x1a3   : > { %v7878_v63 = vmul.f32 %v11088_v48, %v11087_v53  ;;  %v11091_v53 = vld [vmem:[#allocation86_spill] sm:$0xff] }
 0x1a4   : > { %v2111_v4 = vmul.f32 %v11091_v53, %v11091_v53  ;;  %v11099_v53 = vld [vmem:[#allocation100_spill] sm:$0xff] }
 0x1a5   : > { %1343 = vmatmul.mubr.f32.gmra.mrb[80].mxu0 %v11081_v26  ;;  %v2107_v26 = vmul.f32 %v11085_v23, %v11085_v23 }
 0x1a6   : > { %5083 = vmatprep.mubr.msk.f32.mxu0 %vm655_vm0, %v11082_v44  ;;  %v5546_v44 = vpack.c.bf16 %v2105_v0, %v2103_v13  ;;  %v5548_v0 = vpack.c.bf16 %v2104_v43, %v2102_v30  ;;  %v2117_v30 = vmul.f32 %v11094_v15, %v11094_v15  ;;  %v11096_v43 = vld [vmem:[#allocation119_spill] sm:$0xff] }
 0x1a9   : > { %1349 = vmatmul.mubr.f32.gmra.mrb[82].mxu0 %v7644_v25  ;;  %v2109_v25 = vmul.f32 %v11086_v49, %v11086_v49 }
 0x1aa   : > { %5105 = vmatprep.mubr.msk.f32.mxu0 %vm655_vm0, %v7027_v51  ;;  %v11090_v51 = vld [vmem:[#allocation112_spill] sm:$0xff] }
 0x1ab   : > { %v7882_v17 = vmul.f32 %v11090_v51, %v11089_v7  ;;  %v5550_v13 = vpack.c.bf16 %v2109_v25, %v2107_v26  ;;  %v11092_v7 = vld [vmem:[#allocation87_spill] sm:$0xff]  ;;  %v2112_v25 = vmul.f32 %v11061_v56, %v11061_v56  ;;  %v2114_v56 = vmul.f32 %v11068_v35, %v11068_v35 }
 0x1ac   : > { %v2113_v23 = vmul.f32 %v11092_v7, %v11092_v7  ;;  %v11100_v7 = vld [vmem:[#allocation101_spill] sm:$0xff]  ;;  %v2118_v35 = vmul.f32 %v11077_v27, %v11077_v27 }
 0x1ad   : > { %1718 = vmatmul.mubr.f32.vlgmr.msra.gmra.mrb[84].mxu0 %v7182_v22  ;;  %v5656_v22 = vpack.c.bf16 %v7882_v17, %v7878_v63  ;;  %v8212_v63 = vld [vmem:[#allocation7 + $0x88] sm:$0xff] }
 0x1ae   : > { %5545 = vmatpush1.bf16.msra.mxu0 %v5544_v31  ;;  %5106 = vmatprep.mubr.msk.f32.mxu0 %vm655_vm0, %v7195_v47  ;;  %v5552_v47 = vpack.c.bf16 %v2108_v6, %v2106_v54  ;;  %v2110_v31 = vmul.f32 %v11058_v52, %v11058_v52  ;;  %v5554_v26 = vpack.c.bf16 %v2113_v23, %v2111_v4 }
 0x1af   : > { %5547 = vmatprep.subr.bf16.mxu0 %v5546_v44  ;;  %v11093_v44 = vld [vmem:[#allocation94_spill] sm:$0xff]  ;;  %v2116_v6 = vmul.f32 %v11071_v41, %v11071_v41  ;;  %v2119_v4 = vmul.f32 %v11099_v53, %v11099_v53  ;;  %v2121_v23 = vmul.f32 %v11100_v7, %v11100_v7  ;;  %v2120_v41 = vmul.f32 %v11080_v45, %v11080_v45 }
 0x1b0   : > { %v2115_v12 = vmul.f32 %v11093_v44, %v11093_v44  ;;  %v5556_v52 = vpack.c.bf16 %v2112_v25, %v2110_v31  ;;  %v11101_v31 = vld [vmem:[#allocation108_spill] sm:$0xff]  ;;  %v2122_v45 = vmul.f32 %v11088_v48, %v11088_v48 }
 0x1b1   : > { %1724 = vmatmul.mubr.f32.gmra.mrb[86].mxu0 %v7211_v38  ;;  %v11095_v38 = vld [vmem:[#allocation51_spill] sm:$0xff]  ;;  %v2123_v25 = vmul.f32 %v11101_v31, %v11101_v31  ;;  %v5564_v27 = vpack.c.bf16 %v2120_v41, %v2118_v35  ;;  %v11112_v35 = vld [vmem:[#allocation136_spill] sm:$0xff]  ;;  %v11113_v31 = vld [vmem:[#allocation122_spill] sm:$0xff] }
 0x1b2   : > { %5107 = vmatprep.mubr.msk.f32.mxu0 %vm655_vm0, %v7225_v3  ;;  %5549 = vmatpush1.bf16.msra.mxu0 %v5548_v0  ;;  %v7910_v49 = vmul.f32 %v11096_v43, %v11095_v38  ;;  %v11097_v3 = vld [vmem:[#allocation52_spill] sm:$0xff] }
 0x1b3   : > { %5551 = vmatprep.subr.bf16.mxu0 %v5550_v13  ;;  %v11098_v0 = vld [vmem:[#allocation120_spill] sm:$0xff]  ;;  %v5558_v13 = vpack.c.bf16 %v2117_v30, %v2115_v12  ;;  %v11104_v12 = vld [vmem:[#allocation126_spill] sm:$0xff]  ;;  %v11106_v30 = vld [vmem:[#allocation127_spill] sm:$0xff] }
 0x1b4   : > { %v7914_v54 = vmul.f32 %v11098_v0, %v11097_v3  ;;  %v2124_v3 = vmul.f32 %v11090_v51, %v11090_v51  ;;  %v2126_v51 = vmul.f32 %v11096_v43, %v11096_v43 }
 0x1b5   : > { %1730 = vmatmul.mubr.f32.gmra.mrb[88].mxu0 %v7249_v9 }
 0x1b6   : > { %5108 = vmatprep.mubr.msk.f32.mxu0 %vm655_vm0, %v7262_v5  ;;  %5553 = vmatpush1.bf16.msra.mxu0 %v5552_v47  ;;  %v5660_v9 = vpack.c.bf16 %v7914_v54, %v7910_v49  ;;  %v5560_v5 = vpack.c.bf16 %v2116_v6, %v2114_v56  ;;  %v5562_v47 = vpack.c.bf16 %v2121_v23, %v2119_v4  ;;  %v11107_v56 = vld [vmem:[#allocation114_spill] sm:$0xff]  ;;  %v11110_v4 = vld [vmem:[#allocation135_spill] sm:$0xff] }
 0x1b7   : > { %5555 = vmatprep.subr.bf16.mxu0 %v5554_v26  ;;  %v11102_v26 = vld [vmem:[#allocation109_spill] sm:$0xff]  ;;  %v2127_v6 = vmul.f32 %v11107_v56, %v11107_v56  ;;  %v5568_v48 = vpack.c.bf16 %v2124_v3, %v2122_v45  ;;  %v2128_v23 = vmul.f32 %v11098_v0, %v11098_v0  ;;  %v2130_v0 = vmul.f32 %v11104_v12, %v11104_v12 }
 0x1b8   : > { %v2125_v44 = vmul.f32 %v11102_v26, %v11102_v26  ;;  %v2132_v26 = vmul.f32 %v11106_v30, %v11106_v30  ;;  %v11118_v3 = vld [vmem:[#allocation141_spill] sm:$0xff]  ;;  %v2136_v56 = vmul.f32 %v11112_v35, %v11112_v35 }
 0x1b9   : > { %1736 = vmatmul.mubr.f32.gmra.mrb[90].mxu0 %v7278_v8  ;;  %v11103_v8 = vld [vmem:[#allocation55_spill] sm:$0xff]  ;;  %v5572_v43 = vpack.c.bf16 %v2128_v23, %v2126_v51  ;;  %v2138_v23 = vmul.f32 %v11118_v3, %v11118_v3 }
 0x1ba   : > { %5109 = vmatprep.mubr.msk.f32.mxu0 %vm655_vm0, %v7293_v28  ;;  %5557 = vmatpush1.bf16.msra.mxu0 %v5556_v52  ;;  %v7942_v15 = vmul.f32 %v11104_v12, %v11103_v8  ;;  %v11105_v28 = vld [vmem:[#allocation56_spill] sm:$0xff]  ;;  %v5566_v52 = vpack.c.bf16 %v2125_v44, %v2123_v25  ;;  %v11114_v25 = vld [vmem:[#allocation123_spill] sm:$0xff]  ;;  %v11115_v8 = vld [vmem:[#allocation130_spill] sm:$0xff]  ;;  %v5576_v12 = vpack.c.bf16 %v2132_v26, %v2130_v0 }
 0x1bb   : > { %5559 = vmatprep.subr.bf16.mxu0 %v5558_v13  ;;  %v7946_v38 = vmul.f32 %v11106_v30, %v11105_v28  ;;  %v11108_v13 = vld [vmem:[#allocation115_spill] sm:$0xff]  ;;  %v2135_v28 = vmul.f32 %v11115_v8, %v11115_v8  ;;  %v2134_v30 = vmul.f32 %v11110_v4, %v11110_v4 }
 0x1bc   : > { %v2129_v53 = vmul.f32 %v11108_v13, %v11108_v13  ;;  %v11120_v13 = vld [vmem:[#allocation142_spill] sm:$0xff] }
 0x1bd   : > { %1742 = vmatmul.mubr.f32.gmra.mrb[92].mxu0 %v7317_v58  ;;  %v8193_v58 = vld [vmem:[#allocation7 + $0x60] sm:$0xff]  ;;  %v11167_v49 = vpack.c.bf16 %v7946_v38, %v7942_v15 }
 0x1be   : > { %5110 = vmatprep.mubr.msk.f32.mxu0 %vm655_vm0, %v7330_v62  ;;  %5561 = vmatpush1.bf16.msra.mxu0 %v5560_v5  ;;  %v11109_v62 = vld [vmem:[#allocation60_spill] sm:$0xff]  ;;  %v11111_v5 = vld [vmem:[#allocation61_spill] sm:$0xff] }
 0x1bf   : > { %5563 = vmatprep.subr.bf16.mxu0 %v5562_v47  ;;  %v7963_v7 = vmul.f32 %v11110_v4, %v11109_v62  ;;  %v7974_v41 = vmul.f32 %v11112_v35, %v11111_v5  ;;  %v5570_v47 = vpack.c.bf16 %v2129_v53, %v2127_v6  ;;  %v11119_v6 = vld [vmem:[#allocation67_spill] sm:$0xff]  ;;  %v11121_v62 = vld [vmem:[#allocation138_spill] sm:$0xff]  ;;  %v5580_v4 = vpack.c.bf16 %v2136_v56, %v2134_v30  ;;  %v11133_v56 = vld [vmem:[#allocation169_spill] sm:$0xff] }
 0x1c0   : > { %v8006_v53 = vmul.f32 %v11120_v13, %v11119_v6  ;;  %v2140_v5 = vmul.f32 %v11120_v13, %v11120_v13  ;;  %v11135_v13 = vld [vmem:[#allocation173_spill] sm:$0xff] }
 0x1c1   : > { %1748 = vmatmul.mubr.f32.gmra.mrb[94].mxu0 %v7346_v39  ;;  %v2131_v39 = vmul.f32 %v11113_v31, %v11113_v31  ;;  %v6144_v31 = vld [vmem:[%s6828_s19 + $0x8] sm:$0xff]  ;;  %v11168_v15 = vpack.c.bf16 %v7974_v41, %v7963_v7  ;;  %v11170_v41 = vld [vmem:[#allocation23_spill] sm:$0xff] }
 0x1c2   : > { %5111 = vmatprep.mubr.msk.f32.mxu0 %vm655_vm0, %v7361_v33  ;;  %5565 = vmatpush1.bf16.msra.mxu0 %v5564_v27  ;;  %v2133_v33 = vmul.f32 %v11114_v25, %v11114_v25  ;;  %v11116_v27 = vld [vmem:[#allocation131_spill] sm:$0xff] }
 0x1c3   : > { %5567 = vmatprep.subr.bf16.mxu0 %v5566_v52  ;;  %v2137_v45 = vmul.f32 %v11116_v27, %v11116_v27  ;;  %v6145_v25 = vld [vmem:[%s6821_s29 + $0x18] sm:$0xff]  ;;  %v11127_v27 = vld [vmem:[#allocation157_spill] sm:$0xff] }
 0x1c4   : > { %v5574_v44 = vpack.c.bf16 %v2133_v33, %v2131_v39  ;;  %v6146_v33 = vld [vmem:[%s6828_s19 + $0x18] sm:$0xff] }
 0x1c5   : > { %1754 = vmatmul.mubr.f32.gmra.mrb[96].mxu0 %v7385_v40  ;;  %v8178_v40 = vld [vmem:[#allocation7 + $0x50] sm:$0xff] }
 0x1c6   : > { %5112 = vmatprep.mubr.msk.f32.mxu0 %vm655_vm0, %v7398_v36  ;;  %5569 = vmatpush1.bf16.msra.mxu0 %v5568_v48  ;;  %v11117_v36 = vld [vmem:[#allocation66_spill] sm:$0xff]  ;;  %v11122_v48 = vld [vmem:[#allocation139_spill] sm:$0xff] }
 0x1c7   : > { %5571 = vmatprep.subr.bf16.mxu0 %v5570_v47  ;;  %v7995_v52 = vmul.f32 %v11118_v3, %v11117_v36  ;;  %v2141_v51 = vmul.f32 %v11122_v48, %v11122_v48  ;;  %v6143_v47 = vld [vmem:[%s6821_s29 + $0x8] sm:$0xff] }
 0x1c8   : > { %v2588_v39 = vmul.f32 %v6144_v31, %v6143_v47  ;;  %v11129_v36 = vld [vmem:[#allocation161_spill] sm:$0xff] }
 0x1c9   : > { %1760 = vmatmul.mubr.f32.gmra.mrb[98].mxu0 %v11011_v1  ;;  %v5578_v1 = vpack.c.bf16 %v2137_v45, %v2135_v28  ;;  %v6148_v47 = vld [vmem:[%s6828_s19 + $0x28] sm:$0xff] }
 0x1ca   : > { %5113 = vmatprep.mubr.msk.f32.mxu0 %vm655_vm0, %v11012_v60  ;;  %5573 = vmatpush1.bf16.msra.mxu0 %v5572_v43  ;;  %v2139_v60 = vmul.f32 %v11121_v62, %v11121_v62  ;;  %v2590_v43 = vmul.f32 %v6146_v33, %v6145_v25  ;;  %v11137_v62 = vld [vmem:[#allocation175_spill] sm:$0xff] }
 0x1cb   : > { %5575 = vmatprep.subr.bf16.mxu0 %v5574_v44  ;;  %v6150_v25 = vld [vmem:[%s6828_s19 + $0x38] sm:$0xff] }
 0x1cc   : > { %v5582_v35 = vpack.c.bf16 %v2141_v51, %v2139_v60  ;;  %v5630_v0 = vpack.c.bf16 %v2590_v43, %v2588_v39  ;;  %v11139_v60 = vld [vmem:[#allocation177_spill] sm:$0xff]  ;;  %v11140_v51 = vld [vmem:[#allocation180_spill] sm:$0xff]  ;;  %v6149_v39 = vld [vmem:[%s6821_s29 + $0x38] sm:$0xff] }
 0x1cd   : > { %1766 = vmatmul.mubr.f32.gmra.mrb[100].mxu0 %v7453_v11  ;;  %v2594_v33 = vmul.f32 %v6150_v25, %v6149_v39  ;;  %v11143_v43 = vld [vmem:[#allocation181_spill] sm:$0xff]  ;;  %v11151_v39 = vld [vmem:[#allocation187_spill] sm:$0xff] }
 0x1ce   : > { %5114 = vmatprep.mubr.msk.f32.mxu0 %vm655_vm0, %v7466_v16  ;;  %5577 = vmatpush1.bf16.msra.mxu0 %v5576_v12  ;;  %v5584_v16 = vpack.c.bf16 %v2140_v5, %v2138_v23  ;;  %v11131_v12 = vld [vmem:[#allocation165_spill] sm:$0xff]  ;;  %v11142_v23 = vld [vmem:[#allocation182_spill] sm:$0xff] }
 0x1cf   : > { %5579 = vmatprep.subr.bf16.mxu0 %v5578_v1  ;;  %v11136_v1 = vld [vmem:[#allocation176_spill] sm:$0xff] }
 0x1d1   : > { %1772 = vmatmul.mubr.f32.gmra.mrb[102].mxu0 %v7484_v10 }
 0x1d2   : > { %5115 = vmatprep.mubr.msk.f32.mxu0 %vm655_vm0, %v11029_v34  ;;  %5581 = vmatpush1.bf16.msra.mxu0 %v5580_v4  ;;  %v11123_v34 = vld [vmem:[#allocation149_spill] sm:$0xff]  ;;  %v11141_v4 = vld [vmem:[#allocation179_spill] sm:$0xff] }
 0x1d3   : > { %5583 = vmatprep.subr.bf16.mxu0 %v5582_v35  ;;  %v6147_v35 = vld [vmem:[%s6821_s29 + $0x28] sm:$0xff] }
 0x1d4   : > { %v2592_v31 = vmul.f32 %v6148_v47, %v6147_v35  ;;  %v6160_v35 = vld [vmem:[%s6821_s29 + $0x78] sm:$0xff] }
 0x1d5   : > { %1778 = vmatmul.mubr.f32.gmra.mrb[104].mxu0 %v11033_v42  ;;  %v11124_v42 = vld [vmem:[#allocation151_spill] sm:$0xff] }
 0x1d6   : > { %5116 = vmatprep.mubr.msk.f32.mxu0 %vm655_vm0, %v11034_v55  ;;  %5585 = vmatpush1.bf16.msra.mxu0 %v5584_v16  ;;  %v11125_v55 = vld [vmem:[#allocation153_spill] sm:$0xff]  ;;  %v6161_v47 = vld [vmem:[%s6828_s19 + $0x78] sm:$0xff] }
 0x1d7   : > { %5631 = vmatprep.subr.bf16.mxu0 %v5630_v0  ;;  %v11144_v0 = vld [vmem:[#allocation184_spill] sm:$0xff] }
 0x1d8   : > { %v785_v26 = vpop.f32.mrb[0].mxu0 }
 0x1d9   : > { %v787_v44 = vpop.f32.mrb[1].mxu0  ;;  %1784 = vmatmul.mubr.f32.gmra.mrb[106].mxu0 %v7524_v57 }
 0x1da   : > { %5042 = vmatprep.mubr.msk.f32.mxu1 %vm655_vm0, %v787_v44  ;;  %5117 = vmatprep.mubr.msk.f32.mxu0 %vm655_vm0, %v11044_v24  ;;  %v11126_v24 = vld [vmem:[#allocation156_spill] sm:$0xff] }
 0x1db   : > { %1038 = vmatmul.mubr.f32.vlgmr.msra.gmra.mrb[0].mxu1 %v785_v26  ;;  %v11145_v26 = vld [vmem:[#allocation183_spill] sm:$0xff]  ;;  %v8091_v44 = vld [vmem:[#allocation7 + $0x8] sm:$0xff] }
 0x1dc   : > { %v791_v10 = vpop.f32.mrb[2].mxu0  ;;  %5413 = vmatpush1.bf16.msra.mxu1 %v11123_v34 }
 0x1dd   : > { %v793_v8 = vpop.f32.mrb[3].mxu0  ;;  %1790 = vmatmul.mubr.f32.gmra.mrb[108].mxu0 %v11045_v32  ;;  %5415 = vmatprep.subr.bf16.mxu1 %v11124_v42 }
 0x1de   : > { %5043 = vmatprep.mubr.msk.f32.mxu1 %vm655_vm0, %v793_v8  ;;  %5118 = vmatprep.mubr.msk.f32.mxu0 %vm655_vm0, %v11046_v18  ;;  %v11128_v18 = vld [vmem:[#allocation159_spill] sm:$0xff]  ;;  %v5634_v8 = vpack.c.bf16 %v2594_v33, %v2592_v31  ;;  %v2602_v31 = vmul.f32 %v6161_v47, %v6160_v35  ;;  %v8117_v33 = vld [vmem:[#allocation7 + $0x10] sm:$0xff] }
 0x1df   : > { %1044 = vmatmul.mubr.f32.gmra.mrb[2].mxu1 %v791_v10 }
 0x1e0   : > { %v797_v57 = vpop.f32.mrb[4].mxu0  ;;  %5417 = vmatpush1.bf16.msra.mxu1 %v11125_v55 }
 0x1e1   : > { %v799_v28 = vpop.f32.mrb[5].mxu0  ;;  %1796 = vmatmul.mubr.f32.gmra.mrb[110].mxu0 %v11047_v61  ;;  %5419 = vmatprep.subr.bf16.mxu1 %v11126_v24 }
 0x1e2   : > { %5044 = vmatprep.mubr.msk.f32.mxu1 %vm655_vm0, %v799_v28  ;;  %5119 = vmatprep.mubr.msk.f32.mxu0 %vm655_vm0, %v11054_v19  ;;  %v11130_v19 = vld [vmem:[#allocation164_spill] sm:$0xff] }
 0x1e3   : > { %1050 = vmatmul.mubr.f32.gmra.mrb[4].mxu1 %v797_v57  ;;  %v6152_v57 = vld [vmem:[%s6821_s29 + $0x48] sm:$0xff] }
 0x1e4   : > { %v803_v32 = vpop.f32.mrb[6].mxu0  ;;  %5421 = vmatpush1.bf16.msra.mxu1 %v11127_v27  ;;  %v6153_v28 = vld [vmem:[%s6828_s19 + $0x48] sm:$0xff] }
 0x1e5   : > { %v805_v45 = vpop.f32.mrb[7].mxu0  ;;  %1802 = vmatmul.mubr.f32.gmra.mrb[112].mxu0 %v11055_v20  ;;  %5423 = vmatprep.subr.bf16.mxu1 %v11128_v18 }
 0x1e6   : > { %5045 = vmatprep.mubr.msk.f32.mxu1 %vm655_vm0, %v805_v45  ;;  %5120 = vmatprep.mubr.msk.f32.mxu0 %vm655_vm0, %v11056_v29  ;;  %v11132_v29 = vld [vmem:[#allocation167_spill] sm:$0xff] }
 0x1e7   : > { %1056 = vmatmul.mubr.f32.gmra.mrb[6].mxu1 %v803_v32  ;;  %v2596_v32 = vmul.f32 %v6153_v28, %v6152_v57  ;;  %v6154_v45 = vld [vmem:[%s6821_s29 + $0x58] sm:$0xff] }
 0x1e8   : > { %v809_v61 = vpop.f32.mrb[8].mxu0  ;;  %5425 = vmatpush1.bf16.msra.mxu1 %v11129_v36 }
 0x1e9   : > { %v811_v3 = vpop.f32.mrb[9].mxu0  ;;  %1808 = vmatmul.mubr.f32.gmra.mrb[114].mxu0 %v11063_v50  ;;  %5427 = vmatprep.subr.bf16.mxu1 %v11130_v19 }
 0x1ea   : > { %5046 = vmatprep.mubr.msk.f32.mxu1 %vm655_vm0, %v811_v3  ;;  %5121 = vmatprep.mubr.msk.f32.mxu0 %vm655_vm0, %v11064_v46  ;;  %v11134_v46 = vld [vmem:[#allocation171_spill] sm:$0xff] }
 0x1eb   : > { %1062 = vmatmul.mubr.f32.gmra.mrb[8].mxu1 %v809_v61  ;;  %v6155_v61 = vld [vmem:[%s6828_s19 + $0x58] sm:$0xff] }
 0x1ec   : > { %v815_v20 = vpop.f32.mrb[10].mxu0  ;;  %5429 = vmatpush1.bf16.msra.mxu1 %v11131_v12  ;;  %v2598_v3 = vmul.f32 %v6155_v61, %v6154_v45  ;;  %v6164_v45 = vld [vmem:[%s6821_s29 + $0x88] sm:$0xff] }
 0x1ed   : > { %v817_v30 = vpop.f32.mrb[11].mxu0  ;;  %1814 = vmatmul.mubr.f32.gmra.mrb[116].mxu0 %v11065_v37  ;;  %5431 = vmatprep.subr.bf16.mxu1 %v11132_v29  ;;  %v6165_v61 = vld [vmem:[%s6828_s19 + $0x88] sm:$0xff] }
 0x1ee   : > { %5047 = vmatprep.mubr.msk.f32.mxu1 %vm655_vm0, %v817_v30  ;;  %5122 = vmatprep.mubr.msk.f32.mxu0 %vm655_vm0, %v11066_v14 }
 0x1ef   : > { %1068 = vmatmul.mubr.f32.gmra.mrb[10].mxu1 %v815_v20  ;;  %v11146_v20 = vld [vmem:[#allocation185_spill] sm:$0xff] }
 0x1f0   : > { %v821_v50 = vpop.f32.mrb[12].mxu0  ;;  %5433 = vmatpush1.bf16.msra.mxu1 %v11133_v56 }
 0x1f1   : > { %v823_v6 = vpop.f32.mrb[13].mxu0  ;;  %1820 = vmatmul.mubr.f32.gmra.mrb[118].mxu0 %v11073_v2  ;;  %5435 = vmatprep.subr.bf16.mxu1 %v11134_v46  ;;  %v11138_v2 = vld [vmem:[#allocation178_spill] sm:$0xff] }
 0x1f2   : > { %5048 = vmatprep.mubr.msk.f32.mxu1 %vm655_vm0, %v823_v6  ;;  %5123 = vmatprep.mubr.msk.f32.mxu0 %vm655_vm0, %v11074_v59  ;;  %v11147_v6 = vld [vmem:[#allocation186_spill] sm:$0xff] }
 0x1f3   : > { %1074 = vmatmul.mubr.f32.gmra.mrb[12].mxu1 %v821_v50  ;;  %v8100_v50 = vld [vmem:[#allocation7] sm:$0xff] }
 0x1f4   : > { %v827_v37 = vpop.f32.mrb[14].mxu0  ;;  %5437 = vmatpush1.bf16.msra.mxu1 %v11135_v13 }
 0x1f5   : > { %v829_v14 = vpop.f32.mrb[15].mxu0  ;;  %1826 = vmatmul.mubr.f32.gmra.mrb[120].mxu0 %v11136_v1  ;;  %5439 = vmatprep.subr.bf16.mxu1 %v11137_v62 }
 0x1f6   : > { %5049 = vmatprep.mubr.msk.f32.mxu1 %vm655_vm0, %v829_v14  ;;  %5124 = vmatprep.mubr.msk.f32.mxu0 %vm655_vm0, %v11138_v2  ;;  %v11149_v14 = vld [vmem:[#allocation57_spill] sm:$0xff]  ;;  %v8108_v2 = vld [vmem:[#allocation7 + $0x18] sm:$0xff] }
 0x1f7   : > { %1080 = vmatmul.mubr.f32.gmra.mrb[14].mxu1 %v827_v37  ;;  %v11148_v37 = vld [vmem:[#allocation124_spill] sm:$0xff] }
 0x1f8   : > { %v833_v59 = vpop.f32.mrb[16].mxu0  ;;  %5441 = vmatpush1.bf16.msra.mxu1 %v11139_v60  ;;  %v11150_v1 = vpack.c.bf16 %v11148_v37, %v11149_v14  ;;  %v6167_v37 = vld [vmem:[%s6828_s19 + $0x98] sm:$0xff] }
 0x1f9   : > { %v835_v48 = vpop.f32.mrb[17].mxu0  ;;  %1832 = vmatmul.mubr.f32.gmra.mrb[122].mxu0 %v11140_v51  ;;  %5443 = vmatprep.subr.bf16.mxu1 %v11141_v4  ;;  %v6158_v51 = vld [vmem:[%s6821_s29 + $0x68] sm:$0xff] }
 0x1fa   : > { %5050 = vmatprep.mubr.msk.f32.mxu1 %vm655_vm0, %v835_v48  ;;  %5125 = vmatprep.mubr.msk.f32.mxu0 %vm655_vm0, %v11142_v23  ;;  %v5638_v48 = vpack.c.bf16 %v2598_v3, %v2596_v32  ;;  %v6159_v23 = vld [vmem:[%s6828_s19 + $0x68] sm:$0xff]  ;;  %v2604_v3 = vmul.f32 %v6165_v61, %v6164_v45 }
 0x1fb   : > { %1086 = vmatmul.mubr.f32.gmra.mrb[16].mxu1 %v833_v59 }
 0x1fc   : > { %v839_v5 = vpop.f32.mrb[18].mxu0  ;;  %5445 = vmatpush1.bf16.msra.mxu1 %v11143_v43 }
 0x1fd   : > { %v841_v16 = vpop.f32.mrb[19].mxu0  ;;  %1838 = vmatmul.mubr.f32.gmra.mrb[124].mxu0 %v11144_v0  ;;  %5447 = vmatprep.subr.bf16.mxu1 %v11145_v26  ;;  %v8122_v0 = vld [vmem:[#allocation7 + $0x28] sm:$0xff] }
 0x1fe   : > { %5051 = vmatprep.mubr.msk.f32.mxu1 %vm655_vm0, %v841_v16  ;;  %5147 = vmatprep.mubr.msk.f32.mxu0 %vm655_vm0, %v8091_v44  ;;  %v11152_v16 = vld [vmem:[#allocation148_spill] sm:$0xff] }
 0x1ff   : > { %1092 = vmatmul.mubr.f32.gmra.mrb[18].mxu1 %v839_v5  ;;  %v2600_v5 = vmul.f32 %v6159_v23, %v6158_v51  ;;  %v8133_v51 = vld [vmem:[#allocation7 + $0x20] sm:$0xff] }
 0x200   : > { %v845_v10 = vpop.f32.mrb[20].mxu0  ;;  %5449 = vmatpush1.bf16.msra.mxu1 %v11146_v20  ;;  %v11157_v23 = vld [vmem:[#allocation88_spill] sm:$0xff] }
 0x201   : > { %v847_v30 = vpop.f32.mrb[21].mxu0  ;;  %2207 = vmatmul.mubr.f32.vlgmr.msra.gmra.mrb[126].mxu0 %v8100_v50  ;;  %5451 = vmatprep.subr.bf16.mxu1 %v11147_v6  ;;  %v5642_v32 = vpack.c.bf16 %v2602_v31, %v2600_v5  ;;  %v6170_v31 = vld [vmem:[%s6821_s29 + $0xa8] sm:$0xff] }
 0x202   : > { %5052 = vmatprep.mubr.msk.f32.mxu1 %vm655_vm0, %v847_v30  ;;  %5633 = vmatpush1.bf16.msra.mxu0 %v11150_v1  ;;  %v6166_v30 = vld [vmem:[%s6821_s29 + $0x98] sm:$0xff] }
 0x203   : > { %1098 = vmatmul.mubr.f32.gmra.mrb[20].mxu1 %v845_v10  ;;  %5148 = vmatprep.mubr.msk.f32.mxu0 %vm655_vm0, %v8108_v2  ;;  %v11153_v10 = vld [vmem:[#allocation89_spill] sm:$0xff]  ;;  %v2606_v14 = vmul.f32 %v6167_v37, %v6166_v30 }
 0x204   : > { %v851_v59 = vpop.f32.mrb[22].mxu0  ;;  %5635 = vmatprep.subr.bf16.mxu0 %v5634_v8  ;;  %5453 = vmatpush1.bf16.msra.mxu1 %v11151_v39  ;;  %v11154_v8 = vld [vmem:[#allocation128_spill] sm:$0xff]  ;;  %v8148_v30 = vld [vmem:[#allocation7 + $0x30] sm:$0xff] }
 0x205   : > { %v853_v25 = vpop.f32.mrb[23].mxu0  ;;  %2213 = vmatmul.mubr.f32.gmra.mrb[128].mxu0 %v8117_v33  ;;  %5499 = vmatprep.subr.bf16.mxu1 %v11152_v16  ;;  %v11155_v57 = vpack.c.bf16 %v11153_v10, %v11154_v8  ;;  %v5646_v47 = vpack.c.bf16 %v2606_v14, %v2604_v3  ;;  %v6172_v8 = vld [vmem:[%s6821_s29 + $0xb8] sm:$0xff] }
 0x206   : > { %5053 = vmatprep.mubr.msk.f32.mxu1 %vm655_vm0, %v853_v25  ;;  %5149 = vmatprep.mubr.msk.f32.mxu0 %vm655_vm0, %v8122_v0  ;;  %v6171_v25 = vld [vmem:[%s6828_s19 + $0xa8] sm:$0xff]  ;;  %v11160_v3 = vld [vmem:[#allocation63_spill] sm:$0xff] }
 0x207   : > { %1104 = vmatmul.mubr.f32.gmra.mrb[22].mxu1 %v851_v59  ;;  %5637 = vmatpush1.bf16.msra.mxu0 %v11155_v57  ;;  %v8137_v59 = vld [vmem:[#allocation7 + $0x38] sm:$0xff]  ;;  %v2608_v10 = vmul.f32 %v6171_v25, %v6170_v31 }
 0x208   : > { %v857_v28 = vpop.f32.mrb[24].mxu0  ;;  %5639 = vmatprep.subr.bf16.mxu0 %v5638_v48  ;;  %v11156_v48 = vld [vmem:[#allocation62_spill] sm:$0xff] }
 0x209   : > { %v859_v1 = vpop.f32.mrb[25].mxu0  ;;  %2219 = vmatmul.mubr.f32.gmra.mrb[130].mxu0 %v8133_v51  ;;  %v11158_v5 = vpack.c.bf16 %v11156_v48, %v11157_v23  ;;  %v6173_v57 = vld [vmem:[%s6828_s19 + $0xb8] sm:$0xff]  ;;  %v6176_v48 = vld [vmem:[%s6821_s29 + $0xc8] sm:$0xff] }
 0x20a   : > { %5054 = vmatprep.mubr.msk.f32.mxu1 %vm655_vm0, %v859_v1  ;;  %5150 = vmatprep.mubr.msk.f32.mxu0 %vm655_vm0, %v8137_v59  ;;  %v2610_v45 = vmul.f32 %v6173_v57, %v6172_v8  ;;  %v6177_v23 = vld [vmem:[%s6828_s19 + $0xc8] sm:$0xff]  ;;  %v6178_v31 = vld [vmem:[%s6821_s29 + $0xd8] sm:$0xff] }
 0x20b   : > { %1110 = vmatmul.mubr.f32.gmra.mrb[24].mxu1 %v857_v28  ;;  %5641 = vmatpush1.bf16.msra.mxu0 %v11158_v5  ;;  %v8152_v28 = vld [vmem:[#allocation7 + $0x48] sm:$0xff]  ;;  %v2612_v5 = vmul.f32 %v6177_v23, %v6176_v48  ;;  %v6179_v25 = vld [vmem:[%s6828_s19 + $0xd8] sm:$0xff] }
 0x20c   : > { %v863_v35 = vpop.f32.mrb[26].mxu0  ;;  %5643 = vmatprep.subr.bf16.mxu0 %v5642_v32  ;;  %v11159_v32 = vld [vmem:[#allocation103_spill] sm:$0xff]  ;;  %v5650_v1 = vpack.c.bf16 %v2610_v45, %v2608_v10  ;;  %v2614_v8 = vmul.f32 %v6179_v25, %v6178_v31  ;;  %v11163_v10 = vld [vmem:[#allocation102_spill] sm:$0xff]  ;;  %v6183_v48 = vld [vmem:[%s6828_s19 + $0xe8] sm:$0xff] }
 0x20d   : > { %v865_v61 = vpop.f32.mrb[27].mxu0  ;;  %2225 = vmatmul.mubr.f32.gmra.mrb[132].mxu0 %v8148_v30  ;;  %v11161_v37 = vpack.c.bf16 %v11159_v32, %v11160_v3  ;;  %v6184_v31 = vld [vmem:[%s6821_s29 + $0xf8] sm:$0xff] }
 0x20e   : > { %5055 = vmatprep.mubr.msk.f32.mxu1 %vm655_vm0, %v865_v61  ;;  %5151 = vmatprep.mubr.msk.f32.mxu0 %vm655_vm0, %v8152_v28  ;;  %v8163_v61 = vld [vmem:[#allocation7 + $0x40] sm:$0xff]  ;;  %v5654_v3 = vpack.c.bf16 %v2614_v8, %v2612_v5  ;;  %v6185_v25 = vld [vmem:[%s6828_s19 + $0xf8] sm:$0xff] }
 0x20f   : > { %1116 = vmatmul.mubr.f32.gmra.mrb[26].mxu1 %v863_v35  ;;  %5645 = vmatpush1.bf16.msra.mxu0 %v11161_v37  ;;  %v8167_v35 = vld [vmem:[#allocation7 + $0x58] sm:$0xff]  ;;  %v6182_v37 = vld [vmem:[%s6821_s29 + $0xe8] sm:$0xff] }
 0x210   : > { %v869_v14 = vpop.f32.mrb[28].mxu0  ;;  %5647 = vmatprep.subr.bf16.mxu0 %v5646_v47  ;;  %v11162_v47 = vld [vmem:[#allocation68_spill] sm:$0xff]  ;;  %v2616_v23 = vmul.f32 %v6183_v48, %v6182_v37  ;;  %v6190_v48 = vld [vmem:[%s6821_s29 + $0x118] sm:$0xff] }
 0x211   : > { %v871_v57 = vpop.f32.mrb[29].mxu0  ;;  %2231 = vmatmul.mubr.f32.gmra.mrb[134].mxu0 %v8163_v61  ;;  %v11164_v45 = vpack.c.bf16 %v11162_v47, %v11163_v10  ;;  %v6188_v10 = vld [vmem:[%s6821_s29 + $0x108] sm:$0xff] }
 0x212   : > { %5056 = vmatprep.mubr.msk.f32.mxu1 %vm655_vm0, %v871_v57  ;;  %5152 = vmatprep.mubr.msk.f32.mxu0 %vm655_vm0, %v8167_v35  ;;  %v2618_v57 = vmul.f32 %v6185_v25, %v6184_v31 }
 0x213   : > { %1122 = vmatmul.mubr.f32.gmra.mrb[28].mxu1 %v869_v14  ;;  %5649 = vmatpush1.bf16.msra.mxu0 %v11164_v45  ;;  %v8182_v14 = vld [vmem:[#allocation7 + $0x68] sm:$0xff] }
 0x214   : > { %v875_v32 = vpop.f32.mrb[30].mxu0  ;;  %5651 = vmatprep.subr.bf16.mxu0 %v5650_v1  ;;  %v11165_v1 = vld [vmem:[#allocation69_spill] sm:$0xff]  ;;  %v5658_v47 = vpack.c.bf16 %v2618_v57, %v2616_v23 }
 0x215   : > { %v877_v11 = vpop.f32.mrb[31].mxu0  ;;  %2237 = vmatmul.mubr.f32.gmra.mrb[136].mxu0 %v8178_v40  ;;  %v11166_v5 = vpack.c.bf16 %v7850_v21, %v11165_v1  ;;  %v6189_v45 = vld [vmem:[%s6828_s19 + $0x108] sm:$0xff]  ;;  %v8197_v21 = vld [vmem:[#allocation7 + $0x78] sm:$0xff] }
 0x216   : > { %5057 = vmatprep.mubr.msk.f32.mxu1 %vm655_vm0, %v877_v11  ;;  %5153 = vmatprep.mubr.msk.f32.mxu0 %vm655_vm0, %v8182_v14  ;;  %v2620_v37 = vmul.f32 %v6189_v45, %v6188_v10  ;;  %v6191_v11 = vld [vmem:[%s6828_s19 + $0x118] sm:$0xff]  ;;  %v6194_v23 = vld [vmem:[%s6821_s29 + $0x128] sm:$0xff] }
 0x217   : > { %1128 = vmatmul.mubr.f32.gmra.mrb[30].mxu1 %v875_v32  ;;  %5653 = vmatpush1.bf16.msra.mxu0 %v11166_v5  ;;  %v2622_v31 = vmul.f32 %v6191_v11, %v6190_v48  ;;  %v6195_v57 = vld [vmem:[%s6828_s19 + $0x128] sm:$0xff]  ;;  %v6196_v5 = vld [vmem:[%s6821_s29 + $0x138] sm:$0xff]  ;;  %v8208_v11 = vld [vmem:[#allocation7 + $0x70] sm:$0xff] }
 0x218   : > { %v881_v8 = vpop.f32.mrb[32].mxu0  ;;  %5655 = vmatprep.subr.bf16.mxu0 %v5654_v3  ;;  %v2624_v1 = vmul.f32 %v6195_v57, %v6194_v23  ;;  %v6197_v10 = vld [vmem:[%s6828_s19 + $0x138] sm:$0xff] }
 0x219   : > { %v883_v25 = vpop.f32.mrb[33].mxu0  ;;  %2243 = vmatmul.mubr.f32.gmra.mrb[138].mxu0 %v8193_v58  ;;  %v5662_v3 = vpack.c.bf16 %v2622_v31, %v2620_v37  ;;  %v2626_v45 = vmul.f32 %v6197_v10, %v6196_v5  ;;  %v6202_v31 = vld [vmem:[%s6821_s29 + $0x158] sm:$0xff]  ;;  %v8223_v5 = vld [vmem:[#allocation7 + $0x80] sm:$0xff]  ;;  %v8238_v10 = vld [vmem:[#allocation7 + $0xa8] sm:$0xff] }
 0x21a   : > { %5058 = vmatprep.mubr.msk.f32.mxu1 %vm655_vm0, %v883_v25  ;;  %5154 = vmatprep.mubr.msk.f32.mxu0 %vm655_vm0, %v8197_v21  ;;  %v6203_v25 = vld [vmem:[%s6828_s19 + $0x158] sm:$0xff] }
 0x21b   : > { %1134 = vmatmul.mubr.f32.gmra.mrb[32].mxu1 %v881_v8  ;;  %5657 = vmatpush1.bf16.msra.mxu0 %v5656_v22  ;;  %v5666_v22 = vpack.c.bf16 %v2626_v45, %v2624_v1  ;;  %v6200_v8 = vld [vmem:[%s6821_s29 + $0x148] sm:$0xff]  ;;  %v2630_v23 = vmul.f32 %v6203_v25, %v6202_v31  ;;  %v8234_v1 = vld [vmem:[#allocation7 + $0x90] sm:$0xff]  ;;  %v8271_v25 = vld [vmem:[#allocation7 + $0xd8] sm:$0xff]  ;;  %s10306_s29 = scalar_lea.hbm %s10367_s6, %s5275_s16 }
 0x21c   : > { %v887_v32 = vpop.f32.mrb[34].mxu0  ;;  %5659 = vmatprep.subr.bf16.mxu0 %v5658_v47  ;;  %v6201_v47 = vld [vmem:[%s6828_s19 + $0x148] sm:$0xff]  ;;  %s470_s19 = scalar_lea.vmem %s11694_s17, %s10215_s15 }
 0x21d   : > { %v889_v48 = vpop.f32.mrb[35].mxu0  ;;  %2249 = vmatmul.mubr.f32.gmra.mrb[140].mxu0 %v8208_v11  ;;  %v2628_v37 = vmul.f32 %v6201_v47, %v6200_v8  ;;  %v8257_v47 = vld [vmem:[#allocation7 + $0xb0] sm:$0xff] }
 0x21e   : > { %5059 = vmatprep.mubr.msk.f32.mxu1 %vm655_vm0, %v889_v48  ;;  %5155 = vmatprep.mubr.msk.f32.mxu0 %vm655_vm0, %v8212_v63  ;;  %v8245_v48 = vld [vmem:[#allocation7 + $0xa0] sm:$0xff] }
 0x21f   : > { %1140 = vmatmul.mubr.f32.gmra.mrb[34].mxu1 %v887_v32  ;;  %5661 = vmatpush1.bf16.msra.mxu0 %v5660_v9  ;;  %v8227_v32 = vld [vmem:[#allocation7 + $0x98] sm:$0xff]  ;;  %v5670_v9 = vpack.c.bf16 %v2630_v23, %v2628_v37  ;;  %v8261_v37 = vld [vmem:[#allocation7 + $0xc8] sm:$0xff] }
 0x220   : > { %v893_v17 = vpop.f32.mrb[36].mxu0  ;;  %5663 = vmatprep.subr.bf16.mxu0 %v5662_v3 }
 0x221   : > { %v895_v57 = vpop.f32.mrb[37].mxu0  ;;  %2255 = vmatmul.mubr.f32.gmra.mrb[142].mxu0 %v8223_v5 }
 0x222   : > { %5060 = vmatprep.mubr.msk.f32.mxu1 %vm655_vm0, %v895_v57  ;;  %5156 = vmatprep.mubr.msk.f32.mxu0 %vm655_vm0, %v8227_v32 }
 0x223   : > { %1146 = vmatmul.mubr.f32.gmra.mrb[36].mxu1 %v893_v17  ;;  %5665 = vmatpush1.bf16.msra.mxu0 %v11167_v49  ;;  %v8249_v17 = vld [vmem:[#allocation7 + $0xb8] sm:$0xff]  ;;  %v8276_v49 = vld [vmem:[#allocation7 + $0xd0] sm:$0xff] }
 0x224   : > { %v899_v54 = vpop.f32.mrb[38].mxu0  ;;  %5667 = vmatprep.subr.bf16.mxu0 %v5666_v22  ;;  %v11169_v22 = vpack.c.bf16 %v8006_v53, %v7995_v52  ;;  %v8266_v53 = vld [vmem:[#allocation7 + $0xc0] sm:$0xff] }
 0x225   : > { %v901_v3 = vpop.f32.mrb[39].mxu0  ;;  %2261 = vmatmul.mubr.f32.gmra.mrb[144].mxu0 %v8234_v1 }
 0x226   : > { %5061 = vmatprep.mubr.msk.f32.mxu1 %vm655_vm0, %v901_v3  ;;  %5157 = vmatprep.mubr.msk.f32.mxu0 %vm655_vm0, %v8238_v10 }
 0x227   : > { %1152 = vmatmul.mubr.f32.gmra.mrb[38].mxu1 %v899_v54  ;;  %5669 = vmatpush1.bf16.msra.mxu0 %v11168_v15  ;;  %v8281_v54 = vld [vmem:[#allocation7 + $0xe8] sm:$0xff]  ;;  %v8286_v15 = vld [vmem:[#allocation7 + $0xe0] sm:$0xff] }
 0x228   : > { %v905_v38 = vpop.f32.mrb[40].mxu0  ;;  %5671 = vmatprep.subr.bf16.mxu0 %v5670_v9 }
 0x229   : > { %v907_v45 = vpop.f32.mrb[41].mxu0  ;;  %2267 = vmatmul.mubr.f32.gmra.mrb[146].mxu0 %v8245_v48 }
 0x22a   : > { %5062 = vmatprep.mubr.msk.f32.mxu1 %vm655_vm0, %v907_v45  ;;  %5158 = vmatprep.mubr.msk.f32.mxu0 %vm655_vm0, %v8249_v17 }
 0x22b   : > { %1158 = vmatmul.mubr.f32.gmra.mrb[40].mxu1 %v905_v38  ;;  %5673 = vmatpush1.bf16.msra.mxu0 %v11169_v22  ;;  %v8291_v38 = vld [vmem:[#allocation7 + $0xf8] sm:$0xff] }
 0x22c   : > { %v1230_v7 = vpop.f32.mrb[42].mxu0  ;;  %5719 = vmatprep.subr.bf16.mxu0 %v11170_v41  ;;  %v8301_v41 = vld [vmem:[#allocation7 + $0x108] sm:$0xff] }
 0x22d   : > { %v1232_v8 = vpop.f32.mrb[43].mxu0  ;;  %2273 = vmatmul.mubr.f32.gmra.mrb[148].mxu0 %v8257_v47 }
 0x22e   : > { %5084 = vmatprep.mubr.msk.f32.mxu1 %vm655_vm0, %v1232_v8  ;;  %5159 = vmatprep.mubr.msk.f32.mxu0 %vm655_vm0, %v8261_v37 }
 0x22f   : > { %1483 = vmatmul.mubr.f32.vlgmr.msra.gmra.mrb[42].mxu1 %v1230_v7  ;;  %v8296_v7 = vld [vmem:[#allocation7 + $0xf0] sm:$0xff] }
 0x230   : > { %v1236_v31 = vpop.f32.mrb[44].mxu0  ;;  %5501 = vmatpush1.bf16.msra.mxu1 %v11123_v34 }
 0x231   : > { %v1238_v52 = vpop.f32.mrb[45].mxu0  ;;  %2279 = vmatmul.mubr.f32.gmra.mrb[150].mxu0 %v8266_v53  ;;  %5503 = vmatprep.subr.bf16.mxu1 %v11124_v42 }
 0x232   : > { %5085 = vmatprep.mubr.msk.f32.mxu1 %vm655_vm0, %v1238_v52  ;;  %5160 = vmatprep.mubr.msk.f32.mxu0 %vm655_vm0, %v8271_v25  ;;  %v8306_v52 = vld [vmem:[#allocation7 + $0x100] sm:$0xff] }
 0x233   : > { %1489 = vmatmul.mubr.f32.gmra.mrb[44].mxu1 %v1236_v31 }
 0x234   : > { %v1242_v23 = vpop.f32.mrb[46].mxu0  ;;  %5505 = vmatpush1.bf16.msra.mxu1 %v11125_v55 }
 0x235   : > { %v1244_v57 = vpop.f32.mrb[47].mxu0  ;;  %2285 = vmatmul.mubr.f32.gmra.mrb[152].mxu0 %v8276_v49  ;;  %5507 = vmatprep.subr.bf16.mxu1 %v11126_v24 }
 0x236   : > { %5086 = vmatprep.mubr.msk.f32.mxu1 %vm655_vm0, %v1244_v57  ;;  %5161 = vmatprep.mubr.msk.f32.mxu0 %vm655_vm0, %v8281_v54 }
 0x237   : > { %1495 = vmatmul.mubr.f32.gmra.mrb[46].mxu1 %v1242_v23  ;;  %v8311_v23 = vld [vmem:[#allocation7 + $0x118] sm:$0xff] }
 0x238   : > { %v1248_v9 = vpop.f32.mrb[48].mxu0  ;;  %5509 = vmatpush1.bf16.msra.mxu1 %v11127_v27 }
 0x239   : > { %v1250_v3 = vpop.f32.mrb[49].mxu0  ;;  %2291 = vmatmul.mubr.f32.gmra.mrb[154].mxu0 %v8286_v15  ;;  %5511 = vmatprep.subr.bf16.mxu1 %v11128_v18 }
 0x23a   : > { %5087 = vmatprep.mubr.msk.f32.mxu1 %vm655_vm0, %v1250_v3  ;;  %5162 = vmatprep.mubr.msk.f32.mxu0 %vm655_vm0, %v8291_v38  ;;  %v8316_v3 = vld [vmem:[#allocation7 + $0x110] sm:$0xff] }
 0x23b   : > { %1501 = vmatmul.mubr.f32.gmra.mrb[48].mxu1 %v1248_v9 }
 0x23c   : > { %v1254_v45 = vpop.f32.mrb[50].mxu0  ;;  %5513 = vmatpush1.bf16.msra.mxu1 %v11129_v36 }
 0x23d   : > { %v1256_v22 = vpop.f32.mrb[51].mxu0  ;;  %2297 = vmatmul.mubr.f32.gmra.mrb[156].mxu0 %v8296_v7  ;;  %5515 = vmatprep.subr.bf16.mxu1 %v11130_v19 }
 0x23e   : > { %5088 = vmatprep.mubr.msk.f32.mxu1 %vm655_vm0, %v1256_v22  ;;  %5163 = vmatprep.mubr.msk.f32.mxu0 %vm655_vm0, %v8301_v41 }
 0x23f   : > { %1507 = vmatmul.mubr.f32.gmra.mrb[50].mxu1 %v1254_v45  ;;  %v8321_v45 = vld [vmem:[#allocation7 + $0x128] sm:$0xff] }
 0x240   : > { %v1260_v8 = vpop.f32.mrb[52].mxu0  ;;  %5517 = vmatpush1.bf16.msra.mxu1 %v11131_v12 }
 0x241   : > { %v1262_v31 = vpop.f32.mrb[53].mxu0  ;;  %2303 = vmatmul.mubr.f32.gmra.mrb[158].mxu0 %v8306_v52  ;;  %5519 = vmatprep.subr.bf16.mxu1 %v11132_v29 }
 0x242   : > { %5089 = vmatprep.mubr.msk.f32.mxu1 %vm655_vm0, %v1262_v31  ;;  %5164 = vmatprep.mubr.msk.f32.mxu0 %vm655_vm0, %v8311_v23  ;;  %v8326_v31 = vld [vmem:[#allocation7 + $0x120] sm:$0xff] }
 0x243   : > { %1513 = vmatmul.mubr.f32.gmra.mrb[52].mxu1 %v1260_v8 }
 0x244   : > { %v1266_v57 = vpop.f32.mrb[54].mxu0  ;;  %5521 = vmatpush1.bf16.msra.mxu1 %v11133_v56 }
 0x245   : > { %v1268_v9 = vpop.f32.mrb[55].mxu0  ;;  %2309 = vmatmul.mubr.f32.gmra.mrb[160].mxu0 %v8316_v3  ;;  %5523 = vmatprep.subr.bf16.mxu1 %v11134_v46  ;;  %v8331_v46 = vld [vmem:[#allocation7 + $0x138] sm:$0xff] }
 0x246   : > { %5090 = vmatprep.mubr.msk.f32.mxu1 %vm655_vm0, %v1268_v9  ;;  %5165 = vmatprep.mubr.msk.f32.mxu0 %vm655_vm0, %v8321_v45 }
 0x247   : > { %1519 = vmatmul.mubr.f32.gmra.mrb[54].mxu1 %v1266_v57 }
 0x248   : > { %v1272_v22 = vpop.f32.mrb[56].mxu0  ;;  %5525 = vmatpush1.bf16.msra.mxu1 %v11135_v13  ;;  %v8336_v13 = vld [vmem:[#allocation7 + $0x130] sm:$0xff] }
 0x249   : > { %v1274_v8 = vpop.f32.mrb[57].mxu0  ;;  %2315 = vmatmul.mubr.f32.gmra.mrb[162].mxu0 %v8326_v31  ;;  %5527 = vmatprep.subr.bf16.mxu1 %v11137_v62  ;;  %v8341_v62 = vld [vmem:[#allocation7 + $0x148] sm:$0x3f] }
 0x24a   : > { %5091 = vmatprep.mubr.msk.f32.mxu1 %vm655_vm0, %v1274_v8  ;;  %5166 = vmatprep.mubr.msk.f32.mxu0 %vm655_vm0, %v8331_v46 }
 0x24b   : > { %1525 = vmatmul.mubr.f32.gmra.mrb[56].mxu1 %v1272_v22 }
 0x24c   : > { %v1278_v9 = vpop.f32.mrb[58].mxu0  ;;  %5529 = vmatpush1.bf16.msra.mxu1 %v11139_v60  ;;  %v8346_v60 = vld [vmem:[#allocation7 + $0x140] sm:$0x3f] }
 0x24d   : > { %v1280_v57 = vpop.f32.mrb[59].mxu0  ;;  %2321 = vmatmul.mubr.f32.gmra.mrb[164].mxu0 %v8336_v13  ;;  %5531 = vmatprep.subr.bf16.mxu1 %v11141_v4 }
 0x24e   : > { %5092 = vmatprep.mubr.msk.f32.mxu1 %vm655_vm0, %v1280_v57  ;;  %5167 = vmatprep.mubr.msk.f32.mxu0 %vm655_vm0, %v8341_v62 }
 0x24f   : > { %1531 = vmatmul.mubr.f32.gmra.mrb[58].mxu1 %v1278_v9 }
 0x250   : > { %v1284_v8 = vpop.f32.mrb[60].mxu0  ;;  %5533 = vmatpush1.bf16.msra.mxu1 %v11143_v43 }
 0x251   : > { %v1286_v22 = vpop.f32.mrb[61].mxu0  ;;  %2327 = vmatmul.mubr.f32.gmra.mrb[166].mxu0 %v8346_v60  ;;  %5535 = vmatprep.subr.bf16.mxu1 %v11145_v26  ;;  %v11171_v26 = vld [vmem:[#allocation25_spill] sm:$0xff] }
 0x252   : > { %5093 = vmatprep.mubr.msk.f32.mxu1 %vm655_vm0, %v1286_v22  ;;  %5189 = vmatprep.mubr.msk.f32.mxu0 %vm655_vm0, %v8091_v44  ;;  %v11172_v44 = vld [vmem:[#allocation27_spill] sm:$0xff] }
 0x253   : > { %1537 = vmatmul.mubr.f32.gmra.mrb[60].mxu1 %v1284_v8 }
 0x254   : > { %v1290_v57 = vpop.f32.mrb[62].mxu0  ;;  %5537 = vmatpush1.bf16.msra.mxu1 %v11146_v20 }
 0x255   : > { %v1292_v9 = vpop.f32.mrb[63].mxu0  ;;  %2696 = vmatmul.mubr.f32.vlgmr.msra.gmra.mrb[168].mxu0 %v8100_v50  ;;  %5539 = vmatprep.subr.bf16.mxu1 %v11147_v6  ;;  %v11173_v50 = vld [vmem:[#allocation29_spill] sm:$0xff] }
 0x256   : > { %5094 = vmatprep.mubr.msk.f32.mxu1 %vm655_vm0, %v1292_v9  ;;  %5190 = vmatprep.mubr.msk.f32.mxu0 %vm655_vm0, %v8108_v2 }
 0x257   : > { %1543 = vmatmul.mubr.f32.gmra.mrb[62].mxu1 %v1290_v57  ;;  %5721 = vmatpush1.bf16.msra.mxu0 %v11171_v26  ;;  %v11174_v26 = vld [vmem:[#allocation30_spill] sm:$0xff] }
 0x258   : > { %v1296_v22 = vpop.f32.mrb[64].mxu0  ;;  %5541 = vmatpush1.bf16.msra.mxu1 %v11151_v39  ;;  %5723 = vmatprep.subr.bf16.mxu0 %v11172_v44  ;;  %v11176_v44 = vld [vmem:[#allocation34_spill] sm:$0xff] }
 0x259   : > { %v1298_v8 = vpop.f32.mrb[65].mxu0  ;;  %2702 = vmatmul.mubr.f32.gmra.mrb[170].mxu0 %v8117_v33  ;;  %5587 = vmatprep.subr.bf16.mxu1 %v11152_v16  ;;  %v11175_v33 = vld [vmem:[#allocation33_spill] sm:$0xff] }
 0x25a   : > { %5095 = vmatprep.mubr.msk.f32.mxu1 %vm655_vm0, %v1298_v8  ;;  %5191 = vmatprep.mubr.msk.f32.mxu0 %vm655_vm0, %v8122_v0  ;;  %v11178_v8 = vld [vmem:[#allocation38_spill] sm:$0xff] }
 0x25b   : > { %1549 = vmatmul.mubr.f32.gmra.mrb[64].mxu1 %v1296_v22  ;;  %5725 = vmatpush1.bf16.msra.mxu0 %v11173_v50 }
 0x25c   : > { %v1302_v2 = vpop.f32.mrb[66].mxu0  ;;  %5727 = vmatprep.subr.bf16.mxu0 %v11174_v26 }
 0x25d   : > { %v1304_v57 = vpop.f32.mrb[67].mxu0  ;;  %2708 = vmatmul.mubr.f32.gmra.mrb[172].mxu0 %v8133_v51  ;;  %v11177_v51 = vld [vmem:[#allocation37_spill] sm:$0xff] }
 0x25e   : > { %5096 = vmatprep.mubr.msk.f32.mxu1 %vm655_vm0, %v1304_v57  ;;  %5192 = vmatprep.mubr.msk.f32.mxu0 %vm655_vm0, %v8137_v59  ;;  %v11182_v57 = vld [vmem:[#allocation46_spill] sm:$0xff] }
 0x25f   : > { %1555 = vmatmul.mubr.f32.gmra.mrb[66].mxu1 %v1302_v2  ;;  %5729 = vmatpush1.bf16.msra.mxu0 %v11175_v33  ;;  %v11180_v2 = vld [vmem:[#allocation42_spill] sm:$0xff] }
 0x260   : > { %v1308_v9 = vpop.f32.mrb[68].mxu0  ;;  %5731 = vmatprep.subr.bf16.mxu0 %v11176_v44 }
 0x261   : > { %v1310_v0 = vpop.f32.mrb[69].mxu0  ;;  %2714 = vmatmul.mubr.f32.gmra.mrb[174].mxu0 %v8148_v30  ;;  %v11179_v30 = vld [vmem:[#allocation41_spill] sm:$0xff] }
 0x262   : > { %5097 = vmatprep.mubr.msk.f32.mxu1 %vm655_vm0, %v1310_v0  ;;  %5193 = vmatprep.mubr.msk.f32.mxu0 %vm655_vm0, %v8152_v28  ;;  %v11186_v0 = vld [vmem:[#allocation54_spill] sm:$0xff] }
 0x263   : > { %1561 = vmatmul.mubr.f32.gmra.mrb[68].mxu1 %v1308_v9  ;;  %5733 = vmatpush1.bf16.msra.mxu0 %v11177_v51  ;;  %v11184_v9 = vld [vmem:[#allocation50_spill] sm:$0xff] }
 0x264   : > { %v1314_v22 = vpop.f32.mrb[70].mxu0  ;;  %5735 = vmatprep.subr.bf16.mxu0 %v11178_v8 }
 0x265   : > { %v1316_v59 = vpop.f32.mrb[71].mxu0  ;;  %2720 = vmatmul.mubr.f32.gmra.mrb[176].mxu0 %v8163_v61  ;;  %v11181_v61 = vld [vmem:[#allocation45_spill] sm:$0xff] }
 0x266   : > { %5098 = vmatprep.mubr.msk.f32.mxu1 %vm655_vm0, %v1316_v59  ;;  %5194 = vmatprep.mubr.msk.f32.mxu0 %vm655_vm0, %v8167_v35  ;;  %v11190_v59 = vld [vmem:[#allocation65_spill] sm:$0xff] }
 0x267   : > { %1567 = vmatmul.mubr.f32.gmra.mrb[70].mxu1 %v1314_v22  ;;  %5737 = vmatpush1.bf16.msra.mxu0 %v11179_v30  ;;  %v11188_v22 = vld [vmem:[#allocation59_spill] sm:$0xff] }
 0x268   : > { %v1320_v50 = vpop.f32.mrb[72].mxu0  ;;  %5739 = vmatprep.subr.bf16.mxu0 %v11180_v2 }
 0x269   : > { %v1322_v28 = vpop.f32.mrb[73].mxu0  ;;  %2726 = vmatmul.mubr.f32.gmra.mrb[178].mxu0 %v8178_v40  ;;  %v11183_v40 = vld [vmem:[#allocation49_spill] sm:$0xff] }
 0x26a   : > { %5099 = vmatprep.mubr.msk.f32.mxu1 %vm655_vm0, %v1322_v28  ;;  %5195 = vmatprep.mubr.msk.f32.mxu0 %vm655_vm0, %v8182_v14  ;;  %v11194_v28 = vld [vmem:[#allocation173_spill] sm:$0xff] }
 0x26b   : > { %1573 = vmatmul.mubr.f32.gmra.mrb[72].mxu1 %v1320_v50  ;;  %5741 = vmatpush1.bf16.msra.mxu0 %v11181_v61  ;;  %v11192_v50 = vld [vmem:[#allocation73_spill] sm:$0xff] }
 0x26c   : > { %v1326_v26 = vpop.f32.mrb[74].mxu0  ;;  %5743 = vmatprep.subr.bf16.mxu0 %v11182_v57 }
 0x26d   : > { %v1328_v35 = vpop.f32.mrb[75].mxu0  ;;  %2732 = vmatmul.mubr.f32.gmra.mrb[180].mxu0 %v8193_v58  ;;  %v11185_v58 = vld [vmem:[#allocation53_spill] sm:$0xff] }
 0x26e   : > { %5100 = vmatprep.mubr.msk.f32.mxu1 %vm655_vm0, %v1328_v35  ;;  %5196 = vmatprep.mubr.msk.f32.mxu0 %vm655_vm0, %v8197_v21  ;;  %v11197_v35 = vld [vmem:[#allocation183_spill] sm:$0xff] }
 0x26f   : > { %1579 = vmatmul.mubr.f32.gmra.mrb[74].mxu1 %v1326_v26  ;;  %5745 = vmatpush1.bf16.msra.mxu0 %v11183_v40  ;;  %v11196_v26 = vld [vmem:[#allocation177_spill] sm:$0xff] }
 0x270   : > { %v1332_v33 = vpop.f32.mrb[76].mxu0  ;;  %5747 = vmatprep.subr.bf16.mxu0 %v11184_v9  ;;  %v8486_v40 = vld [vmem:[#allocation10 + $0x18] sm:$0xff]  ;;  %v8492_v9 = vld [vmem:[#allocation10 + $0x10] sm:$0xff] }
 0x271   : > { %v1334_v14 = vpop.f32.mrb[77].mxu0  ;;  %2738 = vmatmul.mubr.f32.gmra.mrb[182].mxu0 %v8208_v11  ;;  %v11187_v11 = vld [vmem:[#allocation58_spill] sm:$0xff] }
 0x272   : > { %5101 = vmatprep.mubr.msk.f32.mxu1 %vm655_vm0, %v1334_v14  ;;  %5197 = vmatprep.mubr.msk.f32.mxu0 %vm655_vm0, %v8212_v63 }
 0x273   : > { %1585 = vmatmul.mubr.f32.gmra.mrb[76].mxu1 %v1332_v33  ;;  %5749 = vmatpush1.bf16.msra.mxu0 %v11185_v58  ;;  %v11199_v58 = vld [vmem:[#allocation79_spill] sm:$0xff] }
 0x274   : > { %v1338_v44 = vpop.f32.mrb[78].mxu0  ;;  %5751 = vmatprep.subr.bf16.mxu0 %v11186_v0 }
 0x275   : > { %v1340_v21 = vpop.f32.mrb[79].mxu0  ;;  %2744 = vmatmul.mubr.f32.gmra.mrb[184].mxu0 %v8223_v5  ;;  %v11189_v5 = vld [vmem:[#allocation64_spill] sm:$0xff] }
 0x276   : > { %5102 = vmatprep.mubr.msk.f32.mxu1 %vm655_vm0, %v1340_v21  ;;  %5198 = vmatprep.mubr.msk.f32.mxu0 %vm655_vm0, %v8227_v32 }
 0x277   : > { %1591 = vmatmul.mubr.f32.gmra.mrb[78].mxu1 %v1338_v44  ;;  %5753 = vmatpush1.bf16.msra.mxu0 %v11187_v11  ;;  %v8498_v44 = vld [vmem:[#allocation10 + $0x28] sm:$0xff] }
 0x278   : > { %v1344_v51 = vpop.f32.mrb[80].mxu0  ;;  %5755 = vmatprep.subr.bf16.mxu0 %v11188_v22  ;;  %v11200_v11 = vld [vmem:[#allocation82_spill] sm:$0xff] }
 0x279   : > { %v1346_v63 = vpop.f32.mrb[81].mxu0  ;;  %2750 = vmatmul.mubr.f32.gmra.mrb[186].mxu0 %v8234_v1  ;;  %v11191_v1 = vld [vmem:[#allocation70_spill] sm:$0xff] }
 0x27a   : > { %5103 = vmatprep.mubr.msk.f32.mxu1 %vm655_vm0, %v1346_v63  ;;  %5199 = vmatprep.mubr.msk.f32.mxu0 %vm655_vm0, %v8238_v10 }
 0x27b   : > { %1597 = vmatmul.mubr.f32.gmra.mrb[80].mxu1 %v1344_v51  ;;  %5757 = vmatpush1.bf16.msra.mxu0 %v11189_v5  ;;  %v8506_v51 = vld [vmem:[#allocation10 + $0x20] sm:$0xff] }
 0x27c   : > { %v1350_v8 = vpop.f32.mrb[82].mxu0  ;;  %5759 = vmatprep.subr.bf16.mxu0 %v11190_v59  ;;  %v11201_v5 = vld [vmem:[#allocation85_spill] sm:$0xff] }
 0x27d   : > { %v1352_v32 = vpop.f32.mrb[83].mxu0  ;;  %2756 = vmatmul.mubr.f32.gmra.mrb[188].mxu0 %v8245_v48 }
 0x27e   : > { %5104 = vmatprep.mubr.msk.f32.mxu1 %vm655_vm0, %v1352_v32  ;;  %5200 = vmatprep.mubr.msk.f32.mxu0 %vm655_vm0, %v8249_v17  ;;  %v11202_v32 = vld [vmem:[#allocation90_spill] sm:$0xff] }
 0x27f   : > { %1603 = vmatmul.mubr.f32.gmra.mrb[82].mxu1 %v1350_v8  ;;  %5761 = vmatpush1.bf16.msra.mxu0 %v11191_v1  ;;  %v8520_v1 = vld [vmem:[#allocation10 + $0x30] sm:$0xff] }
 0x280   : > { %v1719_v30 = vpop.f32.mrb[84].mxu0  ;;  %5796 = vmatprep.subr.bf16.mxu0 %v11192_v50 }
 0x281   : > { %v1721_v10 = vpop.f32.mrb[85].mxu0  ;;  %2762 = vmatmul.mubr.f32.gmra.mrb[190].mxu0 %v8257_v47 }
 0x282   : > { %5126 = vmatprep.mubr.msk.f32.mxu1 %vm655_vm0, %v1721_v10  ;;  %5201 = vmatprep.mubr.msk.f32.mxu0 %vm655_vm0, %v8261_v37  ;;  %v11203_v10 = vld [vmem:[#allocation93_spill] sm:$0xff] }
 0x283   : > { %1972 = vmatmul.mubr.f32.vlgmr.msra.gmra.mrb[84].mxu1 %v1719_v30 }
 0x284   : > { %v1725_v48 = vpop.f32.mrb[86].mxu0  ;;  %5589 = vmatpush1.bf16.msra.mxu1 %v11123_v34 }
 0x285   : > { %v1727_v2 = vpop.f32.mrb[87].mxu0  ;;  %2768 = vmatmul.mubr.f32.gmra.mrb[192].mxu0 %v8266_v53  ;;  %5591 = vmatprep.subr.bf16.mxu1 %v11124_v42 }
 0x286   : > { %5127 = vmatprep.mubr.msk.f32.mxu1 %vm655_vm0, %v1727_v2  ;;  %5202 = vmatprep.mubr.msk.f32.mxu0 %vm655_vm0, %v8271_v25 }
 0x287   : > { %1978 = vmatmul.mubr.f32.gmra.mrb[86].mxu1 %v1725_v48  ;;  %v8527_v48 = vld [vmem:[#allocation10 + $0x48] sm:$0xff] }
 0x288   : > { %v1731_v17 = vpop.f32.mrb[88].mxu0  ;;  %5593 = vmatpush1.bf16.msra.mxu1 %v11125_v55 }
 0x289   : > { %v1733_v47 = vpop.f32.mrb[89].mxu0  ;;  %2774 = vmatmul.mubr.f32.gmra.mrb[194].mxu0 %v8276_v49  ;;  %5595 = vmatprep.subr.bf16.mxu1 %v11126_v24 }
 0x28a   : > { %5128 = vmatprep.mubr.msk.f32.mxu1 %vm655_vm0, %v1733_v47  ;;  %5203 = vmatprep.mubr.msk.f32.mxu0 %vm655_vm0, %v8281_v54  ;;  %v11204_v47 = vld [vmem:[#allocation96_spill] sm:$0xff] }
 0x28b   : > { %1984 = vmatmul.mubr.f32.gmra.mrb[88].mxu1 %v1731_v17 }
 0x28c   : > { %v1737_v37 = vpop.f32.mrb[90].mxu0  ;;  %5597 = vmatpush1.bf16.msra.mxu1 %v11127_v27 }
 0x28d   : > { %v1739_v53 = vpop.f32.mrb[91].mxu0  ;;  %2780 = vmatmul.mubr.f32.gmra.mrb[196].mxu0 %v8286_v15  ;;  %5599 = vmatprep.subr.bf16.mxu1 %v11128_v18 }
 0x28e   : > { %5129 = vmatprep.mubr.msk.f32.mxu1 %vm655_vm0, %v1739_v53  ;;  %5204 = vmatprep.mubr.msk.f32.mxu0 %vm655_vm0, %v8291_v38 }
 0x28f   : > { %1990 = vmatmul.mubr.f32.gmra.mrb[90].mxu1 %v1737_v37  ;;  %v8534_v37 = vld [vmem:[#allocation10 + $0x40] sm:$0xff] }
 0x290   : > { %v1743_v25 = vpop.f32.mrb[92].mxu0  ;;  %5601 = vmatpush1.bf16.msra.mxu1 %v11129_v36 }
 0x291   : > { %v1745_v49 = vpop.f32.mrb[93].mxu0  ;;  %2786 = vmatmul.mubr.f32.gmra.mrb[198].mxu0 %v8296_v7  ;;  %5603 = vmatprep.subr.bf16.mxu1 %v11130_v19 }
 0x292   : > { %5130 = vmatprep.mubr.msk.f32.mxu1 %vm655_vm0, %v1745_v49  ;;  %5205 = vmatprep.mubr.msk.f32.mxu0 %vm655_vm0, %v8301_v41  ;;  %v11193_v41 = vld [vmem:[#allocation171_spill] sm:$0xff] }
 0x293   : > { %1996 = vmatmul.mubr.f32.gmra.mrb[92].mxu1 %v1743_v25  ;;  %v11205_v49 = vld [vmem:[#allocation99_spill] sm:$0xff] }
 0x294   : > { %v1749_v54 = vpop.f32.mrb[94].mxu0  ;;  %5605 = vmatpush1.bf16.msra.mxu1 %v11131_v12 }
 0x295   : > { %v1751_v15 = vpop.f32.mrb[95].mxu0  ;;  %2792 = vmatmul.mubr.f32.gmra.mrb[200].mxu0 %v8306_v52  ;;  %5607 = vmatprep.subr.bf16.mxu1 %v11132_v29 }
 0x296   : > { %5131 = vmatprep.mubr.msk.f32.mxu1 %vm655_vm0, %v1751_v15  ;;  %5206 = vmatprep.mubr.msk.f32.mxu0 %vm655_vm0, %v8311_v23  ;;  %v11195_v23 = vld [vmem:[#allocation175_spill] sm:$0xff] }
 0x297   : > { %2002 = vmatmul.mubr.f32.gmra.mrb[94].mxu1 %v1749_v54  ;;  %v8541_v54 = vld [vmem:[#allocation10 + $0x58] sm:$0xff] }
 0x298   : > { %v1755_v38 = vpop.f32.mrb[96].mxu0  ;;  %5609 = vmatpush1.bf16.msra.mxu1 %v11133_v56 }
 0x299   : > { %v1757_v7 = vpop.f32.mrb[97].mxu0  ;;  %2798 = vmatmul.mubr.f32.gmra.mrb[202].mxu0 %v8316_v3  ;;  %5611 = vmatprep.subr.bf16.mxu1 %v11193_v41 }
 0x29a   : > { %5132 = vmatprep.mubr.msk.f32.mxu1 %vm655_vm0, %v1757_v7  ;;  %5207 = vmatprep.mubr.msk.f32.mxu0 %vm655_vm0, %v8321_v45  ;;  %v8475_v45 = vld [vmem:[#allocation10 + $0x8] sm:$0xff]  ;;  %v11206_v7 = vld [vmem:[#allocation104_spill] sm:$0xff] }
 0x29b   : > { %2008 = vmatmul.mubr.f32.gmra.mrb[96].mxu1 %v1755_v38 }
 0x29c   : > { %v1761_v52 = vpop.f32.mrb[98].mxu0  ;;  %5613 = vmatpush1.bf16.msra.mxu1 %v11194_v28 }
 0x29d   : > { %v1763_v61 = vpop.f32.mrb[99].mxu0  ;;  %2804 = vmatmul.mubr.f32.gmra.mrb[204].mxu0 %v8326_v31  ;;  %5615 = vmatprep.subr.bf16.mxu1 %v11195_v23 }
 0x29e   : > { %5133 = vmatprep.mubr.msk.f32.mxu1 %vm655_vm0, %v1763_v61  ;;  %5208 = vmatprep.mubr.msk.f32.mxu0 %vm655_vm0, %v8331_v46 }
 0x29f   : > { %2014 = vmatmul.mubr.f32.gmra.mrb[98].mxu1 %v1761_v52  ;;  %v8548_v52 = vld [vmem:[#allocation10 + $0x50] sm:$0xff] }
 0x2a0   : > { %v1767_v3 = vpop.f32.mrb[100].mxu0  ;;  %5617 = vmatpush1.bf16.msra.mxu1 %v11196_v26 }
 0x2a1   : > { %v1769_v57 = vpop.f32.mrb[101].mxu0  ;;  %2810 = vmatmul.mubr.f32.gmra.mrb[206].mxu0 %v8336_v13  ;;  %5619 = vmatprep.subr.bf16.mxu1 %v11141_v4  ;;  %v8483_v13 = vld [vmem:[#allocation10] sm:$0xff] }
 0x2a2   : > { %5134 = vmatprep.mubr.msk.f32.mxu1 %vm655_vm0, %v1769_v57  ;;  %5209 = vmatprep.mubr.msk.f32.mxu0 %vm655_vm0, %v8341_v62  ;;  %v11207_v57 = vld [vmem:[#allocation107_spill] sm:$0xff] }
 0x2a3   : > { %2020 = vmatmul.mubr.f32.gmra.mrb[100].mxu1 %v1767_v3 }
 0x2a4   : > { %v1773_v31 = vpop.f32.mrb[102].mxu0  ;;  %5621 = vmatpush1.bf16.msra.mxu1 %v11143_v43 }
 0x2a5   : > { %v1775_v46 = vpop.f32.mrb[103].mxu0  ;;  %2816 = vmatmul.mubr.f32.gmra.mrb[208].mxu0 %v8346_v60  ;;  %5623 = vmatprep.subr.bf16.mxu1 %v11197_v35  ;;  %v11198_v60 = vld [vmem:[#allocation76_spill] sm:$0xff] }
 0x2a6   : > { %5135 = vmatprep.mubr.msk.f32.mxu1 %vm655_vm0, %v1775_v46  ;;  %5231 = vmatprep.mubr.msk.f32.mxu0 %vm655_vm0, %v8475_v45 }
 0x2a7   : > { %2026 = vmatmul.mubr.f32.gmra.mrb[102].mxu1 %v1773_v31  ;;  %v8555_v31 = vld [vmem:[#allocation10 + $0x68] sm:$0xff] }
 0x2a8   : > { %v1779_v62 = vpop.f32.mrb[104].mxu0  ;;  %5625 = vmatpush1.bf16.msra.mxu1 %v11146_v20 }
 0x2a9   : > { %v1781_v33 = vpop.f32.mrb[105].mxu0  ;;  %5627 = vmatprep.subr.bf16.mxu1 %v11147_v6  ;;  %4248 = vmatmul.mubr.f32.vlgmr.msra.gmra.mrb[210].mxu0 %v8483_v13 }
 0x2aa   : > { %5136 = vmatprep.mubr.msk.f32.mxu1 %vm655_vm0, %v1781_v33  ;;  %5798 = vmatpush1.bf16.msra.mxu0 %v11198_v60  ;;  %v11208_v33 = vld [vmem:[#allocation110_spill] sm:$0xff] }
 0x2ab   : > { %2032 = vmatmul.mubr.f32.gmra.mrb[104].mxu1 %v1779_v62  ;;  %5232 = vmatprep.mubr.msk.f32.mxu0 %vm655_vm0, %v8486_v40  ;;  %v8562_v60 = vld [vmem:[#allocation10 + $0x60] sm:$0xff] }
 0x2ac   : > { %v1785_v14 = vpop.f32.mrb[106].mxu0  ;;  %5629 = vmatpush1.bf16.msra.mxu1 %v11151_v39  ;;  %5800 = vmatprep.subr.bf16.mxu0 %v11199_v58 }
 0x2ad   : > { %v1787_v0 = vpop.f32.mrb[107].mxu0  ;;  %5675 = vmatprep.subr.bf16.mxu1 %v11152_v16  ;;  %4254 = vmatmul.mubr.f32.gmra.mrb[212].mxu0 %v8492_v9  ;;  %v8513_v16 = vld [vmem:[#allocation10 + $0x38] sm:$0xff] }
 0x2ae   : > { %v8502_v21 = vpop.f32.mrb[0].mxu1  ;;  %5137 = vmatprep.mubr.msk.f32.mxu1 %vm655_vm0, %v1787_v0  ;;  %5802 = vmatpush1.bf16.msra.mxu0 %v11200_v11  ;;  %v11209_v0 = vld [vmem:[#allocation113_spill] sm:$0xff] }
 0x2af   : > { %v8508_v22 = vpop.f32.mrb[1].mxu1  ;;  %2038 = vmatmul.mubr.f32.gmra.mrb[106].mxu1 %v1785_v14  ;;  %5233 = vmatprep.mubr.msk.f32.mxu0 %vm655_vm0, %v8498_v44  ;;  %v8569_v11 = vld [vmem:[#allocation10 + $0x78] sm:$0xff] }
 0x2b0   : > { %v1791_v63 = vpop.f32.mrb[108].mxu0  ;;  %5804 = vmatprep.subr.bf16.mxu0 %v11201_v5 }
 0x2b1   : > { %v1793_v8 = vpop.f32.mrb[109].mxu0  ;;  %4260 = vmatmul.mubr.f32.gmra.mrb[214].mxu0 %v8506_v51 }
 0x2b2   : > { %v8516_v59 = vpop.f32.mrb[2].mxu1  ;;  %5138 = vmatprep.mubr.msk.f32.mxu1 %vm655_vm0, %v1793_v8  ;;  %5806 = vmatpush1.bf16.msra.mxu0 %v11202_v32  ;;  %v11210_v8 = vld [vmem:[#allocation118_spill] sm:$0xff]  ;;  %v8576_v32 = vld [vmem:[#allocation10 + $0x70] sm:$0xff] }
 0x2b3   : > { %v8522_v30 = vpop.f32.mrb[3].mxu1  ;;  %2044 = vmatmul.mubr.f32.gmra.mrb[108].mxu1 %v1791_v63  ;;  %5234 = vmatprep.mubr.msk.f32.mxu0 %vm655_vm0, %v8513_v16 }
 0x2b4   : > { %v1797_v50 = vpop.f32.mrb[110].mxu0  ;;  %5808 = vmatprep.subr.bf16.mxu0 %v11203_v10 }
 0x2b5   : > { %v1799_v2 = vpop.f32.mrb[111].mxu0  ;;  %4266 = vmatmul.mubr.f32.gmra.mrb[216].mxu0 %v8520_v1 }
 0x2b6   : > { %v8530_v17 = vpop.f32.mrb[4].mxu1  ;;  %5139 = vmatprep.mubr.msk.f32.mxu1 %vm655_vm0, %v1799_v2  ;;  %5810 = vmatpush1.bf16.msra.mxu0 %v11204_v47  ;;  %v11211_v2 = vld [vmem:[#allocation121_spill] sm:$0xff]  ;;  %v8583_v47 = vld [vmem:[#allocation10 + $0x88] sm:$0xff] }
 0x2b7   : > { %v8536_v53 = vpop.f32.mrb[5].mxu1  ;;  %2050 = vmatmul.mubr.f32.gmra.mrb[110].mxu1 %v1797_v50  ;;  %5235 = vmatprep.mubr.msk.f32.mxu0 %vm655_vm0, %v8527_v48 }
 0x2b8   : > { %v1803_v25 = vpop.f32.mrb[112].mxu0  ;;  %5812 = vmatprep.subr.bf16.mxu0 %v11205_v49 }
 0x2b9   : > { %v1805_v15 = vpop.f32.mrb[113].mxu0  ;;  %4272 = vmatmul.mubr.f32.gmra.mrb[218].mxu0 %v8534_v37 }
 0x2ba   : > { %v8544_v38 = vpop.f32.mrb[6].mxu1  ;;  %5140 = vmatprep.mubr.msk.f32.mxu1 %vm655_vm0, %v1805_v15  ;;  %5814 = vmatpush1.bf16.msra.mxu0 %v11206_v7  ;;  %v11212_v15 = vld [vmem:[#allocation125_spill] sm:$0xff] }
 0x2bb   : > { %v8550_v61 = vpop.f32.mrb[7].mxu1  ;;  %2056 = vmatmul.mubr.f32.gmra.mrb[112].mxu1 %v1803_v25  ;;  %5236 = vmatprep.mubr.msk.f32.mxu0 %vm655_vm0, %v8541_v54  ;;  %v8590_v7 = vld [vmem:[#allocation10 + $0x80] sm:$0xff] }
 0x2bc   : > { %v1809_v3 = vpop.f32.mrb[114].mxu0  ;;  %5816 = vmatprep.subr.bf16.mxu0 %v11207_v57 }
 0x2bd   : > { %v1811_v46 = vpop.f32.mrb[115].mxu0  ;;  %4278 = vmatmul.mubr.f32.gmra.mrb[220].mxu0 %v8548_v52 }
 0x2be   : > { %v8558_v62 = vpop.f32.mrb[8].mxu1  ;;  %5141 = vmatprep.mubr.msk.f32.mxu1 %vm655_vm0, %v1811_v46  ;;  %5818 = vmatpush1.bf16.msra.mxu0 %v11208_v33  ;;  %v11214_v46 = vld [vmem:[#allocation129_spill] sm:$0xff] }
 0x2bf   : > { %v8564_v14 = vpop.f32.mrb[9].mxu1  ;;  %2062 = vmatmul.mubr.f32.gmra.mrb[114].mxu1 %v1809_v3  ;;  %5237 = vmatprep.mubr.msk.f32.mxu0 %vm655_vm0, %v8555_v31  ;;  %v8597_v33 = vld [vmem:[#allocation10 + $0x98] sm:$0xff] }
 0x2c0   : > { %v1815_v58 = vpop.f32.mrb[116].mxu0  ;;  %5820 = vmatprep.subr.bf16.mxu0 %v11209_v0 }
 0x2c1   : > { %v1817_v63 = vpop.f32.mrb[117].mxu0  ;;  %4284 = vmatmul.mubr.f32.gmra.mrb[222].mxu0 %v8562_v60 }
 0x2c2   : > { %v8572_v5 = vpop.f32.mrb[10].mxu1  ;;  %5142 = vmatprep.mubr.msk.f32.mxu1 %vm655_vm0, %v1817_v63  ;;  %5822 = vmatpush1.bf16.msra.mxu0 %v11210_v8  ;;  %v11216_v63 = vld [vmem:[#allocation134_spill] sm:$0xff]  ;;  %v8604_v8 = vld [vmem:[#allocation10 + $0x90] sm:$0xff] }
 0x2c3   : > { %v8578_v50 = vpop.f32.mrb[11].mxu1  ;;  %2068 = vmatmul.mubr.f32.gmra.mrb[116].mxu1 %v1815_v58  ;;  %5238 = vmatprep.mubr.msk.f32.mxu0 %vm655_vm0, %v8569_v11 }
 0x2c4   : > { %v1821_v10 = vpop.f32.mrb[118].mxu0  ;;  %5824 = vmatprep.subr.bf16.mxu0 %v11211_v2 }
 0x2c5   : > { %v1823_v25 = vpop.f32.mrb[119].mxu0  ;;  %4290 = vmatmul.mubr.f32.gmra.mrb[224].mxu0 %v8576_v32 }
 0x2c6   : > { %v8586_v49 = vpop.f32.mrb[12].mxu1  ;;  %5143 = vmatprep.mubr.msk.f32.mxu1 %vm655_vm0, %v1823_v25  ;;  %5826 = vmatpush1.bf16.msra.mxu0 %v11212_v15  ;;  %v11218_v25 = vld [vmem:[#allocation137_spill] sm:$0xff]  ;;  %v8611_v15 = vld [vmem:[#allocation10 + $0xa8] sm:$0xff] }
 0x2c7   : > { %v8592_v3 = vpop.f32.mrb[13].mxu1  ;;  %2074 = vmatmul.mubr.f32.gmra.mrb[118].mxu1 %v1821_v10  ;;  %5239 = vmatprep.mubr.msk.f32.mxu0 %vm655_vm0, %v8583_v47 }
 0x2c8   : > { %11213 = vst [vmem:[#allocation22_spill] sm:$0xff] %v8592_v3  ;;  %v1827_v57 = vpop.f32.mrb[120].mxu0  ;;  %5828 = vmatprep.subr.bf16.mxu0 %v11214_v46 }
 0x2c9   : > { %v1829_v58 = vpop.f32.mrb[121].mxu0  ;;  %4296 = vmatmul.mubr.f32.gmra.mrb[226].mxu0 %v8590_v7 }
 0x2ca   : > { %v8600_v0 = vpop.f32.mrb[14].mxu1  ;;  %5144 = vmatprep.mubr.msk.f32.mxu1 %vm655_vm0, %v1829_v58  ;;  %5830 = vmatpush1.bf16.msra.mxu0 %v11216_v63  ;;  %v11219_v58 = vld [vmem:[#allocation140_spill] sm:$0xff]  ;;  %v8618_v63 = vld [vmem:[#allocation10 + $0xa0] sm:$0xff] }
 0x2cb   : > { %11215 = vst [vmem:[#allocation71_spill] sm:$0xff] %v8600_v0  ;;  %v8606_v10 = vpop.f32.mrb[15].mxu1  ;;  %2080 = vmatmul.mubr.f32.gmra.mrb[120].mxu1 %v1827_v57  ;;  %5240 = vmatprep.mubr.msk.f32.mxu0 %vm655_vm0, %v8597_v33 }
 0x2cc   : > { %11217 = vst [vmem:[#allocation24_spill] sm:$0xff] %v8606_v10  ;;  %v1833_v2 = vpop.f32.mrb[122].mxu0  ;;  %5832 = vmatprep.subr.bf16.mxu0 %v11218_v25  ;;  %v11221_v10 = vld [vmem:[#allocation144_spill] sm:$0xff] }
 0x2cd   : > { %v1835_v46 = vpop.f32.mrb[123].mxu0  ;;  %4302 = vmatmul.mubr.f32.gmra.mrb[228].mxu0 %v8604_v8 }
 0x2ce   : > { %v8614_v39 = vpop.f32.mrb[16].mxu1  ;;  %5145 = vmatprep.mubr.msk.f32.mxu1 %vm655_vm0, %v1835_v46  ;;  %5834 = vmatpush1.bf16.msra.mxu0 %v11219_v58  ;;  %v11222_v46 = vld [vmem:[#allocation146_spill] sm:$0xff] }
 0x2cf   : > { %v8620_v57 = vpop.f32.mrb[17].mxu1  ;;  %2086 = vmatmul.mubr.f32.gmra.mrb[122].mxu1 %v1833_v2  ;;  %5241 = vmatprep.mubr.msk.f32.mxu0 %vm655_vm0, %v8611_v15 }
 0x2d0   : > { %11220 = vst [vmem:[#allocation72_spill] sm:$0xff] %v8620_v57  ;;  %v1839_v25 = vpop.f32.mrb[124].mxu0  ;;  %5836 = vmatprep.subr.bf16.mxu0 %v11221_v10 }
 0x2d1   : > { %v1841_v0 = vpop.f32.mrb[125].mxu0  ;;  %4308 = vmatmul.mubr.f32.gmra.mrb[230].mxu0 %v8618_v63 }
 0x2d2   : > { %v8626_v3 = vpop.f32.mrb[18].mxu1  ;;  %5146 = vmatprep.mubr.msk.f32.mxu1 %vm655_vm0, %v1841_v0  ;;  %5838 = vmatpush1.bf16.msra.mxu0 %v11222_v46 }
 0x2d3   : > { %v8630_v58 = vpop.f32.mrb[19].mxu1  ;;  %2092 = vmatmul.mubr.f32.gmra.mrb[124].mxu1 %v1839_v25  ;;  %5253 = vmatprep.mubr.msk.f32.mxu0 %vm655_vm0, %v8475_v45 }
 0x2d4   : > { %11223 = vst [vmem:[#allocation143_spill] sm:$0xff] %v8630_v58  ;;  %v2208_v2 = vpop.f32.mrb[126].mxu0 }
 0x2d5   : > { %v2210_v57 = vpop.f32.mrb[127].mxu0  ;;  %4544 = vmatmul.mubr.f32.vlgmr.msra.gmra.mrb[232].mxu0 %v8483_v13 }
 0x2d6   : > { %v8635_v10 = vpop.f32.mrb[20].mxu1  ;;  %5168 = vmatprep.mubr.msk.f32.mxu1 %vm655_vm0, %v2210_v57  ;;  %5254 = vmatprep.mubr.msk.f32.mxu0 %vm655_vm0, %v8486_v40 }
 0x2d7   : > { %v8640_v0 = vpop.f32.mrb[21].mxu1  ;;  %2461 = vmatmul.mubr.f32.vlgmr.msra.gmra.mrb[126].mxu1 %v2208_v2 }
 0x2d8   : > { %v2214_v46 = vpop.f32.mrb[128].mxu0  ;;  %5677 = vmatpush1.bf16.msra.mxu1 %v11123_v34 }
 0x2d9   : > { %v2216_v25 = vpop.f32.mrb[129].mxu0  ;;  %5679 = vmatprep.subr.bf16.mxu1 %v11124_v42  ;;  %4550 = vmatmul.mubr.f32.gmra.mrb[234].mxu0 %v8492_v9 }
 0x2da   : > { %v8645_v45 = vpop.f32.mrb[22].mxu1  ;;  %5169 = vmatprep.mubr.msk.f32.mxu1 %vm655_vm0, %v2216_v25  ;;  %5255 = vmatprep.mubr.msk.f32.mxu0 %vm655_vm0, %v8498_v44  ;;  %v8765_v25 = vmul.f32 %v8550_v61, %v8550_v61 }
 0x2db   : > { %v8650_v13 = vpop.f32.mrb[23].mxu1  ;;  %2467 = vmatmul.mubr.f32.gmra.mrb[128].mxu1 %v2214_v46  ;;  %v8761_v46 = vmul.f32 %v8544_v38, %v8544_v38 }
 0x2dc   : > { %11224 = vst [vmem:[#allocation117_spill] sm:$0xff] %v8650_v13  ;;  %v2220_v40 = vpop.f32.mrb[130].mxu0  ;;  %5681 = vmatpush1.bf16.msra.mxu1 %v11125_v55  ;;  %11238 = vst [vmem:[#allocation31_spill] sm:$0xff] %v8765_v25 }
 0x2dd   : > { %v2222_v57 = vpop.f32.mrb[131].mxu0  ;;  %5683 = vmatprep.subr.bf16.mxu1 %v11126_v24  ;;  %4556 = vmatmul.mubr.f32.gmra.mrb[236].mxu0 %v8506_v51  ;;  %11237 = vst [vmem:[#allocation155_spill] sm:$0xff] %v8761_v46 }
 0x2de   : > { %v8655_v34 = vpop.f32.mrb[24].mxu1  ;;  %5170 = vmatprep.mubr.msk.f32.mxu1 %vm655_vm0, %v2222_v57  ;;  %5256 = vmatprep.mubr.msk.f32.mxu0 %vm655_vm0, %v8513_v16 }
 0x2df   : > { %v8660_v42 = vpop.f32.mrb[25].mxu1  ;;  %2473 = vmatmul.mubr.f32.gmra.mrb[130].mxu1 %v2220_v40  ;;  %v8769_v40 = vmul.f32 %v8558_v62, %v8558_v62 }
 0x2e0   : > { %11225 = vst [vmem:[#allocation116_spill] sm:$0xff] %v8660_v42  ;;  %v2226_v9 = vpop.f32.mrb[132].mxu0  ;;  %5685 = vmatpush1.bf16.msra.mxu1 %v11127_v27 }
 0x2e1   : > { %v2228_v44 = vpop.f32.mrb[133].mxu0  ;;  %5687 = vmatprep.subr.bf16.mxu1 %v11128_v18  ;;  %4562 = vmatmul.mubr.f32.gmra.mrb[238].mxu0 %v8520_v1 }
 0x2e2   : > { %v8665_v55 = vpop.f32.mrb[26].mxu1  ;;  %5171 = vmatprep.mubr.msk.f32.mxu1 %vm655_vm0, %v2228_v44  ;;  %5257 = vmatprep.mubr.msk.f32.mxu0 %vm655_vm0, %v8527_v48  ;;  %v8788_v44 = vmul.f32 %v8586_v49, %v8586_v49 }
 0x2e3   : > { %v8670_v24 = vpop.f32.mrb[27].mxu1  ;;  %2479 = vmatmul.mubr.f32.gmra.mrb[132].mxu1 %v2226_v9  ;;  %v8784_v9 = vmul.f32 %v8578_v50, %v8578_v50 }
 0x2e4   : > { %11226 = vst [vmem:[#allocation145_spill] sm:$0xff] %v8670_v24  ;;  %v2232_v51 = vpop.f32.mrb[134].mxu0  ;;  %5689 = vmatpush1.bf16.msra.mxu1 %v11129_v36 }
 0x2e5   : > { %v2234_v16 = vpop.f32.mrb[135].mxu0  ;;  %5691 = vmatprep.subr.bf16.mxu1 %v11130_v19  ;;  %4568 = vmatmul.mubr.f32.gmra.mrb[240].mxu0 %v8534_v37 }
 0x2e6   : > { %v8675_v27 = vpop.f32.mrb[28].mxu1  ;;  %5172 = vmatprep.mubr.msk.f32.mxu1 %vm655_vm0, %v2234_v16  ;;  %5258 = vmatprep.mubr.msk.f32.mxu0 %vm655_vm0, %v8541_v54  ;;  %v11240_v16 = vld [vmem:[#allocation22_spill] sm:$0xff] }
 0x2e7   : > { %v8680_v18 = vpop.f32.mrb[29].mxu1  ;;  %2485 = vmatmul.mubr.f32.gmra.mrb[134].mxu1 %v2232_v51 }
 0x2e8   : > { %v2238_v1 = vpop.f32.mrb[136].mxu0  ;;  %5693 = vmatpush1.bf16.msra.mxu1 %v11131_v12 }
 0x2e9   : > { %v2240_v48 = vpop.f32.mrb[137].mxu0  ;;  %5695 = vmatprep.subr.bf16.mxu1 %v11132_v29  ;;  %4574 = vmatmul.mubr.f32.gmra.mrb[242].mxu0 %v8548_v52 }
 0x2ea   : > { %v8685_v36 = vpop.f32.mrb[30].mxu1  ;;  %5173 = vmatprep.mubr.msk.f32.mxu1 %vm655_vm0, %v2240_v48  ;;  %5259 = vmatprep.mubr.msk.f32.mxu0 %vm655_vm0, %v8555_v31  ;;  %v11241_v48 = vld [vmem:[#allocation71_spill] sm:$0xff] }
 0x2eb   : > { %v8690_v19 = vpop.f32.mrb[31].mxu1  ;;  %2491 = vmatmul.mubr.f32.gmra.mrb[136].mxu1 %v2238_v1  ;;  %v8794_v1 = vmul.f32 %v11240_v16, %v11240_v16 }
 0x2ec   : > { %v2244_v37 = vpop.f32.mrb[138].mxu0  ;;  %5697 = vmatpush1.bf16.msra.mxu1 %v11133_v56 }
 0x2ed   : > { %v2246_v54 = vpop.f32.mrb[139].mxu0  ;;  %5699 = vmatprep.subr.bf16.mxu1 %v11193_v41  ;;  %4580 = vmatmul.mubr.f32.gmra.mrb[244].mxu0 %v8562_v60 }
 0x2ee   : > { %v8695_v12 = vpop.f32.mrb[32].mxu1  ;;  %5174 = vmatprep.mubr.msk.f32.mxu1 %vm655_vm0, %v2246_v54  ;;  %5260 = vmatprep.mubr.msk.f32.mxu0 %vm655_vm0, %v8569_v11  ;;  %v11242_v54 = vld [vmem:[#allocation24_spill] sm:$0xff] }
 0x2ef   : > { %11227 = vst [vmem:[#allocation147_spill] sm:$0xff] %v8695_v12  ;;  %v8700_v29 = vpop.f32.mrb[33].mxu1  ;;  %2497 = vmatmul.mubr.f32.gmra.mrb[138].mxu1 %v2244_v37  ;;  %v8798_v37 = vmul.f32 %v11241_v48, %v11241_v48 }
 0x2f0   : > { %v2250_v52 = vpop.f32.mrb[140].mxu0  ;;  %5701 = vmatpush1.bf16.msra.mxu1 %v11194_v28 }
 0x2f1   : > { %v2252_v31 = vpop.f32.mrb[141].mxu0  ;;  %5703 = vmatprep.subr.bf16.mxu1 %v11195_v23  ;;  %4586 = vmatmul.mubr.f32.gmra.mrb[246].mxu0 %v8576_v32 }
 0x2f2   : > { %v8705_v56 = vpop.f32.mrb[34].mxu1  ;;  %5175 = vmatprep.mubr.msk.f32.mxu1 %vm655_vm0, %v2252_v31  ;;  %5261 = vmatprep.mubr.msk.f32.mxu0 %vm655_vm0, %v8583_v47  ;;  %v8806_v31 = vmul.f32 %v8614_v39, %v8614_v39 }
 0x2f3   : > { %v8710_v41 = vpop.f32.mrb[35].mxu1  ;;  %2503 = vmatmul.mubr.f32.gmra.mrb[140].mxu1 %v2250_v52  ;;  %v8802_v52 = vmul.f32 %v11242_v54, %v11242_v54 }
 0x2f4   : > { %v2256_v60 = vpop.f32.mrb[142].mxu0  ;;  %5705 = vmatpush1.bf16.msra.mxu1 %v11196_v26  ;;  %11244 = vst [vmem:[#allocation84_spill] sm:$0xff] %v8806_v31 }
 0x2f5   : > { %v2258_v11 = vpop.f32.mrb[143].mxu0  ;;  %5707 = vmatprep.subr.bf16.mxu1 %v11141_v4  ;;  %4592 = vmatmul.mubr.f32.gmra.mrb[248].mxu0 %v8590_v7  ;;  %v8734_v7 = vmul.f32 %v8502_v21, %v8502_v21  ;;  %11243 = vst [vmem:[#allocation32_spill] sm:$0xff] %v8802_v52  ;;  %v8823_v52 = vmul.f32 %v8635_v10, %v8635_v10 }
 0x2f6   : > { %v8715_v28 = vpop.f32.mrb[36].mxu1  ;;  %5176 = vmatprep.mubr.msk.f32.mxu1 %vm655_vm0, %v2258_v11  ;;  %5262 = vmatprep.mubr.msk.f32.mxu0 %vm655_vm0, %v8597_v33  ;;  %v8743_v33 = vmul.f32 %v8516_v59, %v8516_v59  ;;  %v11245_v11 = vld [vmem:[#allocation187_spill] sm:$0xff] }
 0x2f7   : > { %11228 = vst [vmem:[#allocation133_spill] sm:$0xff] %v8715_v28  ;;  %v8720_v23 = vpop.f32.mrb[37].mxu1  ;;  %2509 = vmatmul.mubr.f32.gmra.mrb[142].mxu1 %v2256_v60  ;;  %11231 = vst [vmem:[#allocation77_spill] sm:$0xff] %v8734_v7 }
 0x2f8   : > { %v2262_v32 = vpop.f32.mrb[144].mxu0  ;;  %5709 = vmatpush1.bf16.msra.mxu1 %v11143_v43  ;;  %v8738_v43 = vmul.f32 %v8508_v22, %v8508_v22  ;;  %11233 = vst [vmem:[#allocation78_spill] sm:$0xff] %v8743_v33  ;;  %11250 = vst [vmem:[#allocation35_spill] sm:$0xff] %v8823_v52  ;;  %v8844_v52 = vmul.f32 %v8660_v42, %v8660_v42 }
 0x2f9   : > { %v2264_v47 = vpop.f32.mrb[145].mxu0  ;;  %5711 = vmatprep.subr.bf16.mxu1 %v11197_v35  ;;  %4598 = vmatmul.mubr.f32.gmra.mrb[250].mxu0 %v8604_v8  ;;  %v8747_v8 = vmul.f32 %v8522_v30, %v8522_v30 }
 0x2fa   : > { %v8725_v4 = vpop.f32.mrb[38].mxu1  ;;  %5177 = vmatprep.mubr.msk.f32.mxu1 %vm655_vm0, %v2264_v47  ;;  %5263 = vmatprep.mubr.msk.f32.mxu0 %vm655_vm0, %v8611_v15  ;;  %11232 = vst [vmem:[#allocation28_spill] sm:$0xff] %v8738_v43  ;;  %v8751_v15 = vmul.f32 %v8530_v17, %v8530_v17  ;;  %11255 = vst [vmem:[#allocation166_spill] sm:$0xff] %v8844_v52 }
 0x2fb   : > { %11229 = vst [vmem:[#allocation132_spill] sm:$0xff] %v8725_v4  ;;  %v8730_v26 = vpop.f32.mrb[39].mxu1  ;;  %2515 = vmatmul.mubr.f32.gmra.mrb[144].mxu1 %v2262_v32  ;;  %11234 = vst [vmem:[#allocation150_spill] sm:$0xff] %v8747_v8  ;;  %v11246_v32 = vld [vmem:[#allocation72_spill] sm:$0xff] }
 0x2fc   : > { %11230 = vst [vmem:[#allocation26_spill] sm:$0xff] %v8730_v26  ;;  %v2268_v35 = vpop.f32.mrb[146].mxu0  ;;  %5713 = vmatpush1.bf16.msra.mxu1 %v11146_v20  ;;  %11235 = vst [vmem:[#allocation152_spill] sm:$0xff] %v8751_v15  ;;  %v8757_v20 = vmul.f32 %v8536_v53, %v8536_v53  ;;  %v8811_v47 = vmul.f32 %v11246_v32, %v11246_v32 }
 0x2fd   : > { %v2270_v2 = vpop.f32.mrb[147].mxu0  ;;  %5715 = vmatprep.subr.bf16.mxu1 %v11147_v6  ;;  %4604 = vmatmul.mubr.f32.gmra.mrb[252].mxu0 %v8618_v63  ;;  %v8776_v6 = vmul.f32 %v8564_v14, %v8564_v14  ;;  %v8780_v63 = vmul.f32 %v8572_v5, %v8572_v5 }
 0x2fe   : > { %11236 = vst [vmem:[#allocation154_spill] sm:$0xff] %v8757_v20  ;;  %v8771_v57 = vpop.f32.mrb[40].mxu1  ;;  %5178 = vmatprep.mubr.msk.f32.mxu1 %vm655_vm0, %v2270_v2  ;;  %11247 = vst [vmem:[#allocation158_spill] sm:$0xff] %v8811_v47  ;;  %v8819_v2 = vmul.f32 %v8630_v58, %v8630_v58  ;;  %v8831_v47 = vmul.f32 %v8645_v45, %v8645_v45 }
 0x2ff   : > { %11239 = vst [vmem:[#allocation83_spill] sm:$0xff] %v8771_v57  ;;  %v8790_v51 = vpop.f32.mrb[41].mxu1  ;;  %2521 = vmatmul.mubr.f32.gmra.mrb[146].mxu1 %v2268_v35  ;;  %v8815_v35 = vmul.f32 %v8626_v3, %v8626_v3 }
 0x300   : > { %v2274_v60 = vpop.f32.mrb[148].mxu0  ;;  %5717 = vmatpush1.bf16.msra.mxu1 %v11245_v11  ;;  %11249 = vst [vmem:[#allocation162_spill] sm:$0xff] %v8819_v2  ;;  %v8827_v11 = vmul.f32 %v8640_v0, %v8640_v0  ;;  %11252 = vst [vmem:[#allocation36_spill] sm:$0xff] %v8831_v47  ;;  %v8839_v2 = vmul.f32 %v8655_v34, %v8655_v34 }
 0x301   : > { %11248 = vst [vmem:[#allocation160_spill] sm:$0xff] %v8815_v35  ;;  %v2276_v31 = vpop.f32.mrb[149].mxu0  ;;  %v8835_v35 = vmul.f32 %v8650_v13, %v8650_v13 }
 0x302   : > { %11251 = vst [vmem:[#allocation91_spill] sm:$0xff] %v8827_v11  ;;  %11254 = vst [vmem:[#allocation163_spill] sm:$0xff] %v8839_v2  ;;  %v1484_v58 = vpop.f32.mrb[42].mxu1  ;;  %5179 = vmatprep.mubr.msk.f32.mxu1 %vm655_vm0, %v2276_v31  ;;  %v8848_v11 = vmul.f32 %v8665_v55, %v8665_v55  ;;  %v8857_v2 = vmul.f32 %v8670_v24, %v8670_v24  ;;  %v10654_v24 = vmov 0.0|0.0  }
 0x303   : > { %11253 = vst [vmem:[#allocation92_spill] sm:$0xff] %v8835_v35  ;;  %v8850_v47 = vmul.f32 %v1484_v58, %v1484_v58  ;;  %v8853_v13 = vmul.f32 %v1484_v58, %v8502_v21  ;;  %v1486_v35 = vpop.f32.mrb[43].mxu1  ;;  %2527 = vmatmul.mubr.f32.gmra.mrb[148].mxu1 %v2274_v60  ;;  %v8870_v21 = vmul.f32 %v8680_v18, %v8680_v18 }
 0x304   : > { %11256 = vst [vmem:[#allocation168_spill] sm:$0xff] %v8848_v11  ;;  %11259 = vst [vmem:[#allocation97_spill] sm:$0xff] %v8857_v2  ;;  %v8859_v31 = vmul.f32 %v1486_v35, %v1486_v35  ;;  %v8862_v42 = vmul.f32 %v1486_v35, %v8508_v22  ;;  %v2280_v52 = vpop.f32.mrb[150].mxu0  ;;  %v8866_v11 = vmul.f32 %v8675_v27, %v8675_v27  ;;  %5762 = vmatprep.subr.bf16.mxu1 %v10654_v24 }
 0x305   : > { %11257 = vst [vmem:[#allocation170_spill] sm:$0xff] %v8850_v47  ;;  %11258 = vst [vmem:[#allocation39_spill] sm:$0xff] %v8853_v13  ;;  %v8874_v58 = vmul.f32 %v8685_v36, %v8685_v36  ;;  %v3664_v60 = vadd.f32 %v8850_v47, %v8734_v7  ;;  %v2282_v2 = vpop.f32.mrb[151].mxu0  ;;  %v8881_v22 = vmul.f32 %v8690_v19, %v8690_v19 }
 0x306   : > { %11260 = vst [vmem:[#allocation40_spill] sm:$0xff] %v8859_v31  ;;  %11261 = vst [vmem:[#allocation98_spill] sm:$0xff] %v8862_v42  ;;  %v8885_v35 = vmul.f32 %v8695_v12, %v8695_v12  ;;  %v1490_v47 = vpop.f32.mrb[44].mxu1  ;;  %5180 = vmatprep.mubr.msk.f32.mxu1 %vm655_vm0, %v2282_v2  ;;  %v8896_v24 = vmul.f32 %v8705_v56, %v8705_v56 }
 0x307   : > { %11262 = vst [vmem:[#allocation172_spill] sm:$0xff] %v8866_v11  ;;  %11263 = vst [vmem:[#allocation174_spill] sm:$0xff] %v8870_v21  ;;  %v8889_v21 = vmul.f32 %v8700_v29, %v8700_v29  ;;  %v3706_v7 = vadd.f32 6.5025, %v3664_v60  ;;  %v8901_v12 = vmul.f32 %v1490_v47, %v8516_v59  ;;  %2533 = vmatmul.mubr.f32.gmra.mrb[150].mxu1 %v2280_v52 }
 0x308   : > { %11264 = vst [vmem:[#allocation43_spill] sm:$0xff] %v8874_v58  ;;  %11265 = vst [vmem:[#allocation105_spill] sm:$0xff] %v8881_v22  ;;  %v3665_v58 = vadd.f32 %v8859_v31, %v8738_v43  ;;  %v8898_v22 = vmul.f32 %v1490_v47, %v1490_v47  ;;  %v8909_v31 = vmul.f32 %v8715_v28, %v8715_v28  ;;  %v2286_v60 = vpop.f32.mrb[152].mxu0 }
 0x309   : > { %11266 = vst [vmem:[#allocation44_spill] sm:$0xff] %v8885_v35  ;;  %11267 = vst [vmem:[#allocation106_spill] sm:$0xff] %v8889_v21  ;;  %v1492_v35 = vpop.f32.mrb[45].mxu1  ;;  %v8905_v21 = vmul.f32 %v8710_v41, %v8710_v41  ;;  %v8918_v59 = vmul.f32 %v8720_v23, %v8720_v23  ;;  %5975 = vrcp.f32 %v3706_v7  ;;  %v8924_v28 = vmul.f32 %v8725_v4, %v8725_v4 }
 0x30a   : > { %11268 = vst [vmem:[#allocation74_spill] sm:$0xff] %v8896_v24  ;;  %11269 = vst [vmem:[#allocation75_spill] sm:$0xff] %v8898_v22  ;;  %v8911_v2 = vmul.f32 %v1492_v35, %v1492_v35  ;;  %v8914_v43 = vmul.f32 %v1492_v35, %v8522_v30  ;;  %v3707_v52 = vadd.f32 6.5025, %v3665_v58  ;;  %v3666_v47 = vadd.f32 %v8898_v22, %v8743_v33  ;;  %v1496_v58 = vpop.f32.mrb[46].mxu1 }
 0x30b   : > { %11270 = vst [vmem:[#allocation80_spill] sm:$0xff] %v8901_v12  ;;  %11271 = vst [vmem:[#allocation81_spill] sm:$0xff] %v8905_v21  ;;  %v2288_v21 = vpop.f32.mrb[153].mxu0  ;;  %v8932_v30 = vmul.f32 %v8771_v57, %v8771_v57  ;;  %v3580_v35 = vmul.f32 2.0, %v8853_v13  ;;  %v3581_v22 = vmul.f32 2.0, %v8862_v42  ;;  %v8939_v33 = vmul.f32 %v1496_v58, %v1496_v58  ;;  %v4129_v57 = vld [vmem:[#allocation11 + $0x8] sm:$0xff] }
 0x30c   : > { %11272 = vst [vmem:[#allocation47_spill] sm:$0xff] %v8909_v31  ;;  %11273 = vst [vmem:[#allocation111_spill] sm:$0xff] %v8911_v2  ;;  %v8928_v31 = vmul.f32 %v8730_v26, %v8730_v26  ;;  %v3667_v7 = vadd.f32 %v8911_v2, %v8747_v8  ;;  %5181 = vmatprep.mubr.msk.f32.mxu1 %vm655_vm0, %v2288_v21  ;;  %v4128_v26 = vld [vmem:[#allocation11] sm:$0xff]  ;;  %v2292_v13 = vpop.f32.mrb[154].mxu0  ;;  %5977 = vrcp.f32 %v3707_v52  ;;  %v3708_v42 = vadd.f32 6.5025, %v3666_v47 }
 0x30d   : > { %11274 = vst [vmem:[#allocation48_spill] sm:$0xff] %v8914_v43  ;;  %11275 = vst [vmem:[#allocation112_spill] sm:$0xff] %v8918_v59  ;;  %2539 = vmatmul.mubr.f32.gmra.mrb[152].mxu1 %v2286_v60  ;;  %v3583_v8 = vmul.f32 2.0, %v8914_v43  ;;  %v8955_v60 = vmul.f32 %v8790_v51, %v8790_v51  ;;  %v8962_v52 = vadd.f32 6.5025, %v3581_v22 }
 0x30e   : > { %11276 = vst [vmem:[#allocation86_spill] sm:$0xff] %v8924_v28  ;;  %11277 = vst [vmem:[#allocation87_spill] sm:$0xff] %v8928_v31  ;;  %v8942_v28 = vmul.f32 %v1496_v58, %v8530_v17  ;;  %v1498_v31 = vpop.f32.mrb[47].mxu1  ;;  %v3709_v4 = vadd.f32 6.5025, %v3667_v7  ;;  %v3668_v17 = vadd.f32 %v8939_v33, %v8751_v15  ;;  %v2294_v58 = vpop.f32.mrb[155].mxu0 }
 0x30f   : > { %11278 = vst [vmem:[#allocation94_spill] sm:$0xff] %v8932_v30  ;;  %11279 = vst [vmem:[#allocation95_spill] sm:$0xff] %v8939_v33  ;;  %v3582_v30 = vmul.f32 2.0, %v8901_v12  ;;  %v8945_v2 = vmul.f32 %v1498_v31, %v1498_v31  ;;  %v8948_v21 = vmul.f32 %v1498_v31, %v8536_v53  ;;  %v1502_v12 = vpop.f32.mrb[48].mxu1  ;;  %5182 = vmatprep.mubr.msk.f32.mxu1 %vm655_vm0, %v2294_v58  ;;  %v3622_v31 = vadd.f32 6.5025, %v3580_v35 }
 0x310   : > { %11280 = vst [vmem:[#allocation51_spill] sm:$0xff] %v8942_v28  ;;  %11283 = vst [vmem:[#allocation120_spill] sm:$0xff] %v8955_v60  ;;  %5979 = vrcp.f32 %v3709_v4  ;;  %v8960_v53 = vpack.c.bf16 %v4129_v57, %v4128_v26  ;;  %v8964_v47 = vmul.f32 %v1502_v12, %v1502_v12  ;;  %v8967_v43 = vmul.f32 %v1502_v12, %v8544_v38  ;;  %v1504_v33 = vpop.f32.mrb[49].mxu1  ;;  %v2298_v26 = vpop.f32.mrb[156].mxu0 }
 0x311   : > { %11281 = vst [vmem:[#allocation119_spill] sm:$0xff] %v8945_v2  ;;  %11282 = vst [vmem:[#allocation52_spill] sm:$0xff] %v8948_v21  ;;  %v3669_v7 = vadd.f32 %v8945_v2, %v8757_v20  ;;  %2545 = vmatmul.mubr.f32.gmra.mrb[154].mxu1 %v2292_v13  ;;  %v8969_v15 = vadd.f32 6.5025, %v3582_v30  ;;  %v8971_v60 = vmul.f32 %v1504_v33, %v1504_v33  ;;  %5981 = vrcp.f32 %v3708_v42  ;;  %v2300_v58 = vpop.f32.mrb[157].mxu0 }
 0x312   : > { %11284 = vst [vmem:[#allocation100_spill] sm:$0xff] %v8960_v53  ;;  %11285 = vst [vmem:[#allocation101_spill] sm:$0xff] %v8964_v47  ;;  %v8974_v2 = vmul.f32 %v1504_v33, %v8550_v61  ;;  %v3625_v57 = vadd.f32 6.5025, %v3583_v8  ;;  %v3710_v22 = vadd.f32 6.5025, %v3668_v17  ;;  %v3670_v35 = vadd.f32 %v8964_v47, %v8761_v46  ;;  %5183 = vmatprep.mubr.msk.f32.mxu1 %vm655_vm0, %v2300_v58 }
 0x313   : > { %11286 = vst [vmem:[#allocation108_spill] sm:$0xff] %v8967_v43  ;;  %v3711_v4 = vadd.f32 6.5025, %v3669_v7  ;;  %11287 = vst [vmem:[#allocation109_spill] sm:$0xff] %v8971_v60  ;;  %v3584_v38 = vmul.f32 2.0, %v8942_v28  ;;  %v3585_v13 = vmul.f32 2.0, %v8948_v21  ;;  %v3671_v12 = vadd.f32 %v8971_v60, %v8765_v25  ;;  %v5976_v42 = vpop.eup %5975 }
 0x314   : > { %11288 = vst [vmem:[#allocation55_spill] sm:$0xff] %v8974_v2  ;;  %v1508_v30 = vpop.f32.mrb[50].mxu1  ;;  %v4130_v61 = vld [vmem:[#allocation11 + $0x10] sm:$0xff]  ;;  %v4131_v33 = vld [vmem:[#allocation11 + $0x18] sm:$0xff]  ;;  %v3586_v8 = vmul.f32 2.0, %v8967_v43  ;;  %v3587_v17 = vmul.f32 2.0, %v8974_v2  ;;  %v8999_v20 = vmul.f32 %v5976_v42, %v3622_v31 }
 0x315   : > { %5983 = vrcp.f32 %v3711_v4  ;;  %v8985_v7 = vmul.f32 %v1508_v30, %v1508_v30  ;;  %v8988_v28 = vmul.f32 %v1508_v30, %v8558_v62  ;;  %v1510_v21 = vpop.f32.mrb[51].mxu1  ;;  %2551 = vmatmul.mubr.f32.gmra.mrb[156].mxu1 %v2298_v26  ;;  %v3712_v4 = vadd.f32 6.5025, %v3670_v35  ;;  %v2304_v25 = vpop.f32.mrb[158].mxu0 }
 0x316   : > { %v3713_v47 = vadd.f32 6.5025, %v3671_v12  ;;  %v8990_v60 = vmul.f32 %v1510_v21, %v1510_v21  ;;  %v8993_v58 = vmul.f32 %v1510_v21, %v8564_v14  ;;  %5985 = vrcp.f32 %v3710_v22  ;;  %v2306_v2 = vpop.f32.mrb[159].mxu0  ;;  %11294 = vst [vmem:[#allocation60_spill] sm:$0xff] %v8999_v20  ;;  %v1514_v12 = vpop.f32.mrb[52].mxu1 }
 0x317   : > { %11289 = vst [vmem:[#allocation126_spill] sm:$0xff] %v8985_v7  ;;  %11290 = vst [vmem:[#allocation56_spill] sm:$0xff] %v8988_v28  ;;  %v3672_v43 = vadd.f32 %v8985_v7, %v8769_v40  ;;  %v8997_v46 = vpack.c.bf16 %v4131_v33, %v4130_v61  ;;  %v9001_v62 = vadd.f32 6.5025, %v3584_v38  ;;  %v3627_v26 = vadd.f32 6.5025, %v3585_v13  ;;  %5184 = vmatprep.mubr.msk.f32.mxu1 %vm655_vm0, %v2306_v2  ;;  %v5978_v14 = vpop.eup %5977 }
 0x318   : > { %11291 = vst [vmem:[#allocation127_spill] sm:$0xff] %v8990_v60  ;;  %11292 = vst [vmem:[#allocation114_spill] sm:$0xff] %v8993_v58  ;;  %5987 = vrcp.f32 %v3713_v47  ;;  %v3673_v35 = vadd.f32 %v8990_v60, %v8776_v6  ;;  %v9006_v21 = vadd.f32 6.5025, %v3586_v8  ;;  %v3629_v22 = vadd.f32 6.5025, %v3587_v17 }
 0x319   : > { %11293 = vst [vmem:[#allocation115_spill] sm:$0xff] %v8997_v46  ;;  %v9008_v30 = vmul.f32 %v1514_v12, %v1514_v12  ;;  %v9011_v61 = vmul.f32 %v1514_v12, %v8572_v5  ;;  %v1516_v31 = vpop.f32.mrb[53].mxu1  ;;  %2557 = vmatmul.mubr.f32.gmra.mrb[158].mxu1 %v2304_v25  ;;  %5989 = vrcp.f32 %v3712_v4  ;;  %v2310_v2 = vpop.f32.mrb[160].mxu0  ;;  %v3588_v8 = vmul.f32 2.0, %v8988_v28 }
 0x31a   : > { %v5980_v38 = vpop.eup %5979  ;;  %v3715_v47 = vadd.f32 6.5025, %v3673_v35  ;;  %v9013_v13 = vmul.f32 %v1516_v31, %v1516_v31  ;;  %v9016_v33 = vmul.f32 %v1516_v31, %v8578_v50  ;;  %v3714_v17 = vadd.f32 6.5025, %v3672_v43  ;;  %v2312_v12 = vpop.f32.mrb[161].mxu0  ;;  %v4132_v50 = vld [vmem:[#allocation11 + $0x20] sm:$0xff] }
 0x31b   : > { %11295 = vst [vmem:[#allocation135_spill] sm:$0xff] %v9008_v30  ;;  %11296 = vst [vmem:[#allocation61_spill] sm:$0xff] %v9011_v61  ;;  %v9018_v42 = vmul.f32 %v5980_v38, %v3625_v57  ;;  %v3674_v5 = vadd.f32 %v9008_v30, %v8780_v63  ;;  %v3589_v25 = vmul.f32 2.0, %v8993_v58  ;;  %v1520_v35 = vpop.f32.mrb[54].mxu1  ;;  %5185 = vmatprep.mubr.msk.f32.mxu1 %vm655_vm0, %v2312_v12  ;;  %v4133_v31 = vld [vmem:[#allocation11 + $0x28] sm:$0xff]  ;;  %v5982_v38 = vpop.eup %5981  ;;  %v3590_v43 = vmul.f32 2.0, %v9011_v61 }
 0x31c   : > { %11297 = vst [vmem:[#allocation136_spill] sm:$0xff] %v9013_v13  ;;  %11298 = vst [vmem:[#allocation122_spill] sm:$0xff] %v9016_v33  ;;  %5991 = vrcp.f32 %v3715_v47  ;;  %v3675_v4 = vadd.f32 %v9013_v13, %v8784_v9  ;;  %v9028_v57 = vmul.f32 %v5978_v14, %v8962_v52  ;;  %v3591_v28 = vmul.f32 2.0, %v9016_v33  ;;  %v1522_v58 = vpop.f32.mrb[55].mxu1  ;;  %v2316_v14 = vpop.f32.mrb[162].mxu0 }
 0x31d   : > { %11299 = vst [vmem:[#allocation123_spill] sm:$0xff] %v9018_v42  ;;  %v9032_v42 = vmul.f32 %v1520_v35, %v1520_v35  ;;  %v9035_v47 = vmul.f32 %v1520_v35, %v8586_v49  ;;  %2563 = vmatmul.mubr.f32.gmra.mrb[160].mxu1 %v2310_v2  ;;  %v3716_v13 = vadd.f32 6.5025, %v3674_v5  ;;  %v9037_v30 = vmul.f32 %v1522_v58, %v1522_v58  ;;  %v2318_v61 = vpop.f32.mrb[163].mxu0 }
 0x31e   : > { %11300 = vst [vmem:[#allocation130_spill] sm:$0xff] %v9028_v57  ;;  %v3717_v12 = vadd.f32 6.5025, %v3675_v4  ;;  %v9040_v52 = vmul.f32 %v1522_v58, %v11240_v16  ;;  %5993 = vrcp.f32 %v3714_v17  ;;  %v9046_v49 = vpack.c.bf16 %v4133_v31, %v4132_v50  ;;  %v1526_v4 = vpop.f32.mrb[56].mxu1  ;;  %5186 = vmatprep.mubr.msk.f32.mxu1 %vm655_vm0, %v2318_v61 }
 0x31f   : > { %11301 = vst [vmem:[#allocation131_spill] sm:$0xff] %v9032_v42  ;;  %11302 = vst [vmem:[#allocation66_spill] sm:$0xff] %v9035_v47  ;;  %v5984_v20 = vpop.eup %5983  ;;  %v3676_v33 = vadd.f32 %v9032_v42, %v8788_v44  ;;  %v9048_v35 = vadd.f32 6.5025, %v3588_v8  ;;  %v3631_v2 = vadd.f32 6.5025, %v3589_v25  ;;  %v3677_v5 = vadd.f32 %v9037_v30, %v8794_v1 }
 0x320   : > { %11303 = vst [vmem:[#allocation141_spill] sm:$0xff] %v9037_v30  ;;  %11304 = vst [vmem:[#allocation67_spill] sm:$0xff] %v9040_v52  ;;  %v9042_v57 = vmul.f32 %v5984_v20, %v3627_v26  ;;  %5995 = vrcp.f32 %v3717_v12  ;;  %v9053_v16 = vpop.eup %5985  ;;  %v9055_v20 = vadd.f32 6.5025, %v3590_v43  ;;  %v9057_v58 = vadd.f32 6.5025, %v3591_v28 }
 0x321   : > { %11306 = vst [vmem:[#allocation138_spill] sm:$0xff] %v9046_v49  ;;  %v9059_v26 = vmul.f32 %v1526_v4, %v1526_v4  ;;  %v9062_v17 = vmul.f32 %v1526_v4, %v11241_v48  ;;  %v1528_v8 = vpop.f32.mrb[57].mxu1  ;;  %2569 = vmatmul.mubr.f32.gmra.mrb[162].mxu1 %v2316_v14  ;;  %5997 = vrcp.f32 %v3716_v13  ;;  %v3719_v50 = vadd.f32 6.5025, %v3677_v5  ;;  %v2322_v12 = vpop.f32.mrb[164].mxu0  ;;  %v4134_v30 = vld [vmem:[#allocation11 + $0x30] sm:$0xff] }
 0x322   : > { %11305 = vst [vmem:[#allocation142_spill] sm:$0xff] %v9042_v57  ;;  %v5988_v25 = vpop.eup %5987  ;;  %v9064_v31 = vmul.f32 %v1528_v8, %v1528_v8  ;;  %v9067_v61 = vmul.f32 %v1528_v8, %v11242_v54  ;;  %v3592_v28 = vmul.f32 2.0, %v9035_v47  ;;  %v3718_v57 = vadd.f32 6.5025, %v3676_v33  ;;  %v2324_v4 = vpop.f32.mrb[165].mxu0  ;;  %v4135_v14 = vld [vmem:[#allocation11 + $0x38] sm:$0xff] }
 0x323   : > { %11307 = vst [vmem:[#allocation139_spill] sm:$0xff] %v9059_v26  ;;  %11308 = vst [vmem:[#allocation149_spill] sm:$0xff] %v9062_v17  ;;  %v9069_v43 = vmul.f32 %v5988_v25, %v3629_v22  ;;  %v3678_v48 = vadd.f32 %v9059_v26, %v8798_v37  ;;  %v9074_v42 = vpop.eup %5989  ;;  %v3593_v13 = vmul.f32 2.0, %v9040_v52  ;;  %5999 = vrcp.f32 %v3719_v50  ;;  %v11312_v5 = vld [vmem:[#allocation32_spill] sm:$0xff]  ;;  %v1532_v8 = vpop.f32.mrb[58].mxu1  ;;  %5187 = vmatprep.mubr.msk.f32.mxu1 %vm655_vm0, %v2324_v4 }
 0x324   : > { %11309 = vst [vmem:[#allocation151_spill] sm:$0xff] %v9064_v31  ;;  %11310 = vst [vmem:[#allocation153_spill] sm:$0xff] %v9067_v61  ;;  %v3679_v54 = vadd.f32 %v9064_v31, %v11312_v5  ;;  %v9081_v22 = vmul.f32 %v5982_v38, %v8969_v15  ;;  %v3594_v33 = vmul.f32 2.0, %v9062_v17  ;;  %v9084_v47 = vmul.f32 %v1532_v8, %v1532_v8  ;;  %v1534_v26 = vpop.f32.mrb[59].mxu1  ;;  %v2328_v4 = vpop.f32.mrb[166].mxu0  ;;  %v11320_v17 = vld [vmem:[#allocation84_spill] sm:$0xff] }
 0x325   : > { %11311 = vst [vmem:[#allocation156_spill] sm:$0xff] %v9069_v43  ;;  %v3720_v25 = vadd.f32 6.5025, %v3678_v48  ;;  %v9087_v43 = vmul.f32 %v1532_v8, %v8614_v39  ;;  %2575 = vmatmul.mubr.f32.gmra.mrb[164].mxu1 %v2322_v12  ;;  %v9089_v60 = vmul.f32 %v1534_v26, %v1534_v26  ;;  %v9092_v31 = vmul.f32 %v1534_v26, %v11246_v32  ;;  %v2330_v8 = vpop.f32.mrb[167].mxu0 }
 0x326   : > { %11313 = vst [vmem:[#allocation157_spill] sm:$0xff] %v9081_v22  ;;  %11314 = vst [vmem:[#allocation159_spill] sm:$0xff] %v9084_v47  ;;  %v5992_v50 = vpop.eup %5991  ;;  %v3721_v52 = vadd.f32 6.5025, %v3679_v54  ;;  %v9094_v15 = vpack.c.bf16 %v4135_v14, %v4134_v30  ;;  %v9098_v48 = vadd.f32 6.5025, %v3592_v28  ;;  %6001 = vrcp.f32 %v3718_v57  ;;  %5188 = vmatprep.mubr.msk.f32.mxu1 %vm655_vm0, %v2330_v8 }
 0x327   : > { %11315 = vst [vmem:[#allocation161_spill] sm:$0xff] %v9087_v43  ;;  %11316 = vst [vmem:[#allocation164_spill] sm:$0xff] %v9089_v60  ;;  %v9096_v38 = vmul.f32 %v5992_v50, %v3631_v2  ;;  %v3680_v39 = vadd.f32 %v9084_v47, %v11320_v17  ;;  %v3635_v12 = vadd.f32 6.5025, %v3593_v13  ;;  %v3595_v54 = vmul.f32 2.0, %v9067_v61  ;;  %v11321_v22 = vld [vmem:[#allocation158_spill] sm:$0xff] }
 0x328   : > { %11317 = vst [vmem:[#allocation165_spill] sm:$0xff] %v9092_v31  ;;  %11318 = vst [vmem:[#allocation167_spill] sm:$0xff] %v9094_v15  ;;  %6003 = vrcp.f32 %v3721_v52  ;;  %v3681_v32 = vadd.f32 %v9089_v60, %v11321_v22  ;;  %v1538_v26 = vpop.f32.mrb[60].mxu1  ;;  %v9106_v30 = vpop.eup %5993  ;;  %v9108_v2 = vadd.f32 6.5025, %v3594_v33  ;;  %v3596_v52 = vmul.f32 2.0, %v9087_v43 }
 0x329   : > { %11319 = vst [vmem:[#allocation169_spill] sm:$0xff] %v9096_v38  ;;  %6005 = vrcp.f32 %v3720_v25  ;;  %v9110_v57 = vmul.f32 %v1538_v26, %v1538_v26  ;;  %v9113_v28 = vmul.f32 %v1538_v26, %v8626_v3  ;;  %v1540_v14 = vpop.f32.mrb[61].mxu1  ;;  %2581 = vmatmul.mubr.f32.gmra.mrb[166].mxu1 %v2328_v4  ;;  %v11325_v38 = vld [vmem:[#allocation143_spill] sm:$0xff]  ;;  %v2697_v60 = vpop.f32.mrb[168].mxu0  ;;  %v4137_v47 = vld [vmem:[#allocation11 + $0x48] sm:$0xff]  ;;  %v3597_v3 = vmul.f32 2.0, %v9092_v31 }
 0x32a   : > { %v5996_v13 = vpop.eup %5995  ;;  %v3723_v50 = vadd.f32 6.5025, %v3681_v32  ;;  %v9116_v61 = vmul.f32 %v1540_v14, %v1540_v14  ;;  %v9119_v8 = vmul.f32 %v1540_v14, %v11325_v38  ;;  %v4136_v33 = vld [vmem:[#allocation11 + $0x40] sm:$0xff]  ;;  %v3722_v7 = vadd.f32 6.5025, %v3680_v39  ;;  %v2699_v22 = vpop.f32.mrb[169].mxu0 }
 0x32b   : > { %11322 = vst [vmem:[#allocation176_spill] sm:$0xff] %v9110_v57  ;;  %11323 = vst [vmem:[#allocation178_spill] sm:$0xff] %v9113_v28  ;;  %v9122_v25 = vmul.f32 %v5996_v13, %v9057_v58  ;;  %v11328_v26 = vld [vmem:[#allocation160_spill] sm:$0xff]  ;;  %v9127_v43 = vpop.eup %5997  ;;  %v3637_v32 = vadd.f32 6.5025, %v3595_v54  ;;  %v11329_v17 = vld [vmem:[#allocation162_spill] sm:$0xff]  ;;  %5210 = vmatprep.mubr.msk.f32.mxu1 %vm655_vm0, %v2699_v22  ;;  %v9134_v58 = vmul.f32 %v9053_v16, %v9001_v62 }
 0x32c   : > { %11324 = vst [vmem:[#allocation180_spill] sm:$0xff] %v9116_v61  ;;  %11326 = vst [vmem:[#allocation179_spill] sm:$0xff] %v9119_v8  ;;  %v3682_v4 = vadd.f32 %v9110_v57, %v11328_v26  ;;  %6007 = vrcp.f32 %v3723_v50  ;;  %v3683_v38 = vadd.f32 %v9116_v61, %v11329_v17  ;;  %v1544_v14 = vpop.f32.mrb[62].mxu1  ;;  %v3598_v39 = vmul.f32 2.0, %v9113_v28  ;;  %v2703_v16 = vpop.f32.mrb[170].mxu0 }
 0x32d   : > { %11327 = vst [vmem:[#allocation182_spill] sm:$0xff] %v9122_v25  ;;  %11330 = vst [vmem:[#allocation181_spill] sm:$0xff] %v9134_v58  ;;  %v9137_v13 = vmul.f32 %v1544_v14, %v1544_v14  ;;  %v9140_v31 = vmul.f32 %v1544_v14, %v8635_v10  ;;  %v1546_v25 = vpop.f32.mrb[63].mxu1  ;;  %2950 = vmatmul.mubr.f32.vlgmr.msra.gmra.mrb[168].mxu1 %v2697_v60  ;;  %v9142_v54 = vpack.c.bf16 %v4137_v47, %v4136_v33  ;;  %v6000_v50 = vpop.eup %5999  ;;  %v11337_v14 = vld [vmem:[#allocation35_spill] sm:$0xff]  ;;  %v11338_v33 = vmov 0.0|0.0  }
 0x32e   : > { %v9144_v61 = vadd.f32 6.5025, %v3596_v52  ;;  %v3725_v57 = vadd.f32 6.5025, %v3683_v38  ;;  %v9146_v22 = vmul.f32 %v1546_v25, %v1546_v25  ;;  %v9149_v62 = vmul.f32 %v1546_v25, %v8640_v0  ;;  %5764 = vmatpush1.bf16.msra.mxu1 %v8960_v53  ;;  %v2705_v47 = vpop.f32.mrb[171].mxu0  ;;  %v11339_v38 = vld [vmem:[#allocation91_spill] sm:$0xff] }
 0x32f   : > { %11331 = vst [vmem:[#allocation184_spill] sm:$0xff] %v9137_v13  ;;  %11332 = vst [vmem:[#allocation185_spill] sm:$0xff] %v9140_v31  ;;  %v9152_v28 = vmul.f32 %v6000_v50, %v3635_v12  ;;  %6009 = vrcp.f32 %v3722_v7  ;;  %v3639_v10 = vadd.f32 6.5025, %v3597_v3  ;;  %v3684_v60 = vadd.f32 %v9137_v13, %v11337_v14  ;;  %5765 = vmatprep.subr.bf16.mxu1 %v11338_v33  ;;  %v1550_v25 = vpop.f32.mrb[64].mxu1 }
 0x330   : > { %11333 = vst [vmem:[#allocation186_spill] sm:$0xff] %v9142_v54  ;;  %11334 = vst [vmem:[#allocation124_spill] sm:$0xff] %v9146_v22  ;;  %v3599_v52 = vmul.f32 2.0, %v9119_v8  ;;  %6011 = vrcp.f32 %v3725_v57  ;;  %v3685_v0 = vadd.f32 %v9146_v22, %v11339_v38  ;;  %5211 = vmatprep.mubr.msk.f32.mxu1 %vm655_vm0, %v2705_v47  ;;  %v9163_v12 = vmul.f32 %v9074_v42, %v9006_v21  ;;  %v9165_v7 = vpop.eup %6001  ;;  %v1552_v57 = vpop.f32.mrb[65].mxu1  ;;  %v11344_v21 = vld [vmem:[#allocation117_spill] sm:$0xff] }
 0x331   : > { %11335 = vst [vmem:[#allocation57_spill] sm:$0xff] %v9149_v62  ;;  %11336 = vst [vmem:[#allocation148_spill] sm:$0xff] %v9152_v28  ;;  %v9167_v3 = vadd.f32 6.5025, %v3598_v39  ;;  %v3724_v50 = vadd.f32 6.5025, %v3682_v4  ;;  %v9169_v28 = vmul.f32 %v1550_v25, %v1550_v25  ;;  %v9172_v8 = vmul.f32 %v1550_v25, %v8645_v45  ;;  %2956 = vmatmul.mubr.f32.gmra.mrb[170].mxu1 %v2703_v16 }
 0x332   : > { %11340 = vst [vmem:[#allocation89_spill] sm:$0xff] %v9163_v12  ;;  %v6004_v58 = vpop.eup %6003  ;;  %v3600_v22 = vmul.f32 2.0, %v9140_v31  ;;  %v3727_v47 = vadd.f32 6.5025, %v3685_v0  ;;  %v9175_v13 = vmul.f32 %v1552_v57, %v1552_v57  ;;  %v9178_v42 = vmul.f32 %v1552_v57, %v11344_v21  ;;  %v2709_v12 = vpop.f32.mrb[172].mxu0  ;;  %5767 = vmatpush1.bf16.msra.mxu1 %v8997_v46  ;;  %v11347_v16 = vld [vmem:[#allocation36_spill] sm:$0xff] }
 0x333   : > { %11341 = vst [vmem:[#allocation128_spill] sm:$0xff] %v9169_v28  ;;  %11342 = vst [vmem:[#allocation62_spill] sm:$0xff] %v9172_v8  ;;  %v9181_v4 = vpop.eup %6005  ;;  %v9183_v39 = vmul.f32 %v6004_v58, %v3637_v32  ;;  %v3726_v45 = vadd.f32 6.5025, %v3684_v60  ;;  %v3601_v25 = vmul.f32 2.0, %v9149_v62  ;;  %v3686_v53 = vadd.f32 %v9169_v28, %v11347_v16  ;;  %v2711_v31 = vpop.f32.mrb[173].mxu0  ;;  %5768 = vmatprep.subr.bf16.mxu1 %v11338_v33 }
 0x334   : > { %11343 = vst [vmem:[#allocation88_spill] sm:$0xff] %v9175_v13  ;;  %11345 = vst [vmem:[#allocation103_spill] sm:$0xff] %v9178_v42  ;;  %6013 = vrcp.f32 %v3727_v47  ;;  %v3602_v0 = vmul.f32 2.0, %v9172_v8  ;;  %v11348_v57 = vld [vmem:[#allocation92_spill] sm:$0xff]  ;;  %v1556_v46 = vpop.f32.mrb[66].mxu1  ;;  %5212 = vmatprep.mubr.msk.f32.mxu1 %vm655_vm0, %v2711_v31  ;;  %v9195_v32 = vmul.f32 %v9106_v30, %v9048_v35  ;;  %v3603_v60 = vmul.f32 2.0, %v9178_v42 }
 0x335   : > { %11346 = vst [vmem:[#allocation63_spill] sm:$0xff] %v9183_v39  ;;  %v3687_v21 = vadd.f32 %v9175_v13, %v11348_v57  ;;  %v3641_v58 = vadd.f32 6.5025, %v3599_v52  ;;  %v9198_v62 = vmul.f32 %v1556_v46, %v1556_v46  ;;  %v9201_v39 = vmul.f32 %v1556_v46, %v8655_v34  ;;  %v1558_v47 = vpop.f32.mrb[67].mxu1  ;;  %2962 = vmatmul.mubr.f32.gmra.mrb[172].mxu1 %v2709_v12  ;;  %v11353_v31 = vld [vmem:[#allocation116_spill] sm:$0xff]  ;;  %v2715_v35 = vpop.f32.mrb[174].mxu0 }
 0x336   : > { %11349 = vst [vmem:[#allocation68_spill] sm:$0xff] %v9195_v32  ;;  %v6008_v8 = vpop.eup %6007  ;;  %6015 = vrcp.f32 %v3724_v50  ;;  %v9203_v28 = vmul.f32 %v1558_v47, %v1558_v47  ;;  %v9206_v57 = vmul.f32 %v1558_v47, %v11353_v31  ;;  %5770 = vmatpush1.bf16.msra.mxu1 %v9046_v49  ;;  %v9211_v52 = vadd.f32 6.5025, %v3600_v22  ;;  %v11356_v34 = vld [vmem:[#allocation163_spill] sm:$0xff]  ;;  %v2717_v12 = vpop.f32.mrb[175].mxu0  ;;  %v11357_v47 = vld [vmem:[#allocation166_spill] sm:$0xff] }
 0x337   : > { %11350 = vst [vmem:[#allocation102_spill] sm:$0xff] %v9198_v62  ;;  %11351 = vst [vmem:[#allocation69_spill] sm:$0xff] %v9201_v39  ;;  %v3729_v13 = vadd.f32 6.5025, %v3687_v21  ;;  %v9209_v30 = vmul.f32 %v6008_v8, %v3639_v10  ;;  %6017 = vrcp.f32 %v3726_v45  ;;  %v3688_v46 = vadd.f32 %v9198_v62, %v11356_v34  ;;  %5771 = vmatprep.subr.bf16.mxu1 %v11338_v33  ;;  %v1562_v42 = vpop.f32.mrb[68].mxu1  ;;  %v11361_v62 = vld [vmem:[#allocation145_spill] sm:$0xff] }
 0x338   : > { %11352 = vst [vmem:[#allocation23_spill] sm:$0xff] %v9203_v28  ;;  %11354 = vst [vmem:[#allocation25_spill] sm:$0xff] %v9206_v57  ;;  %v3643_v50 = vadd.f32 6.5025, %v3601_v25  ;;  %v9216_v21 = vadd.f32 6.5025, %v3602_v0  ;;  %v3689_v31 = vadd.f32 %v9203_v28, %v11357_v47  ;;  %5213 = vmatprep.mubr.msk.f32.mxu1 %vm655_vm0, %v2717_v12  ;;  %v9225_v45 = vmul.f32 %v1562_v42, %v1562_v42 }
 0x339   : > { %11355 = vst [vmem:[#allocation27_spill] sm:$0xff] %v9209_v30  ;;  %6019 = vrcp.f32 %v3729_v13  ;;  %v9221_v8 = vpop.eup %6009  ;;  %v3728_v22 = vadd.f32 6.5025, %v3686_v53  ;;  %v9223_v10 = vadd.f32 6.5025, %v3603_v60  ;;  %v9228_v30 = vmul.f32 %v1562_v42, %v8665_v55  ;;  %v1564_v25 = vpop.f32.mrb[69].mxu1  ;;  %2968 = vmatmul.mubr.f32.gmra.mrb[174].mxu1 %v2715_v35 }
 0x33a   : > { %11358 = vst [vmem:[#allocation29_spill] sm:$0xff] %v9225_v45  ;;  %v6012_v0 = vpop.eup %6011  ;;  %v3604_v13 = vmul.f32 2.0, %v9201_v39  ;;  %v3731_v32 = vadd.f32 6.5025, %v3689_v31  ;;  %v9231_v28 = vmul.f32 %v1564_v25, %v1564_v25  ;;  %v9234_v12 = vmul.f32 %v1564_v25, %v11361_v62  ;;  %v2721_v49 = vpop.f32.mrb[176].mxu0  ;;  %5773 = vmatpush1.bf16.msra.mxu1 %v9094_v15  ;;  %v4138_v53 = vld [vmem:[#allocation11 + $0x50] sm:$0xff] }
 0x33b   : > { %11359 = vst [vmem:[#allocation30_spill] sm:$0xff] %v9228_v30  ;;  %v4139_v60 = vld [vmem:[#allocation11 + $0x58] sm:$0xff]  ;;  %v9237_v47 = vmul.f32 %v6012_v0, %v3641_v58  ;;  %v3730_v55 = vadd.f32 6.5025, %v3688_v46  ;;  %v3605_v42 = vmul.f32 2.0, %v9206_v57  ;;  %v11364_v35 = vld [vmem:[#allocation168_spill] sm:$0xff]  ;;  %5774 = vmatprep.subr.bf16.mxu1 %v11338_v33  ;;  %v9249_v58 = vmul.f32 %v9127_v43, %v9055_v20 }
 0x33c   : > { %11360 = vst [vmem:[#allocation33_spill] sm:$0xff] %v9231_v28  ;;  %11362 = vst [vmem:[#allocation34_spill] sm:$0xff] %v9234_v12  ;;  %v3690_v34 = vadd.f32 %v9225_v45, %v11364_v35  ;;  %v2723_v39 = vpop.f32.mrb[177].mxu0  ;;  %6021 = vrcp.f32 %v3731_v32  ;;  %v3606_v62 = vmul.f32 2.0, %v9228_v30  ;;  %v11365_v31 = vld [vmem:[#allocation97_spill] sm:$0xff]  ;;  %v1568_v15 = vpop.f32.mrb[70].mxu1  ;;  %v9256_v32 = vpack.c.bf16 %v4139_v60, %v4138_v53 }
 0x33d   : > { %11363 = vst [vmem:[#allocation37_spill] sm:$0xff] %v9237_v47  ;;  %v3691_v25 = vadd.f32 %v9231_v28, %v11365_v31  ;;  %5214 = vmatprep.mubr.msk.f32.mxu1 %vm655_vm0, %v2723_v39  ;;  %11366 = vst [vmem:[#allocation38_spill] sm:$0xff] %v9249_v58  ;;  %6023 = vrcp.f32 %v3728_v22  ;;  %v9251_v46 = vmul.f32 %v1568_v15, %v1568_v15  ;;  %v1570_v57 = vpop.f32.mrb[71].mxu1  ;;  %v9258_v47 = vadd.f32 6.5025, %v3604_v13  ;;  %v2727_v20 = vpop.f32.mrb[178].mxu0 }
 0x33e   : > { %v9254_v0 = vmul.f32 %v1568_v15, %v8675_v27  ;;  %2974 = vmatmul.mubr.f32.gmra.mrb[176].mxu1 %v2721_v49  ;;  %11369 = vst [vmem:[#allocation45_spill] sm:$0xff] %v9256_v32  ;;  %v6014_v30 = vpop.eup %6013  ;;  %v9260_v45 = vmul.f32 %v1570_v57, %v1570_v57  ;;  %v9263_v39 = vmul.f32 %v1570_v57, %v8680_v18  ;;  %6025 = vrcp.f32 %v3730_v55  ;;  %v2729_v15 = vpop.f32.mrb[179].mxu0  ;;  %v4140_v22 = vld [vmem:[#allocation11 + $0x60] sm:$0xff]  ;;  %v4141_v13 = vld [vmem:[#allocation11 + $0x68] sm:$0xff]  ;;  %v11373_v60 = vld [vmem:[#allocation174_spill] sm:$0xff] }
 0x33f   : > { %11367 = vst [vmem:[#allocation41_spill] sm:$0xff] %v9251_v46  ;;  %v3733_v28 = vadd.f32 6.5025, %v3691_v25  ;;  %5776 = vmatpush1.bf16.msra.mxu1 %v9142_v54  ;;  %v9266_v43 = vmul.f32 %v6014_v30, %v3643_v50  ;;  %v3607_v27 = vmul.f32 2.0, %v9234_v12  ;;  %v3692_v49 = vadd.f32 %v9251_v46, %v8866_v11  ;;  %v1574_v50 = vpop.f32.mrb[72].mxu1  ;;  %5215 = vmatprep.mubr.msk.f32.mxu1 %vm655_vm0, %v2729_v15  ;;  %v11466_v31 = vld [vmem:[#allocation186_spill] sm:$0xff] }
 0x340   : > { %11368 = vst [vmem:[#allocation42_spill] sm:$0xff] %v9254_v0  ;;  %11370 = vst [vmem:[#allocation46_spill] sm:$0xff] %v9260_v45  ;;  %5777 = vmatprep.subr.bf16.mxu1 %v11338_v33  ;;  %v9272_v53 = vpop.eup %6015  ;;  %v3647_v18 = vadd.f32 6.5025, %v3605_v42  ;;  %v9274_v57 = vadd.f32 6.5025, %v3606_v62  ;;  %v3693_v30 = vadd.f32 %v9260_v45, %v11373_v60  ;;  %v9285_v58 = vmul.f32 %v1574_v50, %v8685_v36 }
 0x341   : > { %11371 = vst [vmem:[#allocation49_spill] sm:$0xff] %v9263_v39  ;;  %11372 = vst [vmem:[#allocation50_spill] sm:$0xff] %v9266_v43  ;;  %6027 = vrcp.f32 %v3733_v28  ;;  %v9279_v55 = vpop.eup %6017  ;;  %v3732_v25 = vadd.f32 6.5025, %v3690_v34  ;;  %v3608_v12 = vmul.f32 2.0, %v9254_v0  ;;  %v9282_v43 = vmul.f32 %v1574_v50, %v1574_v50  ;;  %v1576_v42 = vpop.f32.mrb[73].mxu1 }
 0x342   : > { %11375 = vst [vmem:[#allocation54_spill] sm:$0xff] %v9285_v58  ;;  %2980 = vmatmul.mubr.f32.gmra.mrb[178].mxu1 %v2727_v20  ;;  %v3735_v28 = vadd.f32 6.5025, %v3693_v30  ;;  %v9287_v46 = vmul.f32 %v1576_v42, %v1576_v42  ;;  %v9290_v45 = vmul.f32 %v1576_v42, %v8690_v19  ;;  %v2733_v15 = vpop.f32.mrb[180].mxu0  ;;  %v9293_v34 = vpack.c.bf16 %v4141_v13, %v4140_v22  ;;  %v11380_v50 = vld [vmem:[#allocation43_spill] sm:$0xff]  ;;  %v11381_v19 = vld [vmem:[#allocation105_spill] sm:$0xff] }
 0x343   : > { %11374 = vst [vmem:[#allocation53_spill] sm:$0xff] %v9282_v43  ;;  %v6020_v62 = vpop.eup %6019  ;;  %5779 = vmatpush1.bf16.msra.mxu1 %v9256_v32  ;;  %v3649_v54 = vadd.f32 6.5025, %v3607_v27  ;;  %v3734_v36 = vadd.f32 6.5025, %v3692_v49  ;;  %v3694_v20 = vadd.f32 %v9282_v43, %v11380_v50  ;;  %v2735_v60 = vpop.f32.mrb[181].mxu0 }
 0x344   : > { %11376 = vst [vmem:[#allocation58_spill] sm:$0xff] %v9287_v46  ;;  %11377 = vst [vmem:[#allocation59_spill] sm:$0xff] %v9290_v45  ;;  %v9296_v0 = vmul.f32 %v6020_v62, %v9223_v10  ;;  %5780 = vmatprep.subr.bf16.mxu1 %v11338_v33  ;;  %v3609_v30 = vmul.f32 2.0, %v9263_v39  ;;  %6029 = vrcp.f32 %v3735_v28  ;;  %v3695_v42 = vadd.f32 %v9287_v46, %v11381_v19  ;;  %v1580_v32 = vpop.f32.mrb[74].mxu1  ;;  %v11384_v22 = vld [vmem:[#allocation147_spill] sm:$0xff]  ;;  %v4142_v28 = vld [vmem:[#allocation11 + $0x70] sm:$0xff] }
 0x345   : > { %11378 = vst [vmem:[#allocation64_spill] sm:$0xff] %v9293_v34  ;;  %5216 = vmatprep.mubr.msk.f32.mxu1 %vm655_vm0, %v2735_v60  ;;  %v9307_v10 = vmul.f32 %v9165_v7, %v9098_v48  ;;  %6031 = vrcp.f32 %v3732_v25  ;;  %v3610_v27 = vmul.f32 2.0, %v9285_v58  ;;  %v9310_v49 = vmul.f32 %v1580_v32, %v1580_v32  ;;  %v1582_v62 = vpop.f32.mrb[75].mxu1  ;;  %v4143_v39 = vld [vmem:[#allocation11 + $0x78] sm:$0xff]  ;;  %v2739_v7 = vpop.f32.mrb[182].mxu0 }
 0x346   : > { %11379 = vst [vmem:[#allocation65_spill] sm:$0xff] %v9296_v0  ;;  %v9313_v13 = vmul.f32 %v1580_v32, %v11384_v22  ;;  %2986 = vmatmul.mubr.f32.gmra.mrb[180].mxu1 %v2733_v15  ;;  %v6022_v0 = vpop.eup %6021  ;;  %v9315_v46 = vadd.f32 6.5025, %v3608_v12  ;;  %v3737_v60 = vadd.f32 6.5025, %v3695_v42  ;;  %v9317_v43 = vmul.f32 %v1582_v62, %v1582_v62  ;;  %v11389_v22 = vld [vmem:[#allocation44_spill] sm:$0xff] }
 0x347   : > { %11382 = vst [vmem:[#allocation70_spill] sm:$0xff] %v9307_v10  ;;  %11383 = vst [vmem:[#allocation73_spill] sm:$0xff] %v9310_v49  ;;  %v9320_v48 = vmul.f32 %v1582_v62, %v8700_v29  ;;  %5782 = vmatpush1.bf16.msra.mxu1 %v9293_v34  ;;  %v9323_v25 = vpop.eup %6023  ;;  %v9325_v32 = vmul.f32 %v6022_v0, %v3647_v18  ;;  %6033 = vrcp.f32 %v3734_v36  ;;  %v3611_v15 = vmul.f32 2.0, %v9290_v45  ;;  %v2741_v58 = vpop.f32.mrb[183].mxu0  ;;  %v11390_v29 = vld [vmem:[#allocation106_spill] sm:$0xff] }
 0x348   : > { %11385 = vst [vmem:[#allocation171_spill] sm:$0xff] %v9313_v13  ;;  %11386 = vst [vmem:[#allocation173_spill] sm:$0xff] %v9317_v43  ;;  %v3696_v12 = vadd.f32 %v9310_v49, %v11389_v22  ;;  %5783 = vmatprep.subr.bf16.mxu1 %v11338_v33  ;;  %v3651_v42 = vadd.f32 6.5025, %v3609_v30  ;;  %6035 = vrcp.f32 %v3737_v60  ;;  %v3697_v62 = vadd.f32 %v9317_v43, %v11390_v29  ;;  %v1586_v10 = vpop.f32.mrb[76].mxu1  ;;  %v9336_v0 = vpop.eup %6025  ;;  %v4144_v60 = vld [vmem:[#allocation11 + $0x80] sm:$0xff] }
 0x349   : > { %11387 = vst [vmem:[#allocation175_spill] sm:$0xff] %v9320_v48  ;;  %11388 = vst [vmem:[#allocation177_spill] sm:$0xff] %v9325_v32  ;;  %5217 = vmatprep.mubr.msk.f32.mxu1 %vm655_vm0, %v2741_v58  ;;  %v9334_v34 = vpack.c.bf16 %v4143_v39, %v4142_v28  ;;  %v9338_v18 = vadd.f32 6.5025, %v3610_v27  ;;  %v3736_v36 = vadd.f32 6.5025, %v3694_v20  ;;  %v9340_v45 = vmul.f32 %v1586_v10, %v1586_v10 }
 0x34a   : > { %v9343_v32 = vmul.f32 %v1586_v10, %v8705_v56  ;;  %v1588_v30 = vpop.f32.mrb[77].mxu1  ;;  %2992 = vmatmul.mubr.f32.gmra.mrb[182].mxu1 %v2739_v7  ;;  %v3738_v43 = vadd.f32 6.5025, %v3696_v12  ;;  %v3739_v29 = vadd.f32 6.5025, %v3697_v62  ;;  %v2745_v39 = vpop.f32.mrb[184].mxu0 }
 0x34b   : > { %11391 = vst [vmem:[#allocation183_spill] sm:$0xff] %v9334_v34  ;;  %11392 = vst [vmem:[#allocation76_spill] sm:$0xff] %v9340_v45  ;;  %v6028_v49 = vpop.eup %6027  ;;  %v9345_v22 = vmul.f32 %v1588_v30, %v1588_v30  ;;  %v9348_v58 = vmul.f32 %v1588_v30, %v8710_v41  ;;  %5785 = vmatpush1.bf16.msra.mxu1 %v9334_v34  ;;  %v4145_v20 = vld [vmem:[#allocation11 + $0x88] sm:$0xff]  ;;  %v3653_v28 = vadd.f32 6.5025, %v3611_v15  ;;  %v3612_v56 = vmul.f32 2.0, %v9313_v13 }
 0x34c   : > { %11393 = vst [vmem:[#allocation79_spill] sm:$0xff] %v9343_v32  ;;  %v9351_v27 = vmul.f32 %v6028_v49, %v3649_v54  ;;  %v3698_v10 = vadd.f32 %v9340_v45, %v8896_v24  ;;  %v2747_v7 = vpop.f32.mrb[185].mxu0  ;;  %5786 = vmatprep.subr.bf16.mxu1 %v11338_v33  ;;  %v3613_v12 = vmul.f32 2.0, %v9320_v48  ;;  %6037 = vrcp.f32 %v3739_v29  ;;  %v11397_v41 = vld [vmem:[#allocation81_spill] sm:$0xff]  ;;  %v1592_v30 = vpop.f32.mrb[78].mxu1 }
 0x34d   : > { %11394 = vst [vmem:[#allocation82_spill] sm:$0xff] %v9345_v22  ;;  %11395 = vst [vmem:[#allocation85_spill] sm:$0xff] %v9348_v58  ;;  %v3699_v62 = vadd.f32 %v9345_v22, %v11397_v41  ;;  %5218 = vmatprep.mubr.msk.f32.mxu1 %vm655_vm0, %v2747_v7  ;;  %v9361_v54 = vpack.c.bf16 %v4145_v20, %v4144_v60  ;;  %6039 = vrcp.f32 %v3736_v36  ;;  %v11400_v13 = vld [vmem:[#allocation133_spill] sm:$0xff]  ;;  %v1594_v45 = vpop.f32.mrb[79].mxu1  ;;  %v2751_v60 = vpop.f32.mrb[186].mxu0  ;;  %v4147_v36 = vld [vmem:[#allocation11 + $0x98] sm:$0xff] }
 0x34e   : > { %11396 = vst [vmem:[#allocation90_spill] sm:$0xff] %v9351_v27  ;;  %v3740_v49 = vadd.f32 6.5025, %v3698_v10  ;;  %v9363_v15 = vmul.f32 %v1592_v30, %v1592_v30  ;;  %v9366_v27 = vmul.f32 %v1592_v30, %v11400_v13  ;;  %2998 = vmatmul.mubr.f32.gmra.mrb[184].mxu1 %v2745_v39  ;;  %v4146_v34 = vld [vmem:[#allocation11 + $0x90] sm:$0xff]  ;;  %v6030_v48 = vpop.eup %6029  ;;  %6041 = vrcp.f32 %v3738_v43  ;;  %v11405_v39 = vld [vmem:[#allocation47_spill] sm:$0xff]  ;;  %v2753_v7 = vpop.f32.mrb[187].mxu0 }
 0x34f   : > { %11398 = vst [vmem:[#allocation93_spill] sm:$0xff] %v9361_v54  ;;  %v3741_v29 = vadd.f32 6.5025, %v3699_v62  ;;  %v9368_v24 = vmul.f32 %v1594_v45, %v1594_v45  ;;  %v9371_v22 = vmul.f32 %v1594_v45, %v8720_v23  ;;  %5788 = vmatpush1.bf16.msra.mxu1 %v9361_v54  ;;  %v9374_v20 = vpop.eup %6031  ;;  %v9376_v10 = vmul.f32 %v6030_v48, %v3651_v42  ;;  %v1598_v45 = vpop.f32.mrb[80].mxu1 }
 0x350   : > { %11399 = vst [vmem:[#allocation96_spill] sm:$0xff] %v9363_v15  ;;  %11401 = vst [vmem:[#allocation99_spill] sm:$0xff] %v9366_v27  ;;  %v9378_v13 = vadd.f32 6.5025, %v3612_v56  ;;  %6043 = vrcp.f32 %v3740_v49  ;;  %v3700_v43 = vadd.f32 %v9363_v15, %v11405_v39  ;;  %5789 = vmatprep.subr.bf16.mxu1 %v11338_v33  ;;  %v3655_v62 = vadd.f32 6.5025, %v3613_v12  ;;  %5219 = vmatprep.mubr.msk.f32.mxu1 %vm655_vm0, %v2753_v7 }
 0x351   : > { %11402 = vst [vmem:[#allocation104_spill] sm:$0xff] %v9368_v24  ;;  %11403 = vst [vmem:[#allocation107_spill] sm:$0xff] %v9371_v22  ;;  %6045 = vrcp.f32 %v3741_v29  ;;  %v3701_v23 = vadd.f32 %v9368_v24, %v8918_v59  ;;  %v9386_v30 = vpack.c.bf16 %v4147_v36, %v4146_v34  ;;  %v9388_v48 = vpop.eup %6033  ;;  %v3614_v42 = vmul.f32 2.0, %v9343_v32  ;;  %v1600_v12 = vpop.f32.mrb[81].mxu1  ;;  %v4148_v29 = vld [vmem:[#allocation11 + $0xa0] sm:$0xff]  ;;  %v11411_v34 = vld [vmem:[#allocation26_spill] sm:$0xff] }
 0x352   : > { %11404 = vst [vmem:[#allocation110_spill] sm:$0xff] %v9376_v10  ;;  %v3742_v56 = vadd.f32 6.5025, %v3700_v43  ;;  %v9391_v49 = vmul.f32 %v1598_v45, %v1598_v45  ;;  %v11408_v10 = vld [vmem:[#allocation132_spill] sm:$0xff]  ;;  %3004 = vmatmul.mubr.f32.gmra.mrb[186].mxu1 %v2751_v60  ;;  %v6036_v54 = vpop.eup %6035  ;;  %v3615_v24 = vmul.f32 2.0, %v9348_v58  ;;  %v9397_v7 = vmul.f32 %v1600_v12, %v1600_v12  ;;  %v2757_v39 = vpop.f32.mrb[188].mxu0 }
 0x353   : > { %11406 = vst [vmem:[#allocation113_spill] sm:$0xff] %v9386_v30  ;;  %v9394_v15 = vmul.f32 %v1598_v45, %v11408_v10  ;;  %v3743_v59 = vadd.f32 6.5025, %v3701_v23  ;;  %v9400_v36 = vmul.f32 %v1600_v12, %v11411_v34  ;;  %5791 = vmatpush1.bf16.msra.mxu1 %v9386_v30  ;;  %v4149_v43 = vld [vmem:[#allocation11 + $0xa8] sm:$0xff]  ;;  %v9403_v32 = vmul.f32 %v6036_v54, %v3653_v28  ;;  %v11414_v60 = vld [vmem:[#allocation86_spill] sm:$0xff]  ;;  %v2759_v41 = vpop.f32.mrb[189].mxu0 }
 0x354   : > { %11407 = vst [vmem:[#allocation118_spill] sm:$0xff] %v9391_v49  ;;  %11410 = vst [vmem:[#allocation125_spill] sm:$0xff] %v9397_v7  ;;  %v3616_v10 = vmul.f32 2.0, %v9366_v27  ;;  %6047 = vrcp.f32 %v3742_v56  ;;  %v3702_v45 = vadd.f32 %v9391_v49, %v11414_v60  ;;  %5792 = vmatprep.subr.bf16.mxu1 %v11338_v33  ;;  %v3617_v23 = vmul.f32 2.0, %v9371_v22  ;;  %v11415_v12 = vld [vmem:[#allocation87_spill] sm:$0xff]  ;;  %v1604_v58 = vpop.f32.mrb[82].mxu1  ;;  %5220 = vmatprep.mubr.msk.f32.mxu1 %vm655_vm0, %v2759_v41 }
 0x355   : > { %11409 = vst [vmem:[#allocation121_spill] sm:$0xff] %v9394_v15  ;;  %11412 = vst [vmem:[#allocation129_spill] sm:$0xff] %v9400_v36  ;;  %6049 = vrcp.f32 %v3743_v59  ;;  %v3703_v34 = vadd.f32 %v9397_v7, %v11415_v12  ;;  %v9413_v28 = vpack.c.bf16 %v4149_v43, %v4148_v29  ;;  %v3656_v54 = vadd.f32 6.5025, %v3614_v42  ;;  %v1606_v30 = vpop.f32.mrb[83].mxu1  ;;  %v2763_v41 = vpop.f32.mrb[190].mxu0 }
 0x356   : > { %11413 = vst [vmem:[#allocation134_spill] sm:$0xff] %v9403_v32  ;;  %v3744_v27 = vadd.f32 6.5025, %v3702_v45  ;;  %v9415_v56 = vmul.f32 %v1604_v58, %v1604_v58  ;;  %v11418_v32 = vld [vmem:[#allocation83_spill] sm:$0xff]  ;;  %3010 = vmatmul.mubr.f32.gmra.mrb[188].mxu1 %v2757_v39  ;;  %v6038_v60 = vpop.eup %6037  ;;  %v3657_v22 = vadd.f32 6.5025, %v3615_v24  ;;  %v9420_v19 = vmul.f32 %v1606_v30, %v1606_v30 }
 0x357   : > { %11416 = vst [vmem:[#allocation137_spill] sm:$0xff] %v9413_v28  ;;  %v9418_v49 = vmul.f32 %v1604_v58, %v11418_v32  ;;  %v3745_v59 = vadd.f32 6.5025, %v3703_v34  ;;  %v9423_v7 = vmul.f32 %v1606_v30, %v8790_v51  ;;  %5794 = vmatpush1.bf16.msra.mxu1 %v9413_v28  ;;  %v6040_v42 = vpop.eup %6039  ;;  %v9426_v29 = vmul.f32 %v6038_v60, %v3655_v62  ;;  %v11423_v32 = vld [vmem:[#allocation94_spill] sm:$0xff]  ;;  %v2765_v39 = vpop.f32.mrb[191].mxu0  ;;  %v11424_v34 = vld [vmem:[#allocation120_spill] sm:$0xff] }
 0x358   : > { %11417 = vst [vmem:[#allocation140_spill] sm:$0xff] %v9415_v56  ;;  %11420 = vst [vmem:[#allocation146_spill] sm:$0xff] %v9420_v19  ;;  %v3658_v43 = vadd.f32 6.5025, %v3616_v10  ;;  %6051 = vrcp.f32 %v3744_v27  ;;  %v3704_v58 = vadd.f32 %v9415_v56, %v11423_v32  ;;  %5839 = vmatprep.subr.bf16.mxu1 %v11338_v33  ;;  %v6042_v24 = vpop.eup %6041  ;;  %v3659_v45 = vadd.f32 6.5025, %v3617_v23  ;;  %5221 = vmatprep.mubr.msk.f32.mxu1 %vm655_vm0, %v2765_v39 }
 0x359   : > { %11419 = vst [vmem:[#allocation144_spill] sm:$0xff] %v9418_v49  ;;  %11421 = vst [vmem:[#allocation22_spill] sm:$0xff] %v9423_v7  ;;  %6053 = vrcp.f32 %v3745_v59  ;;  %v3705_v51 = vadd.f32 %v9420_v19, %v11424_v34  ;;  %v9433_v30 = vpop.f32.mrb[84].mxu1  ;;  %v9438_v62 = vmul.f32 %v9181_v4, %v9108_v2  ;;  %v3618_v10 = vmul.f32 2.0, %v9394_v15  ;;  %v11428_v2 = vld [vmem:[#allocation28_spill] sm:$0xff] }
 0x35a   : > { %11422 = vst [vmem:[#allocation71_spill] sm:$0xff] %v9426_v29  ;;  %v6044_v27 = vpop.eup %6043  ;;  %v3746_v60 = vadd.f32 6.5025, %v3704_v58  ;;  %v11426_v29 = vld [vmem:[#allocation77_spill] sm:$0xff]  ;;  %v9443_v23 = vpop.f32.mrb[85].mxu1  ;;  %3016 = vmatmul.mubr.f32.gmra.mrb[190].mxu1 %v2763_v41  ;;  %v9447_v59 = vmul.f32 %v9221_v8, %v9144_v61  ;;  %v3619_v39 = vmul.f32 2.0, %v9400_v36  ;;  %v9454_v58 = vmul.f32 %v9272_v53, %v9167_v3 }
 0x35b   : > { %11425 = vst [vmem:[#allocation24_spill] sm:$0xff] %v9438_v62  ;;  %v6046_v19 = vpop.eup %6045  ;;  %v3747_v28 = vadd.f32 6.5025, %v3705_v51  ;;  %v2769_v62 = vpop.f32.mrb[192].mxu0  ;;  %v9460_v61 = vmul.f32 %v9279_v55, %v9211_v52  ;;  %v9464_v8 = vmul.f32 %v9323_v25, %v9216_v21  ;;  %v9471_v3 = vmul.f32 %v9336_v0, %v9258_v47  ;;  %v11436_v21 = vld [vmem:[#allocation78_spill] sm:$0xff] }
 0x35c   : > { %11427 = vst [vmem:[#allocation187_spill] sm:$0xff] %v9447_v59  ;;  %11429 = vst [vmem:[#allocation72_spill] sm:$0xff] %v9454_v58  ;;  %v9456_v56 = vmul.f32 %v6046_v19, %v3657_v22  ;;  %6055 = vrcp.f32 %v3746_v60  ;;  %v2771_v41 = vpop.f32.mrb[193].mxu0  ;;  %v9466_v51 = vpop.f32.mrb[86].mxu1  ;;  %v9475_v53 = vmul.f32 %v9374_v20, %v9274_v57  ;;  %v9479_v52 = vmul.f32 %v9388_v48, %v9315_v46  ;;  %v11440_v20 = vld [vmem:[#allocation150_spill] sm:$0xff]  ;;  %v11456_v58 = vld [vmem:[#allocation115_spill] sm:$0xff] }
 0x35d   : > { %11431 = vst [vmem:[#allocation143_spill] sm:$0xff] %v9460_v61  ;;  %11432 = vst [vmem:[#allocation160_spill] sm:$0xff] %v9464_v8  ;;  %6057 = vrcp.f32 %v3747_v28  ;;  %5222 = vmatprep.mubr.msk.f32.mxu1 %vm655_vm0, %v2771_v41  ;;  %v9483_v25 = vpop.f32.mrb[87].mxu1  ;;  %v9486_v22 = vmul.f32 %v6040_v42, %v9338_v18  ;;  %v9489_v47 = vmul.f32 %v6042_v24, %v9378_v13  ;;  %v2775_v48 = vpop.f32.mrb[194].mxu0  ;;  %v3660_v19 = vadd.f32 6.5025, %v3618_v10 }
 0x35e   : > { %11430 = vst [vmem:[#allocation32_spill] sm:$0xff] %v9456_v56  ;;  %11433 = vst [vmem:[#allocation162_spill] sm:$0xff] %v9471_v3  ;;  %v6048_v55 = vpop.eup %6047  ;;  %3022 = vmatmul.mubr.f32.gmra.mrb[192].mxu1 %v2769_v62  ;;  %v9491_v0 = vmul.f32 %v6044_v27, %v3656_v54  ;;  %v2777_v41 = vpop.f32.mrb[195].mxu0  ;;  %v3620_v62 = vmul.f32 2.0, %v9418_v49  ;;  %v3661_v54 = vadd.f32 6.5025, %v3619_v39 }
 0x35f   : > { %11434 = vst [vmem:[#allocation35_spill] sm:$0xff] %v9475_v53  ;;  %11435 = vst [vmem:[#allocation117_spill] sm:$0xff] %v9479_v52  ;;  %v6050_v57 = vpop.eup %6049  ;;  %v9495_v28 = vmul.f32 %v6048_v55, %v3658_v43  ;;  %v9500_v18 = vpop.f32.mrb[88].mxu1  ;;  %5223 = vmatprep.mubr.msk.f32.mxu1 %vm655_vm0, %v2777_v41  ;;  %v3621_v42 = vmul.f32 2.0, %v9423_v7  ;;  %v11443_v24 = vld [vmem:[#allocation152_spill] sm:$0xff]  ;;  %v11490_v12 = vld [vmem:[#allocation137_spill] sm:$0xff] }
 0x360   : > { %11437 = vst [vmem:[#allocation116_spill] sm:$0xff] %v9486_v22  ;;  %11438 = vst [vmem:[#allocation145_spill] sm:$0xff] %v9489_v47  ;;  %v9497_v60 = vmul.f32 %v6050_v57, %v3659_v45  ;;  %v9506_v46 = vpop.f32.mrb[89].mxu1  ;;  %v11444_v45 = vld [vmem:[#allocation154_spill] sm:$0xff]  ;;  %v2781_v55 = vpop.f32.mrb[196].mxu0 }
 0x361   : > { %11439 = vst [vmem:[#allocation147_spill] sm:$0xff] %v9491_v0  ;;  %11441 = vst [vmem:[#allocation133_spill] sm:$0xff] %v9495_v28  ;;  %v2783_v41 = vpop.f32.mrb[197].mxu0  ;;  %v3663_v27 = vadd.f32 6.5025, %v3621_v42  ;;  %v11447_v28 = vld [vmem:[#allocation155_spill] sm:$0xff] }
 0x362   : > { %11442 = vst [vmem:[#allocation132_spill] sm:$0xff] %v9497_v60  ;;  %v6052_v13 = vpop.eup %6051  ;;  %3028 = vmatmul.mubr.f32.gmra.mrb[194].mxu1 %v2775_v48  ;;  %v3662_v60 = vadd.f32 6.5025, %v3620_v62  ;;  %v9514_v39 = vpop.f32.mrb[90].mxu1 }
 0x363   : > { %v6054_v43 = vpop.eup %6053  ;;  %v9510_v57 = vmul.f32 %v6052_v13, %v3660_v19  ;;  %5224 = vmatprep.mubr.msk.f32.mxu1 %vm655_vm0, %v2783_v41  ;;  %v9519_v49 = vpop.f32.mrb[91].mxu1  ;;  %v11449_v19 = vld [vmem:[#allocation31_spill] sm:$0xff] }
 0x364   : > { %v9512_v4 = vmul.f32 %v6054_v43, %v3661_v54  ;;  %v2787_v54 = vpop.f32.mrb[198].mxu0 }
 0x365   : > { %11445 = vst [vmem:[#allocation26_spill] sm:$0xff] %v9510_v57  ;;  %v2789_v43 = vpop.f32.mrb[199].mxu0 }
 0x366   : > { %11446 = vst [vmem:[#allocation83_spill] sm:$0xff] %v9512_v4  ;;  %v6056_v7 = vpop.eup %6055  ;;  %3034 = vmatmul.mubr.f32.gmra.mrb[196].mxu1 %v2781_v55  ;;  %v9527_v4 = vpop.f32.mrb[92].mxu1 }
 0x367   : > { %v6058_v10 = vpop.eup %6057  ;;  %v9521_v56 = vmul.f32 %v6056_v7, %v3662_v60  ;;  %5225 = vmatprep.mubr.msk.f32.mxu1 %vm655_vm0, %v2789_v43  ;;  %v9532_v41 = vpop.f32.mrb[93].mxu1 }
 0x368   : > { %v9525_v62 = vmul.f32 %v6058_v10, %v3663_v27  ;;  %v2793_v60 = vpop.f32.mrb[200].mxu0 }
 0x369   : > { %11448 = vst [vmem:[#allocation77_spill] sm:$0xff] %v9521_v56  ;;  %v2795_v55 = vpop.f32.mrb[201].mxu0 }
 0x36a   : > { %11450 = vst [vmem:[#allocation28_spill] sm:$0xff] %v9525_v62  ;;  %3040 = vmatmul.mubr.f32.gmra.mrb[198].mxu1 %v2787_v54  ;;  %v9536_v13 = vpop.f32.mrb[94].mxu1 }
 0x36b   : > { %5226 = vmatprep.mubr.msk.f32.mxu1 %vm655_vm0, %v2795_v55  ;;  %v9541_v10 = vpop.f32.mrb[95].mxu1  ;;  %v11451_v55 = vld [vmem:[#allocation84_spill] sm:$0xff] }
 0x36c   : > { %v2799_v42 = vpop.f32.mrb[202].mxu0 }
 0x36d   : > { %v2801_v54 = vpop.f32.mrb[203].mxu0 }
 0x36e   : > { %3046 = vmatmul.mubr.f32.gmra.mrb[200].mxu1 %v2793_v60  ;;  %v9545_v48 = vpop.f32.mrb[96].mxu1 }
 0x36f   : > { %5227 = vmatprep.mubr.msk.f32.mxu1 %vm655_vm0, %v2801_v54  ;;  %v9550_v62 = vpop.f32.mrb[97].mxu1 }
 0x370   : > { %v2805_v27 = vpop.f32.mrb[204].mxu0 }
 0x371   : > { %v2807_v60 = vpop.f32.mrb[205].mxu0 }
 0x372   : > { %3052 = vmatmul.mubr.f32.gmra.mrb[202].mxu1 %v2799_v42  ;;  %v9554_v56 = vpop.f32.mrb[98].mxu1 }
 0x373   : > { %5228 = vmatprep.mubr.msk.f32.mxu1 %vm655_vm0, %v2807_v60  ;;  %v9559_v57 = vpop.f32.mrb[99].mxu1  ;;  %v11452_v60 = vld [vmem:[#allocation158_spill] sm:$0xff] }
 0x374   : > { %v2811_v7 = vpop.f32.mrb[206].mxu0 }
 0x375   : > { %v2813_v42 = vpop.f32.mrb[207].mxu0 }
 0x376   : > { %3058 = vmatmul.mubr.f32.gmra.mrb[204].mxu1 %v2805_v27  ;;  %v9563_v36 = vpop.f32.mrb[100].mxu1 }
 0x377   : > { %5229 = vmatprep.mubr.msk.f32.mxu1 %vm655_vm0, %v2813_v42  ;;  %v9568_v15 = vpop.f32.mrb[101].mxu1 }
 0x378   : > { %v2817_v47 = vpop.f32.mrb[208].mxu0 }
 0x379   : > { %v2819_v27 = vpop.f32.mrb[209].mxu0 }
 0x37a   : > { %3064 = vmatmul.mubr.f32.gmra.mrb[206].mxu1 %v2811_v7  ;;  %v9572_v22 = vpop.f32.mrb[102].mxu1 }
 0x37b   : > { %5230 = vmatprep.mubr.msk.f32.mxu1 %vm655_vm0, %v2819_v27  ;;  %v9577_v52 = vpop.f32.mrb[103].mxu1 }
 0x37c   : > { %v4249_v0 = vpop.f32.mrb[210].mxu0 }
 0x37d   : > { %v4251_v7 = vpop.f32.mrb[211].mxu0 }
 0x37e   : > { %3070 = vmatmul.mubr.f32.gmra.mrb[208].mxu1 %v2817_v47  ;;  %v9581_v53 = vpop.f32.mrb[104].mxu1  ;;  %v11453_v47 = vld [vmem:[#allocation100_spill] sm:$0xff] }
 0x37f   : > { %5242 = vmatprep.mubr.msk.f32.mxu1 %vm655_vm0, %v4251_v7  ;;  %v9586_v3 = vpop.f32.mrb[105].mxu1 }
 0x380   : > { %v4255_v54 = vpop.f32.mrb[212].mxu0 }
 0x381   : > { %v4257_v8 = vpop.f32.mrb[213].mxu0 }
 0x382   : > { %4412 = vmatmul.mubr.f32.vlgmr.msra.gmra.mrb[210].mxu1 %v4249_v0  ;;  %v9592_v42 = vpop.f32.mrb[106].mxu1  ;;  %v11460_v0 = vld [vmem:[#allocation138_spill] sm:$0xff] }
 0x383   : > { %5841 = vmatpush1.bf16.msra.mxu1 %v11453_v47  ;;  %5243 = vmatprep.mubr.msk.f32.mxu1 %vm655_vm0, %v4257_v8  ;;  %v9597_v43 = vpop.f32.mrb[107].mxu1  ;;  %v11457_v8 = vld [vmem:[#allocation163_spill] sm:$0xff] }
 0x384   : > { %5842 = vmatprep.subr.bf16.mxu1 %v11338_v33  ;;  %11454 = vst [vmem:[#allocation78_spill] sm:$0xff] %v9597_v43  ;;  %v4261_v27 = vpop.f32.mrb[214].mxu0 }
 0x385   : > { %v4263_v47 = vpop.f32.mrb[215].mxu0 }
 0x386   : > { %4417 = vmatmul.mubr.f32.gmra.mrb[212].mxu1 %v4255_v54  ;;  %v9603_v59 = vpop.f32.mrb[108].mxu1  ;;  %v11462_v54 = vld [vmem:[#allocation167_spill] sm:$0xff] }
 0x387   : > { %5844 = vmatpush1.bf16.msra.mxu1 %v11456_v58  ;;  %5244 = vmatprep.mubr.msk.f32.mxu1 %vm655_vm0, %v4263_v47  ;;  %v9608_v7 = vpop.f32.mrb[109].mxu1 }
 0x388   : > { %5845 = vmatprep.subr.bf16.mxu1 %v11338_v33  ;;  %11458 = vst [vmem:[#allocation150_spill] sm:$0xff] %v9608_v7  ;;  %v4267_v61 = vpop.f32.mrb[216].mxu0 }
 0x389   : > { %v4269_v58 = vpop.f32.mrb[217].mxu0 }
 0x38a   : > { %4422 = vmatmul.mubr.f32.gmra.mrb[214].mxu1 %v4261_v27  ;;  %v9614_v43 = vpop.f32.mrb[110].mxu1 }
 0x38b   : > { %5847 = vmatpush1.bf16.msra.mxu1 %v11460_v0  ;;  %5245 = vmatprep.mubr.msk.f32.mxu1 %vm655_vm0, %v4269_v58  ;;  %v9619_v38 = vpop.f32.mrb[111].mxu1 }
 0x38c   : > { %5848 = vmatprep.subr.bf16.mxu1 %v11338_v33  ;;  %11461 = vst [vmem:[#allocation152_spill] sm:$0xff] %v9619_v38  ;;  %v4273_v16 = vpop.f32.mrb[218].mxu0 }
 0x38d   : > { %v4275_v0 = vpop.f32.mrb[219].mxu0 }
 0x38e   : > { %4427 = vmatmul.mubr.f32.gmra.mrb[216].mxu1 %v4267_v61  ;;  %v9625_v7 = vpop.f32.mrb[112].mxu1  ;;  %v11470_v61 = vld [vmem:[#allocation45_spill] sm:$0xff] }
 0x38f   : > { %5850 = vmatpush1.bf16.msra.mxu1 %v11462_v54  ;;  %11463 = vst [vmem:[#allocation154_spill] sm:$0xff] %v9625_v7  ;;  %5246 = vmatprep.mubr.msk.f32.mxu1 %vm655_vm0, %v4275_v0  ;;  %v9630_v47 = vpop.f32.mrb[113].mxu1 }
 0x390   : > { %5851 = vmatprep.subr.bf16.mxu1 %v11338_v33  ;;  %11464 = vst [vmem:[#allocation155_spill] sm:$0xff] %v9630_v47  ;;  %v4279_v27 = vpop.f32.mrb[220].mxu0 }
 0x391   : > { %v4281_v54 = vpop.f32.mrb[221].mxu0 }
 0x392   : > { %4432 = vmatmul.mubr.f32.gmra.mrb[218].mxu1 %v4273_v16  ;;  %v9636_v38 = vpop.f32.mrb[114].mxu1  ;;  %v11475_v16 = vld [vmem:[#allocation64_spill] sm:$0xff] }
 0x393   : > { %5853 = vmatpush1.bf16.msra.mxu1 %v11466_v31  ;;  %11467 = vst [vmem:[#allocation31_spill] sm:$0xff] %v9636_v38  ;;  %5247 = vmatprep.mubr.msk.f32.mxu1 %vm655_vm0, %v4281_v54  ;;  %v9641_v58 = vpop.f32.mrb[115].mxu1 }
 0x394   : > { %5854 = vmatprep.subr.bf16.mxu1 %v11338_v33  ;;  %11468 = vst [vmem:[#allocation84_spill] sm:$0xff] %v9641_v58  ;;  %v4285_v35 = vpop.f32.mrb[222].mxu0 }
 0x395   : > { %v4287_v31 = vpop.f32.mrb[223].mxu0 }
 0x396   : > { %4437 = vmatmul.mubr.f32.gmra.mrb[220].mxu1 %v4279_v27  ;;  %v9647_v47 = vpop.f32.mrb[116].mxu1  ;;  %v11480_v27 = vld [vmem:[#allocation183_spill] sm:$0xff] }
 0x397   : > { %5856 = vmatpush1.bf16.msra.mxu1 %v11470_v61  ;;  %11471 = vst [vmem:[#allocation158_spill] sm:$0xff] %v9647_v47  ;;  %5248 = vmatprep.mubr.msk.f32.mxu1 %vm655_vm0, %v4287_v31  ;;  %v9652_v0 = vpop.f32.mrb[117].mxu1 }
 0x398   : > { %5857 = vmatprep.subr.bf16.mxu1 %v11338_v33  ;;  %11473 = vst [vmem:[#allocation100_spill] sm:$0xff] %v9652_v0  ;;  %v4291_v11 = vpop.f32.mrb[224].mxu0 }
 0x399   : > { %v4293_v61 = vpop.f32.mrb[225].mxu0 }
 0x39a   : > { %4442 = vmatmul.mubr.f32.gmra.mrb[222].mxu1 %v4285_v35  ;;  %v9658_v58 = vpop.f32.mrb[118].mxu1  ;;  %v11484_v35 = vld [vmem:[#allocation93_spill] sm:$0xff] }
 0x39b   : > { %5859 = vmatpush1.bf16.msra.mxu1 %v11475_v16  ;;  %11476 = vst [vmem:[#allocation115_spill] sm:$0xff] %v9658_v58  ;;  %5249 = vmatprep.mubr.msk.f32.mxu1 %vm655_vm0, %v4293_v61  ;;  %v9663_v7 = vpop.f32.mrb[119].mxu1 }
 0x39c   : > { %5860 = vmatprep.subr.bf16.mxu1 %v11338_v33  ;;  %11478 = vst [vmem:[#allocation163_spill] sm:$0xff] %v9663_v7  ;;  %v4297_v50 = vpop.f32.mrb[226].mxu0 }
 0x39d   : > { %v4299_v16 = vpop.f32.mrb[227].mxu0 }
 0x39e   : > { %4447 = vmatmul.mubr.f32.gmra.mrb[224].mxu1 %v4291_v11  ;;  %v9669_v0 = vpop.f32.mrb[120].mxu1  ;;  %v11488_v11 = vld [vmem:[#allocation113_spill] sm:$0xff] }
 0x39f   : > { %5862 = vmatpush1.bf16.msra.mxu1 %v11480_v27  ;;  %5250 = vmatprep.mubr.msk.f32.mxu1 %vm655_vm0, %v4299_v16  ;;  %v9674_v38 = vpop.f32.mrb[121].mxu1 }
 0x3a0   : > { %5863 = vmatprep.subr.bf16.mxu1 %v11338_v33  ;;  %11482 = vst [vmem:[#allocation138_spill] sm:$0xff] %v9674_v38  ;;  %v4303_v54 = vpop.f32.mrb[228].mxu0 }
 0x3a1   : > { %v4305_v27 = vpop.f32.mrb[229].mxu0 }
 0x3a2   : > { %4452 = vmatmul.mubr.f32.gmra.mrb[226].mxu1 %v4297_v50  ;;  %v9680_v7 = vpop.f32.mrb[122].mxu1 }
 0x3a3   : > { %5865 = vmatpush1.bf16.msra.mxu1 %v11484_v35  ;;  %11485 = vst [vmem:[#allocation167_spill] sm:$0xff] %v9680_v7  ;;  %5251 = vmatprep.mubr.msk.f32.mxu1 %vm655_vm0, %v4305_v27  ;;  %v9685_v47 = vpop.f32.mrb[123].mxu1 }
 0x3a4   : > { %5866 = vmatprep.subr.bf16.mxu1 %v11338_v33  ;;  %11487 = vst [vmem:[#allocation186_spill] sm:$0xff] %v9685_v47  ;;  %v4309_v31 = vpop.f32.mrb[230].mxu0 }
 0x3a5   : > { %v4311_v35 = vpop.f32.mrb[231].mxu0 }
 0x3a6   : > { %4457 = vmatmul.mubr.f32.gmra.mrb[228].mxu1 %v4303_v54  ;;  %v9691_v38 = vpop.f32.mrb[124].mxu1 }
 0x3a7   : > { %5868 = vmatpush1.bf16.msra.mxu1 %v11488_v11  ;;  %5252 = vmatprep.mubr.msk.f32.mxu1 %vm655_vm0, %v4311_v35  ;;  %v9696_v58 = vpop.f32.mrb[125].mxu1  ;;  %v11492_v35 = vld [vmem:[#allocation40_spill] sm:$0xff] }
 0x3a8   : > { %5869 = vmatprep.subr.bf16.mxu1 %v11338_v33  ;;  %11489 = vst [vmem:[#allocation45_spill] sm:$0xff] %v9696_v58  ;;  %v4545_v50 = vpop.f32.mrb[232].mxu0  ;;  %v11491_v33 = vld [vmem:[#allocation170_spill] sm:$0xff] }
 0x3a9   : > { %v4547_v11 = vpop.f32.mrb[233].mxu0 }
 0x3aa   : > { %4462 = vmatmul.mubr.f32.gmra.mrb[230].mxu1 %v4309_v31  ;;  %v2462_v47 = vpop.f32.mrb[126].mxu1  ;;  %v11493_v31 = vsub.f32 %v9433_v30, %v11426_v29  ;;  %v11497_v29 = vsub.f32 %v9466_v51, %v11436_v21  ;;  %v11501_v51 = vsub.f32 %v9500_v18, %v11443_v24  ;;  %v11505_v18 = vsub.f32 %v9514_v39, %v11447_v28 }
 0x3ab   : > { %5871 = vmatpush1.bf16.msra.mxu1 %v11490_v12  ;;  %5264 = vmatprep.mubr.msk.f32.mxu1 %vm655_vm0, %v4547_v11  ;;  %v3244_v16 = vsub.f32 %v2462_v47, %v11491_v33  ;;  %v2464_v7 = vpop.f32.mrb[127].mxu1  ;;  %v11494_v12 = vsub.f32 %v9443_v23, %v11428_v2  ;;  %v11495_v47 = vld [vmem:[#allocation75_spill] sm:$0xff]  ;;  %v11498_v23 = vsub.f32 %v9483_v25, %v11440_v20 }
 0x3ac   : > { %v3245_v61 = vsub.f32 %v2464_v7, %v11492_v35  ;;  %v4551_v27 = vpop.f32.mrb[234].mxu0  ;;  %v11496_v7 = vld [vmem:[#allocation111_spill] sm:$0xff]  ;;  %v11502_v25 = vsub.f32 %v9506_v46, %v11444_v45  ;;  %v11506_v46 = vsub.f32 %v9519_v49, %v11449_v19  ;;  %v11509_v28 = vsub.f32 %v9527_v4, %v8769_v40 }
 0x3ad   : > { %v9707_v32 = vadd.f32 %v3244_v16, %v11493_v31  ;;  %v4553_v54 = vpop.f32.mrb[235].mxu0  ;;  %v11500_v31 = vld [vmem:[#allocation119_spill] sm:$0xff]  ;;  %v11510_v49 = vsub.f32 %v9532_v41, %v8776_v6  ;;  %v11513_v40 = vsub.f32 %v9536_v13, %v8780_v63  ;;  %v11514_v6 = vsub.f32 %v9541_v10, %v8784_v9 }
 0x3ae   : > { %4708 = vmatmul.mubr.f32.vlgmr.msra.gmra.mrb[232].mxu1 %v4545_v50  ;;  %v9712_v34 = vadd.f32 %v3245_v61, %v11494_v12  ;;  %v2468_v58 = vpop.f32.mrb[128].mxu1  ;;  %v11517_v63 = vsub.f32 %v9545_v48, %v8788_v44  ;;  %v11518_v9 = vsub.f32 %v9550_v62, %v8794_v1  ;;  %v11521_v44 = vsub.f32 %v9554_v56, %v8798_v37 }
 0x3af   : > { %5265 = vmatprep.mubr.msk.f32.mxu1 %vm655_vm0, %v4553_v54  ;;  %v3246_v11 = vsub.f32 %v2468_v58, %v11495_v47  ;;  %v2470_v50 = vpop.f32.mrb[129].mxu1  ;;  %v11499_v58 = vld [vmem:[#allocation95_spill] sm:$0xff]  ;;  %v11522_v1 = vsub.f32 %v9559_v57, %v11312_v5  ;;  %v11525_v37 = vsub.f32 %v9563_v36, %v11451_v55  ;;  %v11526_v5 = vsub.f32 %v9568_v15, %v11452_v60 }
 0x3b0   : > { %v3247_v33 = vsub.f32 %v2470_v50, %v11496_v7  ;;  %v4557_v35 = vpop.f32.mrb[236].mxu0  ;;  %v11503_v7 = vld [vmem:[#allocation101_spill] sm:$0xff]  ;;  %v11529_v36 = vsub.f32 %v9572_v22, %v11328_v26  ;;  %v11530_v15 = vsub.f32 %v9577_v52, %v11329_v17  ;;  %v11533_v26 = vsub.f32 %v9581_v53, %v11337_v14  ;;  %v11541_v14 = vld [vmem:[#allocation92_spill] sm:$0xff] }
 0x3b1   : > { %v9720_v30 = vadd.f32 %v3246_v11, %v11497_v29  ;;  %v4559_v16 = vpop.f32.mrb[237].mxu0  ;;  %v11504_v29 = vld [vmem:[#allocation109_spill] sm:$0xff] }
 0x3b2   : > { %4713 = vmatmul.mubr.f32.gmra.mrb[234].mxu1 %v4551_v27  ;;  %v9725_v2 = vadd.f32 %v3247_v33, %v11498_v23  ;;  %v2474_v61 = vpop.f32.mrb[130].mxu1 }
 0x3b3   : > { %5266 = vmatprep.mubr.msk.f32.mxu1 %vm655_vm0, %v4559_v16  ;;  %v3248_v54 = vsub.f32 %v2474_v61, %v11499_v58  ;;  %v2476_v27 = vpop.f32.mrb[131].mxu1 }
 0x3b4   : > { %v3249_v12 = vsub.f32 %v2476_v27, %v11500_v31  ;;  %v4563_v47 = vpop.f32.mrb[238].mxu0 }
 0x3b5   : > { %v9733_v21 = vadd.f32 %v3248_v54, %v11501_v51  ;;  %v4565_v11 = vpop.f32.mrb[239].mxu0  ;;  %v11507_v54 = vld [vmem:[#allocation126_spill] sm:$0xff] }
 0x3b6   : > { %4718 = vmatmul.mubr.f32.gmra.mrb[236].mxu1 %v4557_v35  ;;  %v9738_v20 = vadd.f32 %v3249_v12, %v11502_v25  ;;  %v2480_v50 = vpop.f32.mrb[132].mxu1  ;;  %v11508_v12 = vld [vmem:[#allocation127_spill] sm:$0xff] }
 0x3b7   : > { %5267 = vmatprep.mubr.msk.f32.mxu1 %vm655_vm0, %v4565_v11  ;;  %v3250_v33 = vsub.f32 %v2480_v50, %v11503_v7  ;;  %v2482_v35 = vpop.f32.mrb[133].mxu1  ;;  %v11511_v50 = vld [vmem:[#allocation135_spill] sm:$0xff] }
 0x3b8   : > { %v3251_v16 = vsub.f32 %v2482_v35, %v11504_v29  ;;  %v4569_v23 = vpop.f32.mrb[240].mxu0  ;;  %v11512_v35 = vld [vmem:[#allocation136_spill] sm:$0xff] }
 0x3b9   : > { %v9746_v24 = vadd.f32 %v3250_v33, %v11505_v18  ;;  %v4571_v61 = vpop.f32.mrb[241].mxu0 }
 0x3ba   : > { %4723 = vmatmul.mubr.f32.gmra.mrb[238].mxu1 %v4563_v47  ;;  %v9751_v45 = vadd.f32 %v3251_v16, %v11506_v46  ;;  %v2486_v58 = vpop.f32.mrb[134].mxu1 }
 0x3bb   : > { %5268 = vmatprep.mubr.msk.f32.mxu1 %vm655_vm0, %v4571_v61  ;;  %v3252_v27 = vsub.f32 %v2486_v58, %v11507_v54  ;;  %v2488_v31 = vpop.f32.mrb[135].mxu1  ;;  %v11515_v61 = vld [vmem:[#allocation131_spill] sm:$0xff]  ;;  %v11516_v54 = vld [vmem:[#allocation141_spill] sm:$0xff] }
 0x3bc   : > { %v3253_v47 = vsub.f32 %v2488_v31, %v11508_v12  ;;  %v4575_v51 = vpop.f32.mrb[242].mxu0 }
 0x3bd   : > { %v9759_v39 = vadd.f32 %v3252_v27, %v11509_v28  ;;  %v4577_v11 = vpop.f32.mrb[243].mxu0 }
 0x3be   : > { %4728 = vmatmul.mubr.f32.gmra.mrb[240].mxu1 %v4569_v23  ;;  %v9764_v19 = vadd.f32 %v3253_v47, %v11510_v49  ;;  %v2492_v25 = vpop.f32.mrb[136].mxu1  ;;  %v11520_v49 = vld [vmem:[#allocation151_spill] sm:$0xff] }
 0x3bf   : > { %5269 = vmatprep.mubr.msk.f32.mxu1 %vm655_vm0, %v4577_v11  ;;  %v3254_v7 = vsub.f32 %v2492_v25, %v11511_v50  ;;  %v2494_v33 = vpop.f32.mrb[137].mxu1 }
 0x3c0   : > { %v3255_v29 = vsub.f32 %v2494_v33, %v11512_v35  ;;  %v4581_v16 = vpop.f32.mrb[244].mxu0  ;;  %v11523_v35 = vld [vmem:[#allocation159_spill] sm:$0xff] }
 0x3c1   : > { %v9772_v4 = vadd.f32 %v3254_v7, %v11513_v40  ;;  %v4583_v23 = vpop.f32.mrb[245].mxu0  ;;  %v11524_v40 = vld [vmem:[#allocation164_spill] sm:$0xff] }
 0x3c2   : > { %4733 = vmatmul.mubr.f32.gmra.mrb[242].mxu1 %v4575_v51  ;;  %v9777_v41 = vadd.f32 %v3255_v29, %v11514_v6  ;;  %v2498_v18 = vpop.f32.mrb[138].mxu1  ;;  %v11519_v51 = vld [vmem:[#allocation139_spill] sm:$0xff] }
 0x3c3   : > { %5270 = vmatprep.mubr.msk.f32.mxu1 %vm655_vm0, %v4583_v23  ;;  %v3256_v46 = vsub.f32 %v2498_v18, %v11515_v61  ;;  %v2500_v58 = vpop.f32.mrb[139].mxu1 }
 0x3c4   : > { %v3257_v27 = vsub.f32 %v2500_v58, %v11516_v54  ;;  %v4587_v31 = vpop.f32.mrb[246].mxu0 }
 0x3c5   : > { %v9785_v13 = vadd.f32 %v3256_v46, %v11517_v63  ;;  %v4589_v12 = vpop.f32.mrb[247].mxu0  ;;  %v11527_v46 = vld [vmem:[#allocation176_spill] sm:$0xff] }
 0x3c6   : > { %4738 = vmatmul.mubr.f32.gmra.mrb[244].mxu1 %v4581_v16  ;;  %v9790_v10 = vadd.f32 %v3257_v27, %v11518_v9  ;;  %v2504_v47 = vpop.f32.mrb[140].mxu1  ;;  %v11528_v27 = vld [vmem:[#allocation180_spill] sm:$0xff] }
 0x3c7   : > { %5271 = vmatprep.mubr.msk.f32.mxu1 %vm655_vm0, %v4589_v12  ;;  %v3258_v28 = vsub.f32 %v2504_v47, %v11519_v51  ;;  %v2506_v11 = vpop.f32.mrb[141].mxu1  ;;  %v11531_v47 = vld [vmem:[#allocation184_spill] sm:$0xff] }
 0x3c8   : > { %v3259_v25 = vsub.f32 %v2506_v11, %v11520_v49  ;;  %v4593_v50 = vpop.f32.mrb[248].mxu0  ;;  %v11532_v11 = vld [vmem:[#allocation124_spill] sm:$0xff] }
 0x3c9   : > { %v9798_v48 = vadd.f32 %v3258_v28, %v11521_v44  ;;  %v4595_v7 = vpop.f32.mrb[249].mxu0  ;;  %v11536_v44 = vld [vmem:[#allocation128_spill] sm:$0xff] }
 0x3ca   : > { %4743 = vmatmul.mubr.f32.gmra.mrb[246].mxu1 %v4587_v31  ;;  %v9803_v62 = vadd.f32 %v3259_v25, %v11522_v1  ;;  %v2510_v33 = vpop.f32.mrb[142].mxu1  ;;  %v11534_v25 = vld [vmem:[#allocation91_spill] sm:$0xff] }
 0x3cb   : > { %5272 = vmatprep.mubr.msk.f32.mxu1 %vm655_vm0, %v4595_v7  ;;  %v3260_v29 = vsub.f32 %v2510_v33, %v11523_v35  ;;  %v2512_v16 = vpop.f32.mrb[143].mxu1  ;;  %v11537_v33 = vld [vmem:[#allocation88_spill] sm:$0xff] }
 0x3cc   : > { %v3261_v23 = vsub.f32 %v2512_v16, %v11524_v40  ;;  %v4599_v6 = vpop.f32.mrb[250].mxu0 }
 0x3cd   : > { %v9811_v56 = vadd.f32 %v3260_v29, %v11525_v37  ;;  %v4601_v18 = vpop.f32.mrb[251].mxu0  ;;  %v11538_v29 = vld [vmem:[#allocation36_spill] sm:$0xff] }
 0x3ce   : > { %4748 = vmatmul.mubr.f32.gmra.mrb[248].mxu1 %v4593_v50  ;;  %v9816_v57 = vadd.f32 %v3261_v23, %v11526_v5  ;;  %v2516_v61 = vpop.f32.mrb[144].mxu1  ;;  %v11535_v50 = vsub.f32 %v9586_v3, %v11534_v25  ;;  %v11539_v16 = vsub.f32 %v9592_v42, %v11538_v29  ;;  %v11540_v23 = vld [vmem:[#allocation78_spill] sm:$0xff]  ;;  %v11559_v29 = vld [vmem:[#allocation172_spill] sm:$0xff] }
 0x3cf   : > { %5273 = vmatprep.mubr.msk.f32.mxu1 %vm655_vm0, %v4601_v18  ;;  %v3262_v58 = vsub.f32 %v2516_v61, %v11527_v46  ;;  %v2518_v54 = vpop.f32.mrb[145].mxu1  ;;  %v11542_v53 = vsub.f32 %v11540_v23, %v11541_v14  ;;  %v11543_v3 = vld [vmem:[#allocation102_spill] sm:$0xff]  ;;  %v11544_v61 = vld [vmem:[#allocation23_spill] sm:$0xff] }
 0x3d0   : > { %v3263_v31 = vsub.f32 %v2518_v54, %v11528_v27  ;;  %v4605_v63 = vpop.f32.mrb[252].mxu0  ;;  %v11546_v27 = vld [vmem:[#allocation150_spill] sm:$0xff]  ;;  %v11561_v14 = vld [vmem:[#allocation155_spill] sm:$0xff] }
 0x3d1   : > { %v9824_v55 = vadd.f32 %v3262_v58, %v11529_v36  ;;  %v4607_v12 = vpop.f32.mrb[253].mxu0  ;;  %v11545_v58 = vsub.f32 %v9603_v59, %v11457_v8  ;;  %v11547_v42 = vld [vmem:[#allocation166_spill] sm:$0xff]  ;;  %v11554_v59 = vld [vmem:[#allocation97_spill] sm:$0xff] }
 0x3d2   : > { %4753 = vmatmul.mubr.f32.gmra.mrb[250].mxu1 %v4599_v6  ;;  %v9829_v60 = vadd.f32 %v3263_v31, %v11530_v15  ;;  %v2522_v9 = vpop.f32.mrb[146].mxu1  ;;  %v11548_v31 = vsub.f32 %v11546_v27, %v11547_v42  ;;  %v11566_v27 = vld [vmem:[#allocation31_spill] sm:$0xff] }
 0x3d3   : > { %5274 = vmatprep.mubr.msk.f32.mxu1 %vm655_vm0, %v4607_v12  ;;  %v3264_v51 = vsub.f32 %v2522_v9, %v11531_v47  ;;  %v2524_v28 = vpop.f32.mrb[147].mxu1  ;;  %v11549_v12 = vld [vmem:[#allocation29_spill] sm:$0xff]  ;;  %v11567_v42 = vld [vmem:[#allocation43_spill] sm:$0xff] }
 0x3d4   : > { %v3265_v49 = vsub.f32 %v2524_v28, %v11532_v11  ;;  %v11550_v47 = vld [vmem:[#allocation33_spill] sm:$0xff]  ;;  %v11551_v28 = vld [vmem:[#allocation168_spill] sm:$0xff] }
 0x3d5   : > { %v9837_v22 = vadd.f32 %v3264_v51, %v11533_v26  ;;  %v11552_v11 = vsub.f32 %v9614_v43, %v11551_v28  ;;  %v11553_v26 = vld [vmem:[#allocation152_spill] sm:$0xff]  ;;  %v11562_v43 = vld [vmem:[#allocation174_spill] sm:$0xff]  ;;  %v11572_v28 = vld [vmem:[#allocation73_spill] sm:$0xff] }
 0x3d6   : > { %4758 = vmatmul.mubr.f32.gmra.mrb[252].mxu1 %v4605_v63  ;;  %v9842_v17 = vadd.f32 %v3265_v49, %v11535_v50  ;;  %v2528_v52 = vpop.f32.mrb[148].mxu1  ;;  %v11555_v8 = vsub.f32 %v11553_v26, %v11554_v59  ;;  %v3454_v59 = vadd.f32 58.5225, %v9707_v32  ;;  %v11580_v32 = vld [vmem:[#allocation76_spill] sm:$0xff] }
 0x3d7   : > { %v3266_v7 = vsub.f32 %v2528_v52, %v11536_v44  ;;  %v2530_v1 = vpop.f32.mrb[149].mxu1  ;;  %v11556_v52 = vld [vmem:[#allocation41_spill] sm:$0xff] }
 0x3d8   : > { %v3267_v35 = vsub.f32 %v2530_v1, %v11537_v33  ;;  %v11557_v1 = vld [vmem:[#allocation46_spill] sm:$0xff]  ;;  %6059 = vrcp.f32 %v3454_v59  ;;  %v3462_v59 = vadd.f32 58.5225, %v9759_v39  ;;  %v3465_v39 = vadd.f32 58.5225, %v9777_v41 }
 0x3d9   : > { %v9849_v40 = vadd.f32 %v3266_v7, %v11539_v16  ;;  %v3468_v41 = vadd.f32 58.5225, %v9798_v48 }
 0x3da   : > { %v9854_v6 = vadd.f32 %v3267_v35, %v11542_v53  ;;  %v2534_v37 = vpop.f32.mrb[150].mxu1  ;;  %v11558_v35 = vld [vmem:[#allocation154_spill] sm:$0xff]  ;;  %v11563_v53 = vsub.f32 %v11561_v14, %v11562_v43 }
 0x3db   : > { %v3268_v18 = vsub.f32 %v2534_v37, %v11543_v3  ;;  %v2536_v5 = vpop.f32.mrb[151].mxu1  ;;  %v11560_v16 = vsub.f32 %v11558_v35, %v11559_v29  ;;  %v3456_v35 = vadd.f32 58.5225, %v9720_v30  ;;  %v11577_v29 = vld [vmem:[#allocation100_spill] sm:$0xff]  ;;  %v11582_v30 = vld [vmem:[#allocation115_spill] sm:$0xff] }
 0x3dc   : > { %v3269_v46 = vsub.f32 %v2536_v5, %v11544_v61 }
 0x3dd   : > { %v9861_v54 = vadd.f32 %v3268_v18, %v11545_v58  ;;  %v11564_v18 = vld [vmem:[#allocation53_spill] sm:$0xff] }
 0x3de   : > { %v9866_v63 = vadd.f32 %v3269_v46, %v11548_v31  ;;  %v11565_v46 = vld [vmem:[#allocation58_spill] sm:$0xff]  ;;  %v11568_v31 = vsub.f32 %v11566_v27, %v11567_v42 }
 0x3df   : > { %v11583_v27 = vld [vmem:[#allocation74_spill] sm:$0xff] }
 0x3e0   : > { %v2540_v36 = vpop.f32.mrb[152].mxu1  ;;  %v11584_v42 = vsub.f32 %v11582_v30, %v11583_v27  ;;  %v11600_v30 = vld [vmem:[#allocation186_spill] sm:$0xff]  ;;  %v11601_v27 = vld [vmem:[#allocation87_spill] sm:$0xff] }
 0x3e1   : > { %v3270_v15 = vsub.f32 %v2540_v36, %v11549_v12  ;;  %v2542_v9 = vpop.f32.mrb[153].mxu1  ;;  %v11569_v12 = vld [vmem:[#allocation84_spill] sm:$0xff] }
 0x3e2   : > { %v3271_v51 = vsub.f32 %v2542_v9, %v11550_v47 }
 0x3e3   : > { %v9873_v49 = vadd.f32 %v3270_v15, %v11552_v11  ;;  %v11570_v15 = vld [vmem:[#allocation105_spill] sm:$0xff] }
 0x3e4   : > { %v9878_v25 = vadd.f32 %v3271_v51, %v11555_v8  ;;  %v2546_v50 = vpop.f32.mrb[154].mxu1  ;;  %v11571_v9 = vsub.f32 %v11569_v12, %v11570_v15  ;;  %v11573_v8 = vld [vmem:[#allocation173_spill] sm:$0xff]  ;;  %v3460_v12 = vadd.f32 58.5225, %v9746_v24  ;;  %v3463_v24 = vadd.f32 58.5225, %v9764_v19 }
 0x3e5   : > { %v3272_v44 = vsub.f32 %v2546_v50, %v11556_v52  ;;  %v2548_v7 = vpop.f32.mrb[155].mxu1  ;;  %v3455_v52 = vadd.f32 58.5225, %v9712_v34  ;;  %v3458_v34 = vadd.f32 58.5225, %v9733_v21  ;;  %v11586_v15 = vld [vmem:[#allocation81_spill] sm:$0xff] }
 0x3e6   : > { %v3273_v33 = vsub.f32 %v2548_v7, %v11557_v1  ;;  %v11575_v7 = vld [vmem:[#allocation44_spill] sm:$0xff]  ;;  %v3461_v21 = vadd.f32 58.5225, %v9751_v45  ;;  %v11592_v45 = vld [vmem:[#allocation138_spill] sm:$0xff] }
 0x3e7   : > { %v9885_v23 = vadd.f32 %v3272_v44, %v11560_v16  ;;  %v11574_v44 = vld [vmem:[#allocation158_spill] sm:$0xff]  ;;  %6061 = vrcp.f32 %v3455_v52  ;;  %v11590_v52 = vld [vmem:[#allocation47_spill] sm:$0xff] }
 0x3e8   : > { %v9890_v37 = vadd.f32 %v3273_v33, %v11563_v53  ;;  %v2552_v3 = vpop.f32.mrb[156].mxu1  ;;  %v11576_v1 = vsub.f32 %v11574_v44, %v11575_v7  ;;  %v11578_v16 = vld [vmem:[#allocation106_spill] sm:$0xff]  ;;  %6063 = vrcp.f32 %v3456_v35  ;;  %v11591_v44 = vsub.f32 %v9669_v0, %v11590_v52  ;;  %v11593_v35 = vld [vmem:[#allocation112_spill] sm:$0xff] }
 0x3e9   : > { %v3274_v5 = vsub.f32 %v2552_v3, %v11564_v18  ;;  %v2554_v61 = vpop.f32.mrb[157].mxu1  ;;  %v11579_v14 = vsub.f32 %v11577_v29, %v11578_v16  ;;  %v3457_v3 = vadd.f32 58.5225, %v9725_v2  ;;  %v11585_v2 = vld [vmem:[#allocation163_spill] sm:$0xff]  ;;  %v11594_v29 = vsub.f32 %v11592_v45, %v11593_v35 }
 0x3ea   : > { %v3275_v58 = vsub.f32 %v2554_v61, %v11565_v46  ;;  %v11581_v61 = vld [vmem:[#allocation82_spill] sm:$0xff]  ;;  %v3466_v0 = vadd.f32 58.5225, %v9785_v13  ;;  %v3472_v52 = vadd.f32 58.5225, %v9824_v55 }
 0x3eb   : > { %v9897_v36 = vadd.f32 %v3274_v5, %v11568_v31  ;;  %6065 = vrcp.f32 %v3457_v3  ;;  %v11611_v55 = vld [vmem:[#allocation98_spill] sm:$0xff] }
 0x3ec   : > { %v9902_v47 = vadd.f32 %v3275_v58, %v11571_v9  ;;  %v2558_v51 = vpop.f32.mrb[158].mxu1  ;;  %v3459_v58 = vadd.f32 58.5225, %v9738_v20  ;;  %v11587_v9 = vsub.f32 %v11585_v2, %v11586_v15  ;;  %6067 = vrcp.f32 %v3458_v34  ;;  %v11598_v34 = vld [vmem:[#allocation86_spill] sm:$0xff] }
 0x3ed   : > { %v3276_v11 = vsub.f32 %v2558_v51, %v11572_v28  ;;  %v2560_v26 = vpop.f32.mrb[159].mxu1  ;;  %v3469_v15 = vadd.f32 58.5225, %v9803_v62 }
 0x3ee   : > { %v3277_v50 = vsub.f32 %v2560_v26, %v11573_v8  ;;  %v11589_v8 = vld [vmem:[#allocation104_spill] sm:$0xff]  ;;  %6069 = vrcp.f32 %v3459_v58  ;;  %v6060_v58 = vpop.eup %6059 }
 0x3ef   : > { %v9911_v33 = vadd.f32 %v3276_v11, %v11576_v1  ;;  %v11588_v11 = vld [vmem:[#allocation96_spill] sm:$0xff]  ;;  %6071 = vrcp.f32 %v3460_v12  ;;  %v3464_v1 = vadd.f32 58.5225, %v9772_v4  ;;  %v3467_v4 = vadd.f32 58.5225, %v9790_v10 }
 0x3f0   : > { %v9917_v43 = vadd.f32 %v3277_v50, %v11579_v14  ;;  %v2564_v53 = vpop.f32.mrb[160].mxu1  ;;  %6073 = vrcp.f32 %v3461_v21  ;;  %v11603_v10 = vld [vmem:[#allocation140_spill] sm:$0xff] }
 0x3f1   : > { %v3278_v18 = vsub.f32 %v2564_v53, %v11580_v32  ;;  %v2566_v5 = vpop.f32.mrb[161].mxu1  ;;  %v11595_v53 = vld [vmem:[#allocation118_spill] sm:$0xff]  ;;  %6075 = vrcp.f32 %v3462_v59  ;;  %v11596_v32 = vld [vmem:[#allocation125_spill] sm:$0xff]  ;;  %v6062_v2 = vpop.eup %6061  ;;  %v3471_v59 = vadd.f32 58.5225, %v9816_v57 }
 0x3f2   : > { %v3279_v46 = vsub.f32 %v2566_v5, %v11581_v61  ;;  %6077 = vrcp.f32 %v3463_v24  ;;  %v11597_v5 = vld [vmem:[#allocation167_spill] sm:$0xff]  ;;  %v9969_v21 = vpop.eup %6063  ;;  %v3473_v57 = vadd.f32 58.5225, %v9829_v60  ;;  %v3476_v60 = vadd.f32 58.5225, %v9849_v40 }
 0x3f3   : > { %v9927_v31 = vadd.f32 %v3278_v18, %v11584_v42  ;;  %v11599_v61 = vsub.f32 %v11597_v5, %v11598_v34  ;;  %6079 = vrcp.f32 %v3464_v1  ;;  %v11602_v42 = vsub.f32 %v11600_v30, %v11601_v27  ;;  %v11608_v1 = vld [vmem:[#allocation120_spill] sm:$0xff] }
 0x3f4   : > { %v9933_v51 = vadd.f32 %v3279_v46, %v11587_v9  ;;  %v2570_v28 = vpop.f32.mrb[162].mxu1  ;;  %6081 = vrcp.f32 %v3465_v39  ;;  %v11612_v30 = vld [vmem:[#allocation80_spill] sm:$0xff]  ;;  %v3478_v40 = vadd.f32 58.5225, %v9861_v54 }
 0x3f5   : > { %v3280_v26 = vsub.f32 %v2570_v28, %v11588_v11  ;;  %v2572_v20 = vpop.f32.mrb[163].mxu1  ;;  %6083 = vrcp.f32 %v3466_v0  ;;  %v3470_v11 = vadd.f32 58.5225, %v9811_v56 }
 0x3f6   : > { %v3281_v50 = vsub.f32 %v2572_v20, %v11589_v8  ;;  %v9973_v20 = vpop.eup %6065  ;;  %6085 = vrcp.f32 %v3467_v4  ;;  %v11605_v8 = vld [vmem:[#allocation94_spill] sm:$0xff] }
 0x3f7   : > { %v9943_v7 = vadd.f32 %v3280_v26, %v11591_v44  ;;  %v11604_v26 = vld [vmem:[#allocation146_spill] sm:$0xff]  ;;  %v9981_v62 = vpop.eup %6067  ;;  %6087 = vrcp.f32 %v3468_v41  ;;  %v11607_v44 = vld [vmem:[#allocation45_spill] sm:$0xff] }
 0x3f8   : > { %v9949_v16 = vadd.f32 %v3281_v50, %v11594_v29  ;;  %v2576_v14 = vpop.f32.mrb[164].mxu1  ;;  %v11606_v50 = vsub.f32 %v9691_v38, %v11605_v8  ;;  %v11609_v56 = vsub.f32 %v11607_v44, %v11608_v1  ;;  %v9989_v29 = vpop.eup %6069  ;;  %6089 = vrcp.f32 %v3469_v15  ;;  %v11613_v15 = vld [vmem:[#allocation48_spill] sm:$0xff]  ;;  %v11614_v44 = vld [vmem:[#allocation51_spill] sm:$0xff] }
 0x3f9   : > { %v3282_v3 = vsub.f32 %v2576_v14, %v11595_v53  ;;  %v2578_v19 = vpop.f32.mrb[165].mxu1  ;;  %v11610_v14 = vld [vmem:[#allocation39_spill] sm:$0xff]  ;;  %v9993_v53 = vpop.eup %6071  ;;  %6091 = vrcp.f32 %v3470_v11 }
 0x3fa   : > { %v3283_v18 = vsub.f32 %v2578_v19, %v11596_v32  ;;  %v9997_v0 = vpop.eup %6073  ;;  %6093 = vrcp.f32 %v3471_v59  ;;  %v3475_v32 = vadd.f32 58.5225, %v9842_v17 }
 0x3fb   : > { %v9959_v46 = vadd.f32 %v3282_v3, %v11599_v61  ;;  %v3474_v3 = vadd.f32 58.5225, %v9837_v22  ;;  %v10000_v4 = vpop.eup %6075  ;;  %6095 = vrcp.f32 %v3472_v52  ;;  %v3477_v22 = vadd.f32 58.5225, %v9854_v6 }
 0x3fc   : > { %v9965_v12 = vadd.f32 %v3283_v18, %v11602_v42  ;;  %v2582_v13 = vpop.f32.mrb[166].mxu1  ;;  %v10003_v61 = vpop.eup %6077  ;;  %6097 = vrcp.f32 %v3473_v57  ;;  %v3479_v6 = vadd.f32 58.5225, %v9866_v63  ;;  %v11617_v63 = vld [vmem:[#allocation130_spill] sm:$0xff] }
 0x3fd   : > { %v3284_v9 = vsub.f32 %v2582_v13, %v11603_v10  ;;  %v2584_v28 = vpop.f32.mrb[167].mxu1  ;;  %v10007_v13 = vpop.eup %6079  ;;  %6099 = vrcp.f32 %v3474_v3 }
 0x3fe   : > { %v3285_v48 = vsub.f32 %v2584_v28, %v11604_v26  ;;  %6101 = vrcp.f32 %v3475_v32 }
 0x3ff   : > { %v9979_v24 = vadd.f32 %v3284_v9, %v11606_v50  ;;  %v10010_v9 = vpop.eup %6081  ;;  %6103 = vrcp.f32 %v3476_v60 }
 0x400   : > { %v9987_v45 = vadd.f32 %v3285_v48, %v11609_v56  ;;  %v2951_v35 = vpop.f32.mrb[168].mxu1  ;;  %v10013_v26 = vpop.eup %6083  ;;  %6105 = vrcp.f32 %v3477_v22 }
 0x401   : > { %v3286_v38 = vsub.f32 %v2951_v35, %v11610_v14  ;;  %v2953_v39 = vpop.f32.mrb[169].mxu1  ;;  %v10016_v50 = vpop.eup %6085  ;;  %v11615_v35 = vld [vmem:[#allocation60_spill] sm:$0xff]  ;;  %6107 = vrcp.f32 %v3478_v40 }
 0x402   : > { %v3287_v19 = vsub.f32 %v2953_v39, %v11611_v55  ;;  %v10020_v54 = vpop.eup %6087  ;;  %v11616_v14 = vld [vmem:[#allocation52_spill] sm:$0xff]  ;;  %6109 = vrcp.f32 %v3479_v6 }
 0x403   : > { %v3328_v18 = vmul.f32 2.0, %v3286_v38  ;;  %v10025_v55 = vpop.eup %6089 }
 0x404   : > { %v3329_v5 = vmul.f32 2.0, %v3287_v19  ;;  %v2957_v34 = vpop.f32.mrb[170].mxu1 }
 0x405   : > { %v3370_v41 = vadd.f32 58.5225, %v3328_v18  ;;  %v3288_v27 = vsub.f32 %v2957_v34, %v11612_v30  ;;  %v2959_v42 = vpop.f32.mrb[171].mxu1  ;;  %v10028_v18 = vpop.eup %6091 }
 0x406   : > { %v3371_v17 = vadd.f32 58.5225, %v3329_v5  ;;  %v3289_v10 = vsub.f32 %v2959_v42, %v11613_v15 }
 0x407   : > { %v3330_v28 = vmul.f32 2.0, %v3288_v27  ;;  %v3497_v11 = vmul.f32 %v6060_v58, %v3370_v41  ;;  %v10032_v41 = vpop.eup %6093  ;;  %v11618_v27 = vld [vmem:[#allocation108_spill] sm:$0xff] }
 0x408   : > { %v3331_v48 = vmul.f32 2.0, %v3289_v10  ;;  %v2963_v59 = vpop.f32.mrb[172].mxu1  ;;  %v3499_v8 = vmul.f32 %v6062_v2, %v3371_v17  ;;  %v11619_v10 = vld [vmem:[#allocation157_spill] sm:$0xff] }
 0x409   : > { %v3372_v52 = vadd.f32 58.5225, %v3330_v28  ;;  %v3290_v1 = vsub.f32 %v2963_v59, %v11614_v44  ;;  %v2965_v56 = vpop.f32.mrb[173].mxu1  ;;  %v3832_v57 = vmul.f32 %v11615_v35, %v3497_v11 }
 0x40a   : > { %v3373_v58 = vadd.f32 58.5225, %v3331_v48  ;;  %v3291_v38 = vsub.f32 %v2965_v56, %v11616_v14  ;;  %v3992_v39 = vsel %vm3874_vm1, %v3499_v8, 0.0  ;;  %v3833_v3 = vmul.f32 %v11617_v63, %v3499_v8  ;;  %v11621_v48 = vld [vmem:[#allocation123_spill] sm:$0xff] }
 0x40b   : > { %v3332_v2 = vmul.f32 2.0, %v3290_v1  ;;  %v3993_v19 = vadd.f32 %v3992_v39, %v3497_v11  ;;  %v3501_v32 = vmul.f32 %v9969_v21, %v3372_v52  ;;  %v10036_v21 = vpop.eup %6095  ;;  %v11620_v11 = vld [vmem:[#allocation55_spill] sm:$0xff]  ;;  %v3480_v52 = vadd.f32 58.5225, %v9873_v49 }
 0x40c   : > { %v3503_v60 = vmul.f32 %v9973_v20, %v3373_v58  ;;  %v3333_v5 = vmul.f32 2.0, %v3291_v38  ;;  %v2969_v34 = vpop.f32.mrb[174].mxu1  ;;  %v3875_v22 = vsel %vm3874_vm1, %v3833_v3, 0.0  ;;  %v10041_v8 = vpop.eup %6097 }
 0x40d   : > { %v3374_v30 = vadd.f32 58.5225, %v3332_v2  ;;  %v3292_v42 = vsub.f32 %v2969_v34, %v11618_v27  ;;  %3994 = vadd.xlane.f32.xlu1 %v3993_v19  ;;  %v2971_v17 = vpop.f32.mrb[175].mxu1  ;;  %v3876_v15 = vadd.f32 %v3875_v22, %v3832_v57  ;;  %v3834_v40 = vmul.f32 %v11619_v10, %v3501_v32  ;;  %v10045_v35 = vpop.eup %6099  ;;  %v11622_v2 = vld [vmem:[#allocation56_spill] sm:$0xff] }
 0x40e   : > { %v3375_v28 = vadd.f32 58.5225, %v3333_v5  ;;  %v3293_v6 = vsub.f32 %v2971_v17, %v11620_v11  ;;  %v3996_v20 = vsel %vm3874_vm1, %v3503_v60, 0.0  ;;  %v3835_v59 = vmul.f32 %v11621_v48, %v3503_v60  ;;  %v10050_v63 = vpop.eup %6101  ;;  %v11623_v60 = vld [vmem:[#allocation181_spill] sm:$0xff] }
 0x40f   : > { %v3334_v44 = vmul.f32 2.0, %v3292_v42  ;;  %3877 = vadd.xlane.f32.xlu0 %v3876_v15  ;;  %v3997_v1 = vadd.f32 %v3996_v20, %v3501_v32  ;;  %v3505_v56 = vmul.f32 %v9981_v62, %v3374_v30  ;;  %v3481_v57 = vadd.f32 58.5225, %v9878_v25  ;;  %v10054_v5 = vpop.eup %6103  ;;  %v11624_v25 = vld [vmem:[#allocation114_spill] sm:$0xff] }
 0x410   : > { %v3507_v58 = vmul.f32 %v9989_v29, %v3375_v28  ;;  %v3335_v14 = vmul.f32 2.0, %v3293_v6  ;;  %v3879_v39 = vsel %vm3874_vm1, %v3835_v59, 0.0  ;;  %v11625_v30 = vld [vmem:[#allocation142_spill] sm:$0xff]  ;;  %v10059_v42 = vpop.eup %6105  ;;  %6111 = vrcp.f32 %v3480_v52  ;;  %v11626_v59 = vld [vmem:[#allocation61_spill] sm:$0xff] }
 0x411   : > { %v2975_v38 = vpop.f32.mrb[176].mxu1  ;;  %v3376_v3 = vadd.f32 58.5225, %v3334_v44  ;;  %3998 = vadd.xlane.f32.xlu1 %v3997_v1  ;;  %v3880_v32 = vadd.f32 %v3879_v39, %v3834_v40  ;;  %v3836_v62 = vmul.f32 %v11623_v60, %v3505_v56  ;;  %6113 = vrcp.f32 %v3481_v57  ;;  %v10064_v20 = vpop.eup %6107  ;;  %v11628_v57 = vld [vmem:[#allocation122_spill] sm:$0xff]  ;;  %v11629_v39 = vld [vmem:[#allocation156_spill] sm:$0xff] }
 0x412   : > { %v3294_v49 = vsub.f32 %v2975_v38, %v11622_v2  ;;  %v2977_v19 = vpop.f32.mrb[177].mxu1  ;;  %v3377_v34 = vadd.f32 58.5225, %v3335_v14  ;;  %v4000_v29 = vsel %vm3874_vm1, %v3507_v58, 0.0  ;;  %v3837_v27 = vmul.f32 %v11625_v30, %v3507_v58  ;;  %v11627_v58 = vld [vmem:[#allocation89_spill] sm:$0xff]  ;;  %v11630_v30 = vld [vmem:[#allocation66_spill] sm:$0xff] }
 0x413   : > { %v3295_v22 = vsub.f32 %v2977_v19, %v11624_v25  ;;  %3881 = vadd.xlane.f32.xlu0 %v3880_v32  ;;  %v4001_v15 = vadd.f32 %v4000_v29, %v3505_v56  ;;  %v3509_v10 = vmul.f32 %v9993_v53, %v3376_v3  ;;  %v10068_v56 = vpop.eup %6109  ;;  %v3482_v2 = vadd.f32 58.5225, %v9885_v23  ;;  %v11631_v23 = vld [vmem:[#allocation68_spill] sm:$0xff] }
 0x414   : > { %v3336_v17 = vmul.f32 2.0, %v3294_v49  ;;  %v3511_v40 = vmul.f32 %v9997_v0, %v3377_v34  ;;  %v3883_v6 = vsel %vm3874_vm1, %v3837_v27, 0.0  ;;  %v3483_v60 = vadd.f32 58.5225, %v9890_v37  ;;  %v11633_v37 = vld [vmem:[#allocation169_spill] sm:$0xff] }
 0x415   : > { %v3337_v28 = vmul.f32 2.0, %v3295_v22  ;;  %v2981_v11 = vpop.f32.mrb[178].mxu1  ;;  %4002 = vadd.xlane.f32.xlu1 %v4001_v15  ;;  %v3884_v52 = vadd.f32 %v3883_v6, %v3836_v62  ;;  %v3838_v14 = vmul.f32 %v11627_v58, %v3509_v10  ;;  %6115 = vrcp.f32 %v3482_v2 }
 0x416   : > { %v3378_v48 = vadd.f32 58.5225, %v3336_v17  ;;  %v3296_v44 = vsub.f32 %v2981_v11, %v11626_v59  ;;  %v2983_v1 = vpop.f32.mrb[179].mxu1  ;;  %v4004_v0 = vsel %vm3874_vm1, %v3511_v40, 0.0  ;;  %v3839_v3 = vmul.f32 %v11629_v39, %v3511_v40 }
 0x417   : > { %v3379_v53 = vadd.f32 58.5225, %v3337_v28  ;;  %v3297_v38 = vsub.f32 %v2983_v1, %v11628_v57  ;;  %3885 = vadd.xlane.f32.xlu0 %v3884_v52  ;;  %v4005_v19 = vadd.f32 %v4004_v0, %v3509_v10  ;;  %v11632_v10 = vld [vmem:[#allocation67_spill] sm:$0xff]  ;;  %6117 = vrcp.f32 %v3483_v60  ;;  %v11634_v57 = vld [vmem:[#allocation149_spill] sm:$0xff]  ;;  %v11637_v60 = vld [vmem:[#allocation182_spill] sm:$0xff] }
 0x418   : > { %v3338_v49 = vmul.f32 2.0, %v3296_v44  ;;  %v3513_v32 = vmul.f32 %v10000_v4, %v3378_v48  ;;  %v3887_v22 = vsel %vm3874_vm1, %v3839_v3, 0.0  ;;  %v11635_v3 = vld [vmem:[#allocation38_spill] sm:$0xff] }
 0x419   : > { %v3515_v62 = vmul.f32 %v10003_v61, %v3379_v53  ;;  %v3339_v34 = vmul.f32 2.0, %v3297_v38  ;;  %v2987_v25 = vpop.f32.mrb[180].mxu1  ;;  %4006 = vadd.xlane.f32.xlu1 %v4005_v19  ;;  %v3888_v15 = vadd.f32 %v3887_v22, %v3838_v14  ;;  %v11636_v19 = vld [vmem:[#allocation153_spill] sm:$0xff] }
 0x41a   : > { %v3380_v29 = vadd.f32 58.5225, %v3338_v49  ;;  %v3298_v27 = vsub.f32 %v2987_v25, %v11630_v30  ;;  %v2989_v17 = vpop.f32.mrb[181].mxu1  ;;  %v3840_v40 = vmul.f32 %v11631_v23, %v3513_v32  ;;  %v10086_v14 = vpop.eup %6111  ;;  %v3485_v30 = vadd.f32 58.5225, %v9902_v47  ;;  %v11641_v47 = vld [vmem:[#allocation148_spill] sm:$0xff] }
 0x41b   : > { %v3381_v28 = vadd.f32 58.5225, %v3339_v34  ;;  %v3299_v11 = vsub.f32 %v2989_v17, %v11632_v10  ;;  %v4008_v4 = vsel %vm3874_vm1, %v3515_v62, 0.0  ;;  %v3841_v6 = vmul.f32 %v11633_v37, %v3515_v62  ;;  %3889 = vadd.xlane.f32.xlu0 %v3888_v15  ;;  %v10090_v49 = vpop.eup %6113 }
 0x41c   : > { %v3340_v61 = vmul.f32 2.0, %v3298_v27  ;;  %v4009_v48 = vadd.f32 %v4008_v4, %v3513_v32  ;;  %v3517_v59 = vmul.f32 %v10007_v13, %v3380_v29  ;;  %v3484_v34 = vadd.f32 58.5225, %v9897_v36  ;;  %v11639_v36 = vld [vmem:[#allocation70_spill] sm:$0xff] }
 0x41d   : > { %v3519_v44 = vmul.f32 %v10010_v9, %v3381_v28  ;;  %v3341_v1 = vmul.f32 2.0, %v3299_v11  ;;  %v2993_v52 = vpop.f32.mrb[182].mxu1  ;;  %v3891_v58 = vsel %vm3874_vm1, %v3841_v6, 0.0  ;;  %v11638_v28 = vld [vmem:[#allocation161_spill] sm:$0xff] }
 0x41e   : > { %v3382_v53 = vadd.f32 58.5225, %v3340_v61  ;;  %v3300_v38 = vsub.f32 %v2993_v52, %v11634_v57  ;;  %4010 = vadd.xlane.f32.xlu1 %v4009_v48  ;;  %v2995_v0 = vpop.f32.mrb[183].mxu1  ;;  %v3892_v39 = vadd.f32 %v3891_v58, %v3840_v40  ;;  %v3842_v2 = vmul.f32 %v11635_v3, %v3517_v59  ;;  %v11640_v61 = vld [vmem:[#allocation165_spill] sm:$0xff] }
 0x41f   : > { %v3383_v13 = vadd.f32 58.5225, %v3341_v1  ;;  %v3301_v32 = vsub.f32 %v2995_v0, %v11636_v19  ;;  %v4012_v9 = vsel %vm3874_vm1, %v3519_v44, 0.0  ;;  %v3843_v62 = vmul.f32 %v11637_v60, %v3519_v44  ;;  %v11643_v19 = vld [vmem:[#allocation24_spill] sm:$0xff]  ;;  %v11644_v60 = vld [vmem:[#allocation179_spill] sm:$0xff] }
 0x420   : > { %v3342_v25 = vmul.f32 2.0, %v3300_v38  ;;  %3893 = vadd.xlane.f32.xlu0 %v3892_v39  ;;  %v4013_v22 = vadd.f32 %v4012_v9, %v3517_v59  ;;  %v3521_v29 = vmul.f32 %v10013_v26, %v3382_v53  ;;  %6119 = vrcp.f32 %v3484_v34  ;;  %v10108_v38 = vpop.eup %6115  ;;  %v11642_v39 = vld [vmem:[#allocation178_spill] sm:$0xff]  ;;  %v11645_v34 = vld [vmem:[#allocation63_spill] sm:$0xff] }
 0x421   : > { %v3523_v27 = vmul.f32 %v10016_v50, %v3383_v13  ;;  %v3343_v17 = vmul.f32 2.0, %v3301_v32  ;;  %v2999_v15 = vpop.f32.mrb[184].mxu1  ;;  %v3895_v23 = vsel %vm3874_vm1, %v3843_v62, 0.0  ;;  %6121 = vrcp.f32 %v3485_v30  ;;  %v10112_v9 = vpop.eup %6117 }
 0x422   : > { %v3384_v40 = vadd.f32 58.5225, %v3342_v25  ;;  %v3302_v10 = vsub.f32 %v2999_v15, %v11638_v28  ;;  %4014 = vadd.xlane.f32.xlu1 %v4013_v22  ;;  %v3001_v11 = vpop.f32.mrb[185].mxu1  ;;  %v3896_v4 = vadd.f32 %v3895_v23, %v3842_v2  ;;  %v3844_v37 = vmul.f32 %v11639_v36, %v3521_v29 }
 0x423   : > { %v3385_v6 = vadd.f32 58.5225, %v3343_v17  ;;  %v3303_v48 = vsub.f32 %v3001_v11, %v11640_v61  ;;  %v4016_v26 = vsel %vm3874_vm1, %v3523_v27, 0.0  ;;  %v3845_v59 = vmul.f32 %v11641_v47, %v3523_v27  ;;  %v11646_v11 = vld [vmem:[#allocation185_spill] sm:$0xff] }
 0x424   : > { %v3344_v50 = vmul.f32 2.0, %v3302_v10  ;;  %3897 = vadd.xlane.f32.xlu0 %v3896_v4  ;;  %v4017_v44 = vadd.f32 %v4016_v26, %v3521_v29  ;;  %v3525_v1 = vmul.f32 %v10020_v54, %v3384_v40  ;;  %v3486_v22 = vadd.f32 58.5225, %v9911_v33  ;;  %v11647_v33 = vld [vmem:[#allocation187_spill] sm:$0xff] }
 0x425   : > { %v3527_v52 = vmul.f32 %v10025_v55, %v3385_v6  ;;  %v3345_v58 = vmul.f32 2.0, %v3303_v48  ;;  %v3005_v53 = vpop.f32.mrb[186].mxu1  ;;  %v3899_v57 = vsel %vm3874_vm1, %v3845_v59, 0.0  ;;  %v3487_v17 = vadd.f32 58.5225, %v9917_v43  ;;  %v11648_v48 = vld [vmem:[#allocation57_spill] sm:$0xff] }
 0x426   : > { %v3386_v0 = vadd.f32 58.5225, %v3344_v50  ;;  %v3304_v3 = vsub.f32 %v3005_v53, %v11642_v39  ;;  %4018 = vadd.xlane.f32.xlu1 %v4017_v44  ;;  %v3007_v2 = vpop.f32.mrb[187].mxu1  ;;  %v3900_v13 = vadd.f32 %v3899_v57, %v3844_v37  ;;  %v3846_v32 = vmul.f32 %v11643_v19, %v3525_v1  ;;  %v11649_v43 = vld [vmem:[#allocation27_spill] sm:$0xff] }
 0x427   : > { %v3387_v54 = vadd.f32 58.5225, %v3345_v58  ;;  %v3305_v62 = vsub.f32 %v3007_v2, %v11644_v60  ;;  %v4020_v55 = vsel %vm3874_vm1, %v3527_v52, 0.0  ;;  %v3847_v25 = vmul.f32 %v11645_v34, %v3527_v52 }
 0x428   : > { %v3346_v29 = vmul.f32 2.0, %v3304_v3  ;;  %3901 = vadd.xlane.f32.xlu0 %v3900_v13  ;;  %v4021_v30 = vadd.f32 %v4020_v55, %v3525_v1  ;;  %v3529_v27 = vmul.f32 %v10028_v18, %v3386_v0  ;;  %6123 = vrcp.f32 %v3486_v22  ;;  %v11650_v0 = vld [vmem:[#allocation62_spill] sm:$0xff]  ;;  %v11651_v13 = vld [vmem:[#allocation72_spill] sm:$0xff] }
 0x429   : > { %v3531_v15 = vmul.f32 %v10032_v41, %v3387_v54  ;;  %v3347_v23 = vmul.f32 2.0, %v3305_v62  ;;  %v3011_v40 = vpop.f32.mrb[188].mxu1  ;;  %v3903_v28 = vsel %vm3874_vm1, %v3847_v25, 0.0  ;;  %6125 = vrcp.f32 %v3487_v17  ;;  %v11652_v54 = vld [vmem:[#allocation103_spill] sm:$0xff]  ;;  %v11653_v62 = vld [vmem:[#allocation37_spill] sm:$0xff] }
 0x42a   : > { %v3388_v10 = vadd.f32 58.5225, %v3346_v29  ;;  %v3306_v4 = vsub.f32 %v3011_v40, %v11646_v11  ;;  %4022 = vadd.xlane.f32.xlu1 %v4021_v30  ;;  %v3013_v36 = vpop.f32.mrb[189].mxu1  ;;  %v3904_v37 = vadd.f32 %v3903_v28, %v3846_v32  ;;  %v3848_v6 = vmul.f32 %v11647_v33, %v3529_v27  ;;  %v10130_v53 = vpop.eup %6119  ;;  %v11654_v28 = vld [vmem:[#allocation69_spill] sm:$0xff] }
 0x42b   : > { %v3389_v61 = vadd.f32 58.5225, %v3347_v23  ;;  %v3307_v26 = vsub.f32 %v3013_v36, %v11648_v48  ;;  %v4024_v18 = vsel %vm3874_vm1, %v3531_v15, 0.0  ;;  %v3849_v47 = vmul.f32 %v11649_v43, %v3531_v15  ;;  %v10134_v32 = vpop.eup %6121  ;;  %v11656_v33 = vld [vmem:[#allocation25_spill] sm:$0xff] }
 0x42c   : > { %v3348_v41 = vmul.f32 2.0, %v3306_v4  ;;  %3905 = vadd.xlane.f32.xlu0 %v3904_v37  ;;  %v4025_v59 = vadd.f32 %v4024_v18, %v3529_v27  ;;  %v3533_v50 = vmul.f32 %v10036_v21, %v3388_v10  ;;  %v3488_v34 = vadd.f32 58.5225, %v9927_v31  ;;  %v11655_v31 = vld [vmem:[#allocation143_spill] sm:$0xff] }
 0x42d   : > { %v3535_v44 = vmul.f32 %v10041_v8, %v3389_v61  ;;  %v3349_v1 = vmul.f32 2.0, %v3307_v26  ;;  %v3017_v52 = vpop.f32.mrb[190].mxu1  ;;  %v3907_v58 = vsel %vm3874_vm1, %v3849_v47, 0.0  ;;  %v3489_v30 = vadd.f32 58.5225, %v9933_v51  ;;  %v11657_v51 = vld [vmem:[#allocation50_spill] sm:$0xff] }
 0x42e   : > { %v3390_v57 = vadd.f32 58.5225, %v3348_v41  ;;  %v3308_v39 = vsub.f32 %v3017_v52, %v11650_v0  ;;  %4026 = vadd.xlane.f32.xlu1 %v4025_v59  ;;  %v3019_v3 = vpop.f32.mrb[191].mxu1  ;;  %v3908_v2 = vadd.f32 %v3907_v58, %v3848_v6  ;;  %v3850_v19 = vmul.f32 %v11651_v13, %v3533_v50  ;;  %v11661_v13 = vld [vmem:[#allocation65_spill] sm:$0xff] }
 0x42f   : > { %v3391_v21 = vadd.f32 58.5225, %v3349_v1  ;;  %v3309_v60 = vsub.f32 %v3019_v3, %v11652_v54  ;;  %v4028_v8 = vsel %vm3874_vm1, %v3535_v44, 0.0  ;;  %v3851_v55 = vmul.f32 %v11653_v62, %v3535_v44  ;;  %v11658_v44 = vld [vmem:[#allocation30_spill] sm:$0xff] }
 0x430   : > { %v3350_v25 = vmul.f32 2.0, %v3308_v39  ;;  %3909 = vadd.xlane.f32.xlu0 %v3908_v2  ;;  %v4029_v22 = vadd.f32 %v4028_v8, %v3533_v50  ;;  %v3537_v29 = vmul.f32 %v10045_v35, %v3390_v57  ;;  %6127 = vrcp.f32 %v3488_v34  ;;  %v11659_v57 = vld [vmem:[#allocation160_spill] sm:$0xff]  ;;  %v11660_v3 = vld [vmem:[#allocation34_spill] sm:$0xff] }
 0x431   : > { %v3539_v27 = vmul.f32 %v10050_v63, %v3391_v21  ;;  %v3351_v17 = vmul.f32 2.0, %v3309_v60  ;;  %v3023_v15 = vpop.f32.mrb[192].mxu1  ;;  %v3911_v23 = vsel %vm3874_vm1, %v3851_v55, 0.0  ;;  %6129 = vrcp.f32 %v3489_v30  ;;  %v11662_v30 = vld [vmem:[#allocation42_spill] sm:$0xff] }
 0x432   : > { %v3392_v40 = vadd.f32 58.5225, %v3350_v25  ;;  %v3310_v10 = vsub.f32 %v3023_v15, %v11654_v28  ;;  %4030 = vadd.xlane.f32.xlu1 %v4029_v22  ;;  %v3025_v11 = vpop.f32.mrb[193].mxu1  ;;  %v3912_v4 = vadd.f32 %v3911_v23, %v3850_v19  ;;  %v3852_v36 = vmul.f32 %v11655_v31, %v3537_v29  ;;  %v10152_v59 = vpop.eup %6123  ;;  %v11664_v28 = vld [vmem:[#allocation49_spill] sm:$0xff] }
 0x433   : > { %v3393_v37 = vadd.f32 58.5225, %v3351_v17  ;;  %v3311_v6 = vsub.f32 %v3025_v11, %v11656_v33  ;;  %v4032_v35 = vsel %vm3874_vm1, %v3539_v27, 0.0  ;;  %v3853_v61 = vmul.f32 %v11657_v51, %v3539_v27  ;;  %v10156_v39 = vpop.eup %6125 }
 0x434   : > { %v3352_v63 = vmul.f32 2.0, %v3310_v10  ;;  %3913 = vadd.xlane.f32.xlu0 %v3912_v4  ;;  %v4033_v48 = vadd.f32 %v4032_v35, %v3537_v29  ;;  %v3541_v26 = vmul.f32 %v10054_v5, %v3392_v40  ;;  %v3490_v21 = vadd.f32 58.5225, %v9943_v7  ;;  %v11663_v7 = vld [vmem:[#allocation162_spill] sm:$0xff] }
 0x435   : > { %v3543_v18 = vmul.f32 %v10059_v42, %v3393_v37  ;;  %v3353_v43 = vmul.f32 2.0, %v3311_v6  ;;  %v3029_v47 = vpop.f32.mrb[194].mxu1  ;;  %v3915_v41 = vsel %vm3874_vm1, %v3853_v61, 0.0  ;;  %v3491_v62 = vadd.f32 58.5225, %v9949_v16  ;;  %v11665_v16 = vld [vmem:[#allocation177_spill] sm:$0xff] }
 0x436   : > { %v3394_v50 = vadd.f32 58.5225, %v3352_v63  ;;  %v3312_v1 = vsub.f32 %v3029_v47, %v11658_v44  ;;  %4034 = vadd.xlane.f32.xlu1 %v4033_v48  ;;  %v3031_v52 = vpop.f32.mrb[195].mxu1  ;;  %v3916_v58 = vadd.f32 %v3915_v41, %v3852_v36  ;;  %v3854_v0 = vmul.f32 %v11659_v57, %v3541_v26  ;;  %v11666_v61 = vld [vmem:[#allocation54_spill] sm:$0xff]  ;;  %v11668_v41 = vld [vmem:[#allocation59_spill] sm:$0xff] }
 0x437   : > { %v3395_v5 = vadd.f32 58.5225, %v3353_v43  ;;  %v3313_v2 = vsub.f32 %v3031_v52, %v11660_v3  ;;  %v4036_v42 = vsel %vm3874_vm1, %v3543_v18, 0.0  ;;  %v3855_v19 = vmul.f32 %v11661_v13, %v3543_v18  ;;  %v11667_v18 = vld [vmem:[#allocation35_spill] sm:$0xff]  ;;  %v11669_v44 = vld [vmem:[#allocation90_spill] sm:$0xff] }
 0x438   : > { %v3354_v54 = vmul.f32 2.0, %v3312_v1  ;;  %3917 = vadd.xlane.f32.xlu0 %v3916_v58  ;;  %v4037_v60 = vadd.f32 %v4036_v42, %v3541_v26  ;;  %v3545_v8 = vmul.f32 %v10064_v20, %v3394_v50  ;;  %6131 = vrcp.f32 %v3490_v21  ;;  %v11670_v21 = vld [vmem:[#allocation171_spill] sm:$0xff] }
 0x439   : > { %v3547_v55 = vmul.f32 %v10068_v56, %v3395_v5  ;;  %v3355_v34 = vmul.f32 2.0, %v3313_v2  ;;  %v3035_v25 = vpop.f32.mrb[196].mxu1  ;;  %v3919_v22 = vsel %vm3874_vm1, %v3855_v19, 0.0  ;;  %6133 = vrcp.f32 %v3491_v62 }
 0x43a   : > { %v3396_v29 = vadd.f32 58.5225, %v3354_v54  ;;  %v3314_v27 = vsub.f32 %v3035_v25, %v11662_v30  ;;  %4038 = vadd.xlane.f32.xlu1 %v4037_v60  ;;  %v3037_v17 = vpop.f32.mrb[197].mxu1  ;;  %v3920_v15 = vadd.f32 %v3919_v22, %v3854_v0  ;;  %v3856_v23 = vmul.f32 %v11663_v7, %v3545_v8  ;;  %v10174_v35 = vpop.eup %6127 }
 0x43b   : > { %v3397_v40 = vadd.f32 58.5225, %v3355_v34  ;;  %v3315_v10 = vsub.f32 %v3037_v17, %v11664_v28  ;;  %v4040_v20 = vsel %vm3874_vm1, %v3547_v55, 0.0  ;;  %v3857_v11 = vmul.f32 %v11665_v16, %v3547_v55  ;;  %v10178_v47 = vpop.eup %6129  ;;  %v11672_v34 = vld [vmem:[#allocation175_spill] sm:$0xff] }
 0x43c   : > { %v3356_v56 = vmul.f32 2.0, %v3314_v27  ;;  %3921 = vadd.xlane.f32.xlu0 %v3920_v15  ;;  %v4041_v4 = vadd.f32 %v4040_v20, %v3545_v8  ;;  %v3549_v31 = vmul.f32 %v10086_v14, %v3396_v29  ;;  %v3492_v52 = vadd.f32 58.5225, %v9959_v46  ;;  %v11671_v46 = vld [vmem:[#allocation117_spill] sm:$0xff]  ;;  %v11674_v28 = vld [vmem:[#allocation79_spill] sm:$0xff] }
 0x43d   : > { %v3551_v36 = vmul.f32 %v10090_v49, %v3397_v40  ;;  %v3357_v37 = vmul.f32 2.0, %v3315_v10  ;;  %v3041_v33 = vpop.f32.mrb[198].mxu1  ;;  %v3923_v6 = vsel %vm3874_vm1, %v3857_v11, 0.0  ;;  %v3493_v5 = vadd.f32 58.5225, %v9965_v12  ;;  %v11673_v12 = vld [vmem:[#allocation110_spill] sm:$0xff] }
 0x43e   : > { %v3398_v51 = vadd.f32 58.5225, %v3356_v56  ;;  %v3316_v63 = vsub.f32 %v3041_v33, %v11666_v61  ;;  %4042 = vadd.xlane.f32.xlu1 %v4041_v4  ;;  %v3043_v48 = vpop.f32.mrb[199].mxu1  ;;  %v3924_v26 = vadd.f32 %v3923_v6, %v3856_v23  ;;  %v3858_v43 = vmul.f32 %v11667_v18, %v3549_v31  ;;  %v11675_v11 = vld [vmem:[#allocation116_spill] sm:$0xff] }
 0x43f   : > { %v3399_v14 = vadd.f32 58.5225, %v3357_v37  ;;  %v3317_v50 = vsub.f32 %v3043_v48, %v11668_v41  ;;  %v4044_v49 = vsel %vm3874_vm1, %v3551_v36, 0.0  ;;  %v3859_v1 = vmul.f32 %v11669_v44, %v3551_v36  ;;  %v11677_v37 = vld [vmem:[#allocation134_spill] sm:$0xff] }
 0x440   : > { %v3358_v58 = vmul.f32 2.0, %v3316_v63  ;;  %3925 = vadd.xlane.f32.xlu0 %v3924_v26  ;;  %v4045_v57 = vadd.f32 %v4044_v49, %v3549_v31  ;;  %v3553_v0 = vmul.f32 %v10108_v38, %v3398_v51  ;;  %6135 = vrcp.f32 %v3492_v52 }
 0x441   : > { %v3555_v3 = vmul.f32 %v10112_v9, %v3399_v14  ;;  %v3359_v2 = vmul.f32 2.0, %v3317_v50  ;;  %v3047_v42 = vpop.f32.mrb[200].mxu1  ;;  %v3927_v13 = vsel %vm3874_vm1, %v3859_v1, 0.0  ;;  %6137 = vrcp.f32 %v3493_v5  ;;  %v11678_v50 = vld [vmem:[#allocation99_spill] sm:$0xff]  ;;  %v11679_v1 = vld [vmem:[#allocation145_spill] sm:$0xff] }
 0x442   : > { %v3400_v19 = vadd.f32 58.5225, %v3358_v58  ;;  %v3318_v54 = vsub.f32 %v3047_v42, %v11670_v21  ;;  %4046 = vadd.xlane.f32.xlu1 %v4045_v57  ;;  %v3049_v60 = vpop.f32.mrb[201].mxu1  ;;  %v3928_v8 = vadd.f32 %v3927_v13, %v3858_v43  ;;  %v3860_v62 = vmul.f32 %v11671_v46, %v3553_v0  ;;  %v6132_v23 = vpop.eup %6131 }
 0x443   : > { %v3401_v55 = vadd.f32 58.5225, %v3359_v2  ;;  %v3319_v25 = vsub.f32 %v3049_v60, %v11672_v34  ;;  %v4048_v38 = vsel %vm3874_vm1, %v3555_v3, 0.0  ;;  %v3861_v22 = vmul.f32 %v11673_v12, %v3555_v3  ;;  %v6134_v4 = vpop.eup %6133  ;;  %v11683_v34 = vld [vmem:[#allocation147_spill] sm:$0xff] }
 0x444   : > { %v3360_v9 = vmul.f32 2.0, %v3318_v54  ;;  %3929 = vadd.xlane.f32.xlu0 %v3928_v8  ;;  %v4049_v29 = vadd.f32 %v4048_v38, %v3553_v0  ;;  %v3557_v30 = vmul.f32 %v10130_v53, %v3400_v19  ;;  %v11676_v53 = vld [vmem:[#allocation85_spill] sm:$0xff]  ;;  %v3494_v6 = vadd.f32 58.5225, %v9979_v24 }
 0x445   : > { %v3559_v27 = vmul.f32 %v10134_v32, %v3401_v55  ;;  %v3361_v17 = vmul.f32 2.0, %v3319_v25  ;;  %v3053_v15 = vpop.f32.mrb[202].mxu1  ;;  %v3931_v7 = vsel %vm3874_vm1, %v3861_v22, 0.0  ;;  %v3495_v48 = vadd.f32 58.5225, %v9987_v45  ;;  %v11681_v45 = vld [vmem:[#allocation71_spill] sm:$0xff] }
 0x446   : > { %v3402_v40 = vadd.f32 58.5225, %v3360_v9  ;;  %v3320_v10 = vsub.f32 %v3053_v15, %v11674_v28  ;;  %4050 = vadd.xlane.f32.xlu1 %v4049_v29  ;;  %v3055_v20 = vpop.f32.mrb[203].mxu1  ;;  %v3932_v16 = vadd.f32 %v3931_v7, %v3860_v62  ;;  %v3862_v56 = vmul.f32 %v11675_v11, %v3557_v30  ;;  %v11682_v8 = vld [vmem:[#allocation121_spill] sm:$0xff]  ;;  %v11685_v9 = vld [vmem:[#allocation32_spill] sm:$0xff] }
 0x447   : > { %v3403_v31 = vadd.f32 58.5225, %v3361_v17  ;;  %v3321_v36 = vsub.f32 %v3055_v20, %v11676_v53  ;;  %v4052_v32 = vsel %vm3874_vm1, %v3559_v27, 0.0  ;;  %v3863_v33 = vmul.f32 %v11677_v37, %v3559_v27  ;;  %v11686_v20 = vld [vmem:[#allocation144_spill] sm:$0xff] }
 0x448   : > { %v3362_v51 = vmul.f32 2.0, %v3320_v10  ;;  %3933 = vadd.xlane.f32.xlu0 %v3932_v16  ;;  %v4053_v61 = vadd.f32 %v4052_v32, %v3557_v30  ;;  %v3561_v63 = vmul.f32 %v10152_v59, %v3402_v40  ;;  %v11680_v59 = vld [vmem:[#allocation107_spill] sm:$0xff]  ;;  %6139 = vrcp.f32 %v3494_v6  ;;  %v11688_v32 = vld [vmem:[#allocation22_spill] sm:$0xff] }
 0x449   : > { %v3563_v26 = vmul.f32 %v10156_v39, %v3403_v31  ;;  %v3363_v18 = vmul.f32 2.0, %v3321_v36  ;;  %v3059_v43 = vpop.f32.mrb[204].mxu1  ;;  %v3935_v14 = vsel %vm3874_vm1, %v3863_v33, 0.0  ;;  %6141 = vrcp.f32 %v3495_v48  ;;  %v11687_v31 = vld [vmem:[#allocation133_spill] sm:$0xff]  ;;  %v11689_v33 = vld [vmem:[#allocation132_spill] sm:$0xff] }
 0x44a   : > { %v3404_v41 = vadd.f32 58.5225, %v3362_v51  ;;  %v3322_v49 = vsub.f32 %v3059_v43, %v11678_v50  ;;  %4054 = vadd.xlane.f32.xlu1 %v4053_v61  ;;  %v3061_v24 = vpop.f32.mrb[205].mxu1  ;;  %v3936_v44 = vadd.f32 %v3935_v14, %v3862_v56  ;;  %v3864_v52 = vmul.f32 %v11679_v1, %v3561_v63  ;;  %v6136_v54 = vpop.eup %6135  ;;  %v11690_v50 = vld [vmem:[#allocation26_spill] sm:$0xff] }
 0x44b   : > { %v3405_v58 = vadd.f32 58.5225, %v3363_v18  ;;  %v3323_v57 = vsub.f32 %v3061_v24, %v11680_v59  ;;  %v4056_v0 = vsel %vm3874_vm1, %v3563_v26, 0.0  ;;  %v3865_v5 = vmul.f32 %v11681_v45, %v3563_v26  ;;  %v6138_v38 = vpop.eup %6137 }
 0x44c   : > { %v3364_v39 = vmul.f32 2.0, %v3322_v49  ;;  %3937 = vadd.xlane.f32.xlu0 %v3936_v44  ;;  %v4057_v3 = vadd.f32 %v4056_v0, %v3561_v63  ;;  %v3565_v2 = vmul.f32 %v10174_v35, %v3404_v41  ;;  %v11684_v35 = vld [vmem:[#allocation129_spill] sm:$0xff] }
 0x44d   : > { %v3567_v42 = vmul.f32 %v10178_v47, %v3405_v58  ;;  %v3365_v13 = vmul.f32 2.0, %v3323_v57  ;;  %v3065_v19 = vpop.f32.mrb[206].mxu1  ;;  %v3939_v21 = vsel %vm3874_vm1, %v3865_v5, 0.0 }
 0x44e   : > { %v3406_v60 = vadd.f32 58.5225, %v3364_v39  ;;  %v3324_v46 = vsub.f32 %v3065_v19, %v11682_v8  ;;  %4058 = vadd.xlane.f32.xlu1 %v4057_v3  ;;  %v3067_v62 = vpop.f32.mrb[207].mxu1  ;;  %v3940_v55 = vadd.f32 %v3939_v21, %v3864_v52  ;;  %v3866_v25 = vmul.f32 %v11683_v34, %v3565_v2  ;;  %v11691_v52 = vld [vmem:[#allocation83_spill] sm:$0xff]  ;;  %v11693_v21 = vld [vmem:[#allocation28_spill] sm:$0xff] }
 0x44f   : > { %v3407_v12 = vadd.f32 58.5225, %v3365_v13  ;;  %v3325_v22 = vsub.f32 %v3067_v62, %v11684_v35  ;;  %v4060_v47 = vsel %vm3874_vm1, %v3567_v42, 0.0  ;;  %v3867_v29 = vmul.f32 %v11685_v9, %v3567_v42 }
 0x450   : > { %v3366_v30 = vmul.f32 2.0, %v3324_v46  ;;  %3941 = vadd.xlane.f32.xlu0 %v3940_v55  ;;  %v4061_v27 = vadd.f32 %v4060_v47, %v3565_v2  ;;  %v3569_v17 = vmul.f32 %v6132_v23, %v3406_v60  ;;  %v11692_v2 = vld [vmem:[#allocation77_spill] sm:$0xff] }
 0x451   : > { %v3571_v15 = vmul.f32 %v6134_v4, %v3407_v12  ;;  %v3367_v7 = vmul.f32 2.0, %v3325_v22  ;;  %v3071_v40 = vpop.f32.mrb[208].mxu1  ;;  %v3943_v28 = vsel %vm3874_vm1, %v3867_v29, 0.0 }
 0x452   : > { %v3408_v10 = vadd.f32 58.5225, %v3366_v30  ;;  %v3326_v16 = vsub.f32 %v3071_v40, %v11686_v20  ;;  %4062 = vadd.xlane.f32.xlu1 %v4061_v27  ;;  %v3073_v11 = vpop.f32.mrb[209].mxu1  ;;  %v3944_v56 = vadd.f32 %v3943_v28, %v3866_v25  ;;  %v3868_v53 = vmul.f32 %v11687_v31, %v3569_v17  ;;  %v6140_v43 = vpop.eup %6139 }
 0x453   : > { %v3409_v36 = vadd.f32 58.5225, %v3367_v7  ;;  %v3327_v37 = vsub.f32 %v3073_v11, %v11688_v32  ;;  %v4064_v23 = vsel %vm3874_vm1, %v3571_v15, 0.0  ;;  %v3869_v4 = vmul.f32 %v11689_v33, %v3571_v15  ;;  %v6142_v44 = vpop.eup %6141 }
 0x454   : > { %v3573_v6 = vmul.f32 %v6136_v54, %v3408_v10  ;;  %v3368_v51 = vmul.f32 2.0, %v3326_v16  ;;  %3945 = vadd.xlane.f32.xlu0 %v3944_v56  ;;  %v4065_v61 = vadd.f32 %v4064_v23, %v3569_v17 }
 0x455   : > { %v3575_v63 = vmul.f32 %v6138_v38, %v3409_v36  ;;  %v3369_v48 = vmul.f32 2.0, %v3327_v37  ;;  %v3947_v26 = vsel %vm3874_vm1, %v3869_v4, 0.0  ;;  %v4413_v18 = vpop.f32.mrb[210].mxu1 }
 0x456   : > { %v3410_v14 = vadd.f32 58.5225, %v3368_v51  ;;  %4066 = vadd.xlane.f32.xlu1 %v4065_v61  ;;  %v3948_v41 = vadd.f32 %v3947_v26, %v3868_v53  ;;  %v3870_v49 = vmul.f32 %v11690_v50, %v3573_v6  ;;  %4468 = vst.msk [vmem:[%s10237_s26] sm:$0xff] %vm4467_vm2, %v4413_v18  ;;  %v4415_v24 = vpop.f32.mrb[211].mxu1 }
 0x457   : > { %v3411_v1 = vadd.f32 58.5225, %v3369_v48  ;;  %v3871_v58 = vmul.f32 %v11691_v52, %v3575_v63  ;;  %v4068_v59 = vsel %vm3874_vm1, %v3575_v63, 0.0 }
 0x458   : > { %v3577_v57 = vmul.f32 %v6140_v43, %v3410_v14  ;;  %3949 = vadd.xlane.f32.xlu0 %v3948_v41  ;;  %v4069_v0 = vadd.f32 %v4068_v59, %v3573_v6 }
 0x459   : > { %v3579_v45 = vmul.f32 %v6142_v44, %v3411_v1  ;;  %v3951_v5 = vsel %vm3874_vm1, %v3871_v58, 0.0  ;;  %v4418_v39 = vpop.f32.mrb[212].mxu1 }
 0x45a   : > { %v3952_v3 = vadd.f32 %v3951_v5, %v3870_v49  ;;  %v3872_v42 = vmul.f32 %v11692_v2, %v3577_v57  ;;  %v4072_v13 = vsel %vm3955_vm3, %v3577_v57, 0.0  ;;  %4469 = vst.msk [vmem:[%s10237_s26 + $0x8] sm:$0xff] %vm4467_vm2, %v4418_v39  ;;  %v4420_v19 = vpop.f32.mrb[213].mxu1 }
 0x45b   : > { %v3873_v54 = vmul.f32 %v11693_v21, %v3579_v45  ;;  %v4073_v60 = vsel %vm3957_vm4, %v3579_v45, 0.0 }
 0x45c   : > { %3953 = vadd.xlane.f32.xlu0 %v3952_v3  ;;  %v3956_v8 = vsel %vm3955_vm3, %v3872_v42, 0.0  ;;  %v4074_v46 = vadd.f32 %v4073_v60, %v4072_v13 }
 0x45d   : > { %v3958_v62 = vsel %vm3957_vm4, %v3873_v54, 0.0  ;;  %v4423_v55 = vpop.f32.mrb[214].mxu1 }
 0x45e   : > { %v3959_v34 = vadd.f32 %v3958_v62, %v3956_v8  ;;  %4470 = vst.msk [vmem:[%s10237_s26 + $0x10] sm:$0xff] %vm4467_vm2, %v4423_v55  ;;  %v4425_v25 = vpop.f32.mrb[215].mxu1 }
 0x460   : > { %4070 = vadd.xlane.f32.xlu0 %v4069_v0  ;;  %3960 = vadd.xlane.f32.xlu1 %v3959_v34 }
 0x461   : > { %v4428_v38 = vpop.f32.mrb[216].mxu1 }
 0x462   : > { %4471 = vst.msk [vmem:[%s10237_s26 + $0x18] sm:$0xff] %vm4467_vm2, %v4428_v38  ;;  %v4430_v12 = vpop.f32.mrb[217].mxu1 }
 0x464   : > { %4075 = vadd.xlane.f32.xlu1 %v4074_v46 }
 0x465   : > { %v4433_v35 = vpop.f32.mrb[218].mxu1 }
 0x466   : > { %4472 = vst.msk [vmem:[%s10237_s26 + $0x20] sm:$0xff] %vm4467_vm2, %v4433_v35  ;;  %v4435_v22 = vpop.f32.mrb[219].mxu1 }
 0x469   : > { %v4438_v47 = vpop.f32.mrb[220].mxu1 }
 0x46a   : > { %4473 = vst.msk [vmem:[%s10237_s26 + $0x28] sm:$0xff] %vm4467_vm2, %v4438_v47  ;;  %v4440_v9 = vpop.f32.mrb[221].mxu1 }
 0x46d   : > { %v4443_v29 = vpop.f32.mrb[222].mxu1 }
 0x46e   : > { %4474 = vst.msk [vmem:[%s10237_s26 + $0x30] sm:$0xff] %vm4467_vm2, %v4443_v29  ;;  %v4445_v30 = vpop.f32.mrb[223].mxu1 }
 0x471   : > { %v4448_v27 = vpop.f32.mrb[224].mxu1 }
 0x472   : > { %4475 = vst.msk [vmem:[%s10237_s26 + $0x38] sm:$0xff] %vm4467_vm2, %v4448_v27  ;;  %v4450_v17 = vpop.f32.mrb[225].mxu1 }
 0x475   : > { %v4453_v15 = vpop.f32.mrb[226].mxu1 }
 0x476   : > { %4476 = vst.msk [vmem:[%s10237_s26 + $0x40] sm:$0xff] %vm4467_vm2, %v4453_v15  ;;  %v4455_v7 = vpop.f32.mrb[227].mxu1 }
 0x479   : > { %v4458_v40 = vpop.f32.mrb[228].mxu1 }
 0x47a   : > { %4477 = vst.msk [vmem:[%s10237_s26 + $0x48] sm:$0xff] %vm4467_vm2, %v4458_v40  ;;  %v4460_v28 = vpop.f32.mrb[229].mxu1 }
 0x47d   : > { %v4463_v10 = vpop.f32.mrb[230].mxu1 }
 0x47e   : > { %4478 = vst.msk [vmem:[%s10237_s26 + $0x50] sm:$0xff] %vm4467_vm2, %v4463_v10  ;;  %v4465_v20 = vpop.f32.mrb[231].mxu1  ;;  %s6405_s26 = sshll.u32 %s6496_s21, 4  ;;  %s6406_s26 = int_to_ptr.vmem [resolvable:$false] %s6405_s26 }
 0x47f   : > { %s6407_s24 = scalar_lea.vmem %s6406_s26, 32  ;;  %p6408_p5 = scmp.lt.s32.totalorder %s10308_s22, %s6406_s26 }
 0x480   : > { %p6409_p9 = scmp.lt.s32.totalorder %s6407_s24, %s6401_s23 }
 0x481   : > { %v4709_v16 = vpop.f32.mrb[232].mxu1 }
 0x482   : > { %4763 = vst.msk [vmem:[%s10275_s0] sm:$0xff] %vm4467_vm2, %v4709_v16  ;;  %v4711_v11 = vpop.f32.mrb[233].mxu1  ;;  %p6410_p8 = por %p6409_p9, %p6408_p5 }
 0x484   : > { %p6411_p11 = pnand %p6410_p8, %p6404_p10 }
 0x485   : > { %v4714_v56 = vpop.f32.mrb[234].mxu1 }
 0x486   : > { %4764 = vst.msk [vmem:[%s10275_s0 + $0x8] sm:$0xff] %vm4467_vm2, %v4714_v56  ;;  %v4716_v31 = vpop.f32.mrb[235].mxu1 }
 0x489   : > { %v4719_v53 = vpop.f32.mrb[236].mxu1 }
 0x48a   : > { %4765 = vst.msk [vmem:[%s10275_s0 + $0x10] sm:$0xff] %vm4467_vm2, %v4719_v53  ;;  %v4721_v36 = vpop.f32.mrb[237].mxu1 }
 0x48d   : > { %v4724_v32 = vpop.f32.mrb[238].mxu1 }
 0x48e   : > { %4766 = vst.msk [vmem:[%s10275_s0 + $0x18] sm:$0xff] %vm4467_vm2, %v4724_v32  ;;  %v4726_v37 = vpop.f32.mrb[239].mxu1 }
 0x491   : > { %v4729_v23 = vpop.f32.mrb[240].mxu1 }
 0x492   : > { %4767 = vst.msk [vmem:[%s10275_s0 + $0x20] sm:$0xff] %vm4467_vm2, %v4729_v23  ;;  %v4731_v33 = vpop.f32.mrb[241].mxu1 }
 0x495   : > { %v4734_v4 = vpop.f32.mrb[242].mxu1 }
 0x496   : > { %4768 = vst.msk [vmem:[%s10275_s0 + $0x28] sm:$0xff] %vm4467_vm2, %v4734_v4  ;;  %v4736_v6 = vpop.f32.mrb[243].mxu1 }
 0x499   : > { %v4739_v51 = vpop.f32.mrb[244].mxu1 }
 0x49a   : > { %4769 = vst.msk [vmem:[%s10275_s0 + $0x30] sm:$0xff] %vm4467_vm2, %v4739_v51  ;;  %v4741_v61 = vpop.f32.mrb[245].mxu1  ;;  %v3995_v63 = vpop.xlane.xlu1 %3994 }
 0x49c   : > { %v3878_v48 = vpop.xlane.xlu0 %3877 }
 0x49d   : > { %v4744_v26 = vpop.f32.mrb[246].mxu1 }
 0x49e   : > { %4770 = vst.msk [vmem:[%s10275_s0 + $0x38] sm:$0xff] %vm4467_vm2, %v4744_v26  ;;  %v4746_v18 = vpop.f32.mrb[247].mxu1  ;;  %v3999_v43 = vpop.xlane.xlu1 %3998 }
 0x49f   : > { %v4077_v12 = vadd.f32 %v3999_v43, %v3995_v63 }
 0x4a0   : > { %v3882_v14 = vpop.xlane.xlu0 %3881 }
 0x4a1   : > { %v4749_v41 = vpop.f32.mrb[248].mxu1  ;;  %v3962_v55 = vadd.f32 %v3882_v14, %v3878_v48 }
 0x4a2   : > { %4771 = vst.msk [vmem:[%s10275_s0 + $0x40] sm:$0xff] %vm4467_vm2, %v4749_v41  ;;  %v4751_v50 = vpop.f32.mrb[249].mxu1  ;;  %v4003_v49 = vpop.xlane.xlu1 %4002 }
 0x4a3   : > { %v4078_v47 = vadd.f32 %v4077_v12, %v4003_v49 }
 0x4a4   : > { %v3886_v24 = vpop.xlane.xlu0 %3885 }
 0x4a5   : > { %v4754_v44 = vpop.f32.mrb[250].mxu1  ;;  %v3963_v25 = vadd.f32 %v3962_v55, %v3886_v24 }
 0x4a6   : > { %4772 = vst.msk [vmem:[%s10275_s0 + $0x48] sm:$0xff] %vm4467_vm2, %v4754_v44  ;;  %v4756_v1 = vpop.f32.mrb[251].mxu1  ;;  %v4007_v52 = vpop.xlane.xlu1 %4006 }
 0x4a7   : > { %v4079_v30 = vadd.f32 %v4078_v47, %v4007_v52 }
 0x4a8   : > { %v3890_v58 = vpop.xlane.xlu0 %3889 }
 0x4a9   : > { %v4759_v59 = vpop.f32.mrb[252].mxu1  ;;  %v3964_v35 = vadd.f32 %v3963_v25, %v3890_v58 }
 0x4aa   : > { %4773 = vst.msk [vmem:[%s10275_s0 + $0x50] sm:$0xff] %vm4467_vm2, %v4759_v59  ;;  %v4761_v57 = vpop.f32.mrb[253].mxu1 }
 0x4ab   : > { %v4011_v0 = vpop.xlane.xlu1 %4010 }
 0x4ac   : > { %v4080_v15 = vadd.f32 %v4079_v30, %v4011_v0 }
 0x4ad   : > { %v3894_v45 = vpop.xlane.xlu0 %3893 }
 0x4ae   : > { %v3965_v9 = vadd.f32 %v3964_v35, %v3894_v45 }
 0x4af   : > { %v4015_v5 = vpop.xlane.xlu1 %4014 }
 0x4b0   : > { %v4081_v28 = vadd.f32 %v4080_v15, %v4015_v5 }
 0x4b1   : > { %v3898_v39 = vpop.xlane.xlu0 %3897 }
 0x4b2   : > { %v3966_v27 = vadd.f32 %v3965_v9, %v3898_v39 }
 0x4b3   : > { %v4019_v3 = vpop.xlane.xlu1 %4018 }
 0x4b4   : > { %v4082_v16 = vadd.f32 %v4081_v28, %v4019_v3 }
 0x4b5   : > { %v3902_v2 = vpop.xlane.xlu0 %3901 }
 0x4b6   : > { %v3967_v7 = vadd.f32 %v3966_v27, %v3902_v2 }
 0x4b7   : > { %v4023_v42 = vpop.xlane.xlu1 %4022 }
 0x4b8   : > { %v4083_v31 = vadd.f32 %v4082_v16, %v4023_v42 }
 0x4b9   : > { %v3906_v13 = vpop.xlane.xlu0 %3905 }
 0x4ba   : > { %v3968_v10 = vadd.f32 %v3967_v7, %v3906_v13 }
 0x4bb   : > { %v4027_v19 = vpop.xlane.xlu1 %4026 }
 0x4bc   : > { %v4084_v32 = vadd.f32 %v4083_v31, %v4027_v19 }
 0x4bd   : > { %v3910_v21 = vpop.xlane.xlu0 %3909 }
 0x4be   : > { %v3969_v11 = vadd.f32 %v3968_v10, %v3910_v21 }
 0x4bf   : > { %v4031_v54 = vpop.xlane.xlu1 %4030 }
 0x4c0   : > { %v4085_v23 = vadd.f32 %v4084_v32, %v4031_v54 }
 0x4c1   : > { %v3914_v60 = vpop.xlane.xlu0 %3913 }
 0x4c2   : > { %v3970_v53 = vadd.f32 %v3969_v11, %v3914_v60 }
 0x4c3   : > { %v4035_v8 = vpop.xlane.xlu1 %4034 }
 0x4c4   : > { %v4086_v51 = vadd.f32 %v4085_v23, %v4035_v8 }
 0x4c5   : > { %v3918_v46 = vpop.xlane.xlu0 %3917 }
 0x4c6   : > { %v3971_v37 = vadd.f32 %v3970_v53, %v3918_v46 }
 0x4c7   : > { %v4039_v62 = vpop.xlane.xlu1 %4038 }
 0x4c8   : > { %v4087_v63 = vadd.f32 %v4086_v51, %v4039_v62 }
 0x4c9   : > { %v3922_v34 = vpop.xlane.xlu0 %3921 }
 0x4ca   : > { %v3972_v33 = vadd.f32 %v3971_v37, %v3922_v34 }
 0x4cb   : > { %v4043_v38 = vpop.xlane.xlu1 %4042 }
 0x4cc   : > { %v4088_v18 = vadd.f32 %v4087_v63, %v4043_v38 }
 0x4cd   : > { %v3926_v22 = vpop.xlane.xlu0 %3925 }
 0x4ce   : > { %v3973_v61 = vadd.f32 %v3972_v33, %v3926_v22 }
 0x4cf   : > { %v4047_v29 = vpop.xlane.xlu1 %4046 }
 0x4d0   : > { %v4089_v41 = vadd.f32 %v4088_v18, %v4047_v29 }
 0x4d1   : > { %v3930_v17 = vpop.xlane.xlu0 %3929 }
 0x4d2   : > { %v3974_v48 = vadd.f32 %v3973_v61, %v3930_v17 }
 0x4d3   : > { %v4051_v40 = vpop.xlane.xlu1 %4050 }
 0x4d4   : > { %v4090_v24 = vadd.f32 %v4089_v41, %v4051_v40 }
 0x4d5   : > { %v3934_v20 = vpop.xlane.xlu0 %3933 }
 0x4d6   : > { %v3975_v43 = vadd.f32 %v3974_v48, %v3934_v20 }
 0x4d7   : > { %v4055_v56 = vpop.xlane.xlu1 %4054 }
 0x4d8   : > { %v4091_v1 = vadd.f32 %v4090_v24, %v4055_v56 }
 0x4d9   : > { %v3938_v36 = vpop.xlane.xlu0 %3937 }
 0x4da   : > { %v3976_v50 = vadd.f32 %v3975_v43, %v3938_v36 }
 0x4db   : > { %v4059_v4 = vpop.xlane.xlu1 %4058 }
 0x4dc   : > { %v4092_v57 = vadd.f32 %v4091_v1, %v4059_v4 }
 0x4dd   : > { %v3942_v6 = vpop.xlane.xlu0 %3941 }
 0x4de   : > { %v3977_v44 = vadd.f32 %v3976_v50, %v3942_v6 }
 0x4df   : > { %v4063_v14 = vpop.xlane.xlu1 %4062 }
 0x4e0   : > { %v4093_v45 = vadd.f32 %v4092_v57, %v4063_v14 }
 0x4e1   : > { %v3946_v26 = vpop.xlane.xlu0 %3945 }
 0x4e2   : > { %v3978_v52 = vadd.f32 %v3977_v44, %v3946_v26 }
 0x4e3   : > { %v4067_v58 = vpop.xlane.xlu1 %4066 }
 0x4e4   : > { %v4094_v42 = vadd.f32 %v4093_v45, %v4067_v58 }
 0x4e5   : > { %v3950_v49 = vpop.xlane.xlu0 %3949 }
 0x4e6   : > { %v3979_v0 = vadd.f32 %v3978_v52, %v3950_v49 }
 0x4e9   : > { %v3954_v59 = vpop.xlane.xlu0 %3953 }
 0x4ea   : > { %v3980_v5 = vadd.f32 %v3979_v0, %v3954_v59 }
 0x4ed   : > { %v3961_v39 = vpop.xlane.xlu1 %3960  ;;  %v4071_v3 = vpop.xlane.xlu0 %4070 }
 0x4ee   : > { %v3981_v2 = vsel %vm3955_vm3, %v3961_v39, 0.0  ;;  %v4095_v19 = vadd.f32 %v4094_v42, %v4071_v3 }
 0x4ef   : > { %v3982_v13 = vadd.f32 %v3981_v2, %v3980_v5 }
 0x4f1   : > { %v3983_v21 = vrot.slane %v3982_v13, 4  ;;  %v4076_v54 = vpop.xlane.xlu1 %4075 }
 0x4f2   : > { %v4096_v60 = vsel %vm3955_vm3, %v4076_v54, 0.0 }
 0x4f3   : > { %v3984_v8 = vadd.f32 %v3983_v21, %v3982_v13  ;;  %v4097_v46 = vadd.f32 %v4096_v60, %v4095_v19 }
 0x4f5   : > { %v3985_v62 = vrot.slane %v3984_v8, 2  ;;  %v4098_v55 = vrot.slane %v4097_v46, 4 }
 0x4f7   : > { %v3986_v34 = vadd.f32 %v3985_v62, %v3984_v8  ;;  %v4099_v25 = vadd.f32 %v4098_v55, %v4097_v46 }
 0x4f9   : > { %v3987_v38 = vrot.slane %v3986_v34, 1  ;;  %v4100_v12 = vrot.slane %v4099_v25, 2 }
 0x4fb   : > { %v3988_v35 = vadd.f32 %v3987_v38, %v3986_v34  ;;  %v4101_v22 = vadd.f32 %v4100_v12, %v4099_v25 }
 0x4fd   : > { %v3989_v47 = vmul.f32 3.6289737e-05, %v3988_v35  ;;  %v4102_v9 = vrot.slane %v4101_v22, 1 }
 0x4ff   : > { %v4103_v29 = vadd.f32 %v4102_v9, %v4101_v22  ;;  %3991 = vst.msk [vmem:[%s448_s30] sm:$0x1] %vm3990_vm5, %v3989_v47 }
 0x500   : > { %6414 = shalt.err (!%p6411_p11)
}
 0x501   : > { %s6415_s3 = scalar_lea.hbm %s10306_s29, 16  ;;  %s6419_s16 = scalar_lea.hbm %s10367_s6, 32 }
 0x502   : > { %p6416_p7 = scmp.ne.s32.totalorder %s10306_s29, %s6415_s3  ;;  %p6420_p2 = scmp.lt.u32.totalorder %s10306_s29, %s10367_s6 }
 0x503   : > { %p6421_p13 = scmp.lt.u32.totalorder %s6419_s16, %s6415_s3  ;;  %p6423_p4 = scmp.lt.u32.totalorder %s6415_s3, %s10306_s29 }
 0x504   : > { %p6417_p12 = pnand %p6416_p7, %p6718_p3 }
 0x505   : > { %p6422_p0 = por %p6421_p13, %p6420_p2 }
 0x506   : > { %p6418_p1 = pneg %p6417_p12 }
 0x507   : > { %p6424_p6 = por %p6423_p4, %p6422_p0 }
 0x509   : > { %p6425_p10 = pnand %p6424_p6, %p6418_p1 }
 0x50b   : > { %6428 = shalt.err (!%p6425_p10)
}
 0x50c   : > { %5898 = dma.vmem_to_hbm [thread:$0]  (%p6718_p3), %s10308_s22, 16, %s10306_s29, %s4775_s25   ;;  %v4104_v30 = vmul.f32 3.6289737e-05, %v4103_v29 }
 0x50e   : > { %4105 = vst.msk [vmem:[%s470_s19] sm:$0x1] %vm3990_vm5, %v4104_v30 }
 0x50f PF: > { %s11695_s2 = sld [smem:[#allocation20_spill]]  ;;  %s11696_s23 = sld [smem:[#allocation21_spill]] }
 0x510   : > { %p11698_p9 = scmp.ge.s32.totalorder %s6483_s12, 2 }
 0x515   : > { %s4821_s21 = sand.u32 1, %s11695_s2   ;;  %p11697_p5 = scmp.ne.s32.totalorder %s11696_s23, 0 }
 0x516   : > { %s4822_s20 = scalar_lea.sflag [#allocation4], %s4821_s21 }
 0x517   : > { %p5921_p8 = pnand %p11698_p9, %p11697_p5 }
 0x519   : > { %6466 = dma.done.wait (!%p5921_p8), %s4822_s20, 16  }
 0x51a   : > { %6468 = vsyncadd (!%p5921_p8), %s4822_s20, 4294967280  ;;  %p28_p3 = scmp.ge.s32.totalorder %s6705_s27, 4   ;;  %s11699_s30 = smov %s6475_s10 }
 0x51b   : > { %s11700_s10 = smov %s6479_s11  ;;  %s11701_s11 = smov %s6714_s18 }
 0x51c   : > { %s11702_s12 = smov %s6705_s27  ;;  %30 = sbr.rel (!%p28_p3) target bundleno = 14 (0xe), region = 154 }
 0x523   :  { %4848 = vsyncpa [#allocation3], 1 }
 0x524   :  { %4850 = vsyncpa [#allocation3 + $0x1], 1 }
 0x525   :  { %4851 = vsyncpa [#allocation6], 1 }
 0x526   :  { %4853 = vsyncpa [#allocation6 + $0x1], 1 }
 0x527   :  { %4854 = vsyncpa [#allocation9], 1 }
 0x528   :  { %4855 = vsyncpa [#allocation12], 1 }
 0x529   :  { %4856 = vsyncpa [#allocation4], 1 }
 0x52a   :  { %4858 = vsyncpa [#allocation4 + $0x1], 1 }

</bundles_post_ra>
